<compile_context>
chip_gen: v5e
topology: v5e:2x2
jax: 0.10.0
libtpu: 0.0.40
codegen_flags: <defaults>
</compile_context>

<pallas_src>
import jax
import jax.numpy as jnp
from jax.experimental import pallas as pl
from jax.experimental.pallas import tpu as pltpu

EPS = 1e-5


# ----------------------------- Pallas kernels ------------------------------

def _make_conv3x3_kernel(n_planes, stride, th, Wo, Cin, fuse_bn_act):
    """3x3 conv (pad=1) tile + fused per-channel BN statistics.

    Grid: (N, Cout-tiles, row-tiles).  Inputs: parity planes of the padded
    NHWC image (bf16), optional (scale, shift) rows for a fused BN+ReLU input
    prologue, grouped weights [3, 3*Cin, Cout].  Outputs: y tile
    [1, th*Wo, tc] and accumulated stats [1, 2, tc] = (sum, sum_sq).
    """

    def kernel(*refs):
        i = n_planes
        plane_refs = refs[:n_planes]
        if fuse_bn_act:
            sc_ref, sh_ref = refs[i], refs[i + 1]
            i += 2
        w_ref, y_ref, st_ref = refs[i], refs[i + 1], refs[i + 2]

        r = pl.program_id(2)                       # row-tile index (innermost)
        r0 = pl.multiple_of(r * th, th)
        tc = w_ref.shape[-1]
        mxu_dtype = w_ref.dtype

        if fuse_bn_act:                            # hoisted broadcasts
            sc = sc_ref[...].reshape(1, 1, Cin)
            sh = sh_ref[...].reshape(1, 1, Cin)

        acc = jnp.zeros((th * Wo, tc), jnp.float32)
        # 3 GEMMs with K = 3*Cin: the dj shifts are folded into a channel
        # concat (VPU/XLU work that overlaps the MXU) instead of 9 K=Cin dots.
        for di in range(3):
            parts = []
            for dj in range(3):
                p, a = di % stride, di // stride
                q, b = dj % stride, dj // stride
                plane = plane_refs[p * stride + q]
                win = plane[0, pl.ds(r0 + a, th), b:b + Wo, :]   # [th, Wo, Cin]
                if fuse_bn_act:
                    # a1 = relu(bn1(y1)) computed on the fly (f32 VPU math).
                    win = jnp.maximum(
                        win.astype(jnp.float32) * sc + sh, 0.0
                    ).astype(mxu_dtype)
                elif win.dtype != mxu_dtype:
                    win = win.astype(mxu_dtype)
                parts.append(win)
            patch = jnp.concatenate(parts, axis=-1).reshape(th * Wo, 3 * Cin)
            acc = acc + jnp.dot(patch, w_ref[di],
                                preferred_element_type=jnp.float32)

        y_ref[0] = acc.astype(y_ref.dtype)

        # BN statistics accumulated in the revisited stats output block
        # (constant block index across the innermost "arbitrary" row axis).
        psum = jnp.sum(acc, axis=0, keepdims=True)
        psq = jnp.sum(acc * acc, axis=0, keepdims=True)

        @pl.when(r == 0)
        def _():
            st_ref[0, 0:1] = psum
            st_ref[0, 1:2] = psq

        @pl.when(r != 0)
        def _():
            st_ref[0, 0:1] += psum
            st_ref[0, 1:2] += psq

    return kernel


def _bn_add_relu_kernel(y_ref, sc_ref, sh_ref, skip_ref, o_ref):
    # out = relu(bn2(y2) + identity_skip)   (lane-dense layout, f32 VPU math)
    o_ref[...] = jnp.maximum(
        y_ref[...].astype(jnp.float32) * sc_ref[...] + sh_ref[...]
        + skip_ref[...], 0.0).astype(o_ref.dtype)


def _bn_proj_add_relu_kernel(y_ref, sc_ref, sh_ref, xs_ref, w3_ref, b3_ref,
                             o_ref):
    # out = relu(bn2(y2) + xs @ w3 + b3)    (1x1-conv skip fused in)
    skip = jnp.dot(xs_ref[...].astype(w3_ref.dtype), w3_ref[...],
                   preferred_element_type=jnp.float32) + b3_ref[...]
    o_ref[...] = jnp.maximum(
        y_ref[...].astype(jnp.float32) * sc_ref[...] + sh_ref[...] + skip,
        0.0).astype(o_ref.dtype)


# ------------------------------ tiling helpers ------------------------------

def _out_hw(H, W, stride):
    return (H + 2 - 3) // stride + 1, (W + 2 - 3) // stride + 1


def _conv_tiles(Ho, Wo, Cout, acc_budget=2 * 1024 * 1024):
    """Pick (row tile th, Cout tile tc) for the conv kernel.

    tc: native MXU width (256 on v6e/v7x, 128 fallback) when Cout allows,
        otherwise the whole (small) Cout.
    th: largest divisor of Ho whose f32 accumulator tile (th*Wo, tc) fits the
        byte budget, keeping the per-step VMEM working set bounded (v7x has
        only 64 MiB physical VMEM) while giving the pipeline many steps.
    """
    if Cout % 256 == 0:
        tc = 256
    elif Cout % 128 == 0:
        tc = 128
    else:
        tc = Cout
    lane_c = max(tc, 128)                       # lane padding for narrow Cout
    cands = [d for d in range(1, Ho + 1)
             if Ho % d == 0 and (d == Ho or (d * Wo) % 8 == 0)]
    feasible = [d for d in cands if d * Wo * lane_c * 4 <= acc_budget]
    th = max(feasible) if feasible else min(cands)
    return th, tc


def _row_tiling(R, L, itemsize=4, budget=2 * 1024 * 1024):
    """Largest multiple-of-8 row tile within a per-block VMEM byte budget."""
    if R * L * itemsize <= budget:
        return R, 1
    tm = max(8, min(R, (budget // (L * itemsize)) // 8 * 8))
    return tm, pl.cdiv(R, tm)


# ------------------------------ Pallas wrappers -----------------------------

def conv3x3_bn_stats(x_nhwc, w_oihw, stride, *, bn_act=None,
                     mxu_dtype=jnp.bfloat16, y_dtype=jnp.bfloat16):
    """3x3 conv (pad=1, stride) + fused BN stats (+ optional fused BN1+ReLU
    input prologue).  Returns y [N, Ho*Wo, Cout] (bf16) and stats [N, 2, Cout]
    = (sum, sum_of_squares) in f32."""
    N, H, W, Cin = x_nhwc.shape
    Cout = w_oihw.shape[0]
    Ho, Wo = _out_hw(H, W, stride)
    th, tc = _conv_tiles(Ho, Wo, Cout)

    if bn_act is None:
        xp = jnp.pad(x_nhwc.astype(mxu_dtype), ((0, 0), (1, 1), (1, 1), (0, 0)))
    else:
        # Fused BN+ReLU prologue: pad with a per-channel value whose
        # activation is exactly 0, so the halo reproduces zero-padding of a1.
        sc1, sh1 = bn_act
        safe = jnp.abs(sh1) * 1.25 + 1.0
        fill = jnp.where(sc1 != 0.0, -safe / jnp.where(sc1 != 0.0, sc1, 1.0),
                         0.0)
        # TODO(synk): gamma==0 with beta>0 has no valid fill value; that
        # pathological BN configuration falls back to fill=0 (border error).
        xp = jnp.broadcast_to(fill.astype(mxu_dtype), (N, H + 2, W + 2, Cin))
        xp = jax.lax.dynamic_update_slice(
            xp, x_nhwc.astype(mxu_dtype), (0, 1, 1, 0))

    # Parity planes: total bytes == padded activation (no im2col expansion);
    # lets the kernel use only unstrided window slices (stride 1 => 1 plane).
    # TODO(synk): the pad / parity split is still an XLA-side copy; moving the
    # halo handling fully into the kernel would remove it.
    planes = [xp[:, p::stride, q::stride, :]
              for p in range(stride) for q in range(stride)]
    # Weights grouped so each di row is one K=3*Cin GEMM (kw-major, cin-minor).
    wg = jnp.transpose(w_oihw, (2, 3, 1, 0)).reshape(3, 3 * Cin, Cout)
    wg = wg.astype(mxu_dtype)

    operands = list(planes)
    in_specs = [pl.BlockSpec((1,) + tuple(p.shape[1:]),
                             lambda n, c, r: (n, 0, 0, 0)) for p in planes]
    if bn_act is not None:
        operands += [bn_act[0].reshape(1, Cin).astype(jnp.float32),
                     bn_act[1].reshape(1, Cin).astype(jnp.float32)]
        in_specs += [pl.BlockSpec((1, Cin), lambda n, c, r: (0, 0))] * 2
    operands.append(wg)
    in_specs.append(pl.BlockSpec((3, 3 * Cin, tc), lambda n, c, r: (0, 0, c)))

    kernel = _make_conv3x3_kernel(len(planes), stride, th, Wo, Cin,
                                  bn_act is not None)

    y, st = pl.pallas_call(
        kernel,
        out_shape=(jax.ShapeDtypeStruct((N, Ho * Wo, Cout), y_dtype),
                   jax.ShapeDtypeStruct((N, 2, Cout), jnp.float32)),
        grid_spec=pltpu.PrefetchScalarGridSpec(
            num_scalar_prefetch=0,
            grid=(N, Cout // tc, Ho // th),
            in_specs=in_specs,
            out_specs=[pl.BlockSpec((1, th * Wo, tc),
                                    lambda n, c, r: (n, r, c)),
                       pl.BlockSpec((1, 2, tc),
                                    lambda n, c, r: (n, 0, c))]),
        compiler_params=pltpu.CompilerParams(
            dimension_semantics=("parallel", "parallel", "arbitrary"),
            # Conservative limit that also fits v7x's 64 MiB physical VMEM.
            vmem_limit_bytes=32 * 1024 * 1024),
    )(*operands)
    return y, st


def bn_add_relu(y, scale_row, shift_row, skip):
    """relu(y*scale + shift + skip) on lane-dense [R, L] (identity skip)."""
    R, L = y.shape
    tm, gm = _row_tiling(R, L)
    return pl.pallas_call(
        _bn_add_relu_kernel,
        out_shape=jax.ShapeDtypeStruct((R, L), jnp.float32),
        grid_spec=pltpu.PrefetchScalarGridSpec(
            num_scalar_prefetch=0, grid=(gm,),
            in_specs=[pl.BlockSpec((tm, L), lambda i: (i, 0)),
                      pl.BlockSpec((1, L), lambda i: (0, 0)),
                      pl.BlockSpec((1, L), lambda i: (0, 0)),
                      pl.BlockSpec((tm, L), lambda i: (i, 0))],
            out_specs=pl.BlockSpec((tm, L), lambda i: (i, 0))),
        compiler_params=pltpu.CompilerParams(
            dimension_semantics=("parallel",)),
    )(y, scale_row.reshape(1, L), shift_row.reshape(1, L), skip)


def bn_proj_add_relu(y2, scale, shift, xs, w3_gemm, b3):
    """relu(y2*scale + shift + xs @ w3 + b3): 1x1-conv skip fused in."""
    M, Cout = y2.shape
    Cin = xs.shape[1]
    tm, gm = _row_tiling(M, max(Cout, Cin))
    return pl.pallas_call(
        _bn_proj_add_relu_kernel,
        out_shape=jax.ShapeDtypeStruct((M, Cout), jnp.float32),
        grid_spec=pltpu.PrefetchScalarGridSpec(
            num_scalar_prefetch=0, grid=(gm,),
            in_specs=[pl.BlockSpec((tm, Cout), lambda i: (i, 0)),
                      pl.BlockSpec((1, Cout), lambda i: (0, 0)),
                      pl.BlockSpec((1, Cout), lambda i: (0, 0)),
                      pl.BlockSpec((tm, Cin), lambda i: (i, 0)),
                      pl.BlockSpec((Cin, Cout), lambda i: (0, 0)),
                      pl.BlockSpec((1, Cout), lambda i: (0, 0))],
            out_specs=pl.BlockSpec((tm, Cout), lambda i: (i, 0))),
        compiler_params=pltpu.CompilerParams(
            dimension_semantics=("parallel",)),
    )(y2, scale.reshape(1, Cout), shift.reshape(1, Cout),
      xs, w3_gemm, b3.reshape(1, Cout))


# ------------------------------ glue (plain JAX) ----------------------------

def _fold_bn_stats(stats, count, gamma, beta):
    # TODO(synk): this 2*C-scalar fold stays in plain JAX; every per-element
    # pass over [M, C] data runs inside the Pallas kernels.
    tot = jnp.sum(stats, axis=0)                              # [2, C]
    mean = tot[0] / count
    var = jnp.maximum(tot[1] / count - mean * mean, 0.0)      # biased variance
    scale = gamma * jax.lax.rsqrt(var + EPS)
    shift = beta - mean * scale
    return scale, shift


def residual_forward(x_nchw, params, *, use_1x1conv, stride,
                     mxu_dtype=jnp.bfloat16):
    """Pallas implementation of Residual.forward.  x: NCHW f32 -> NCHW f32."""
    x = jnp.transpose(x_nchw, (0, 2, 3, 1)).astype(jnp.float32)   # NHWC
    N, H, W, Cin = x.shape
    Cout = params["w1"].shape[0]
    Ho, Wo = _out_hw(H, W, stride)
    M = N * Ho * Wo

    # conv1 (3x3, pad 1, stride s) with fused BN1 statistics; y1 stored bf16.
    # conv1/conv2 biases are skipped: training-mode BN re-centers per channel,
    # so a pre-BN bias is an exact no-op (reference keeps them and matches).
    y1, st1 = conv3x3_bn_stats(x, params["w1"], stride, mxu_dtype=mxu_dtype)
    sc1, sh1 = _fold_bn_stats(st1, M, params["gamma1"], params["beta1"])

    # conv2 (3x3, pad 1, stride 1) with BN1-apply + ReLU fused into its input
    # prologue (no standalone bn_relu pass over a1 through HBM) and fused BN2
    # statistics.
    y2, st2 = conv3x3_bn_stats(y1.reshape(N, Ho, Wo, Cout), params["w2"], 1,
                               bn_act=(sc1, sh1), mxu_dtype=mxu_dtype)
    sc2, sh2 = _fold_bn_stats(st2, M, params["gamma2"], params["beta2"])

    if use_1x1conv:
        # Final kernel fuses the 1x1-conv projection skip (+ b3) with
        # bn2-apply + add + relu.
        xs = x[:, ::stride, ::stride, :].reshape(M, Cin).astype(mxu_dtype)
        w3 = jnp.transpose(params["w3"].reshape(Cout, Cin)).astype(mxu_dtype)
        out = bn_proj_add_relu(y2.reshape(M, Cout), sc2, sh2, xs, w3,
                               params["b3"])
    else:
        if stride != 1 or Cin != Cout:
            raise ValueError("identity skip requires stride==1 and Cin==Cout")
        # Final kernel fuses bn2-apply + identity add + relu (lane-dense).
        out = bn_add_relu(y2.reshape(N * Ho, Wo * Cout),
                          jnp.tile(sc2, Wo), jnp.tile(sh2, Wo),
                          x.reshape(N * Ho, Wo * Cout))

    out = out.reshape(N, Ho, Wo, Cout)
    return jnp.transpose(out, (0, 3, 1, 2))                  # back to NCHW


# --------------------------- reference (pure JAX) ----------------------------

def ref_forward(x, params, use_1x1conv, stride):
    def conv(x, w, b, s, pad):
        y = jax.lax.conv_general_dilated(
            x, w, (s, s), [(pad, pad), (pad, pad)],
            dimension_numbers=("NCHW", "OIHW", "NCHW"))
        return y + b[None, :, None, None]

    def bn(x, gamma, beta):
        mean = x.mean(axis=(0, 2, 3), keepdims=True)
        var = x.var(axis=(0, 2, 3), keepdims=True)
        return ((x - mean) / jnp.sqrt(var + EPS)) * gamma[None, :, None, None] \
            + beta[None, :, None, None]

    y = jax.nn.relu(bn(conv(x, params["w1"], params["b1"], stride, 1),
                       params["gamma1"], params["beta1"]))
    y = bn(conv(y, params["w2"], params["b2"], 1, 1),
           params["gamma2"], params["beta2"])
    skip = conv(x, params["w3"], params["b3"], stride, 0) if use_1x1conv else x
    return jax.nn.relu(y + skip)


# ------------------------------- params init --------------------------------

def init_params(key, cin, cout, use_1x1conv):
    ks = jax.random.split(key, 6)
    p = {
        "w1": 0.1 * jax.random.normal(ks[0], (cout, cin, 3, 3), jnp.float32),
        "b1": 0.1 * jax.random.normal(ks[1], (cout,), jnp.float32),
        "w2": 0.1 * jax.random.normal(ks[2], (cout, cout, 3, 3), jnp.float32),
        "b2": 0.1 * jax.random.normal(ks[3], (cout,), jnp.float32),
        "gamma1": jnp.ones((cout,), jnp.float32),
        "beta1": jnp.zeros((cout,), jnp.float32),
        "gamma2": jnp.ones((cout,), jnp.float32),
        "beta2": jnp.zeros((cout,), jnp.float32),
    }
    if use_1x1conv:
        p["w3"] = 0.1 * jax.random.normal(ks[4], (cout, cin, 1, 1), jnp.float32)
        p["b3"] = 0.1 * jax.random.normal(ks[5], (cout,), jnp.float32)
    return p


if __name__ == "__main__":
    key = jax.random.PRNGKey(0)
    kx, kp1, kp2 = jax.random.split(key, 3)
    x = jax.random.normal(kx, (2, 4, 16, 16), dtype=jnp.float32)   # NCHW

    fwd = jax.jit(residual_forward, static_argnames=("use_1x1conv", "stride"))

    # Tolerance note: the Pallas path feeds the MXU bf16 operands and stores
    # y1/y2 in bf16 (BN stats from the f32 accumulator); the reference is pure
    # f32 — hence 1e-1 tolerances.
    # Case 1: identity skip (input_channels == num_channels, stride 1)
    p1 = init_params(kp1, 4, 4, use_1x1conv=False)
    y1 = fwd(x, p1, use_1x1conv=False, stride=1)
    jax.block_until_ready(y1)
    r1 = ref_forward(x, p1, use_1x1conv=False, stride=1)
    assert y1.shape == r1.shape == (2, 4, 16, 16)
    assert bool(jnp.allclose(y1, r1, atol=1e-1, rtol=1e-1)), \
        float(jnp.max(jnp.abs(y1 - r1)))

    # Case 2: 1x1-conv projection skip with stride 2 and channel change (4->8)
    p2 = init_params(kp2, 4, 8, use_1x1conv=True)
    y2 = fwd(x, p2, use_1x1conv=True, stride=2)
    jax.block_until_ready(y2)
    r2 = ref_forward(x, p2, use_1x1conv=True, stride=2)
    assert y2.shape == r2.shape == (2, 8, 8, 8)
    assert bool(jnp.allclose(y2, r2, atol=1e-1, rtol=1e-1)), \
        float(jnp.max(jnp.abs(y2 - r2)))

    print("KERNEL_OK")
</pallas_src>

<mosaic_0001>
module attributes {stable_mosaic.version = 11 : i64} {
  func.func @kernel(%arg0: i32, %arg1: i32, %arg2: i32, %arg3: memref<1x18x18x4xbf16, #tpu.memory_space<vmem>>, %arg4: memref<3x12x4xbf16, #tpu.memory_space<vmem>>, %arg5: memref<1x256x4xbf16, #tpu.memory_space<vmem>>, %arg6: memref<1x2x4xf32, #tpu.memory_space<vmem>>) attributes {dimension_semantics = [#tpu.dimension_semantics<parallel>, #tpu.dimension_semantics<parallel>, #tpu.dimension_semantics<arbitrary>], iteration_bounds = array<i64: 2, 1, 1>, scalar_prefetch = 0 : i64, scratch_operands = 0 : i64, tpu.core_type = #tpu.core_type<tc>, window_params = [{transform_indices = @transform_0, window_bounds = array<i64: 1, 18, 18, 4>}, {transform_indices = @transform_1, window_bounds = array<i64: 3, 12, 4>}, {transform_indices = @transform_2, window_bounds = array<i64: 1, 256, 4>}, {transform_indices = @transform_3, window_bounds = array<i64: 1, 2, 4>}]} {
    %c16_i32 = arith.constant 16 : i32
    %0 = arith.muli %arg2, %c16_i32 : i32
    %1 = tpu.assume_multiple %0, 16 : i32
    %cst = arith.constant 0.000000e+00 : f32
    %2 = vector.broadcast %cst : f32 to vector<256x4xf32>
    %c0_i32 = arith.constant 0 : i32
    %3 = arith.addi %1, %c0_i32 : i32
    %c0 = arith.constant 0 : index
    %4 = arith.index_cast %3 : i32 to index
    %c0_0 = arith.constant 0 : index
    %c0_1 = arith.constant 0 : index
    %5 = vector.load %arg3[%c0, %4, %c0_0, %c0_1] : memref<1x18x18x4xbf16, #tpu.memory_space<vmem>>, vector<1x16x16x4xbf16>
    %6 = vector.shape_cast %5 : vector<1x16x16x4xbf16> to vector<16x16x4xbf16>
    %c0_i32_2 = arith.constant 0 : i32
    %7 = arith.addi %1, %c0_i32_2 : i32
    %c0_3 = arith.constant 0 : index
    %8 = arith.index_cast %7 : i32 to index
    %c1 = arith.constant 1 : index
    %c0_4 = arith.constant 0 : index
    %9 = vector.load %arg3[%c0_3, %8, %c1, %c0_4] : memref<1x18x18x4xbf16, #tpu.memory_space<vmem>>, vector<1x16x16x4xbf16>
    %10 = vector.shape_cast %9 : vector<1x16x16x4xbf16> to vector<16x16x4xbf16>
    %c0_i32_5 = arith.constant 0 : i32
    %11 = arith.addi %1, %c0_i32_5 : i32
    %c0_6 = arith.constant 0 : index
    %12 = arith.index_cast %11 : i32 to index
    %c2 = arith.constant 2 : index
    %c0_7 = arith.constant 0 : index
    %13 = vector.load %arg3[%c0_6, %12, %c2, %c0_7] : memref<1x18x18x4xbf16, #tpu.memory_space<vmem>>, vector<1x16x16x4xbf16>
    %14 = vector.shape_cast %13 : vector<1x16x16x4xbf16> to vector<16x16x4xbf16>
    %15 = tpu.concatenate %6, %10, %14 in 2 : vector<16x16x4xbf16>, vector<16x16x4xbf16>, vector<16x16x4xbf16> -> vector<16x16x12xbf16>
    %16 = vector.shape_cast %15 : vector<16x16x12xbf16> to vector<256x12xbf16>
    %c0_8 = arith.constant 0 : index
    %c0_9 = arith.constant 0 : index
    %c0_10 = arith.constant 0 : index
    %17 = vector.load %arg4[%c0_8, %c0_9, %c0_10] : memref<3x12x4xbf16, #tpu.memory_space<vmem>>, vector<1x12x4xbf16>
    %18 = vector.shape_cast %17 : vector<1x12x4xbf16> to vector<12x4xbf16>
    %cst_11 = arith.constant dense<0.000000e+00> : vector<256x4xf32>
    %19 = tpu.matmul %16, %18, %cst_11 {dimension_numbers = #tpu.dot_dimension_numbers<[1], [0], [0], [1], [0, 0, 1, 1], [], []>} : vector<256x12xbf16>, vector<12x4xbf16>, vector<256x4xf32> -> vector<256x4xf32>
    %20 = arith.addf %2, %19 : vector<256x4xf32>
    %c1_i32 = arith.constant 1 : i32
    %21 = arith.addi %1, %c1_i32 : i32
    %c0_12 = arith.constant 0 : index
    %22 = arith.index_cast %21 : i32 to index
    %c0_13 = arith.constant 0 : index
    %c0_14 = arith.constant 0 : index
    %23 = vector.load %arg3[%c0_12, %22, %c0_13, %c0_14] : memref<1x18x18x4xbf16, #tpu.memory_space<vmem>>, vector<1x16x16x4xbf16>
    %24 = vector.shape_cast %23 : vector<1x16x16x4xbf16> to vector<16x16x4xbf16>
    %c1_i32_15 = arith.constant 1 : i32
    %25 = arith.addi %1, %c1_i32_15 : i32
    %c0_16 = arith.constant 0 : index
    %26 = arith.index_cast %25 : i32 to index
    %c1_17 = arith.constant 1 : index
    %c0_18 = arith.constant 0 : index
    %27 = vector.load %arg3[%c0_16, %26, %c1_17, %c0_18] : memref<1x18x18x4xbf16, #tpu.memory_space<vmem>>, vector<1x16x16x4xbf16>
    %28 = vector.shape_cast %27 : vector<1x16x16x4xbf16> to vector<16x16x4xbf16>
    %c1_i32_19 = arith.constant 1 : i32
    %29 = arith.addi %1, %c1_i32_19 : i32
    %c0_20 = arith.constant 0 : index
    %30 = arith.index_cast %29 : i32 to index
    %c2_21 = arith.constant 2 : index
    %c0_22 = arith.constant 0 : index
    %31 = vector.load %arg3[%c0_20, %30, %c2_21, %c0_22] : memref<1x18x18x4xbf16, #tpu.memory_space<vmem>>, vector<1x16x16x4xbf16>
    %32 = vector.shape_cast %31 : vector<1x16x16x4xbf16> to vector<16x16x4xbf16>
    %33 = tpu.concatenate %24, %28, %32 in 2 : vector<16x16x4xbf16>, vector<16x16x4xbf16>, vector<16x16x4xbf16> -> vector<16x16x12xbf16>
    %34 = vector.shape_cast %33 : vector<16x16x12xbf16> to vector<256x12xbf16>
    %c1_23 = arith.constant 1 : index
    %c0_24 = arith.constant 0 : index
    %c0_25 = arith.constant 0 : index
    %35 = vector.load %arg4[%c1_23, %c0_24, %c0_25] : memref<3x12x4xbf16, #tpu.memory_space<vmem>>, vector<1x12x4xbf16>
    %36 = vector.shape_cast %35 : vector<1x12x4xbf16> to vector<12x4xbf16>
    %cst_26 = arith.constant dense<0.000000e+00> : vector<256x4xf32>
    %37 = tpu.matmul %34, %36, %cst_26 {dimension_numbers = #tpu.dot_dimension_numbers<[1], [0], [0], [1], [0, 0, 1, 1], [], []>} : vector<256x12xbf16>, vector<12x4xbf16>, vector<256x4xf32> -> vector<256x4xf32>
    %38 = arith.addf %20, %37 : vector<256x4xf32>
    %c2_i32 = arith.constant 2 : i32
    %39 = arith.addi %1, %c2_i32 : i32
    %c0_27 = arith.constant 0 : index
    %40 = arith.index_cast %39 : i32 to index
    %c0_28 = arith.constant 0 : index
    %c0_29 = arith.constant 0 : index
    %41 = vector.load %arg3[%c0_27, %40, %c0_28, %c0_29] : memref<1x18x18x4xbf16, #tpu.memory_space<vmem>>, vector<1x16x16x4xbf16>
    %42 = vector.shape_cast %41 : vector<1x16x16x4xbf16> to vector<16x16x4xbf16>
    %c2_i32_30 = arith.constant 2 : i32
    %43 = arith.addi %1, %c2_i32_30 : i32
    %c0_31 = arith.constant 0 : index
    %44 = arith.index_cast %43 : i32 to index
    %c1_32 = arith.constant 1 : index
    %c0_33 = arith.constant 0 : index
    %45 = vector.load %arg3[%c0_31, %44, %c1_32, %c0_33] : memref<1x18x18x4xbf16, #tpu.memory_space<vmem>>, vector<1x16x16x4xbf16>
    %46 = vector.shape_cast %45 : vector<1x16x16x4xbf16> to vector<16x16x4xbf16>
    %c2_i32_34 = arith.constant 2 : i32
    %47 = arith.addi %1, %c2_i32_34 : i32
    %c0_35 = arith.constant 0 : index
    %48 = arith.index_cast %47 : i32 to index
    %c2_36 = arith.constant 2 : index
    %c0_37 = arith.constant 0 : index
    %49 = vector.load %arg3[%c0_35, %48, %c2_36, %c0_37] : memref<1x18x18x4xbf16, #tpu.memory_space<vmem>>, vector<1x16x16x4xbf16>
    %50 = vector.shape_cast %49 : vector<1x16x16x4xbf16> to vector<16x16x4xbf16>
    %51 = tpu.concatenate %42, %46, %50 in 2 : vector<16x16x4xbf16>, vector<16x16x4xbf16>, vector<16x16x4xbf16> -> vector<16x16x12xbf16>
    %52 = vector.shape_cast %51 : vector<16x16x12xbf16> to vector<256x12xbf16>
    %c2_38 = arith.constant 2 : index
    %c0_39 = arith.constant 0 : index
    %c0_40 = arith.constant 0 : index
    %53 = vector.load %arg4[%c2_38, %c0_39, %c0_40] : memref<3x12x4xbf16, #tpu.memory_space<vmem>>, vector<1x12x4xbf16>
    %54 = vector.shape_cast %53 : vector<1x12x4xbf16> to vector<12x4xbf16>
    %cst_41 = arith.constant dense<0.000000e+00> : vector<256x4xf32>
    %55 = tpu.matmul %52, %54, %cst_41 {dimension_numbers = #tpu.dot_dimension_numbers<[1], [0], [0], [1], [0, 0, 1, 1], [], []>} : vector<256x12xbf16>, vector<12x4xbf16>, vector<256x4xf32> -> vector<256x4xf32>
    %56 = arith.addf %38, %55 : vector<256x4xf32>
    %57 = arith.truncf %56 : vector<256x4xf32> to vector<256x4xbf16>
    %c0_42 = arith.constant 0 : index
    %c0_43 = arith.constant 0 : index
    %c0_44 = arith.constant 0 : index
    %58 = vector.load %arg5[%c0_42, %c0_43, %c0_44] : memref<1x256x4xbf16, #tpu.memory_space<vmem>>, vector<1x256x4xbf16>
    %59 = vector.shape_cast %58 : vector<1x256x4xbf16> to vector<256x4xbf16>
    %60 = vector.shape_cast %57 : vector<256x4xbf16> to vector<1x256x4xbf16>
    tpu.vector_store %arg5[%c0_42, %c0_43, %c0_44], %60 {strides = array<i32>} : memref<1x256x4xbf16, #tpu.memory_space<vmem>>, vector<1x256x4xbf16>,
    %cst_45 = arith.constant dense<0.000000e+00> : vector<4xf32>
    %61 = vector.multi_reduction <add>, %56, %cst_45 [0] : vector<256x4xf32> to vector<4xf32>
    %62 = vector.shape_cast %61 : vector<4xf32> to vector<1x4xf32>
    %63 = arith.mulf %56, %56 : vector<256x4xf32>
    %cst_46 = arith.constant dense<0.000000e+00> : vector<4xf32>
    %64 = vector.multi_reduction <add>, %63, %cst_46 [0] : vector<256x4xf32> to vector<4xf32>
    %65 = vector.shape_cast %64 : vector<4xf32> to vector<1x4xf32>
    %c0_i32_47 = arith.constant 0 : i32
    %66 = arith.cmpi eq, %arg2, %c0_i32_47 : i32
    %67 = arith.extui %66 : i1 to i32
    %c0_i32_48 = arith.constant 0 : i32
    %68 = arith.cmpi ne, %67, %c0_i32_48 : i32
    scf.if %68 {
      %c0_51 = arith.constant 0 : index
      %c0_52 = arith.constant 0 : index
      %c0_53 = arith.constant 0 : index
      %72 = vector.load %arg6[%c0_51, %c0_52, %c0_53] : memref<1x2x4xf32, #tpu.memory_space<vmem>>, vector<1x1x4xf32>
      %73 = vector.shape_cast %72 : vector<1x1x4xf32> to vector<1x4xf32>
      %74 = vector.shape_cast %62 : vector<1x4xf32> to vector<1x1x4xf32>
      tpu.vector_store %arg6[%c0_51, %c0_52, %c0_53], %74 {strides = array<i32>} : memref<1x2x4xf32, #tpu.memory_space<vmem>>, vector<1x1x4xf32>,
      %c0_54 = arith.constant 0 : index
      %c1_55 = arith.constant 1 : index
      %c0_56 = arith.constant 0 : index
      %75 = vector.load %arg6[%c0_54, %c1_55, %c0_56] : memref<1x2x4xf32, #tpu.memory_space<vmem>>, vector<1x1x4xf32>
      %76 = vector.shape_cast %75 : vector<1x1x4xf32> to vector<1x4xf32>
      %77 = vector.shape_cast %65 : vector<1x4xf32> to vector<1x1x4xf32>
      tpu.vector_store %arg6[%c0_54, %c1_55, %c0_56], %77 {strides = array<i32>} : memref<1x2x4xf32, #tpu.memory_space<vmem>>, vector<1x1x4xf32>,
    } else {
    }
    %c0_i32_49 = arith.constant 0 : i32
    %69 = arith.cmpi ne, %arg2, %c0_i32_49 : i32
    %70 = arith.extui %69 : i1 to i32
    %c0_i32_50 = arith.constant 0 : i32
    %71 = arith.cmpi ne, %70, %c0_i32_50 : i32
    scf.if %71 {
      %c0_51 = arith.constant 0 : index
      %c0_52 = arith.constant 0 : index
      %c0_53 = arith.constant 0 : index
      %72 = vector.load %arg6[%c0_51, %c0_52, %c0_53] : memref<1x2x4xf32, #tpu.memory_space<vmem>>, vector<1x1x4xf32>
      %73 = vector.shape_cast %72 : vector<1x1x4xf32> to vector<1x4xf32>
      %74 = arith.addf %73, %62 : vector<1x4xf32>
      %c0_54 = arith.constant 0 : index
      %c0_55 = arith.constant 0 : index
      %c0_56 = arith.constant 0 : index
      %75 = vector.load %arg6[%c0_54, %c0_55, %c0_56] : memref<1x2x4xf32, #tpu.memory_space<vmem>>, vector<1x1x4xf32>
      %76 = vector.shape_cast %75 : vector<1x1x4xf32> to vector<1x4xf32>
      %77 = vector.shape_cast %74 : vector<1x4xf32> to vector<1x1x4xf32>
      tpu.vector_store %arg6[%c0_54, %c0_55, %c0_56], %77 {strides = array<i32>} : memref<1x2x4xf32, #tpu.memory_space<vmem>>, vector<1x1x4xf32>,
      %c0_57 = arith.constant 0 : index
      %c1_58 = arith.constant 1 : index
      %c0_59 = arith.constant 0 : index
      %78 = vector.load %arg6[%c0_57, %c1_58, %c0_59] : memref<1x2x4xf32, #tpu.memory_space<vmem>>, vector<1x1x4xf32>
      %79 = vector.shape_cast %78 : vector<1x1x4xf32> to vector<1x4xf32>
      %80 = arith.addf %79, %65 : vector<1x4xf32>
      %c0_60 = arith.constant 0 : index
      %c1_61 = arith.constant 1 : index
      %c0_62 = arith.constant 0 : index
      %81 = vector.load %arg6[%c0_60, %c1_61, %c0_62] : memref<1x2x4xf32, #tpu.memory_space<vmem>>, vector<1x1x4xf32>
      %82 = vector.shape_cast %81 : vector<1x1x4xf32> to vector<1x4xf32>
      %83 = vector.shape_cast %80 : vector<1x4xf32> to vector<1x1x4xf32>
      tpu.vector_store %arg6[%c0_60, %c1_61, %c0_62], %83 {strides = array<i32>} : memref<1x2x4xf32, #tpu.memory_space<vmem>>, vector<1x1x4xf32>,
    } else {
    }
    return
  }
  func.func @transform_0(%arg0: i32, %arg1: i32, %arg2: i32) -> (i32, i32, i32, i32) {
    %c0_i32 = arith.constant 0 : i32
    %c0_i32_0 = arith.constant 0 : i32
    %c0_i32_1 = arith.constant 0 : i32
    %c0_i32_2 = arith.constant 0 : i32
    return %arg0, %c0_i32, %c0_i32_0, %c0_i32_1 : i32, i32, i32, i32
  }
  func.func @transform_1(%arg0: i32, %arg1: i32, %arg2: i32) -> (i32, i32, i32) {
    %c0_i32 = arith.constant 0 : i32
    %c0_i32_0 = arith.constant 0 : i32
    %c0_i32_1 = arith.constant 0 : i32
    return %c0_i32, %c0_i32_0, %arg1 : i32, i32, i32
  }
  func.func @transform_2(%arg0: i32, %arg1: i32, %arg2: i32) -> (i32, i32, i32) {
    %c0_i32 = arith.constant 0 : i32
    return %arg0, %arg2, %arg1 : i32, i32, i32
  }
  func.func @transform_3(%arg0: i32, %arg1: i32, %arg2: i32) -> (i32, i32, i32) {
    %c0_i32 = arith.constant 0 : i32
    %c0_i32_0 = arith.constant 0 : i32
    return %arg0, %c0_i32, %arg1 : i32, i32, i32
  }
}

module attributes {stable_mosaic.version = 11 : i64} {
  func.func @kernel(%arg0: i32, %arg1: i32, %arg2: i32, %arg3: memref<1x18x18x4xbf16, #tpu.memory_space<vmem>>, %arg4: memref<1x4xf32, #tpu.memory_space<vmem>>, %arg5: memref<1x4xf32, #tpu.memory_space<vmem>>, %arg6: memref<3x12x4xbf16, #tpu.memory_space<vmem>>, %arg7: memref<1x256x4xbf16, #tpu.memory_space<vmem>>, %arg8: memref<1x2x4xf32, #tpu.memory_space<vmem>>) attributes {dimension_semantics = [#tpu.dimension_semantics<parallel>, #tpu.dimension_semantics<parallel>, #tpu.dimension_semantics<arbitrary>], iteration_bounds = array<i64: 2, 1, 1>, scalar_prefetch = 0 : i64, scratch_operands = 0 : i64, tpu.core_type = #tpu.core_type<tc>, window_params = [{transform_indices = @transform_0, window_bounds = array<i64: 1, 18, 18, 4>}, {pipeline_mode = #tpu.pipeline_mode<synchronous>, transform_indices = @transform_1, window_bounds = array<i64: 1, 4>}, {pipeline_mode = #tpu.pipeline_mode<synchronous>, transform_indices = @transform_2, window_bounds = array<i64: 1, 4>}, {transform_indices = @transform_3, window_bounds = array<i64: 3, 12, 4>}, {transform_indices = @transform_4, window_bounds = array<i64: 1, 256, 4>}, {transform_indices = @transform_5, window_bounds = array<i64: 1, 2, 4>}]} {
    %c16_i32 = arith.constant 16 : i32
    %0 = arith.muli %arg2, %c16_i32 : i32
    %1 = tpu.assume_multiple %0, 16 : i32
    %c0 = arith.constant 0 : index
    %c0_0 = arith.constant 0 : index
    %2 = vector.load %arg4[%c0, %c0_0] : memref<1x4xf32, #tpu.memory_space<vmem>>, vector<1x4xf32>
    %3 = vector.shape_cast %2 : vector<1x4xf32> to vector<1x1x4xf32>
    %c0_1 = arith.constant 0 : index
    %c0_2 = arith.constant 0 : index
    %4 = vector.load %arg5[%c0_1, %c0_2] : memref<1x4xf32, #tpu.memory_space<vmem>>, vector<1x4xf32>
    %5 = vector.shape_cast %4 : vector<1x4xf32> to vector<1x1x4xf32>
    %cst = arith.constant 0.000000e+00 : f32
    %6 = vector.broadcast %cst : f32 to vector<256x4xf32>
    %c0_i32 = arith.constant 0 : i32
    %7 = arith.addi %1, %c0_i32 : i32
    %c0_3 = arith.constant 0 : index
    %8 = arith.index_cast %7 : i32 to index
    %c0_4 = arith.constant 0 : index
    %c0_5 = arith.constant 0 : index
    %9 = vector.load %arg3[%c0_3, %8, %c0_4, %c0_5] : memref<1x18x18x4xbf16, #tpu.memory_space<vmem>>, vector<1x16x16x4xbf16>
    %10 = vector.shape_cast %9 : vector<1x16x16x4xbf16> to vector<16x16x4xbf16>
    %11 = arith.extf %10 : vector<16x16x4xbf16> to vector<16x16x4xf32>
    %12 = vector.broadcast %3 : vector<1x1x4xf32> to vector<16x16x4xf32>
    %13 = arith.mulf %11, %12 : vector<16x16x4xf32>
    %14 = vector.broadcast %5 : vector<1x1x4xf32> to vector<16x16x4xf32>
    %15 = arith.addf %13, %14 : vector<16x16x4xf32>
    %cst_6 = arith.constant 0.000000e+00 : f32
    %16 = vector.broadcast %cst_6 : f32 to vector<16x16x4xf32>
    %17 = arith.maximumf %15, %16 : vector<16x16x4xf32>
    %18 = arith.truncf %17 : vector<16x16x4xf32> to vector<16x16x4xbf16>
    %c0_i32_7 = arith.constant 0 : i32
    %19 = arith.addi %1, %c0_i32_7 : i32
    %c0_8 = arith.constant 0 : index
    %20 = arith.index_cast %19 : i32 to index
    %c1 = arith.constant 1 : index
    %c0_9 = arith.constant 0 : index
    %21 = vector.load %arg3[%c0_8, %20, %c1, %c0_9] : memref<1x18x18x4xbf16, #tpu.memory_space<vmem>>, vector<1x16x16x4xbf16>
    %22 = vector.shape_cast %21 : vector<1x16x16x4xbf16> to vector<16x16x4xbf16>
    %23 = arith.extf %22 : vector<16x16x4xbf16> to vector<16x16x4xf32>
    %24 = vector.broadcast %3 : vector<1x1x4xf32> to vector<16x16x4xf32>
    %25 = arith.mulf %23, %24 : vector<16x16x4xf32>
    %26 = vector.broadcast %5 : vector<1x1x4xf32> to vector<16x16x4xf32>
    %27 = arith.addf %25, %26 : vector<16x16x4xf32>
    %cst_10 = arith.constant 0.000000e+00 : f32
    %28 = vector.broadcast %cst_10 : f32 to vector<16x16x4xf32>
    %29 = arith.maximumf %27, %28 : vector<16x16x4xf32>
    %30 = arith.truncf %29 : vector<16x16x4xf32> to vector<16x16x4xbf16>
    %c0_i32_11 = arith.constant 0 : i32
    %31 = arith.addi %1, %c0_i32_11 : i32
    %c0_12 = arith.constant 0 : index
    %32 = arith.index_cast %31 : i32 to index
    %c2 = arith.constant 2 : index
    %c0_13 = arith.constant 0 : index
    %33 = vector.load %arg3[%c0_12, %32, %c2, %c0_13] : memref<1x18x18x4xbf16, #tpu.memory_space<vmem>>, vector<1x16x16x4xbf16>
    %34 = vector.shape_cast %33 : vector<1x16x16x4xbf16> to vector<16x16x4xbf16>
    %35 = arith.extf %34 : vector<16x16x4xbf16> to vector<16x16x4xf32>
    %36 = vector.broadcast %3 : vector<1x1x4xf32> to vector<16x16x4xf32>
    %37 = arith.mulf %35, %36 : vector<16x16x4xf32>
    %38 = vector.broadcast %5 : vector<1x1x4xf32> to vector<16x16x4xf32>
    %39 = arith.addf %37, %38 : vector<16x16x4xf32>
    %cst_14 = arith.constant 0.000000e+00 : f32
    %40 = vector.broadcast %cst_14 : f32 to vector<16x16x4xf32>
    %41 = arith.maximumf %39, %40 : vector<16x16x4xf32>
    %42 = arith.truncf %41 : vector<16x16x4xf32> to vector<16x16x4xbf16>
    %43 = tpu.concatenate %18, %30, %42 in 2 : vector<16x16x4xbf16>, vector<16x16x4xbf16>, vector<16x16x4xbf16> -> vector<16x16x12xbf16>
    %44 = vector.shape_cast %43 : vector<16x16x12xbf16> to vector<256x12xbf16>
    %c0_15 = arith.constant 0 : index
    %c0_16 = arith.constant 0 : index
    %c0_17 = arith.constant 0 : index
    %45 = vector.load %arg6[%c0_15, %c0_16, %c0_17] : memref<3x12x4xbf16, #tpu.memory_space<vmem>>, vector<1x12x4xbf16>
    %46 = vector.shape_cast %45 : vector<1x12x4xbf16> to vector<12x4xbf16>
    %cst_18 = arith.constant dense<0.000000e+00> : vector<256x4xf32>
    %47 = tpu.matmul %44, %46, %cst_18 {dimension_numbers = #tpu.dot_dimension_numbers<[1], [0], [0], [1], [0, 0, 1, 1], [], []>} : vector<256x12xbf16>, vector<12x4xbf16>, vector<256x4xf32> -> vector<256x4xf32>
    %48 = arith.addf %6, %47 : vector<256x4xf32>
    %c1_i32 = arith.constant 1 : i32
    %49 = arith.addi %1, %c1_i32 : i32
    %c0_19 = arith.constant 0 : index
    %50 = arith.index_cast %49 : i32 to index
    %c0_20 = arith.constant 0 : index
    %c0_21 = arith.constant 0 : index
    %51 = vector.load %arg3[%c0_19, %50, %c0_20, %c0_21] : memref<1x18x18x4xbf16, #tpu.memory_space<vmem>>, vector<1x16x16x4xbf16>
    %52 = vector.shape_cast %51 : vector<1x16x16x4xbf16> to vector<16x16x4xbf16>
    %53 = arith.extf %52 : vector<16x16x4xbf16> to vector<16x16x4xf32>
    %54 = vector.broadcast %3 : vector<1x1x4xf32> to vector<16x16x4xf32>
    %55 = arith.mulf %53, %54 : vector<16x16x4xf32>
    %56 = vector.broadcast %5 : vector<1x1x4xf32> to vector<16x16x4xf32>
    %57 = arith.addf %55, %56 : vector<16x16x4xf32>
    %cst_22 = arith.constant 0.000000e+00 : f32
    %58 = vector.broadcast %cst_22 : f32 to vector<16x16x4xf32>
    %59 = arith.maximumf %57, %58 : vector<16x16x4xf32>
    %60 = arith.truncf %59 : vector<16x16x4xf32> to vector<16x16x4xbf16>
    %c1_i32_23 = arith.constant 1 : i32
    %61 = arith.addi %1, %c1_i32_23 : i32
    %c0_24 = arith.constant 0 : index
    %62 = arith.index_cast %61 : i32 to index
    %c1_25 = arith.constant 1 : index
    %c0_26 = arith.constant 0 : index
    %63 = vector.load %arg3[%c0_24, %62, %c1_25, %c0_26] : memref<1x18x18x4xbf16, #tpu.memory_space<vmem>>, vector<1x16x16x4xbf16>
    %64 = vector.shape_cast %63 : vector<1x16x16x4xbf16> to vector<16x16x4xbf16>
    %65 = arith.extf %64 : vector<16x16x4xbf16> to vector<16x16x4xf32>
    %66 = vector.broadcast %3 : vector<1x1x4xf32> to vector<16x16x4xf32>
    %67 = arith.mulf %65, %66 : vector<16x16x4xf32>
    %68 = vector.broadcast %5 : vector<1x1x4xf32> to vector<16x16x4xf32>
    %69 = arith.addf %67, %68 : vector<16x16x4xf32>
    %cst_27 = arith.constant 0.000000e+00 : f32
    %70 = vector.broadcast %cst_27 : f32 to vector<16x16x4xf32>
    %71 = arith.maximumf %69, %70 : vector<16x16x4xf32>
    %72 = arith.truncf %71 : vector<16x16x4xf32> to vector<16x16x4xbf16>
    %c1_i32_28 = arith.constant 1 : i32
    %73 = arith.addi %1, %c1_i32_28 : i32
    %c0_29 = arith.constant 0 : index
    %74 = arith.index_cast %73 : i32 to index
    %c2_30 = arith.constant 2 : index
    %c0_31 = arith.constant 0 : index
    %75 = vector.load %arg3[%c0_29, %74, %c2_30, %c0_31] : memref<1x18x18x4xbf16, #tpu.memory_space<vmem>>, vector<1x16x16x4xbf16>
    %76 = vector.shape_cast %75 : vector<1x16x16x4xbf16> to vector<16x16x4xbf16>
    %77 = arith.extf %76 : vector<16x16x4xbf16> to vector<16x16x4xf32>
    %78 = vector.broadcast %3 : vector<1x1x4xf32> to vector<16x16x4xf32>
    %79 = arith.mulf %77, %78 : vector<16x16x4xf32>
    %80 = vector.broadcast %5 : vector<1x1x4xf32> to vector<16x16x4xf32>
    %81 = arith.addf %79, %80 : vector<16x16x4xf32>
    %cst_32 = arith.constant 0.000000e+00 : f32
    %82 = vector.broadcast %cst_32 : f32 to vector<16x16x4xf32>
    %83 = arith.maximumf %81, %82 : vector<16x16x4xf32>
    %84 = arith.truncf %83 : vector<16x16x4xf32> to vector<16x16x4xbf16>
    %85 = tpu.concatenate %60, %72, %84 in 2 : vector<16x16x4xbf16>, vector<16x16x4xbf16>, vector<16x16x4xbf16> -> vector<16x16x12xbf16>
    %86 = vector.shape_cast %85 : vector<16x16x12xbf16> to vector<256x12xbf16>
    %c1_33 = arith.constant 1 : index
    %c0_34 = arith.constant 0 : index
    %c0_35 = arith.constant 0 : index
    %87 = vector.load %arg6[%c1_33, %c0_34, %c0_35] : memref<3x12x4xbf16, #tpu.memory_space<vmem>>, vector<1x12x4xbf16>
    %88 = vector.shape_cast %87 : vector<1x12x4xbf16> to vector<12x4xbf16>
    %cst_36 = arith.constant dense<0.000000e+00> : vector<256x4xf32>
    %89 = tpu.matmul %86, %88, %cst_36 {dimension_numbers = #tpu.dot_dimension_numbers<[1], [0], [0], [1], [0, 0, 1, 1], [], []>} : vector<256x12xbf16>, vector<12x4xbf16>, vector<256x4xf32> -> vector<256x4xf32>
    %90 = arith.addf %48, %89 : vector<256x4xf32>
    %c2_i32 = arith.constant 2 : i32
    %91 = arith.addi %1, %c2_i32 : i32
    %c0_37 = arith.constant 0 : index
    %92 = arith.index_cast %91 : i32 to index
    %c0_38 = arith.constant 0 : index
    %c0_39 = arith.constant 0 : index
    %93 = vector.load %arg3[%c0_37, %92, %c0_38, %c0_39] : memref<1x18x18x4xbf16, #tpu.memory_space<vmem>>, vector<1x16x16x4xbf16>
    %94 = vector.shape_cast %93 : vector<1x16x16x4xbf16> to vector<16x16x4xbf16>
    %95 = arith.extf %94 : vector<16x16x4xbf16> to vector<16x16x4xf32>
    %96 = vector.broadcast %3 : vector<1x1x4xf32> to vector<16x16x4xf32>
    %97 = arith.mulf %95, %96 : vector<16x16x4xf32>
    %98 = vector.broadcast %5 : vector<1x1x4xf32> to vector<16x16x4xf32>
    %99 = arith.addf %97, %98 : vector<16x16x4xf32>
    %cst_40 = arith.constant 0.000000e+00 : f32
    %100 = vector.broadcast %cst_40 : f32 to vector<16x16x4xf32>
    %101 = arith.maximumf %99, %100 : vector<16x16x4xf32>
    %102 = arith.truncf %101 : vector<16x16x4xf32> to vector<16x16x4xbf16>
    %c2_i32_41 = arith.constant 2 : i32
    %103 = arith.addi %1, %c2_i32_41 : i32
    %c0_42 = arith.constant 0 : index
    %104 = arith.index_cast %103 : i32 to index
    %c1_43 = arith.constant 1 : index
    %c0_44 = arith.constant 0 : index
    %105 = vector.load %arg3[%c0_42, %104, %c1_43, %c0_44] : memref<1x18x18x4xbf16, #tpu.memory_space<vmem>>, vector<1x16x16x4xbf16>
    %106 = vector.shape_cast %105 : vector<1x16x16x4xbf16> to vector<16x16x4xbf16>
    %107 = arith.extf %106 : vector<16x16x4xbf16> to vector<16x16x4xf32>
    %108 = vector.broadcast %3 : vector<1x1x4xf32> to vector<16x16x4xf32>
    %109 = arith.mulf %107, %108 : vector<16x16x4xf32>
    %110 = vector.broadcast %5 : vector<1x1x4xf32> to vector<16x16x4xf32>
    %111 = arith.addf %109, %110 : vector<16x16x4xf32>
    %cst_45 = arith.constant 0.000000e+00 : f32
    %112 = vector.broadcast %cst_45 : f32 to vector<16x16x4xf32>
    %113 = arith.maximumf %111, %112 : vector<16x16x4xf32>
    %114 = arith.truncf %113 : vector<16x16x4xf32> to vector<16x16x4xbf16>
    %c2_i32_46 = arith.constant 2 : i32
    %115 = arith.addi %1, %c2_i32_46 : i32
    %c0_47 = arith.constant 0 : index
    %116 = arith.index_cast %115 : i32 to index
    %c2_48 = arith.constant 2 : index
    %c0_49 = arith.constant 0 : index
    %117 = vector.load %arg3[%c0_47, %116, %c2_48, %c0_49] : memref<1x18x18x4xbf16, #tpu.memory_space<vmem>>, vector<1x16x16x4xbf16>
    %118 = vector.shape_cast %117 : vector<1x16x16x4xbf16> to vector<16x16x4xbf16>
    %119 = arith.extf %118 : vector<16x16x4xbf16> to vector<16x16x4xf32>
    %120 = vector.broadcast %3 : vector<1x1x4xf32> to vector<16x16x4xf32>
    %121 = arith.mulf %119, %120 : vector<16x16x4xf32>
    %122 = vector.broadcast %5 : vector<1x1x4xf32> to vector<16x16x4xf32>
    %123 = arith.addf %121, %122 : vector<16x16x4xf32>
    %cst_50 = arith.constant 0.000000e+00 : f32
    %124 = vector.broadcast %cst_50 : f32 to vector<16x16x4xf32>
    %125 = arith.maximumf %123, %124 : vector<16x16x4xf32>
    %126 = arith.truncf %125 : vector<16x16x4xf32> to vector<16x16x4xbf16>
    %127 = tpu.concatenate %102, %114, %126 in 2 : vector<16x16x4xbf16>, vector<16x16x4xbf16>, vector<16x16x4xbf16> -> vector<16x16x12xbf16>
    %128 = vector.shape_cast %127 : vector<16x16x12xbf16> to vector<256x12xbf16>
    %c2_51 = arith.constant 2 : index
    %c0_52 = arith.constant 0 : index
    %c0_53 = arith.constant 0 : index
    %129 = vector.load %arg6[%c2_51, %c0_52, %c0_53] : memref<3x12x4xbf16, #tpu.memory_space<vmem>>, vector<1x12x4xbf16>
    %130 = vector.shape_cast %129 : vector<1x12x4xbf16> to vector<12x4xbf16>
    %cst_54 = arith.constant dense<0.000000e+00> : vector<256x4xf32>
    %131 = tpu.matmul %128, %130, %cst_54 {dimension_numbers = #tpu.dot_dimension_numbers<[1], [0], [0], [1], [0, 0, 1, 1], [], []>} : vector<256x12xbf16>, vector<12x4xbf16>, vector<256x4xf32> -> vector<256x4xf32>
    %132 = arith.addf %90, %131 : vector<256x4xf32>
    %133 = arith.truncf %132 : vector<256x4xf32> to vector<256x4xbf16>
    %c0_55 = arith.constant 0 : index
    %c0_56 = arith.constant 0 : index
    %c0_57 = arith.constant 0 : index
    %134 = vector.load %arg7[%c0_55, %c0_56, %c0_57] : memref<1x256x4xbf16, #tpu.memory_space<vmem>>, vector<1x256x4xbf16>
    %135 = vector.shape_cast %134 : vector<1x256x4xbf16> to vector<256x4xbf16>
    %136 = vector.shape_cast %133 : vector<256x4xbf16> to vector<1x256x4xbf16>
    tpu.vector_store %arg7[%c0_55, %c0_56, %c0_57], %136 {strides = array<i32>} : memref<1x256x4xbf16, #tpu.memory_space<vmem>>, vector<1x256x4xbf16>,
    %cst_58 = arith.constant dense<0.000000e+00> : vector<4xf32>
    %137 = vector.multi_reduction <add>, %132, %cst_58 [0] : vector<256x4xf32> to vector<4xf32>
    %138 = vector.shape_cast %137 : vector<4xf32> to vector<1x4xf32>
    %139 = arith.mulf %132, %132 : vector<256x4xf32>
    %cst_59 = arith.constant dense<0.000000e+00> : vector<4xf32>
    %140 = vector.multi_reduction <add>, %139, %cst_59 [0] : vector<256x4xf32> to vector<4xf32>
    %141 = vector.shape_cast %140 : vector<4xf32> to vector<1x4xf32>
    %c0_i32_60 = arith.constant 0 : i32
    %142 = arith.cmpi eq, %arg2, %c0_i32_60 : i32
    %143 = arith.extui %142 : i1 to i32
    %c0_i32_61 = arith.constant 0 : i32
    %144 = arith.cmpi ne, %143, %c0_i32_61 : i32
    scf.if %144 {
      %c0_64 = arith.constant 0 : index
      %c0_65 = arith.constant 0 : index
      %c0_66 = arith.constant 0 : index
      %148 = vector.load %arg8[%c0_64, %c0_65, %c0_66] : memref<1x2x4xf32, #tpu.memory_space<vmem>>, vector<1x1x4xf32>
      %149 = vector.shape_cast %148 : vector<1x1x4xf32> to vector<1x4xf32>
      %150 = vector.shape_cast %138 : vector<1x4xf32> to vector<1x1x4xf32>
      tpu.vector_store %arg8[%c0_64, %c0_65, %c0_66], %150 {strides = array<i32>} : memref<1x2x4xf32, #tpu.memory_space<vmem>>, vector<1x1x4xf32>,
      %c0_67 = arith.constant 0 : index
      %c1_68 = arith.constant 1 : index
      %c0_69 = arith.constant 0 : index
      %151 = vector.load %arg8[%c0_67, %c1_68, %c0_69] : memref<1x2x4xf32, #tpu.memory_space<vmem>>, vector<1x1x4xf32>
      %152 = vector.shape_cast %151 : vector<1x1x4xf32> to vector<1x4xf32>
      %153 = vector.shape_cast %141 : vector<1x4xf32> to vector<1x1x4xf32>
      tpu.vector_store %arg8[%c0_67, %c1_68, %c0_69], %153 {strides = array<i32>} : memref<1x2x4xf32, #tpu.memory_space<vmem>>, vector<1x1x4xf32>,
    } else {
    }
    %c0_i32_62 = arith.constant 0 : i32
    %145 = arith.cmpi ne, %arg2, %c0_i32_62 : i32
    %146 = arith.extui %145 : i1 to i32
    %c0_i32_63 = arith.constant 0 : i32
    %147 = arith.cmpi ne, %146, %c0_i32_63 : i32
    scf.if %147 {
      %c0_64 = arith.constant 0 : index
      %c0_65 = arith.constant 0 : index
      %c0_66 = arith.constant 0 : index
      %148 = vector.load %arg8[%c0_64, %c0_65, %c0_66] : memref<1x2x4xf32, #tpu.memory_space<vmem>>, vector<1x1x4xf32>
      %149 = vector.shape_cast %148 : vector<1x1x4xf32> to vector<1x4xf32>
      %150 = arith.addf %149, %138 : vector<1x4xf32>
      %c0_67 = arith.constant 0 : index
      %c0_68 = arith.constant 0 : index
      %c0_69 = arith.constant 0 : index
      %151 = vector.load %arg8[%c0_67, %c0_68, %c0_69] : memref<1x2x4xf32, #tpu.memory_space<vmem>>, vector<1x1x4xf32>
      %152 = vector.shape_cast %151 : vector<1x1x4xf32> to vector<1x4xf32>
      %153 = vector.shape_cast %150 : vector<1x4xf32> to vector<1x1x4xf32>
      tpu.vector_store %arg8[%c0_67, %c0_68, %c0_69], %153 {strides = array<i32>} : memref<1x2x4xf32, #tpu.memory_space<vmem>>, vector<1x1x4xf32>,
      %c0_70 = arith.constant 0 : index
      %c1_71 = arith.constant 1 : index
      %c0_72 = arith.constant 0 : index
      %154 = vector.load %arg8[%c0_70, %c1_71, %c0_72] : memref<1x2x4xf32, #tpu.memory_space<vmem>>, vector<1x1x4xf32>
      %155 = vector.shape_cast %154 : vector<1x1x4xf32> to vector<1x4xf32>
      %156 = arith.addf %155, %141 : vector<1x4xf32>
      %c0_73 = arith.constant 0 : index
      %c1_74 = arith.constant 1 : index
      %c0_75 = arith.constant 0 : index
      %157 = vector.load %arg8[%c0_73, %c1_74, %c0_75] : memref<1x2x4xf32, #tpu.memory_space<vmem>>, vector<1x1x4xf32>
      %158 = vector.shape_cast %157 : vector<1x1x4xf32> to vector<1x4xf32>
      %159 = vector.shape_cast %156 : vector<1x4xf32> to vector<1x1x4xf32>
      tpu.vector_store %arg8[%c0_73, %c1_74, %c0_75], %159 {strides = array<i32>} : memref<1x2x4xf32, #tpu.memory_space<vmem>>, vector<1x1x4xf32>,
    } else {
    }
    return
  }
  func.func @transform_0(%arg0: i32, %arg1: i32, %arg2: i32) -> (i32, i32, i32, i32) {
    %c0_i32 = arith.constant 0 : i32
    %c0_i32_0 = arith.constant 0 : i32
    %c0_i32_1 = arith.constant 0 : i32
    %c0_i32_2 = arith.constant 0 : i32
    return %arg0, %c0_i32, %c0_i32_0, %c0_i32_1 : i32, i32, i32, i32
  }
  func.func @transform_1(%arg0: i32, %arg1: i32, %arg2: i32) -> (i32, i32) {
    %c0_i32 = arith.constant 0 : i32
    %c0_i32_0 = arith.constant 0 : i32
    %c0_i32_1 = arith.constant 0 : i32
    return %c0_i32, %c0_i32_0 : i32, i32
  }
  func.func @transform_2(%arg0: i32, %arg1: i32, %arg2: i32) -> (i32, i32) {
    %c0_i32 = arith.constant 0 : i32
    %c0_i32_0 = arith.constant 0 : i32
    %c0_i32_1 = arith.constant 0 : i32
    return %c0_i32, %c0_i32_0 : i32, i32
  }
  func.func @transform_3(%arg0: i32, %arg1: i32, %arg2: i32) -> (i32, i32, i32) {
    %c0_i32 = arith.constant 0 : i32
    %c0_i32_0 = arith.constant 0 : i32
    %c0_i32_1 = arith.constant 0 : i32
    return %c0_i32, %c0_i32_0, %arg1 : i32, i32, i32
  }
  func.func @transform_4(%arg0: i32, %arg1: i32, %arg2: i32) -> (i32, i32, i32) {
    %c0_i32 = arith.constant 0 : i32
    return %arg0, %arg2, %arg1 : i32, i32, i32
  }
  func.func @transform_5(%arg0: i32, %arg1: i32, %arg2: i32) -> (i32, i32, i32) {
    %c0_i32 = arith.constant 0 : i32
    %c0_i32_0 = arith.constant 0 : i32
    return %arg0, %c0_i32, %arg1 : i32, i32, i32
  }
}

module attributes {stable_mosaic.version = 11 : i64} {
  func.func @_bn_add_relu_kernel(%arg0: i32, %arg1: memref<32x64xbf16, #tpu.memory_space<vmem>>, %arg2: memref<1x64xf32, #tpu.memory_space<vmem>>, %arg3: memref<1x64xf32, #tpu.memory_space<vmem>>, %arg4: memref<32x64xf32, #tpu.memory_space<vmem>>, %arg5: memref<32x64xf32, #tpu.memory_space<vmem>>) attributes {dimension_semantics = [#tpu.dimension_semantics<parallel>], iteration_bounds = array<i64: 1>, scalar_prefetch = 0 : i64, scratch_operands = 0 : i64, tpu.core_type = #tpu.core_type<tc>, window_params = [{transform_indices = @transform_0, window_bounds = array<i64: 32, 64>}, {pipeline_mode = #tpu.pipeline_mode<synchronous>, transform_indices = @transform_1, window_bounds = array<i64: 1, 64>}, {pipeline_mode = #tpu.pipeline_mode<synchronous>, transform_indices = @transform_2, window_bounds = array<i64: 1, 64>}, {transform_indices = @transform_3, window_bounds = array<i64: 32, 64>}, {transform_indices = @transform_4, window_bounds = array<i64: 32, 64>}]} {
    %c0 = arith.constant 0 : index
    %c0_0 = arith.constant 0 : index
    %0 = vector.load %arg1[%c0, %c0_0] : memref<32x64xbf16, #tpu.memory_space<vmem>>, vector<32x64xbf16>
    %1 = arith.extf %0 : vector<32x64xbf16> to vector<32x64xf32>
    %c0_1 = arith.constant 0 : index
    %c0_2 = arith.constant 0 : index
    %2 = vector.load %arg2[%c0_1, %c0_2] : memref<1x64xf32, #tpu.memory_space<vmem>>, vector<1x64xf32>
    %3 = vector.broadcast %2 : vector<1x64xf32> to vector<32x64xf32>
    %4 = arith.mulf %1, %3 : vector<32x64xf32>
    %c0_3 = arith.constant 0 : index
    %c0_4 = arith.constant 0 : index
    %5 = vector.load %arg3[%c0_3, %c0_4] : memref<1x64xf32, #tpu.memory_space<vmem>>, vector<1x64xf32>
    %6 = vector.broadcast %5 : vector<1x64xf32> to vector<32x64xf32>
    %7 = arith.addf %4, %6 : vector<32x64xf32>
    %c0_5 = arith.constant 0 : index
    %c0_6 = arith.constant 0 : index
    %8 = vector.load %arg4[%c0_5, %c0_6] : memref<32x64xf32, #tpu.memory_space<vmem>>, vector<32x64xf32>
    %9 = arith.addf %7, %8 : vector<32x64xf32>
    %cst = arith.constant 0.000000e+00 : f32
    %10 = vector.broadcast %cst : f32 to vector<32x64xf32>
    %11 = arith.maximumf %9, %10 : vector<32x64xf32>
    %c0_7 = arith.constant 0 : index
    %c0_8 = arith.constant 0 : index
    %12 = vector.load %arg5[%c0_7, %c0_8] : memref<32x64xf32, #tpu.memory_space<vmem>>, vector<32x64xf32>
    tpu.vector_store %arg5[%c0_7, %c0_8], %11 {strides = array<i32>} : memref<32x64xf32, #tpu.memory_space<vmem>>, vector<32x64xf32>,
    return
  }
  func.func @transform_0(%arg0: i32) -> (i32, i32) {
    %c0_i32 = arith.constant 0 : i32
    %c0_i32_0 = arith.constant 0 : i32
    return %arg0, %c0_i32 : i32, i32
  }
  func.func @transform_1(%arg0: i32) -> (i32, i32) {
    %c0_i32 = arith.constant 0 : i32
    %c0_i32_0 = arith.constant 0 : i32
    %c0_i32_1 = arith.constant 0 : i32
    return %c0_i32, %c0_i32_0 : i32, i32
  }
  func.func @transform_2(%arg0: i32) -> (i32, i32) {
    %c0_i32 = arith.constant 0 : i32
    %c0_i32_0 = arith.constant 0 : i32
    %c0_i32_1 = arith.constant 0 : i32
    return %c0_i32, %c0_i32_0 : i32, i32
  }
  func.func @transform_3(%arg0: i32) -> (i32, i32) {
    %c0_i32 = arith.constant 0 : i32
    %c0_i32_0 = arith.constant 0 : i32
    return %arg0, %c0_i32 : i32, i32
  }
  func.func @transform_4(%arg0: i32) -> (i32, i32) {
    %c0_i32 = arith.constant 0 : i32
    %c0_i32_0 = arith.constant 0 : i32
    return %arg0, %c0_i32 : i32, i32
  }
}

</mosaic_0001>

<bundles_post_ra>
// kernel: tile.13
= control target key start
LH: loop header
LB: loop body
LE: loop exit
PB: predicated region body
PF: predicated region fallthrough
CT: control target
= control target key end

     0   :  { %s28_s0 = inlined_call_operand.vmem [shape: f32[4], index: 0, kind: input, shape index: {}]   ;;  %s29_s1 = inlined_call_operand.vmem [shape: f32[16,4], index: 1, kind: output, shape index: {}]  }
   0x1   :  { %v4_v0 = vld [vmem:[%s28_s0] ss:$0 sm:$0xff] }
   0x2   :  { %5 = vst [vmem:[%s29_s1] sm:$0xff] %v4_v0 }
   0x3   :  { %8 = vst [vmem:[%s29_s1 + $0x8] sm:$0xff] %v4_v0 }

// kernel: tile.18
= control target key start
LH: loop header
LB: loop body
LE: loop exit
PB: predicated region body
PF: predicated region fallthrough
CT: control target
= control target key end

     0   :  { %s131_s10 = smov 60   ;;  %s132_s11 = smov 52   ;;  %vm3_vm0 = vcmask 31744   ;;  %vm9_vm1 = vcmask 523744   ;;  %vm15_vm2 = vcmask 490944   ;;  %vm21_vm3 = vcmask 458144   ;;  %s207_s0 = inlined_call_operand.vmem [shape: f32[16,4], index: 0, kind: input, shape index: {}]   ;;  %s208_s1 = inlined_call_operand.vmem [shape: f32[1,64], index: 1, kind: output, shape index: {}]  }
   0x1   :  { %v101_v0 = vld [vmem:[%s207_s0 + $0xf] sm:$0x1]   ;;  %v103_v1 = vld [vmem:[%s207_s0 + $0xd] sm:$0x1]   ;;  %v105_v2 = vld [vmem:[%s207_s0 + $0xb] sm:$0x1]  }
   0x2   :  { %7 = vrot.lane.b32.xlu0 %v101_v0, %s131_s10  ;;  %19 = vrot.lane.b32.xlu1 %v103_v1, %s132_s11  ;;  %s133_s14 = smov 44   ;;  %v102_v3 = vld [vmem:[%s207_s0 + $0xe] sm:$0x1]   ;;  %v104_v4 = vld [vmem:[%s207_s0 + $0xc] sm:$0x1]   ;;  %s134_s19 = smov 56  }
   0x3   :  { %31 = vrot.lane.b32.xlu2 %v105_v2, %s133_s14  ;;  %s135_s20 = smov 48   ;;  %v106_v5 = vld [vmem:[%s207_s0 + $0xa] sm:$0x1]   ;;  %s136_s23 = smov 40   ;;  %v107_v6 = vld [vmem:[%s207_s0 + $0x9] sm:$0x1]  }
   0x4   :  { %v108_v7 = vld [vmem:[%s207_s0 + $0x8] sm:$0x1]   ;;  %s137_s28 = smov 36   ;;  %s138_s29 = smov 32   ;;  %v109_v8 = vld [vmem:[%s207_s0 + $0x7] sm:$0x1]  }
   0x5   :  { %s139_s3 = smov 28   ;;  %v110_v9 = vld [vmem:[%s207_s0 + $0x6] sm:$0x1]   ;;  %v111_v10 = vld [vmem:[%s207_s0 + $0x5] sm:$0x1]   ;;  %s140_s8 = smov 24  }
   0x6   :  { %s141_s9 = smov 20   ;;  %v112_v11 = vld [vmem:[%s207_s0 + $0x4] sm:$0x1]   ;;  %s142_s12 = smov 16   ;;  %v113_v12 = vld [vmem:[%s207_s0 + $0x3] sm:$0x1]  }
   0x7   :  { %v114_v13 = vld [vmem:[%s207_s0 + $0x2] sm:$0x1]   ;;  %s143_s17 = smov 12   ;;  %s144_s18 = smov 8   ;;  %v115_v14 = vld [vmem:[%s207_s0 + $0x1] sm:$0x1]  }
   0x8   :  { %s145_s21 = smov 4   ;;  %v2_v15 = vld [vmem:[%s207_s0] sm:$0x1]   ;;  %vm27_vm4 = vcmask 425344   ;;  %vm33_vm5 = vcmask 392544   ;;  %vm39_vm6 = vcmask 359744  }
   0x9   :  { %4 = vst.msk [vmem:[#allocation0] sm:$0x1] %vm3_vm0, %v2_v15   ;;  %vm45_vm7 = vcmask 326944   ;;  %vm51_vm8 = vcmask 294144   ;;  %vm57_vm9 = vcmask 261344   ;;  %vm63_vm10 = vcmask 228544  }
   0xa   :  { %13 = vrot.lane.b32.xlu0 %v102_v3, %s134_s19  ;;  %25 = vrot.lane.b32.xlu1 %v104_v4, %s135_s20  ;;  %vm69_vm11 = vcmask 195744   ;;  %vm75_vm12 = vcmask 162944   ;;  %vm81_vm13 = vcmask 130144   ;;  %vm87_vm14 = vcmask 97344  }
   0xb   :  { %37 = vrot.lane.b32.xlu2 %v106_v5, %s136_s23  ;;  %vm93_vm15 = vcmask 64544  }
  0x12   :  { %43 = vrot.lane.b32.xlu0 %v107_v6, %s137_s28  ;;  %49 = vrot.lane.b32.xlu1 %v108_v7, %s138_s29 }
  0x13   :  { %55 = vrot.lane.b32.xlu2 %v109_v8, %s139_s3 }
  0x1a   :  { %61 = vrot.lane.b32.xlu0 %v110_v9, %s140_s8  ;;  %67 = vrot.lane.b32.xlu1 %v111_v10, %s141_s9 }
  0x1b   :  { %73 = vrot.lane.b32.xlu2 %v112_v11, %s142_s12 }
  0x22   :  { %79 = vrot.lane.b32.xlu0 %v113_v12, %s143_s17  ;;  %85 = vrot.lane.b32.xlu1 %v114_v13, %s144_s18 }
  0x23   :  { %91 = vrot.lane.b32.xlu2 %v115_v14, %s145_s21 }
  0x5d   :  { %v32_v16 = vpop.permute.xlu2 %31  }
  0x65   :  { %v38_v17 = vpop.permute.xlu2 %37  }
  0x6d   :  { %v56_v18 = vpop.permute.xlu2 %55  }
  0x74   :  { %v8_v19 = vpop.permute.xlu0 %7   ;;  %v20_v20 = vpop.permute.xlu1 %19  }
  0x75   :  { %10 = vst.msk [vmem:[#allocation0] sm:$0x1] %vm9_vm1, %v8_v19   ;;  %v74_v21 = vpop.permute.xlu2 %73  }
  0x7c   :  { %v14_v22 = vpop.permute.xlu0 %13   ;;  %v26_v23 = vpop.permute.xlu1 %25  }
  0x7d   :  { %16 = vst.msk [vmem:[#allocation0] sm:$0x1] %vm15_vm2, %v14_v22   ;;  %v92_v24 = vpop.permute.xlu2 %91  }
  0x7e   :  { %22 = vst.msk [vmem:[#allocation0] sm:$0x1] %vm21_vm3, %v20_v20  }
  0x7f   :  { %28 = vst.msk [vmem:[#allocation0] sm:$0x1] %vm27_vm4, %v26_v23  }
  0x80   :  { %34 = vst.msk [vmem:[#allocation0] sm:$0x1] %vm33_vm5, %v32_v16  }
  0x81   :  { %40 = vst.msk [vmem:[#allocation0] sm:$0x1] %vm39_vm6, %v38_v17  }
  0x84   :  { %v44_v25 = vpop.permute.xlu0 %43   ;;  %v50_v26 = vpop.permute.xlu1 %49  }
  0x85   :  { %46 = vst.msk [vmem:[#allocation0] sm:$0x1] %vm45_vm7, %v44_v25  }
  0x86   :  { %52 = vst.msk [vmem:[#allocation0] sm:$0x1] %vm51_vm8, %v50_v26  }
  0x87   :  { %58 = vst.msk [vmem:[#allocation0] sm:$0x1] %vm57_vm9, %v56_v18  }
  0x8c   :  { %v62_v27 = vpop.permute.xlu0 %61   ;;  %v68_v28 = vpop.permute.xlu1 %67  }
  0x8d   :  { %64 = vst.msk [vmem:[#allocation0] sm:$0x1] %vm63_vm10, %v62_v27  }
  0x8e   :  { %70 = vst.msk [vmem:[#allocation0] sm:$0x1] %vm69_vm11, %v68_v28  }
  0x8f   :  { %76 = vst.msk [vmem:[#allocation0] sm:$0x1] %vm75_vm12, %v74_v21  }
  0x94   :  { %v80_v29 = vpop.permute.xlu0 %79   ;;  %v86_v30 = vpop.permute.xlu1 %85  }
  0x95   :  { %82 = vst.msk [vmem:[#allocation0] sm:$0x1] %vm81_vm13, %v80_v29  }
  0x96   :  { %88 = vst.msk [vmem:[#allocation0] sm:$0x1] %vm87_vm14, %v86_v30  }
  0x97   :  { %94 = vst.msk [vmem:[#allocation0] sm:$0x1] %vm93_vm15, %v92_v24  }
  0x9e   :  { %v97_v31 = vld [vmem:[#allocation0] sm:$0x1] }
  0x9f   :  { %100 = vst [vmem:[%s208_s1] sm:$0x1] %v97_v31 }

// kernel: residual_forward.5
= control target key start
LH: loop header
LB: loop body
LE: loop exit
PB: predicated region body
PF: predicated region fallthrough
CT: control target
= control target key end

     0   :  { %vm53_vm0 = vcmask 523264   ;;  %s134_s0 = inlined_call_operand.vmem [shape: bf16[32,64], index: 0, kind: input, shape index: {}]   ;;  %s135_s1 = inlined_call_operand.vmem [shape: f32[1,64], index: 1, kind: input, shape index: {}]   ;;  %s136_s2 = inlined_call_operand.vmem [shape: f32[1,64], index: 2, kind: input, shape index: {}]   ;;  %s137_s3 = inlined_call_operand.vmem [shape: f32[32,64], index: 3, kind: input, shape index: {}]   ;;  %s138_s4 = inlined_call_operand.vmem [shape: f32[32,64], index: 4, kind: output, shape index: {}]  }
   0x1   :  { %v63_v0 = vld [vmem:[%s134_s0] sm:$0xff]   ;;  %v70_v5 = vld [vmem:[%s134_s0 + $0x8] sm:$0xff]   ;;  %v43_v16 = vld [vmem:[%s137_s3 + $0x10] sm:$0xff] }
   0x2   :  { %v71_v1 = vld [vmem:[%s135_s1] ss:$0 sm:$0xff]  ;;  %v64_v2 = vunpack.c.l.bf16 %v63_v0  ;;  %v65_v4 = vunpack.c.h.bf16 %v63_v0  ;;  %v68_v8 = vunpack.c.l.bf16 %v70_v5  ;;  %v69_v9 = vunpack.c.h.bf16 %v70_v5  ;;  %v42_v11 = vld [vmem:[%s137_s3 + $0x8] sm:$0xff]  ;;  %v44_v17 = vld [vmem:[%s137_s3 + $0x18] sm:$0xff] }
   0x3   :  { %v72_v3 = vld [vmem:[%s136_s2] ss:$0 sm:$0xff] }
   0x4   :  { %v29_v6 = vmul.f32 %v71_v1, %v64_v2  ;;  %v30_v7 = vmul.f32 %v71_v1, %v65_v4  ;;  %v41_v10 = vld [vmem:[%s137_s3] sm:$0xff]  ;;  %v31_v14 = vmul.f32 %v71_v1, %v68_v8  ;;  %v32_v15 = vmul.f32 %v71_v1, %v69_v9 }
   0x6   :  { %v37_v12 = vadd.f32 %v72_v3, %v29_v6  ;;  %v38_v13 = vadd.f32 %v72_v3, %v30_v7  ;;  %v39_v20 = vadd.f32 %v72_v3, %v31_v14  ;;  %v40_v21 = vadd.f32 %v72_v3, %v32_v15 }
   0x8   :  { %v45_v18 = vadd.f32 %v41_v10, %v37_v12  ;;  %v46_v19 = vadd.f32 %v42_v11, %v38_v13  ;;  %v47_v24 = vadd.f32 %v43_v16, %v39_v20  ;;  %v48_v25 = vadd.f32 %v44_v17, %v40_v21 }
   0xa   :  { %v49_v22 = vmax.f32 %v45_v18, 0.0  ;;  %v50_v23 = vmax.f32 %v46_v19, 0.0  ;;  %v51_v26 = vmax.f32 %v47_v24, 0.0  ;;  %v52_v27 = vmax.f32 %v48_v25, 0.0 }
   0xc   :  { %54 = vst.msk [vmem:[%s138_s4] sm:$0xff] %vm53_vm0, %v49_v22 }
   0xd   :  { %55 = vst.msk [vmem:[%s138_s4 + $0x8] sm:$0xff] %vm53_vm0, %v50_v23 }
   0xe   :  { %56 = vst.msk [vmem:[%s138_s4 + $0x10] sm:$0xff] %vm53_vm0, %v51_v26 }
   0xf   :  { %57 = vst.msk [vmem:[%s138_s4 + $0x18] sm:$0xff] %vm53_vm0, %v52_v27 }

// kernel: residual_forward.3
= control target key start
LH: loop header
LB: loop body
LE: loop exit
PB: predicated region body
PF: predicated region fallthrough
CT: control target
= control target key end

     0   :  { %s3483_s12 = smov 0   ;;  %s3485_s13 = smov 0   ;;  %s4721_s0 = inlined_call_operand.vmem [shape: bf16[2,18,18,4], index: 0, kind: input, shape index: {}]   ;;  %s4722_s1 = inlined_call_operand.vmem [shape: bf16[3,12,4], index: 1, kind: input, shape index: {}]   ;;  %s4723_s2 = inlined_call_operand.vmem [shape: bf16[2,256,4], index: 2, kind: output, shape index: {0}]   ;;  %s4724_s3 = inlined_call_operand.vmem [shape: f32[2,2,4], index: 3, kind: output, shape index: {1}]  }
   0x1   :  { %s3487_s14 = smov 0  }
   0x2 LB: > { %s33_s15 = sadd.s32 1, %s3455_s13  ;;  %p2933_p0 = scmp.ge.s32.totalorder %s3459_s14, 1  ;;  %s3459_s14 = sphi %s3487_s14, %s14_s14   ;;  %s3455_s13 = sphi %s3485_s13, %s4726_s13   ;;  %s3451_s12 = sphi %s3483_s12, %s4725_s12  }
   0x3   : > { %p35_p1 = scmp.ge.s32.totalorder %s33_s15, 2  ;;  %p174_p2 = scmp.lt.s32.totalorder %s3459_s14, 3 }
   0x5   : > { %s4728_s15 = smov (%p35_p1, %s33_s15), 0  ;;  %p175_p3 = pnand %p2933_p0, %p174_p2 }
   0x6   : > { %p216_p4 = scmp.lt.s32.totalorder (!%p175_p3), %s3451_s12, 1  ;;  %s3461_s20 = smov (!%p175_p3), 8  }
   0x7   : > { %178 = sbr.rel (%p175_p3) target bundleno = 560 (0x230), region = 28  ;;  %s3462_s21 = smov (!%p175_p3), 4  }
   0xc   : > { %s4730_s12 = smov (!%p216_p4, %s3451_s12), 1  ;;  %vm715_vm0 = vcmask 1046528   ;;  %vm442_vm1 = vsmask.f32 7424  ;;  %vm1517_vm2 = vcmask 1045504   ;;  %vm796_vm3 = vcmask 31744  }
   0xd   : > { %s3330_s16 = smul.u32 216, %s4730_s12  ;;  %vm829_vm4 = vcmask 64512   ;;  %vm1484_vm5 = vcmask 97280   ;;  %s3132_s7 = sshll.u32 %s4730_s12, 7  ;;  %vm2547_vm6 = vcmask 27648   ;;  %vm2754_vm7 = vcmask 24576  }
   0xe   : > { %s4391_s10 = scalar_lea.vmem %s4723_s2, %s3132_s7  ;;  %s2937_s11 = sshll.u32 %s4730_s12, 1 }
   0xf   : > { %s3507_s19 = scalar_lea.vmem %s4721_s0, %s3330_s16  ;;  %s244_s18 = scalar_lea.vmem %s4724_s3, %s2937_s11 }
  0x10   : > { %v3303_v0 = vld [vmem:[%s3507_s19 + $0x18] sm:$0xf0]  ;;  %v3076_v1 = vld [vmem:[%s3507_s19 + $0x20] sm:$0x1]  ;;  %v3304_v2 = vld [vmem:[%s3507_s19 + $0x18] sm:$0xe] }
  0x11   : > { %v1903_v3 = vunpack.c.l.b16 %v3076_v1  ;;  %v3305_v4 = vor.u32 %v3304_v2, %v3303_v0  ;;  %v3513_v5 = vld [vmem:[%s3507_s19] sm:$0xff]   ;;  %v282_v6 = vld [vmem:[%s3507_s19 + $0x8] sm:$0x1]  ;;  %v3295_v7 = vld [vmem:[%s3507_s19 + $0x18] sm:$0xff]  }
  0x12   : > { %v410_v8 = vunpack.c.l.b16 %v282_v6  ;;  %v444_v9 = vshrl.u32 %v3513_v5, 16  ;;  %v446_v10 = vshll.u32 %v3513_v5, 16  ;;  %v1936_v11 = vshrl.u32 %v3295_v7, 16  ;;  %v3520_v12 = vld [vmem:[%s3507_s19 + $0xc] sm:$0xff]   ;;  %v2970_v14 = vld [vmem:[%s3507_s19 + $0x14] sm:$0x1] }
  0x13   : > { %v3523_v13 = vld [vmem:[%s3507_s19 + $0xc] sm:$0xf0]  ;;  %v1919_v15 = vpack.c.b16 %v1903_v3, %v1903_v3  ;;  %v2207_v16 = vrot.slane %v3305_v4, 1  ;;  %v1938_v17 = vshll.u32 %v3295_v7, 16  ;;  %v3527_v18 = vld [vmem:[%s3507_s19 + $0x9c] sm:$0xff]   ;;  %v1028_v22 = vunpack.c.l.b16 %v2970_v14  ;;  %v3536_v30 = vld [vmem:[%s3507_s19 + $0x24] sm:$0xff]  }
  0x14   : > { %v3530_v19 = vld [vmem:[%s3507_s19 + $0x9c] sm:$0xf0]  ;;  %v426_v20 = vpack.c.b16 %v410_v8, %v410_v8  ;;  %v448_v21 = vrot.slane %v446_v10, 1  ;;  %v2982_v29 = vld [vmem:[%s3507_s19 + $0xa4] sm:$0x1]  ;;  %v1061_v36 = vshrl.u32 %v3520_v12, 16 }
  0x15   : > { %v2208_v23 = vrot.slane %v1919_v15, 1  ;;  %v1940_v24 = vrot.slane %v1938_v17, 1  ;;  %v1943_v25 = vshll.u32 %v1919_v15, 16  ;;  %v3532_v28 = vpack.c.b16 %v1028_v22, %v1028_v22  ;;  %v3365_v31 = vld [vmem:[%s3507_s19 + $0x24] sm:$0xf0]  ;;  %v3560_v57 = vld [vmem:[%s3507_s19 + $0xc] sm:$0xff]  }
  0x16   : > { %v449_v26 = vor.u32 %v448_v21, %v444_v9  ;;  %v451_v27 = vshll.u32 %v426_v20, 16  ;;  %v1063_v37 = vshll.u32 %v3520_v12, 16  ;;  %v3077_v39 = vld [vmem:[%s3507_s19 + $0x2c] sm:$0x1]  ;;  %v1040_v40 = vunpack.c.l.b16 %v2982_v29  ;;  %v3239_v41 = vld [vmem:[%s3507_s19] sm:$0xf0] }
  0x17   : > { %v2209_v32 = vsel %vm715_vm0, %v2207_v16, %v2208_v23  ;;  %v3540_v33 = vor.u32 %v1940_v24, %v1936_v11  ;;  %v1945_v34 = vrot.slane %v1943_v25, 1  ;;  %v1068_v38 = vshll.u32 %v3532_v28, 16  ;;  %v3240_v42 = vld [vmem:[%s3507_s19] sm:$0xe]  ;;  %v3366_v49 = vld [vmem:[%s3507_s19 + $0x24] sm:$0xe] }
  0x18   : > { %2255 = vrot.lane.b32.xlu0 %v2209_v32, %s3461_s20  ;;  %v453_v35 = vrot.slane %v451_v27, 1  ;;  %v1065_v44 = vrot.slane %v1063_v37, 1  ;;  %v3553_v46 = vpack.c.b16 %v1040_v40, %v1040_v40  ;;  %v1207_v47 = vshll.u32 %v3527_v18, 16  ;;  %v3374_v58 = vld [vmem:[%s3507_s19 + $0xc] sm:$0xf0] }
  0x19   : > { %v1946_v45 = vsel %vm442_vm1, %v3540_v33, %v1945_v34  ;;  %v1904_v48 = vunpack.c.l.b16 %v3077_v39  ;;  %v1070_v51 = vrot.slane %v1068_v38, 1  ;;  %v3241_v52 = vor.u32 %v3240_v42, %v3239_v41  ;;  %v283_v61 = vld [vmem:[%s3507_s19 + $0x14] sm:$0x1]  ;;  %v3369_v3 = vld [vmem:[%s3507_s19 + $0xc] sm:$0xe] }
  0x1a   : > { %v454_v43 = vsel %vm442_vm1, %v449_v26, %v453_v35  ;;  %v1066_v50 = vor.u32 %v1065_v44, %v1061_v36  ;;  %v1205_v53 = vshrl.u32 %v3527_v18, 16  ;;  %v1209_v54 = vrot.slane %v1207_v47, 1  ;;  %v3375_v17 = vld [vmem:[%s3507_s19 + $0xc] sm:$0xe]  ;;  %v2971_v22 = vld [vmem:[%s3507_s19 + $0x20] sm:$0x1] }
  0x1b   : > { %635 = vrot.lane.b32.xlu1 %v454_v43, %s3462_s21  ;;  %v1212_v55 = vshll.u32 %v3553_v46, 16  ;;  %v1920_v56 = vpack.c.b16 %v1904_v48, %v1904_v48  ;;  %v1950_v59 = vshll.u32 %v3536_v30, 16  ;;  %v717_v60 = vrot.slane %v426_v20, 1  ;;  %v3372_v23 = vld [vmem:[%s3507_s19 + $0x9c] sm:$0xe]  ;;  %v3296_v47 = vld [vmem:[%s3507_s19 + $0x30] sm:$0xff]  }
  0x1c   : > { %v1948_v62 = vshrl.u32 %v3536_v30, 16  ;;  %v1071_v0 = vsel %vm442_vm1, %v1066_v50, %v1070_v51  ;;  %v716_v2 = vrot.slane %v3241_v52, 1  ;;  %v1210_v4 = vor.u32 %v1209_v54, %v1205_v53  ;;  %v3271_v39 = vld [vmem:[%s3507_s19 + $0x18] sm:$0xf0]  ;;  %v3272_v40 = vld [vmem:[%s3507_s19 + $0x18] sm:$0xe] }
  0x1d   : > { %v1955_v63 = vshll.u32 %v1920_v56, 16  ;;  %v1952_v1 = vrot.slane %v1950_v59, 1  ;;  %v1214_v6 = vrot.slane %v1212_v55, 1  ;;  %v411_v7 = vunpack.c.l.b16 %v283_v61  ;;  %v3599_v55 = vld [vmem:[%s3507_s19 + $0x24] sm:$0xff]   ;;  %v3289_v59 = vld [vmem:[%s3507_s19 + $0xa8] sm:$0xf0] }
  0x1e   : > { %v3367_v8 = vor.u32 %v3366_v49, %v3365_v31  ;;  %v718_v9 = vsel %vm715_vm0, %v716_v2, %v717_v60  ;;  %v458_v16 = vshll.u32 %v3560_v57, 16  ;;  %v3370_v20 = vor.u32 %v3369_v3, %v3523_v13  ;;  %v284_v61 = vld [vmem:[%s3507_s19 + $0x20] sm:$0x1]  ;;  %v2972_v3 = vld [vmem:[%s3507_s19 + $0x2c] sm:$0x1] }
  0x1f   : > { %v1953_v10 = vor.u32 %v1952_v1, %v1948_v62  ;;  %v1957_v11 = vrot.slane %v1955_v63, 1  ;;  %764 = vrot.lane.b32.xlu2 %v718_v9, %s3461_s20  ;;  %v427_v14 = vpack.c.b16 %v411_v7, %v411_v7  ;;  %v1215_v15 = vsel %vm442_vm1, %v1210_v4, %v1214_v6 }
  0x20   : > { %2127 = vrot.lane.b32.xlu0 %v1946_v45, %s3462_s21  ;;  %v1333_v21 = vrot.slane %v3532_v28, 1  ;;  %v2210_v25 = vrot.slane %v3367_v8, 1  ;;  %v2211_v26 = vrot.slane %v1920_v56, 1  ;;  %v456_v27 = vshrl.u32 %v3560_v57, 16  ;;  %v3078_v28 = vld [vmem:[%s3507_s19 + $0x38] sm:$0x1] }
  0x21   : > { %v1958_v24 = vsel %vm442_vm1, %v1953_v10, %v1957_v11  ;;  %v460_v29 = vrot.slane %v458_v16, 1  ;;  %v463_v31 = vshll.u32 %v427_v14, 16  ;;  %v1332_v32 = vrot.slane %v3370_v20, 1  ;;  %v3602_v56 = vld [vmem:[%s3507_s19 + $0x24] sm:$0xf0] }
  0x22   : > { %v1029_v34 = vunpack.c.l.b16 %v2971_v22  ;;  %v3373_v35 = vor.u32 %v3372_v23, %v3530_v19  ;;  %v2212_v36 = vsel %vm715_vm0, %v2210_v25, %v2211_v26  ;;  %v1369_v41 = vrot.slane %v3553_v46, 1  ;;  %v2983_v19 = vld [vmem:[%s3507_s19 + $0xb0] sm:$0x1]  ;;  %v3618_v22 = vld [vmem:[%s3507_s19 + $0xb4] sm:$0xff]  }
  0x23   : > { %1252 = vrot.lane.b32.xlu1 %v1071_v0, %s3462_s21  ;;  %v1334_v13 = vsel %vm715_vm0, %v1332_v32, %v1333_v21  ;;  %v461_v37 = vor.u32 %v460_v29, %v456_v27  ;;  %v465_v38 = vrot.slane %v463_v31, 1  ;;  %v3376_v42 = vor.u32 %v3375_v17, %v3374_v58  ;;  %v3269_v58 = vld [vmem:[%s3507_s19 + $0xa8] sm:$0xff]   ;;  %v3621_v23 = vld [vmem:[%s3507_s19 + $0xb4] sm:$0xf0] }
  0x24   : > { %v1045_v43 = vpack.c.b16 %v1029_v34, %v1029_v34  ;;  %v1905_v44 = vunpack.c.l.b16 %v3078_v28  ;;  %v1368_v45 = vrot.slane %v3373_v35, 1  ;;  %v3273_v48 = vor.u32 %v3272_v40, %v3271_v39  ;;  %v3290_v0 = vld [vmem:[%s3507_s19 + $0xa8] sm:$0xe]  ;;  %v2984_v28 = vld [vmem:[%s3507_s19 + $0xbc] sm:$0x1] }
  0x25   : > { %v466_v50 = vsel %vm442_vm1, %v461_v37, %v465_v38  ;;  %v719_v51 = vrot.slane %v3376_v42, 1  ;;  %v720_v52 = vrot.slane %v427_v14, 1  ;;  %v1962_v54 = vshll.u32 %v3296_v47, 16  ;;  %v3306_v37 = vld [vmem:[%s3507_s19 + $0x30] sm:$0xf0] }
  0x26   : > { %v1080_v49 = vshll.u32 %v1045_v43, 16  ;;  %v1370_v46 = vsel %vm715_vm0, %v1368_v45, %v1369_v41  ;;  %v3596_v53 = vpack.c.b16 %v1905_v44, %v1905_v44  ;;  %v1041_v60 = vunpack.c.l.b16 %v2983_v19  ;;  %v3307_v38 = vld [vmem:[%s3507_s19 + $0x30] sm:$0xe]  ;;  %v3378_v39 = vld [vmem:[%s3507_s19 + $0x24] sm:$0xe] }
  0x27   : > { %1380 = vrot.lane.b32.xlu2 %v1334_v13, %s3461_s20  ;;  %v1335_v62 = vrot.slane %v3273_v48, 1  ;;  %v1336_v63 = vrot.slane %v1045_v43, 1  ;;  %v1960_v2 = vshrl.u32 %v3296_v47, 16  ;;  %v1219_v4 = vshll.u32 %v3269_v58, 16 }
  0x28   : > { %1276 = vrot.lane.b32.xlu0 %v1215_v15, %s3462_s21  ;;  %v1082_v1 = vrot.slane %v1080_v49, 1  ;;  %v721_v6 = vsel %vm715_vm0, %v719_v51, %v720_v52  ;;  %v1964_v7 = vrot.slane %v1962_v54, 1  ;;  %v1967_v8 = vshll.u32 %v3596_v53, 16  ;;  %v3383_v51 = vld [vmem:[%s3507_s19 + $0x3c] sm:$0xf0] }
  0x29   : > { %v412_v9 = vunpack.c.l.b16 %v284_v61  ;;  %v1057_v10 = vpack.c.b16 %v1041_v60, %v1041_v60  ;;  %v3291_v11 = vor.u32 %v3290_v0, %v3289_v59  ;;  %v1337_v14 = vsel %vm715_vm0, %v1335_v62, %v1336_v63  ;;  %v3242_v59 = vld [vmem:[%s3507_s19 + $0x18] sm:$0xf0]  ;;  %v3243_v60 = vld [vmem:[%s3507_s19 + $0x18] sm:$0xe]  ;;  %v3381_v63 = vld [vmem:[%s3507_s19 + $0xb4] sm:$0xe] }
  0x2a   : > { %v1083_v15 = vsel %vm442_vm1, %v3540_v33, %v1082_v1  ;;  %v1030_v16 = vunpack.c.l.b16 %v2972_v3  ;;  %v1217_v17 = vshrl.u32 %v3269_v58, 16  ;;  %v1221_v20 = vrot.slane %v1219_v4, 1  ;;  %v3079_v0 = vld [vmem:[%s3507_s19 + $0x44] sm:$0x1]  ;;  %v3384_v4 = vld [vmem:[%s3507_s19 + $0x3c] sm:$0xe] }
  0x2b   : > { %2129 = vrot.lane.b32.xlu1 %v1958_v24, %s3462_s21  ;;  %v1224_v21 = vshll.u32 %v1057_v10, 16  ;;  %v3623_v24 = vor.u32 %v1964_v7, %v1960_v2  ;;  %v1969_v25 = vrot.slane %v1967_v8, 1  ;;  %v3625_v26 = vpack.c.b16 %v412_v9, %v412_v9 }
  0x2c   : > { %v1371_v27 = vrot.slane %v3291_v11, 1  ;;  %v1372_v29 = vrot.slane %v1057_v10, 1  ;;  %v1046_v31 = vpack.c.b16 %v1030_v16, %v1030_v16  ;;  %v1087_v32 = vshll.u32 %v3599_v55, 16  ;;  %v3669_v16 = vld [vmem:[%s3507_s19 + $0x24] sm:$0xff]  }
  0x2d   : > { %v3630_v34 = vor.u32 %v1221_v20, %v1217_v17  ;;  %v1226_v13 = vrot.slane %v1224_v21, 1  ;;  %v1970_v35 = vsel %vm442_vm1, %v3623_v24, %v1969_v25  ;;  %v1042_v42 = vunpack.c.l.b16 %v2984_v28  ;;  %v3386_v17 = vld [vmem:[%s3507_s19 + $0x24] sm:$0xf0]  ;;  %v285_v28 = vld [vmem:[%s3507_s19 + $0x2c] sm:$0x1] }
  0x2e   : > { %v1373_v40 = vsel %vm715_vm0, %v1371_v27, %v1372_v29  ;;  %v1092_v41 = vshll.u32 %v1046_v31, 16  ;;  %v1085_v43 = vshrl.u32 %v3599_v55, 16  ;;  %v1089_v44 = vrot.slane %v1087_v32, 1 }
  0x2f   : > { %1404 = vrot.lane.b32.xlu2 %v1370_v46, %s3461_s20  ;;  %v1227_v45 = vsel %vm442_vm1, %v3630_v34, %v1226_v13  ;;  %v3308_v47 = vor.u32 %v3307_v38, %v3306_v37  ;;  %v1058_v49 = vpack.c.b16 %v1042_v42, %v1042_v42  ;;  %v3648_v46 = vld [vmem:[%s3507_s19 + $0x3c] sm:$0xff]   ;;  %v2214_v58 = vrot.slane %v3596_v53, 1 }
  0x30   : > { %2257 = vrot.lane.b32.xlu0 %v2212_v36, %s3461_s20  ;;  %v475_v36 = vshll.u32 %v3625_v26, 16  ;;  %v1094_v19 = vrot.slane %v1092_v41, 1  ;;  %v1090_v52 = vor.u32 %v1089_v44, %v1085_v43  ;;  %v3379_v62 = vor.u32 %v3378_v39, %v3602_v56  ;;  %v2973_v56 = vld [vmem:[%s3507_s19 + $0x38] sm:$0x1]  ;;  %v2985_v41 = vld [vmem:[%s3507_s19 + $0xc8] sm:$0x1] }
  0x31   : > { %v2213_v54 = vrot.slane %v3308_v47, 1  ;;  %v1229_v1 = vshrl.u32 %v3618_v22, 16  ;;  %v1236_v3 = vshll.u32 %v1058_v49, 16  ;;  %v1906_v9 = vunpack.c.l.b16 %v3079_v0  ;;  %v3080_v47 = vld [vmem:[%s3507_s19 + $0x50] sm:$0x1] }
  0x32   : > { %v477_v48 = vrot.slane %v475_v36, 1  ;;  %v1095_v53 = vsel %vm442_vm1, %v1090_v52, %v1094_v19  ;;  %v1338_v8 = vrot.slane %v3379_v62, 1  ;;  %v1974_v20 = vshll.u32 %v3648_v46, 16  ;;  %v3270_v52 = vld [vmem:[%s3507_s19 + $0xc0] sm:$0xff]  }
  0x33   : > { %637 = vrot.lane.b32.xlu1 %v466_v50, %s3462_s21  ;;  %v1231_v50 = vshll.u32 %v3618_v22, 16  ;;  %v2215_v7 = vsel %vm715_vm0, %v2213_v54, %v2214_v58  ;;  %v1238_v11 = vrot.slane %v1236_v3, 1  ;;  %v3382_v25 = vor.u32 %v3381_v63, %v3621_v23  ;;  %v3297_v3 = vld [vmem:[%s3507_s19 + $0x48] sm:$0xff]  }
  0x34   : > { %v478_v61 = vsel %vm442_vm1, %v3540_v33, %v477_v48  ;;  %v1339_v33 = vrot.slane %v1046_v31, 1  ;;  %v1031_v27 = vunpack.c.l.b16 %v2973_v56  ;;  %v1922_v29 = vpack.c.b16 %v1906_v9, %v1906_v9 }
  0x35   : > { %v1233_v2 = vrot.slane %v1231_v50, 1  ;;  %v3385_v32 = vor.u32 %v3384_v4, %v3383_v51  ;;  %v1976_v36 = vrot.slane %v1974_v20, 1  ;;  %v1374_v38 = vrot.slane %v3382_v25, 1 }
  0x36   : > { %v1340_v21 = vsel %vm715_vm0, %v1338_v8, %v1339_v33  ;;  %v1979_v37 = vshll.u32 %v1922_v29, 16  ;;  %v1375_v39 = vrot.slane %v1058_v49, 1  ;;  %v3681_v23 = vpack.c.b16 %v1031_v27, %v1031_v27 }
  0x37   : > { %1254 = vrot.lane.b32.xlu2 %v1083_v15, %s3462_s21  ;;  %v1234_v10 = vor.u32 %v1233_v2, %v1229_v1  ;;  %v723_v15 = vrot.slane %v3625_v26, 1  ;;  %v3387_v26 = vld [vmem:[%s3507_s19 + $0x24] sm:$0xe]  ;;  %v2216_v42 = vrot.slane %v3385_v32, 1  ;;  %v2217_v43 = vrot.slane %v1922_v29, 1 }
  0x38   : > { %766 = vrot.lane.b32.xlu0 %v721_v6, %s3461_s20  ;;  %v3244_v6 = vor.u32 %v3243_v60, %v3242_v59  ;;  %v482_v48 = vshll.u32 %v3669_v16, 16  ;;  %v1376_v19 = vsel %vm715_vm0, %v1374_v38, %v1375_v39  ;;  %v1104_v49 = vshll.u32 %v3681_v23, 16  ;;  %v3719_v38 = vld [vmem:[%s3507_s19 + $0x3c] sm:$0xff]  }
  0x39   : > { %v1239_v31 = vsel %vm442_vm1, %v1234_v10, %v1238_v11  ;;  %v1043_v50 = vunpack.c.l.b16 %v2985_v41  ;;  %v2218_v54 = vsel %vm715_vm0, %v2216_v42, %v2217_v43  ;;  %v3388_v58 = vor.u32 %v3387_v26, %v3386_v17  ;;  %v3275_v17 = vld [vmem:[%s3507_s19 + $0x30] sm:$0xe]  ;;  %v3309_v26 = vld [vmem:[%s3507_s19 + $0x48] sm:$0xf0]  ;;  %v3389_v39 = vld [vmem:[%s3507_s19 + $0x3c] sm:$0xf0] }
  0x3a   : > { %v1907_v59 = vunpack.c.l.b16 %v3080_v47  ;;  %v484_v62 = vrot.slane %v482_v48, 1  ;;  %v1106_v0 = vrot.slane %v1104_v49, 1  ;;  %v1243_v2 = vshll.u32 %v3270_v52, 16  ;;  %v3292_v43 = vld [vmem:[%s3507_s19 + $0xc0] sm:$0xf0]  ;;  %v3731_v49 = vld [vmem:[%s3507_s19 + $0x54] sm:$0xff]  }
  0x3b   : > { %1382 = vrot.lane.b32.xlu1 %v1337_v14, %s3461_s20  ;;  %v722_v14 = vrot.slane %v3244_v6, 1  ;;  %v3695_v1 = vpack.c.b16 %v1043_v50, %v1043_v50  ;;  %v725_v4 = vrot.slane %v3388_v58, 1  ;;  %v1241_v8 = vshrl.u32 %v3270_v52, 16  ;;  %v3734_v50 = vld [vmem:[%s3507_s19 + $0x54] sm:$0xf0] }
  0x3c   : > { %v1986_v33 = vshll.u32 %v3297_v3, 16  ;;  %v1107_v10 = vsel %vm442_vm1, %v3623_v24, %v1106_v0  ;;  %v1245_v11 = vrot.slane %v1243_v2, 1  ;;  %v1984_v27 = vshrl.u32 %v3297_v3, 16  ;;  %v2974_v52 = vld [vmem:[%s3507_s19 + $0x44] sm:$0x1] }
  0x3d   : > { %v724_v13 = vsel %vm715_vm0, %v722_v14, %v723_v15  ;;  %v1248_v14 = vshll.u32 %v3695_v1, 16  ;;  %v3274_v15 = vld [vmem:[%s3507_s19 + $0x30] sm:$0xf0]  ;;  %v1342_v42 = vrot.slane %v3681_v23, 1  ;;  %v1032_v2 = vunpack.c.l.b16 %v2974_v52  ;;  %v3081_v3 = vld [vmem:[%s3507_s19 + $0x5c] sm:$0x1] }
  0x3e   : > { %v1988_v29 = vrot.slane %v1986_v33, 1  ;;  %v3276_v32 = vor.u32 %v3275_v17, %v3274_v15  ;;  %v3759_v17 = vld [vmem:[%s3507_s19 + $0x3c] sm:$0xff]  }
  0x3f   : > { %1278 = vrot.lane.b32.xlu2 %v1227_v45, %s3462_s21  ;;  %v1981_v45 = vrot.slane %v1979_v37, 1 }
  0x40   : > { %2131 = vrot.lane.b32.xlu0 %v1970_v35, %s3462_s21  ;;  %v1972_v35 = vshrl.u32 %v3648_v46, 16  ;;  %v1341_v41 = vrot.slane %v3276_v32, 1 }
  0x42   : > { %v1977_v44 = vor.u32 %v1976_v36, %v1972_v35  ;;  %v3310_v35 = vld [vmem:[%s3507_s19 + $0x48] sm:$0xe] }
  0x43   : > { %1406 = vrot.lane.b32.xlu1 %v1373_v40, %s3461_s20  ;;  %v413_v40 = vunpack.c.l.b16 %v285_v28  ;;  %v1250_v28 = vrot.slane %v1248_v14, 1  ;;  %v3311_v47 = vor.u32 %v3310_v35, %v3309_v26  ;;  %v1048_v14 = vpack.c.b16 %v1032_v2, %v1032_v2  ;;  %v3237_v35 = vld [vmem:[%s3507_s19 + $0x90] sm:$0xff]  }
  0x44   : > { %v1982_v60 = vsel %vm442_vm1, %v1977_v44, %v1981_v45  ;;  %v3293_v44 = vld [vmem:[%s3507_s19 + $0xc0] sm:$0xe]  ;;  %v1998_v26 = vshll.u32 %v3731_v49, 16 }
  0x45   : > { %v429_v51 = vpack.c.b16 %v413_v40, %v413_v40  ;;  %v3722_v40 = vor.u32 %v1988_v29, %v1984_v27  ;;  %v3294_v58 = vor.u32 %v3293_v44, %v3292_v43  ;;  %v3112_v27 = vld [vmem:[%s4722_s1 + $0x10] sm:$0xf]  ;;  %v3135_v29 = vld [vmem:[%s4722_s1 + $0x10] sm:$0x30] }
  0x47   : > { %2259 = vrot.lane.b32.xlu2 %v2215_v7, %s3461_s20  ;;  %v487_v63 = vshll.u32 %v429_v51, 16  ;;  %v726_v6 = vrot.slane %v429_v51, 1  ;;  %v286_v7 = vld [vmem:[%s3507_s19 + $0x38] sm:$0x1]  ;;  %v3246_v51 = vld [vmem:[%s3507_s19 + $0x30] sm:$0xe] }
  0x48   : > { %639 = vrot.lane.b32.xlu0 %v478_v61, %s3462_s21  ;;  %v480_v61 = vshrl.u32 %v3669_v16, 16  ;;  %v414_v20 = vunpack.c.l.b16 %v286_v7  ;;  %v1378_v7 = vrot.slane %v3695_v1, 1 }
  0x49   : > { %v489_v56 = vrot.slane %v487_v63, 1  ;;  %v3133_v63 = vld [vmem:[%s4722_s1] sm:$0x30] }
  0x4a   : > { %v485_v9 = vor.u32 %v484_v62, %v480_v61  ;;  %v3714_v36 = vpack.c.b16 %v414_v20, %v414_v20  ;;  %v3026_v62 = vld [vmem:[%s4722_s1] sm:$0xf] }
  0x4b   : > { %1256 = vrot.lane.b32.xlu1 %v1095_v53, %s3462_s21  ;;  %v3700_v53 = vpack.c.b16 %v1907_v59, %v1907_v59  ;;  %v1343_v59 = vsel %vm715_vm0, %v1341_v41, %v1342_v42  ;;  %v3762_v20 = vld [vmem:[%s3507_s19 + $0x3c] sm:$0xf0]  ;;  %v287_v42 = vld [vmem:[%s3507_s19 + $0x44] sm:$0x1] }
  0x4c   : > { %v499_v48 = vshll.u32 %v3714_v36, 16 }
  0x4d   : > { %v1991_v25 = vshll.u32 %v3700_v53, 16  ;;  %v2220_v61 = vrot.slane %v3700_v53, 1  ;;  %v1377_v53 = vrot.slane %v3294_v58, 1  ;;  %v2975_v58 = vld [vmem:[%s3507_s19 + $0x50] sm:$0x1] }
  0x4f   : > { %768 = vrot.lane.b32.xlu2 %v724_v13, %s3461_s20  ;;  %v1246_v13 = vor.u32 %v1245_v11, %v1241_v8  ;;  %v1993_v37 = vrot.slane %v1991_v25, 1  ;;  %v1111_v8 = vshll.u32 %v3719_v38, 16  ;;  %v729_v11 = vrot.slane %v3714_v36, 1  ;;  %v294_v25 = vld [vmem:[%s3507_s19 + $0x98] sm:$0x1] }
  0x50   : > { %1384 = vrot.lane.b32.xlu0 %v1340_v21, %s3461_s20  ;;  %v727_v21 = vsel %vm715_vm0, %v725_v4, %v726_v6  ;;  %v3027_v4 = vor.u32 %v3133_v63, %v3026_v62  ;;  %v501_v6 = vrot.slane %v499_v48, 1  ;;  %v3006_v36 = vld [vmem:[%s4722_s1 + $0x8] sm:$0xf]  ;;  %v422_v41 = vunpack.c.l.b16 %v294_v25 }
  0x51   : > { %v1251_v45 = vsel %vm442_vm1, %v1246_v13, %v1250_v28  ;;  %v1994_v23 = vsel %vm442_vm1, %v3722_v40, %v1993_v37  ;;  %v1113_v32 = vrot.slane %v1111_v8, 1  ;;  %v1116_v13 = vshll.u32 %v1048_v14, 16  ;;  %v3134_v37 = vld [vmem:[%s4722_s1 + $0x8] sm:$0x30]  ;;  %v3804_v8 = vld [vmem:[%s3507_s19 + $0x9c] sm:$0xff]  }
  0x52   : > { %v1648_v33 = vsel %vm1517_vm2, %v3027_v4, 0  ;;  %v502_v1 = vsel %vm442_vm1, %v3623_v24, %v501_v6  ;;  %v3113_v28 = vor.u32 %v3135_v29, %v3112_v27  ;;  %v3007_v44 = vor.u32 %v3134_v37, %v3006_v36  ;;  %v295_v29 = vld [vmem:[%s3507_s19 + $0xa4] sm:$0x1] }
  0x53   : > { %1280 = vrot.lane.b32.xlu1 %v1239_v31, %s3462_s21  ;;  %v490_v31 = vsel %vm442_vm1, %v485_v9, %v489_v56  ;;  %v1908_v56 = vunpack.c.l.b16 %v3081_v3  ;;  %1657 = vmatpush.bf16.msra.mxu1 %v1648_v33  ;;  %v1996_v48 = vshrl.u32 %v3731_v49, 16  ;;  %v415_v62 = vunpack.c.l.b16 %v287_v42 }
  0x54   : > { %v3788_v43 = vsel %vm1517_vm2, %v3113_v28, 0  ;;  %v438_v63 = vpack.c.b16 %v422_v41, %v422_v41  ;;  %v1033_v3 = vunpack.c.l.b16 %v2975_v58  ;;  %v588_v6 = vshrl.u32 %v3237_v35, 16 }
  0x55   : > { %v3776_v24 = vpack.c.b16 %v1908_v56, %v1908_v56  ;;  %2401 = vmatpush.bf16.msra.mxu2 %v3788_v43 }
  0x57   : > { %2133 = vrot.lane.b32.xlu2 %v1982_v60, %s3462_s21  ;;  %v2219_v60 = vrot.slane %v3311_v47, 1  ;;  %v1345_v47 = vrot.slane %v1048_v14, 1  ;;  %v3393_v14 = vld [vmem:[%s3507_s19 + $0x54] sm:$0xe] }
  0x58   : > { %1408 = vrot.lane.b32.xlu0 %v1376_v19, %s3461_s20  ;;  %v3245_v19 = vld [vmem:[%s3507_s19 + $0x30] sm:$0xf0]  ;;  %v3394_v41 = vor.u32 %v3393_v14, %v3734_v50  ;;  %v2223_v50 = vrot.slane %v3776_v24, 1  ;;  %v2976_v14 = vld [vmem:[%s3507_s19 + $0x5c] sm:$0x1] }
  0x59   : > { %v3247_v0 = vor.u32 %v3246_v51, %v3245_v19  ;;  %v2221_v9 = vsel %vm715_vm0, %v2219_v60, %v2220_v61  ;;  %v3257_v19 = vld [vmem:[%s3507_s19 + $0x90] sm:$0xf0]  ;;  %v3258_v51 = vld [vmem:[%s3507_s19 + $0x90] sm:$0xe]  ;;  %v2000_v60 = vrot.slane %v1998_v26, 1  ;;  %v2003_v61 = vshll.u32 %v3776_v24, 16 }
  0x5a   : > { %v3259_v2 = vor.u32 %v3258_v51, %v3257_v19  ;;  %v602_v51 = vshll.u32 %v3804_v8, 16  ;;  %v2222_v58 = vrot.slane %v3394_v41, 1 }
  0x5b   : > { %2261 = vrot.lane.b32.xlu1 %v2218_v54, %s3461_s20  ;;  %v3390_v54 = vld [vmem:[%s3507_s19 + $0x3c] sm:$0xe]  ;;  %v2001_v56 = vor.u32 %v2000_v60, %v1996_v48  ;;  %v3278_v48 = vld [vmem:[%s3507_s19 + $0x48] sm:$0xe] }
  0x5c   : > { %v3391_v15 = vor.u32 %v3390_v54, %v3389_v39  ;;  %v1118_v54 = vrot.slane %v1116_v13, 1 }
  0x5e   : > { %v1344_v39 = vrot.slane %v3391_v15, 1  ;;  %v752_v15 = vrot.slane %v3259_v2, 1 }
  0x5f   : > { %641 = vrot.lane.b32.xlu2 %v490_v31, %s3462_s21  ;;  %v1109_v31 = vshrl.u32 %v3719_v38, 16 }
  0x60   : > { %1258 = vrot.lane.b32.xlu0 %v1107_v10, %s3462_s21  ;;  %v728_v10 = vrot.slane %v3247_v0, 1  ;;  %v1346_v0 = vsel %vm715_vm0, %v1344_v39, %v1345_v47  ;;  %v3277_v47 = vld [vmem:[%s3507_s19 + $0x48] sm:$0xf0] }
  0x61   : > { %v1114_v52 = vor.u32 %v1113_v32, %v1109_v31  ;;  %v504_v32 = vshrl.u32 %v3759_v17, 16 }
  0x63   : > { %770 = vrot.lane.b32.xlu1 %v727_v21, %s3461_s20  ;;  %v1379_v21 = vsel %vm715_vm0, %v1377_v53, %v1378_v7  ;;  %v1119_v4 = vsel %vm442_vm1, %v1114_v52, %v1118_v54  ;;  %v595_v7 = vshll.u32 %v438_v63, 16  ;;  %v3399_v54 = vld [vmem:[%s3507_s19 + $0x9c] sm:$0xe] }
  0x65   : > { %v597_v27 = vrot.slane %v595_v7, 1 }
  0x67   : > { %1386 = vrot.lane.b32.xlu2 %v1343_v59, %s3461_s20  ;;  %v1519_v59 = vsel %vm1517_vm2, %v3007_v44, 0 }
  0x68   : > { %1282 = vrot.lane.b32.xlu0 %v1251_v45, %s3462_s21  ;;  %v730_v45 = vsel %vm715_vm0, %v728_v10, %v729_v11  ;;  %1528 = vmatpush.bf16.msra.mxu0 %v1519_v59  ;;  %v2005_v10 = vrot.slane %v2003_v61, 1  ;;  %v3809_v11 = vpack.c.b16 %v415_v62, %v415_v62  ;;  %v3843_v61 = vld [vmem:[%s3507_s19 + $0x54] sm:$0xff]  }
  0x69   : > { %3327 = vmatpush.bf16.msra.mxu3 %v1519_v59  ;;  %v3279_v59 = vor.u32 %v3278_v48, %v3277_v47  ;;  %v3846_v62 = vld [vmem:[%s3507_s19 + $0x54] sm:$0xf0] }
  0x6a   : > { %v2006_v31 = vsel %vm442_vm1, %v2001_v56, %v2005_v10  ;;  %v511_v28 = vshll.u32 %v3809_v11, 16  ;;  %v3298_v56 = vld [vmem:[%s3507_s19 + $0x60] sm:$0xff]  }
  0x6b   : > { %2135 = vrot.lane.b32.xlu1 %v1994_v23, %s3462_s21  ;;  %v590_v23 = vshll.u32 %v3237_v35, 16  ;;  %v423_v35 = vunpack.c.l.b16 %v295_v29  ;;  %v3312_v29 = vld [vmem:[%s3507_s19 + $0x60] sm:$0xf0]  ;;  %v2008_v48 = vshrl.u32 %v3298_v56, 16 }
  0x6c   : > { %v513_v44 = vrot.slane %v511_v28, 1 }
  0x6d   : > { %3328 = vmatpush.bf16.msrb.mxu3 %v1648_v33  ;;  %v592_v53 = vrot.slane %v590_v23, 1  ;;  %v506_v33 = vshll.u32 %v3759_v17, 16  ;;  %v3834_v19 = vpack.c.b16 %v423_v35, %v423_v35 }
  0x6f   : > { %1410 = vrot.lane.b32.xlu2 %v1379_v21, %s3461_s20  ;;  %v3815_v21 = vpack.c.b16 %v1033_v3, %v1033_v3  ;;  %v3817_v25 = vor.u32 %v592_v53, %v588_v6  ;;  %v508_v13 = vrot.slane %v506_v33, 1  ;;  %v607_v2 = vshll.u32 %v3834_v19, 16  ;;  %v3082_v3 = vld [vmem:[%s3507_s19 + $0x68] sm:$0x1] }
  0x70   : > { %2263 = vrot.lane.b32.xlu0 %v2221_v9, %s3461_s20  ;;  %v3807_v9 = vld [vmem:[%s3507_s19 + $0x9c] sm:$0xf0]  ;;  %v1347_v53 = vrot.slane %v3279_v59, 1  ;;  %v1909_v33 = vunpack.c.l.b16 %v3082_v3  ;;  %v296_v59 = vld [vmem:[%s3507_s19 + $0xb0] sm:$0x1] }
  0x71   : > { %v1128_v37 = vshll.u32 %v3815_v21, 16  ;;  %v598_v39 = vsel %vm442_vm1, %v3817_v25, %v597_v27  ;;  %v509_v42 = vor.u32 %v508_v13, %v504_v32  ;;  %v1348_v7 = vrot.slane %v3815_v21, 1 }
  0x72   : > { %v3400_v27 = vor.u32 %v3399_v54, %v3807_v9  ;;  %v732_v21 = vrot.slane %v3809_v11, 1  ;;  %v2010_v32 = vshll.u32 %v3298_v56, 16  ;;  %v3083_v56 = vld [vmem:[%s3507_s19 + $0x74] sm:$0x1] }
  0x73   : > { %643 = vrot.lane.b32.xlu1 %v502_v1, %s3462_s21  ;;  %v753_v1 = vrot.slane %v438_v63, 1  ;;  %v1130_v52 = vrot.slane %v1128_v37, 1  ;;  %v514_v23 = vsel %vm442_vm1, %v509_v42, %v513_v44  ;;  %v600_v63 = vshrl.u32 %v3804_v8, 16 }
  0x74   : > { %v1349_v28 = vsel %vm715_vm0, %v1347_v53, %v1348_v7  ;;  %v1925_v37 = vpack.c.b16 %v1909_v33, %v1909_v33  ;;  %v755_v11 = vrot.slane %v3400_v27, 1  ;;  %v756_v44 = vrot.slane %v3834_v19, 1 }
  0x75   : > { %v754_v36 = vsel %vm715_vm0, %v752_v15, %v753_v1  ;;  %v1131_v24 = vsel %vm442_vm1, %v3722_v40, %v1130_v52  ;;  %v609_v1 = vrot.slane %v607_v2, 1  ;;  %v3878_v52 = vld [vmem:[%s3507_s19 + $0x6c] sm:$0xff]   ;;  %v1135_v19 = vshll.u32 %v3843_v61, 16 }
  0x76   : > { %v757_v2 = vsel %vm715_vm0, %v755_v11, %v756_v44  ;;  %v2226_v3 = vrot.slane %v1925_v37, 1 }
  0x77   : > { %1260 = vrot.lane.b32.xlu2 %v1119_v4, %s3462_s21  ;;  %v2224_v4 = vsel %vm715_vm0, %v2222_v58, %v2223_v50 }
  0x78   : > { %772 = vrot.lane.b32.xlu0 %v730_v45, %s3461_s20  ;;  %v3396_v45 = vld [vmem:[%s3507_s19 + $0x3c] sm:$0xe] }
  0x79   : > { %v765_v26 = vpop.permute.xlu2 %764  ;;  %v3397_v6 = vor.u32 %v3396_v45, %v3762_v20  ;;  %v288_v45 = vld [vmem:[%s3507_s19 + $0x50] sm:$0x1] }
  0x7b   : > { %1388 = vrot.lane.b32.xlu1 %v1346_v0, %s3461_s20  ;;  %v604_v0 = vrot.slane %v602_v51, 1  ;;  %v731_v20 = vrot.slane %v3397_v6, 1  ;;  %v2015_v51 = vshll.u32 %v1925_v37, 16  ;;  %v3249_v6 = vld [vmem:[%s3507_s19 + $0x48] sm:$0xe] }
  0x7d   : > { %v605_v15 = vor.u32 %v604_v0, %v600_v63  ;;  %v733_v47 = vsel %vm715_vm0, %v731_v20, %v732_v21  ;;  %v3888_v63 = vld [vmem:[%s3507_s19 + $0x18] sm:$0xff]   ;;  %v2017_v7 = vrot.slane %v2015_v51, 1 }
  0x7f   : > { %659 = vrot.lane.b32.xlu2 %v598_v39, %s3462_s21  ;;  %v610_v42 = vsel %vm442_vm1, %v605_v15, %v609_v1  ;;  %v1137_v15 = vrot.slane %v1135_v19, 1  ;;  %v289_v19 = vld [vmem:[%s3507_s19 + $0x5c] sm:$0x1] }
  0x80   : > { %2137 = vrot.lane.b32.xlu0 %v2006_v31, %s3462_s21  ;;  %v3313_v31 = vld [vmem:[%s3507_s19 + $0x60] sm:$0xe] }
  0x81   : > { %v3840_v60 = vpop.permute.xlu2 %1380  ;;  %v3314_v39 = vor.u32 %v3313_v31, %v3312_v29  ;;  %v424_v29 = vunpack.c.l.b16 %v296_v59  ;;  %v3405_v59 = vld [vmem:[%s3507_s19 + $0x6c] sm:$0xe] }
  0x83   : > { %788 = vrot.lane.b32.xlu1 %v754_v36, %s3461_s20  ;;  %v1034_v36 = vunpack.c.l.b16 %v2976_v14  ;;  %v2225_v50 = vrot.slane %v3314_v39, 1  ;;  %v1133_v14 = vshrl.u32 %v3843_v61, 16 }
  0x85   : > { %v3883_v54 = vpack.c.b16 %v1034_v36, %v1034_v36  ;;  %v2227_v36 = vsel %vm715_vm0, %v2225_v50, %v2226_v3  ;;  %v1138_v37 = vor.u32 %v1137_v15, %v1133_v14  ;;  %v417_v3 = vunpack.c.l.b16 %v289_v19 }
  0x87   : > { %2265 = vrot.lane.b32.xlu2 %v2224_v4, %s3461_s20  ;;  %v1140_v1 = vshll.u32 %v3883_v54, 16 }
  0x88   : > { %645 = vrot.lane.b32.xlu0 %v514_v23, %s3462_s21  ;;  %v416_v23 = vunpack.c.l.b16 %v288_v45 }
  0x89   : > { %v3866_v35 = vpop.permute.xlu2 %1404  ;;  %v1142_v39 = vrot.slane %v1140_v1, 1 }
  0x8a   : > { %v2256_v10 = vpop.permute.xlu0 %2255  ;;  %v432_v31 = vpack.c.b16 %v416_v23, %v416_v23 }
  0x8b   : > { %1262 = vrot.lane.b32.xlu1 %v1131_v24, %s3462_s21  ;;  %v3248_v24 = vld [vmem:[%s3507_s19 + $0x48] sm:$0xf0] }
  0x8c   : > { %v3250_v21 = vor.u32 %v3249_v6, %v3248_v24  ;;  %v735_v45 = vrot.slane %v432_v31, 1 }
  0x8d   : > { %v636_v13 = vpop.permute.xlu1 %635 }
  0x8e   : > { %v798_v9 = vsel %vm796_vm3, %v3513_v5, %v636_v13  ;;  %v2012_v5 = vrot.slane %v2010_v32, 1  ;;  %v1910_v32 = vunpack.c.l.b16 %v3083_v56  ;;  %v3911_v13 = vld [vmem:[%s3507_s19 + $0x54] sm:$0xff]   ;;  %v734_v44 = vrot.slane %v3250_v21, 1 }
  0x8f   : > { %v831_v41 = vsel %vm829_vm4, %v798_v9, %v765_v26  ;;  %v3881_v26 = vld [vmem:[%s3507_s19 + $0x6c] sm:$0xf0]  ;;  %774 = vrot.lane.b32.xlu2 %v733_v47, %s3461_s20 }
  0x90   : > { %3028 = vmatmul.msk.bf16.vlgmr.msra.gmra.mxu1 %vm1484_vm5, %v831_v41  ;;  %1390 = vrot.lane.b32.xlu0 %v1349_v28, %s3461_s20  ;;  %v3898_v53 = vor.u32 %v2012_v5, %v2008_v48  ;;  %v3914_v28 = vld [vmem:[%s3507_s19 + $0x54] sm:$0xf0]  ;;  %v3402_v41 = vld [vmem:[%s3507_s19 + $0x54] sm:$0xe]  ;;  %v3928_v47 = vpack.c.b16 %v1910_v32, %v1910_v32  ;;  %v2022_v5 = vshll.u32 %v3878_v52, 16 }
  0x91   : > { %v3904_v27 = vpop.permute.xlu2 %1254  ;;  %v3260_v32 = vld [vmem:[%s3507_s19 + $0xa8] sm:$0xf0] }
  0x92   : > { %v2128_v58 = vpop.permute.xlu0 %2127  ;;  %v2018_v9 = vsel %vm442_vm1, %v3898_v53, %v2017_v7  ;;  %v3403_v7 = vor.u32 %v3402_v41, %v3846_v62  ;;  %v1351_v62 = vrot.slane %v3883_v54, 1  ;;  %v2977_v54 = vld [vmem:[%s3507_s19 + $0x68] sm:$0x1] }
  0x93   : > { %v2288_v0 = vsel %vm796_vm3, %v3888_v63, %v2128_v58  ;;  %661 = vrot.lane.b32.xlu1 %v610_v42, %s3462_s21 }
  0x94   : > { %v2320_v4 = vsel %vm829_vm4, %v2288_v0, %v2256_v10  ;;  %v736_v0 = vsel %vm715_vm0, %v734_v44, %v735_v45 }
  0x95   : > { %v1253_v33 = vpop.permute.xlu1 %1252  ;;  %3114 = vmatmul.msk.bf16.vlgmr.msra.gmra.mxu2 %vm1484_vm5, %v2320_v4  ;;  %v2024_v4 = vrot.slane %v2022_v5, 1  ;;  %v1035_v5 = vunpack.c.l.b16 %v2977_v54 }
  0x96   : > { %v1413_v10 = vsel %vm796_vm3, %v3520_v12, %v1253_v33  ;;  %v523_v12 = vshll.u32 %v432_v31, 16  ;;  %v530_v33 = vshll.u32 %v3911_v13, 16 }
  0x97   : > { %v1445_v20 = vsel %vm829_vm4, %v1413_v10, %v3840_v60  ;;  %v3921_v60 = vpack.c.b16 %v424_v29, %v424_v29  ;;  %2139 = vrot.lane.b32.xlu2 %v2018_v9, %s3462_s21  ;;  %v1350_v29 = vrot.slane %v3403_v7, 1  ;;  %v528_v9 = vshrl.u32 %v3911_v13, 16  ;;  %v3998_v7 = vld [vmem:[%s3507_s19 + $0x78] sm:$0xff]  }
  0x98   : > { %3008 = vmatmul.msk.bf16.vlgmr.msra.gmra.mxu0 %vm1484_vm5, %v1445_v20  ;;  %790 = vrot.lane.b32.xlu0 %v757_v2, %s3461_s20  ;;  %v525_v51 = vrot.slane %v523_v12, 1  ;;  %v2027_v2 = vshll.u32 %v3928_v47, 16  ;;  %v3406_v20 = vor.u32 %v3405_v59, %v3881_v26  ;;  %v532_v12 = vrot.slane %v530_v33, 1  ;;  %v3989_v59 = vld [vmem:[%s3507_s19 + $0xb4] sm:$0xf0] }
  0x99   : > { %v619_v50 = vshll.u32 %v3921_v60, 16  ;;  %v3937_v23 = vpop.permute.xlu2 %1278  ;;  %v1352_v26 = vsel %vm715_vm0, %v1350_v29, %v1351_v62  ;;  %v4011_v29 = vld [vmem:[%s3507_s19 + $0x6c] sm:$0xf0] }
  0x9a   : > { %v1277_v42 = vpop.permute.xlu0 %1276  ;;  %v526_v6 = vsel %vm442_vm1, %v3722_v40, %v525_v51  ;;  %v2029_v1 = vrot.slane %v2027_v2, 1  ;;  %v3408_v40 = vld [vmem:[%s3507_s19 + $0x54] sm:$0xe]  ;;  %v533_v45 = vor.u32 %v532_v12, %v528_v9  ;;  %v3084_v51 = vld [vmem:[%s3507_s19 + $0x80] sm:$0x1] }
  0x9b   : > { %v1437_v11 = vsel %vm796_vm3, %v3527_v18, %v1277_v42  ;;  %2267 = vrot.lane.b32.xlu1 %v2227_v36, %s3461_s20  ;;  %v1143_v18 = vsel %vm442_vm1, %v1138_v37, %v1142_v39  ;;  %v3261_v36 = vld [vmem:[%s3507_s19 + $0xa8] sm:$0xe]  ;;  %v2228_v42 = vrot.slane %v3406_v20, 1  ;;  %v290_v12 = vld [vmem:[%s3507_s19 + $0x68] sm:$0x1] }
  0x9c   : > { %v1469_v48 = vsel %vm829_vm4, %v1437_v11, %v3866_v35  ;;  %v2020_v35 = vshrl.u32 %v3878_v52, 16  ;;  %v3262_v41 = vor.u32 %v3261_v36, %v3260_v32  ;;  %v2229_v11 = vrot.slane %v3928_v47, 1  ;;  %v3281_v47 = vld [vmem:[%s3507_s19 + $0x60] sm:$0xe] }
  0x9d   : > { %v2130_v58 = vpop.permute.xlu1 %2129  ;;  %3020 = vmatmul.msk.bf16.vlgmr.msra.gmra.mxu3 %vm1484_vm5, %v1469_v48  ;;  %v3280_v48 = vld [vmem:[%s3507_s19 + $0x60] sm:$0xf0] }
  0x9e   : > { %3329 = vmatpush.bf16.msra.mxu3 %v3788_v43  ;;  %v2290_v24 = vsel %vm796_vm3, %v3536_v30, %v2130_v58  ;;  %v621_v43 = vrot.slane %v619_v50, 1  ;;  %v3954_v30 = vpack.c.b16 %v417_v3, %v417_v3  ;;  %v2025_v15 = vor.u32 %v2024_v4, %v2020_v35  ;;  %v3986_v50 = vld [vmem:[%s3507_s19 + $0xb4] sm:$0xff]  }
  0x9f   : > { %647 = vrot.lane.b32.xlu2 %v526_v6, %s3462_s21  ;;  %v2230_v2 = vsel %vm715_vm0, %v2228_v42, %v2229_v11  ;;  %v1051_v4 = vpack.c.b16 %v1035_v5, %v1035_v5  ;;  %v3282_v6 = vor.u32 %v3281_v47, %v3280_v48  ;;  %v2032_v11 = vshrl.u32 %v3998_v7, 16  ;;  %v4048_v47 = vld [vmem:[%s3507_s19 + $0x84] sm:$0xf0] }
  0xa0   : > { %1264 = vrot.lane.b32.xlu0 %v1143_v18, %s3462_s21  ;;  %v622_v31 = vsel %vm442_vm1, %v3630_v34, %v621_v43  ;;  %v535_v37 = vshll.u32 %v3954_v30, 16  ;;  %v2030_v34 = vsel %vm442_vm1, %v2025_v15, %v2029_v1  ;;  %v3409_v18 = vor.u32 %v3408_v40, %v3914_v28  ;;  %v3411_v15 = vld [vmem:[%s3507_s19 + $0xb4] sm:$0xe]  ;;  %v4008_v40 = vld [vmem:[%s3507_s19 + $0x6c] sm:$0xff]  }
  0xa1   : > { %v3962_v21 = vpop.permute.xlu2 %2259  ;;  %v1911_v28 = vunpack.c.l.b16 %v3084_v51  ;;  %v738_v33 = vrot.slane %v3954_v30, 1  ;;  %v1152_v1 = vshll.u32 %v1051_v4, 16  ;;  %v1353_v32 = vrot.slane %v3282_v6, 1 }
  0xa2   : > { %v2258_v56 = vpop.permute.xlu0 %2257  ;;  %v537_v58 = vrot.slane %v535_v37, 1  ;;  %v737_v43 = vrot.slane %v3409_v18, 1  ;;  %v1354_v36 = vrot.slane %v1051_v4, 1  ;;  %v4024_v37 = vld [vmem:[%s3507_s19 + $0x30] sm:$0xff]   ;;  %v418_v5 = vunpack.c.l.b16 %v290_v12  ;;  %v4045_v18 = vld [vmem:[%s3507_s19 + $0x84] sm:$0xff]  }
  0xa3   : > { %776 = vrot.lane.b32.xlu1 %v736_v0, %s3461_s20  ;;  %v2322_v14 = vsel %vm829_vm4, %v2290_v24, %v2258_v56  ;;  %v758_v0 = vrot.slane %v3262_v41, 1  ;;  %v297_v56 = vld [vmem:[%s3507_s19 + $0xbc] sm:$0x1]  ;;  %v4013_v62 = vpack.c.b16 %v1911_v28, %v1911_v28  ;;  %v626_v41 = vshll.u32 %v3986_v50, 16  ;;  %v3414_v12 = vld [vmem:[%s3507_s19 + $0x6c] sm:$0xe] }
  0xa4   : > { %v425_v9 = vunpack.c.l.b16 %v297_v56  ;;  %v4056_v4 = vpack.c.b16 %v418_v5, %v418_v5  ;;  %v2046_v5 = vshll.u32 %v4045_v18, 16 }
  0xa5   : > { %v638_v10 = vpop.permute.xlu1 %637  ;;  %3115 = vmatmul.msk.bf16.gmra.mxu2 %vm1484_vm5, %v2322_v14 }
  0xa6   : > { %v800_v39 = vsel %vm796_vm3, %v3560_v57, %v638_v10  ;;  %v1415_v57 = vsel %vm796_vm3, %v3888_v63, %v3904_v27  ;;  %v759_v27 = vrot.slane %v3921_v60, 1  ;;  %v538_v60 = vsel %vm442_vm1, %v533_v45, %v537_v58 }
  0xa7   : > { %1392 = vrot.lane.b32.xlu2 %v1352_v26, %s3461_s20  ;;  %v2034_v10 = vshll.u32 %v3998_v7, 16  ;;  %v2978_v26 = vld [vmem:[%s3507_s19 + $0x74] sm:$0x1]  ;;  %v2039_v45 = vshll.u32 %v4013_v62, 16  ;;  %v441_v51 = vpack.c.b16 %v425_v9, %v425_v9  ;;  %v3316_v9 = vld [vmem:[%s3507_s19 + $0x78] sm:$0xe] }
  0xa8   : > { %663 = vrot.lane.b32.xlu0 %v622_v31, %s3462_s21  ;;  %v760_v14 = vsel %vm715_vm0, %v758_v0, %v759_v27  ;;  %v4017_v31 = vld [vmem:[%s3507_s19 + $0xa8] sm:$0xff]   ;;  %v1036_v58 = vunpack.c.l.b16 %v2978_v26  ;;  %v624_v27 = vshrl.u32 %v3986_v50, 16 }
  0xa9   : > { %v3994_v3 = vpop.permute.xlu2 %768  ;;  %v1439_v20 = vsel %vm796_vm3, %v4017_v31, %v3937_v23  ;;  %v1154_v23 = vrot.slane %v1152_v1, 1 }
  0xaa   : > { %v767_v44 = vpop.permute.xlu0 %766  ;;  %v4062_v56 = vpack.c.b16 %v1036_v58, %v1036_v58  ;;  %v3251_v58 = vld [vmem:[%s3507_s19 + $0x60] sm:$0xf0] }
  0xab   : > { %2141 = vrot.lane.b32.xlu1 %v2030_v34, %s3462_s21  ;;  %v833_v19 = vsel %vm829_vm4, %v800_v39, %v767_v44  ;;  %v739_v34 = vsel %vm715_vm0, %v737_v43, %v738_v33  ;;  %v2036_v44 = vrot.slane %v2034_v10, 1  ;;  %v1155_v0 = vsel %vm442_vm1, %v3898_v53, %v1154_v23  ;;  %v3085_v33 = vld [vmem:[%s3507_s19 + $0x8c] sm:$0x1] }
  0xac   : > { %3029 = vmatmul.msk.bf16.gmra.mxu1 %vm1484_vm5, %v833_v19  ;;  %v3412_v19 = vor.u32 %v3411_v15, %v3989_v59  ;;  %v762_v43 = vrot.slane %v441_v51, 1  ;;  %v1159_v15 = vshll.u32 %v4008_v40, 16 }
  0xad   : > { %v1383_v35 = vpop.permute.xlu1 %1382  ;;  %v4054_v28 = vor.u32 %v2036_v44, %v2032_v11 }
  0xae   : > { %v1447_v24 = vsel %vm829_vm4, %v1415_v57, %v1383_v35  ;;  %v1355_v57 = vsel %vm715_vm0, %v1353_v32, %v1354_v36  ;;  %v628_v35 = vrot.slane %v626_v41, 1  ;;  %v3315_v36 = vld [vmem:[%s3507_s19 + $0x78] sm:$0xf0]  ;;  %v1161_v26 = vrot.slane %v1159_v15, 1 }
  0xaf   : > { %3009 = vmatmul.msk.bf16.gmra.mxu0 %vm1484_vm5, %v1447_v24  ;;  %792 = vrot.lane.b32.xlu2 %v760_v14, %s3461_s20  ;;  %v2041_v24 = vrot.slane %v2039_v45, 1 }
  0xb0   : > { %2269 = vrot.lane.b32.xlu0 %v2230_v2, %s3461_s20  ;;  %v631_v2 = vshll.u32 %v441_v51, 16  ;;  %v629_v1 = vor.u32 %v628_v35, %v624_v27 }
  0xb1   : > { %v4038_v48 = vpop.permute.xlu2 %2133 }
  0xb2   : > { %v2132_v30 = vpop.permute.xlu0 %2131  ;;  %v633_v10 = vrot.slane %v631_v2, 1  ;;  %v3415_v2 = vor.u32 %v3414_v12, %v4011_v29  ;;  %v2294_v12 = vsel %vm796_vm3, %v3648_v46, %v4038_v48 }
  0xb3   : > { %v2292_v54 = vsel %vm796_vm3, %v4024_v37, %v2132_v30  ;;  %649 = vrot.lane.b32.xlu1 %v538_v60, %s3462_s21  ;;  %v761_v60 = vrot.slane %v3412_v19, 1  ;;  %v547_v30 = vshll.u32 %v4056_v4, 16  ;;  %v2232_v19 = vrot.slane %v4013_v62, 1  ;;  %v3088_v62 = vld [vmem:[%s3507_s19 + $0xb0] sm:$0x1] }
  0xb4   : > { %v2324_v39 = vsel %vm829_vm4, %v2292_v54, %v3962_v21  ;;  %v1912_v54 = vunpack.c.l.b16 %v3085_v33  ;;  %v634_v41 = vsel %vm442_vm1, %v629_v1, %v633_v10  ;;  %v1356_v15 = vrot.slane %v3415_v2, 1  ;;  %v4110_v10 = vld [vmem:[%s3507_s19 + $0xa8] sm:$0xff]  }
  0xb5   : > { %v1407_v42 = vpop.permute.xlu1 %1406  ;;  %3116 = vmatmul.msk.bf16.gmra.mxu2 %vm1484_vm5, %v2324_v39  ;;  %v1157_v39 = vshrl.u32 %v4008_v40, 16  ;;  %v549_v11 = vrot.slane %v547_v30, 1  ;;  %v1357_v1 = vrot.slane %v4062_v56, 1 }
  0xb6   : > { %v1471_v21 = vsel %vm829_vm4, %v1439_v20, %v1407_v42  ;;  %v2042_v20 = vsel %vm442_vm1, %v4054_v28, %v2041_v24  ;;  %v3317_v42 = vor.u32 %v3316_v9, %v3315_v36  ;;  %v4084_v45 = vpack.c.b16 %v1912_v54, %v1912_v54  ;;  %v3321_v36 = vld [vmem:[%s3507_s19 + $0xa8] sm:$0xf0] }
  0xb7   : > { %3021 = vmatmul.msk.bf16.gmra.mxu3 %vm1484_vm5, %v1471_v21  ;;  %1266 = vrot.lane.b32.xlu2 %v1155_v0, %s3462_s21  ;;  %v1162_v51 = vor.u32 %v1161_v26, %v1157_v39  ;;  %v3252_v0 = vld [vmem:[%s3507_s19 + $0x60] sm:$0xe]  ;;  %v550_v35 = vsel %vm442_vm1, %v3898_v53, %v549_v11  ;;  %v1915_v9 = vunpack.c.l.b16 %v3088_v62  ;;  %v741_v39 = vrot.slane %v4056_v4, 1 }
  0xb8   : > { %778 = vrot.lane.b32.xlu0 %v739_v34, %s3461_s20  ;;  %v1164_v34 = vshll.u32 %v4062_v56, 16  ;;  %v3253_v33 = vor.u32 %v3252_v0, %v3251_v58  ;;  %v3322_v56 = vld [vmem:[%s3507_s19 + $0xa8] sm:$0xe]  ;;  %v2082_v26 = vshll.u32 %v4110_v10, 16  ;;  %v1358_v48 = vsel %vm715_vm0, %v1356_v15, %v1357_v1  ;;  %v4139_v0 = vld [vmem:[%s3507_s19 + $0xb4] sm:$0xff]  }
  0xb9   : > { %v4072_v32 = vpop.permute.xlu2 %641  ;;  %v2235_v2 = vrot.slane %v4084_v45, 1  ;;  %v3089_v1 = vld [vmem:[%s3507_s19 + $0xbc] sm:$0x1] }
  0xba   : > { %v640_v59 = vpop.permute.xlu0 %639 }
  0xbb   : > { %v802_v6 = vsel %vm796_vm3, %v3888_v63, %v640_v59  ;;  %1394 = vrot.lane.b32.xlu1 %v1355_v57, %s3461_s20  ;;  %v2231_v57 = vrot.slane %v3317_v42, 1  ;;  %v2044_v59 = vshrl.u32 %v4045_v18, 16 }
  0xbc   : > { %v835_v14 = vsel %vm829_vm4, %v802_v6, %v3994_v3  ;;  %v763_v3 = vsel %vm715_vm0, %v761_v60, %v762_v43  ;;  %v2048_v6 = vrot.slane %v2046_v5, 1  ;;  %v2051_v60 = vshll.u32 %v4084_v45, 16  ;;  %v3417_v43 = vld [vmem:[%s3507_s19 + $0x84] sm:$0xe] }
  0xbd   : > { %v1257_v63 = vpop.permute.xlu1 %1256  ;;  %3030 = vmatmul.msk.bf16.gmra.mxu1 %vm1484_vm5, %v835_v14  ;;  %v2233_v29 = vsel %vm715_vm0, %v2231_v57, %v2232_v19  ;;  %v3323_v5 = vor.u32 %v3322_v56, %v3321_v36  ;;  %v3420_v57 = vld [vmem:[%s3507_s19 + $0x6c] sm:$0xe]  ;;  %v2084_v19 = vrot.slane %v2082_v26, 1 }
  0xbe   : > { %v1417_v23 = vsel %vm796_vm3, %v3599_v55, %v1257_v63  ;;  %v1166_v55 = vrot.slane %v1164_v34, 1  ;;  %v2053_v30 = vrot.slane %v2051_v60, 1  ;;  %v4123_v34 = vld [vmem:[%s3507_s19 + $0x6c] sm:$0xff]  }
  0xbf   : > { %665 = vrot.lane.b32.xlu2 %v634_v41, %s3462_s21  ;;  %v3418_v41 = vor.u32 %v3417_v43, %v4048_v47  ;;  %v2080_v47 = vshrl.u32 %v4110_v10, 16  ;;  %v2243_v43 = vrot.slane %v3323_v5, 1 }
  0xc0   : > { %2143 = vrot.lane.b32.xlu0 %v2042_v20, %s3462_s21  ;;  %v1167_v53 = vsel %vm442_vm1, %v1162_v51, %v1166_v55  ;;  %v2049_v20 = vor.u32 %v2048_v6, %v2044_v59  ;;  %v291_v51 = vld [vmem:[%s3507_s19 + $0x74] sm:$0x1]  ;;  %v804_v6 = vsel %vm796_vm3, %v3669_v16, %v4072_v32  ;;  %v554_v16 = vshll.u32 %v4123_v34, 16 }
  0xc1   : > { %v4097_v24 = vpop.permute.xlu2 %1386 }
  0xc2   : > { %v1385_v44 = vpop.permute.xlu0 %1384 }
  0xc3   : > { %794 = vrot.lane.b32.xlu1 %v763_v3, %s3461_s20  ;;  %v1449_v21 = vsel %vm829_vm4, %v1417_v23, %v1385_v44  ;;  %v740_v3 = vrot.slane %v3253_v33, 1  ;;  %v3419_v23 = vld [vmem:[%s3507_s19 + $0x6c] sm:$0xf0]  ;;  %v1931_v44 = vpack.c.b16 %v1915_v9, %v1915_v9  ;;  %v419_v33 = vunpack.c.l.b16 %v291_v51 }
  0xc4   : > { %3010 = vmatmul.msk.bf16.gmra.mxu0 %vm1484_vm5, %v1449_v21  ;;  %v2054_v21 = vsel %vm442_vm1, %v2049_v20, %v2053_v30  ;;  %v2094_v51 = vshll.u32 %v4139_v0, 16 }
  0xc5   : > { %v1281_v27 = vpop.permute.xlu1 %1280  ;;  %v742_v55 = vsel %vm715_vm0, %v740_v3, %v741_v39  ;;  %v2087_v58 = vshll.u32 %v1931_v44, 16  ;;  %v2244_v62 = vrot.slane %v1931_v44, 1  ;;  %v552_v3 = vshrl.u32 %v4123_v34, 16 }
  0xc6   : > { %v1441_v14 = vsel %vm796_vm3, %v3618_v22, %v1281_v27  ;;  %v2979_v22 = vld [vmem:[%s3507_s19 + $0x80] sm:$0x1]  ;;  %v4142_v27 = vld [vmem:[%s3507_s19 + $0xb4] sm:$0xf0]  ;;  %v556_v39 = vrot.slane %v554_v16, 1 }
  0xc7   : > { %2271 = vrot.lane.b32.xlu2 %v2233_v29, %s3461_s20  ;;  %v1037_v11 = vunpack.c.l.b16 %v2979_v22  ;;  %v2085_v29 = vor.u32 %v2084_v19, %v2080_v47  ;;  %v2089_v15 = vrot.slane %v2087_v58, 1  ;;  %v435_v22 = vpack.c.b16 %v419_v33, %v419_v33 }
  0xc8   : > { %651 = vrot.lane.b32.xlu0 %v550_v35, %s3462_s21  ;;  %v2234_v35 = vrot.slane %v3418_v41, 1  ;;  %v2092_v33 = vshrl.u32 %v4139_v0, 16 }
  0xc9   : > { %v1411_v42 = vpop.permute.xlu2 %1410  ;;  %v4145_v59 = vpack.c.b16 %v1037_v11, %v1037_v11  ;;  %v2090_v56 = vsel %vm442_vm1, %v2085_v29, %v2089_v15  ;;  %v559_v26 = vshll.u32 %v435_v22, 16  ;;  %v3360_v11 = vld [vmem:[%s3507_s19 + $0xc0] sm:$0xff]   ;;  %v744_v44 = vrot.slane %v435_v22, 1  ;;  %v4209_v22 = vld [vmem:[%s3507_s19 + $0x84] sm:$0xf0] }
  0xca   : > { %v1409_v63 = vpop.permute.xlu0 %1408  ;;  %v2096_v29 = vrot.slane %v2094_v51, 1 }
  0xcb   : > { %1268 = vrot.lane.b32.xlu1 %v1167_v53, %s3462_s21  ;;  %v1473_v54 = vsel %vm829_vm4, %v1441_v14, %v1409_v63  ;;  %v3086_v14 = vld [vmem:[%s3507_s19 + $0x98] sm:$0x1]  ;;  %v2236_v63 = vsel %vm715_vm0, %v2234_v35, %v2235_v2  ;;  %v1176_v20 = vshll.u32 %v4145_v59, 16  ;;  %v561_v47 = vrot.slane %v559_v26, 1 }
  0xcc   : > { %3022 = vmatmul.msk.bf16.gmra.mxu3 %vm1484_vm5, %v1473_v54  ;;  %v1913_v36 = vunpack.c.l.b16 %v3086_v14  ;;  %v1916_v54 = vunpack.c.l.b16 %v3089_v1 }
  0xcd   : > { %v2262_v46 = vpop.permute.xlu1 %2261 }
  0xce   : > { %v2326_v4 = vsel %vm829_vm4, %v2294_v12, %v2262_v46  ;;  %v3421_v12 = vor.u32 %v3420_v57, %v3419_v23  ;;  %v1178_v46 = vrot.slane %v1176_v20, 1  ;;  %v4176_v5 = vpack.c.b16 %v1916_v54, %v1916_v54 }
  0xcf   : > { %3117 = vmatmul.msk.bf16.gmra.mxu2 %vm1484_vm5, %v2326_v4  ;;  %780 = vrot.lane.b32.xlu2 %v742_v55, %s3461_s20  ;;  %v557_v57 = vor.u32 %v556_v39, %v552_v3  ;;  %v1360_v54 = vrot.slane %v4145_v59, 1  ;;  %v3319_v3 = vld [vmem:[%s3507_s19 + $0x90] sm:$0xe] }
  0xd0   : > { %1396 = vrot.lane.b32.xlu0 %v1358_v48, %s3461_s20  ;;  %v4170_v48 = vpack.c.b16 %v1913_v36, %v1913_v36  ;;  %v743_v23 = vrot.slane %v3421_v12, 1  ;;  %v1179_v58 = vsel %vm442_vm1, %v4054_v28, %v1178_v46  ;;  %v2099_v14 = vshll.u32 %v4176_v5, 16 }
  0xd1   : > { %v4162_v30 = vpop.permute.xlu2 %1260  ;;  %v562_v15 = vsel %vm442_vm1, %v557_v57, %v561_v47  ;;  %v2247_v57 = vrot.slane %v4176_v5, 1  ;;  %v4240_v5 = vld [vmem:[%s3507_s19 + $0x9c] sm:$0xff]  }
  0xd2   : > { %v1259_v60 = vpop.permute.xlu0 %1258  ;;  %v2063_v35 = vshll.u32 %v4170_v48, 16  ;;  %v2101_v36 = vrot.slane %v2099_v14, 1 }
  0xd3   : > { %v1419_v53 = vsel %vm796_vm3, %v4024_v37, %v1259_v60  ;;  %2145 = vrot.lane.b32.xlu1 %v2054_v21, %s3462_s21  ;;  %v292_v21 = vld [vmem:[%s3507_s19 + $0x80] sm:$0x1]  ;;  %v3284_v60 = vld [vmem:[%s3507_s19 + $0x78] sm:$0xe] }
  0xd4   : > { %v1451_v45 = vsel %vm829_vm4, %v1419_v53, %v4097_v24  ;;  %v2245_v24 = vsel %vm715_vm0, %v2243_v43, %v2244_v62  ;;  %v3423_v43 = vld [vmem:[%s3507_s19 + $0xb4] sm:$0xe]  ;;  %v420_v62 = vunpack.c.l.b16 %v292_v21  ;;  %v4194_v53 = vld [vmem:[%s3507_s19 + $0x48] sm:$0xff]   ;;  %v2065_v16 = vrot.slane %v2063_v35, 1  ;;  %v3426_v21 = vld [vmem:[%s3507_s19 + $0x84] sm:$0xe] }
  0xd5   : > { %v771_v32 = vpop.permute.xlu1 %770  ;;  %3011 = vmatmul.msk.bf16.gmra.mxu0 %vm1484_vm5, %v1451_v45  ;;  %v3424_v46 = vor.u32 %v3423_v43, %v4142_v27 }
  0xd6   : > { %v837_v9 = vsel %vm829_vm4, %v804_v6, %v771_v32  ;;  %v3283_v6 = vld [vmem:[%s3507_s19 + $0x78] sm:$0xf0]  ;;  %v2066_v26 = vsel %vm442_vm1, %v3817_v25, %v2065_v16 }
  0xd7   : > { %3031 = vmatmul.msk.bf16.gmra.mxu1 %vm1484_vm5, %v837_v9  ;;  %2151 = vrot.lane.b32.xlu2 %v2090_v56, %s3462_s21  ;;  %v3285_v1 = vor.u32 %v3284_v60, %v3283_v6  ;;  %v4206_v9 = vld [vmem:[%s3507_s19 + $0x84] sm:$0xff]   ;;  %v3318_v56 = vld [vmem:[%s3507_s19 + $0x90] sm:$0xf0]  ;;  %v2246_v51 = vrot.slane %v3424_v46, 1 }
  0xd8   : > { %2273 = vrot.lane.b32.xlu0 %v2236_v63, %s3461_s20  ;;  %v4200_v63 = vpack.c.b16 %v420_v62, %v420_v62  ;;  %v3090_v6 = vld [vmem:[%s3507_s19 + $0xc8] sm:$0x1]  ;;  %v2238_v62 = vrot.slane %v4170_v48, 1 }
  0xd9   : > { %v4185_v2 = vpop.permute.xlu2 %659  ;;  %v1359_v12 = vrot.slane %v3285_v1, 1  ;;  %v1917_v1 = vunpack.c.l.b16 %v3090_v6 }
  0xda   : > { %v1283_v41 = vpop.permute.xlu0 %1282 }
  0xdb   : > { %v1443_v4 = vsel %vm796_vm3, %v3360_v11, %v1283_v41  ;;  %2279 = vrot.lane.b32.xlu1 %v2245_v24, %s3461_s20  ;;  %v2097_v24 = vor.u32 %v2096_v29, %v2092_v33  ;;  %v571_v11 = vshll.u32 %v4200_v63, 16  ;;  %v1361_v27 = vsel %vm715_vm0, %v1359_v12, %v1360_v54  ;;  %v4247_v33 = vld [vmem:[%s3507_s19 + $0x84] sm:$0xff]  }
  0xdc   : > { %v1475_v55 = vsel %vm829_vm4, %v1443_v4, %v1411_v42  ;;  %v745_v42 = vsel %vm715_vm0, %v743_v23, %v744_v44  ;;  %v3254_v4 = vld [vmem:[%s3507_s19 + $0x78] sm:$0xf0]  ;;  %v3255_v23 = vld [vmem:[%s3507_s19 + $0x78] sm:$0xe]  ;;  %v2980_v44 = vld [vmem:[%s3507_s19 + $0x8c] sm:$0x1] }
  0xdd   : > { %v2136_v19 = vpop.permute.xlu1 %2135  ;;  %3023 = vmatmul.msk.bf16.gmra.mxu3 %vm1484_vm5, %v1475_v55  ;;  %v3320_v55 = vor.u32 %v3319_v3, %v3318_v56  ;;  %v2102_v25 = vsel %vm442_vm1, %v2097_v24, %v2101_v36  ;;  %v3256_v47 = vor.u32 %v3255_v23, %v3254_v4  ;;  %v1038_v35 = vunpack.c.l.b16 %v2980_v44  ;;  %v4260_v36 = vld [vmem:[%s3507_s19 + $0xc0] sm:$0xff]   ;;  %v293_v56 = vld [vmem:[%s3507_s19 + $0x8c] sm:$0x1] }
  0xde   : > { %v2296_v45 = vsel %vm796_vm3, %v4194_v53, %v2136_v19  ;;  %v747_v29 = vrot.slane %v4200_v63, 1  ;;  %v3087_v24 = vld [vmem:[%s3507_s19 + $0xa4] sm:$0x1]  ;;  %v3429_v63 = vld [vmem:[%s3507_s19 + $0x9c] sm:$0xe]  ;;  %v1181_v3 = vshrl.u32 %v4206_v9, 16  ;;  %v421_v44 = vunpack.c.l.b16 %v293_v56 }
  0xdf   : > { %653 = vrot.lane.b32.xlu2 %v562_v15, %s3462_s21  ;;  %v2237_v43 = vrot.slane %v3320_v55, 1  ;;  %v746_v48 = vrot.slane %v3256_v47, 1  ;;  %v2106_v46 = vshll.u32 %v4260_v36, 16  ;;  %v576_v56 = vshrl.u32 %v4247_v33, 16 }
  0xe0   : > { %1270 = vrot.lane.b32.xlu0 %v1179_v58, %s3462_s21  ;;  %v573_v58 = vrot.slane %v571_v11, 1  ;;  %v1914_v11 = vunpack.c.l.b16 %v3087_v24 }
  0xe1   : > { %v4218_v41 = vpop.permute.xlu2 %2265  ;;  %v2239_v54 = vsel %vm715_vm0, %v2237_v43, %v2238_v62  ;;  %v748_v23 = vsel %vm715_vm0, %v746_v48, %v747_v29  ;;  %v4296_v43 = vpack.c.b16 %v421_v44, %v421_v44  ;;  %v4304_v48 = vld [vmem:[%s3507_s19 + $0x90] sm:$0xff]   ;;  %v2068_v29 = vshrl.u32 %v4240_v5, 16 }
  0xe2   : > { %v2264_v32 = vpop.permute.xlu0 %2263  ;;  %v574_v12 = vsel %vm442_vm1, %v4054_v28, %v573_v58  ;;  %v1930_v6 = vpack.c.b16 %v1914_v11, %v1914_v11 }
  0xe3   : > { %782 = vrot.lane.b32.xlu1 %v745_v42, %s3461_s20  ;;  %v2328_v20 = vsel %vm829_vm4, %v2296_v45, %v2264_v32  ;;  %v4243_v42 = vld [vmem:[%s3507_s19 + $0x9c] sm:$0xf0]  ;;  %v2248_v45 = vsel %vm715_vm0, %v2246_v51, %v2247_v57  ;;  %v1054_v32 = vpack.c.b16 %v1038_v35, %v1038_v35 }
  0xe4   : > { %3118 = vmatmul.msk.bf16.gmra.mxu2 %vm1484_vm5, %v2328_v20  ;;  %v3427_v20 = vor.u32 %v3426_v21, %v4209_v22  ;;  %v4276_v21 = vld [vmem:[%s3507_s19 + $0x90] sm:$0xff]  }
  0xe5   : > { %v644_v39 = vpop.permute.xlu1 %643  ;;  %v1188_v22 = vshll.u32 %v1054_v32, 16  ;;  %v822_v55 = vsel %vm796_vm3, %v4276_v21, %v4185_v2  ;;  %v2104_v2 = vshrl.u32 %v4260_v36, 16 }
  0xe6   : > { %v806_v59 = vsel %vm796_vm3, %v4024_v37, %v644_v39  ;;  %v1421_v37 = vsel %vm796_vm3, %v3719_v38, %v4162_v30  ;;  %v4250_v38 = vld [vmem:[%s3507_s19 + $0x84] sm:$0xf0]  ;;  %v1183_v30 = vshll.u32 %v4206_v9, 16  ;;  %v1362_v28 = vrot.slane %v3427_v20, 1 }
  0xe7   : > { %1398 = vrot.lane.b32.xlu2 %v1361_v27, %s3461_s20  ;;  %v2981_v27 = vld [vmem:[%s3507_s19 + $0x98] sm:$0x1]  ;;  %v1190_v47 = vrot.slane %v1188_v22, 1 }
  0xe8   : > { %2147 = vrot.lane.b32.xlu0 %v2066_v26, %s3462_s21  ;;  %v1185_v39 = vrot.slane %v1183_v30, 1  ;;  %v4271_v26 = vpack.c.b16 %v1917_v1, %v1917_v1  ;;  %v1039_v62 = vunpack.c.l.b16 %v2981_v27  ;;  %v3325_v27 = vld [vmem:[%s3507_s19 + $0xc0] sm:$0xe] }
  0xe9   : > { %v4255_v15 = vpop.permute.xlu2 %774 }
  0xea   : > { %v773_v19 = vpop.permute.xlu0 %772  ;;  %v1186_v57 = vor.u32 %v1185_v39, %v1181_v3  ;;  %v2111_v35 = vshll.u32 %v4271_v26, 16  ;;  %v583_v3 = vshll.u32 %v4296_v43, 16  ;;  %v4315_v39 = vpack.c.b16 %v1039_v62, %v1039_v62  ;;  %v3286_v62 = vld [vmem:[%s3507_s19 + $0x90] sm:$0xf0] }
  0xeb   : > { %2153 = vrot.lane.b32.xlu1 %v2102_v25, %s3462_s21  ;;  %v839_v60 = vsel %vm829_vm4, %v806_v59, %v773_v19  ;;  %v1363_v25 = vrot.slane %v1054_v32, 1  ;;  %v2070_v19 = vshll.u32 %v4240_v5, 16  ;;  %v4311_v32 = vld [vmem:[%s3507_s19 + $0xcc] sm:$0xf0] }
  0xec   : > { %3032 = vmatmul.msk.bf16.gmra.mxu1 %vm1484_vm5, %v839_v60  ;;  %v3430_v60 = vor.u32 %v3429_v63, %v4243_v42  ;;  %v4308_v42 = vld [vmem:[%s3507_s19 + $0xcc] sm:$0xff]   ;;  %v2113_v24 = vrot.slane %v2111_v35, 1 }
  0xed   : > { %v1389_v14 = vpop.permute.xlu1 %1388  ;;  %v1364_v30 = vsel %vm715_vm0, %v1362_v28, %v1363_v25  ;;  %v2072_v1 = vrot.slane %v2070_v19, 1  ;;  %v3324_v25 = vld [vmem:[%s3507_s19 + $0xc0] sm:$0xf0] }
  0xee   : > { %v1453_v16 = vsel %vm829_vm4, %v1421_v37, %v1389_v14  ;;  %v578_v14 = vshll.u32 %v4247_v33, 16  ;;  %v2240_v63 = vrot.slane %v3430_v60, 1 }
  0xef   : > { %3012 = vmatmul.msk.bf16.gmra.mxu0 %vm1484_vm5, %v1453_v16  ;;  %2275 = vrot.lane.b32.xlu2 %v2239_v54, %s3461_s20  ;;  %v2075_v16 = vshll.u32 %v1930_v6, 16 }
  0xf0   : > { %2281 = vrot.lane.b32.xlu0 %v2248_v45, %s3461_s20  ;;  %v1191_v45 = vsel %vm442_vm1, %v1186_v57, %v1190_v47  ;;  %v1200_v47 = vshll.u32 %v4315_v39, 16 }
  0xf1   : > { %v4292_v37 = vpop.permute.xlu2 %2139  ;;  %v2077_v28 = vrot.slane %v2075_v16, 1 }
  0xf2   : > { %v2138_v4 = vpop.permute.xlu0 %2137 }
  0xf3   : > { %v2298_v59 = vsel %vm796_vm3, %v3731_v49, %v2138_v4  ;;  %655 = vrot.lane.b32.xlu1 %v574_v12, %s3462_s21  ;;  %v2108_v49 = vrot.slane %v2106_v46, 1  ;;  %v2241_v12 = vrot.slane %v1930_v6, 1  ;;  %v1195_v46 = vshll.u32 %v4304_v48, 16 }
  0xf4   : > { %v2330_v51 = vsel %vm829_vm4, %v2298_v59, %v4218_v41  ;;  %v580_v4 = vrot.slane %v578_v14, 1  ;;  %v585_v6 = vrot.slane %v583_v3, 1 }
  0xf5   : > { %v789_v58 = vpop.permute.xlu1 %788  ;;  %3119 = vmatmul.msk.bf16.gmra.mxu2 %vm1484_vm5, %v2330_v51  ;;  %v2109_v20 = vor.u32 %v2108_v49, %v2104_v2  ;;  %v2242_v51 = vsel %vm715_vm0, %v2240_v63, %v2241_v12  ;;  %v1197_v57 = vrot.slane %v1195_v46, 1  ;;  %v3326_v49 = vor.u32 %v3325_v27, %v3324_v25  ;;  %v4358_v25 = vld [vmem:[%s3507_s19 + $0x60] sm:$0xff]  }
  0xf6   : > { %v855_v41 = vsel %vm829_vm4, %v822_v55, %v789_v58  ;;  %v581_v35 = vor.u32 %v580_v4, %v576_v56  ;;  %v2300_v27 = vsel %vm796_vm3, %v4358_v25, %v4292_v37 }
  0xf7   : > { %3040 = vmatmul.msk.bf16.vlgmr.msrb.gmra.mxu3 %vm1484_vm5, %v855_v41  ;;  %1272 = vrot.lane.b32.xlu2 %v1191_v45, %s3462_s21  ;;  %v2114_v55 = vsel %vm442_vm1, %v2109_v20, %v2113_v24  ;;  %v3432_v41 = vld [vmem:[%s3507_s19 + $0x84] sm:$0xe]  ;;  %v2249_v20 = vrot.slane %v3326_v49, 1  ;;  %v2250_v24 = vrot.slane %v4271_v26, 1 }
  0xf8   : > { %784 = vrot.lane.b32.xlu0 %v748_v23, %s3461_s20  ;;  %v2073_v23 = vor.u32 %v2072_v1, %v2068_v29  ;;  %v1202_v29 = vrot.slane %v1200_v47, 1  ;;  %v2118_v1 = vshll.u32 %v4308_v42, 16  ;;  %v3433_v26 = vor.u32 %v3432_v41, %v4250_v38 }
  0xf9   : > { %v4326_v59 = vpop.permute.xlu2 %647 }
  0xfa   : > { %v646_v54 = vpop.permute.xlu0 %645  ;;  %v2078_v58 = vsel %vm442_vm1, %v2073_v23, %v2077_v28  ;;  %v2120_v46 = vrot.slane %v2118_v1, 1  ;;  %v2251_v23 = vsel %vm715_vm0, %v2249_v20, %v2250_v24  ;;  %v810_v41 = vsel %vm796_vm3, %v4194_v53, %v4326_v59 }
  0xfb   : > { %v808_v22 = vsel %vm796_vm3, %v3759_v17, %v646_v54  ;;  %1400 = vrot.lane.b32.xlu1 %v1364_v30, %s3461_s20  ;;  %v3091_v17 = vld [vmem:[%s3507_s19 + $0xd4] sm:$0x1]  ;;  %v3287_v30 = vld [vmem:[%s3507_s19 + $0x90] sm:$0xe]  ;;  %v586_v54 = vsel %vm442_vm1, %v581_v35, %v585_v6 }
  0xfc   : > { %v841_v11 = vsel %vm829_vm4, %v808_v22, %v4255_v15  ;;  %v1193_v15 = vshrl.u32 %v4304_v48, 16  ;;  %v1918_v2 = vunpack.c.l.b16 %v3091_v17  ;;  %v3288_v63 = vor.u32 %v3287_v30, %v3286_v62 }
  0xfd   : > { %v1263_v44 = vpop.permute.xlu1 %1262  ;;  %3033 = vmatmul.msk.bf16.gmra.mxu1 %vm1484_vm5, %v841_v11  ;;  %v2116_v22 = vshrl.u32 %v4308_v42, 16 }
  0xfe   : > { %v1423_v19 = vsel %vm796_vm3, %v4194_v53, %v1263_v44  ;;  %v1198_v45 = vor.u32 %v1197_v57, %v1193_v15  ;;  %v1934_v16 = vpack.c.b16 %v1918_v2, %v1918_v2  ;;  %v1365_v28 = vrot.slane %v3288_v63, 1 }
  0xff   : > { %2149 = vrot.lane.b32.xlu2 %v2078_v58, %s3462_s21  ;;  %v1366_v44 = vrot.slane %v4315_v39, 1  ;;  %v749_v15 = vrot.slane %v3433_v26, 1  ;;  %v750_v39 = vrot.slane %v4296_v43, 1 }
 0x100   : > { %2155 = vrot.lane.b32.xlu0 %v2114_v55, %s3462_s21  ;;  %v1203_v3 = vsel %vm442_vm1, %v1198_v45, %v1202_v29  ;;  %v2123_v4 = vshll.u32 %v1934_v16, 16  ;;  %v3435_v55 = vld [vmem:[%s3507_s19 + $0xcc] sm:$0xe]  ;;  %v2253_v30 = vrot.slane %v1934_v16, 1 }
 0x101   : > { %v1393_v56 = vpop.permute.xlu2 %1392  ;;  %v1367_v47 = vsel %vm715_vm0, %v1365_v28, %v1366_v44  ;;  %v751_v2 = vsel %vm715_vm0, %v749_v15, %v750_v39  ;;  %v3436_v49 = vor.u32 %v3435_v55, %v4311_v32 }
 0x102   : > { %v1391_v60 = vpop.permute.xlu0 %1390  ;;  %v2125_v38 = vrot.slane %v2123_v4, 1 }
 0x103   : > { %2277 = vrot.lane.b32.xlu1 %v2242_v51, %s3461_s20  ;;  %v1455_v14 = vsel %vm829_vm4, %v1423_v19, %v1391_v60  ;;  %v2121_v51 = vor.u32 %v2120_v46, %v2116_v22  ;;  %v2252_v62 = vrot.slane %v3436_v49, 1 }
 0x104   : > { %3013 = vmatmul.msk.bf16.gmra.mxu0 %vm1484_vm5, %v1455_v14 }
 0x105   : > { %v662_v12 = vpop.permute.xlu1 %661  ;;  %v2126_v37 = vsel %vm442_vm1, %v2121_v51, %v2125_v38  ;;  %v2254_v20 = vsel %vm715_vm0, %v2252_v62, %v2253_v30 }
 0x106   : > { %v824_v11 = vsel %vm796_vm3, %v3804_v8, %v662_v12 }
 0x107   : > { %2283 = vrot.lane.b32.xlu2 %v2251_v23, %s3461_s20 }
 0x108   : > { %657 = vrot.lane.b32.xlu0 %v586_v54, %s3462_s21 }
 0x109   : > { %v793_v58 = vpop.permute.xlu2 %792 }
 0x10a   : > { %v791_v17 = vpop.permute.xlu0 %790 }
 0x10b   : > { %1274 = vrot.lane.b32.xlu1 %v1203_v3, %s3462_s21  ;;  %v857_v8 = vsel %vm829_vm4, %v824_v11, %v791_v17 }
 0x10c   : > { %3041 = vmatmul.msk.bf16.gmra.mxu3 %vm1484_vm5, %v857_v8 }
 0x10d   : > { %v2268_v57 = vpop.permute.xlu1 %2267  ;;  %v1659_v6 = vpop.f32.mrf.mxu1 }
 0x10e   : > { %v2332_v19 = vsel %vm829_vm4, %v2300_v27, %v2268_v57 }
 0x10f   : > { %3120 = vmatmul.msk.bf16.gmra.mxu2 %vm1484_vm5, %v2332_v19  ;;  %786 = vrot.lane.b32.xlu2 %v751_v2, %s3461_s20 }
 0x110   : > { %1402 = vrot.lane.b32.xlu0 %v1367_v47, %s3461_s20 }
 0x111   : > { %v1267_v45 = vpop.permute.xlu2 %1266 }
 0x112   : > { %v1265_v35 = vpop.permute.xlu0 %1264 }
 0x113   : > { %v1425_v43 = vsel %vm796_vm3, %v3843_v61, %v1265_v35  ;;  %2157 = vrot.lane.b32.xlu1 %v2126_v37, %s3462_s21  ;;  %v1427_v37 = vsel %vm796_vm3, %v4358_v25, %v1267_v45 }
 0x114   : > { %v1457_v60 = vsel %vm829_vm4, %v1425_v43, %v1393_v56 }
 0x115   : > { %v1530_v14 = vpop.f32.mrf.mxu0  ;;  %3014 = vmatmul.msk.bf16.gmra.mxu0 %vm1484_vm5, %v1457_v60  ;;  %v777_v32 = vpop.permute.xlu1 %776 }
 0x116   : > { %v1660_v29 = vadd.f32 %v1659_v6, %v1530_v14  ;;  %v843_v61 = vsel %vm829_vm4, %v810_v41, %v777_v32  ;;  %v1661_v54 = vpop.f32.mrf.mxu1 }
 0x117   : > { %3034 = vmatmul.msk.bf16.gmra.mxu1 %vm1484_vm5, %v843_v61  ;;  %2285 = vrot.lane.b32.xlu2 %v2254_v20, %s3461_s20 }
 0x118   : > { %v2403_v1 = vpop.f32.mrf.mxu2 }
 0x119   : > { %v2483_v24 = vadd.f32 %v2403_v1, %v1660_v29  ;;  %v666_v3 = vpop.permute.xlu2 %665 }
 0x11a   : > { %v664_v53 = vpop.permute.xlu0 %663  ;;  %v828_v29 = vsel %vm796_vm3, %v3986_v50, %v666_v3 }
 0x11b   : > { %v2515_v59 = vpack.c.bf16 %v2483_v24, %v2483_v24  ;;  %v826_v16 = vsel %vm796_vm3, %v4017_v31, %v664_v53  ;;  %v2649_v4 = vmul.f32 %v2483_v24, %v2483_v24  ;;  %v2580_v23 = vsel %vm796_vm3, %v2483_v24, 0.0 }
 0x11c   : > { %v859_v12 = vsel %vm829_vm4, %v826_v16, %v793_v58 }
 0x11d   : > { %2548 = vst.msk [vmem:[%s4391_s10] sm:$0xf] %vm2547_vm6, %v2515_v59  ;;  %v1532_v63 = vpop.f32.mrf.mxu0  ;;  %3042 = vmatmul.msk.bf16.gmra.mxu3 %vm1484_vm5, %v859_v12  ;;  %v2142_v56 = vpop.permute.xlu1 %2141  ;;  %v2681_v8 = vsel %vm796_vm3, %v2649_v4, 0.0 }
 0x11e   : > { %v1662_v22 = vadd.f32 %v1661_v54, %v1532_v63  ;;  %v2302_v46 = vsel %vm796_vm3, %v3878_v52, %v2142_v56 }
 0x120   : > { %v2405_v11 = vpop.f32.mrf.mxu2 }
 0x121   : > { %v2484_v31 = vadd.f32 %v2405_v11, %v1662_v22  ;;  %v2272_v15 = vpop.permute.xlu2 %2271 }
 0x122   : > { %v2270_v26 = vpop.permute.xlu0 %2269 }
 0x123   : > { %v2516_v28 = vpack.c.bf16 %v2484_v31, %v2484_v31  ;;  %v2581_v44 = vsel %vm796_vm3, %v2484_v31, 0.0  ;;  %v2650_v55 = vmul.f32 %v2484_v31, %v2484_v31  ;;  %v2334_v17 = vsel %vm829_vm4, %v2302_v46, %v2270_v26 }
 0x124   : > { %v2582_v27 = vadd.f32 %v2581_v44, %v2580_v23  ;;  %3121 = vmatmul.msk.bf16.gmra.mxu2 %vm1484_vm5, %v2334_v17  ;;  %v4437_v23 = vpop.f32.mrf.mxu3 }
 0x125   : > { %2549 = vst.msk [vmem:[%s4391_s10 + $0x4] sm:$0xf] %vm2547_vm6, %v2516_v28  ;;  %v2682_v52 = vsel %vm796_vm3, %v2650_v55, 0.0  ;;  %v650_v38 = vpop.permute.xlu1 %649 }
 0x126   : > { %v2683_v51 = vadd.f32 %v2682_v52, %v2681_v8  ;;  %v812_v39 = vsel %vm796_vm3, %v3911_v13, %v650_v38 }
 0x128   : > { %v2408_v19 = vpop.f32.mrf.mxu2 }
 0x129   : > { %v1664_v57 = vpop.f32.mrf.mxu1  ;;  %v781_v6 = vpop.permute.xlu2 %780 }
 0x12a   : > { %v779_v47 = vpop.permute.xlu0 %778 }
 0x12b   : > { %v845_v58 = vsel %vm829_vm4, %v812_v39, %v779_v47 }
 0x12c   : > { %v1535_v2 = vpop.f32.mrf.mxu0  ;;  %3035 = vmatmul.msk.bf16.gmra.mxu1 %vm1484_vm5, %v845_v58  ;;  %v4445_v47 = vpop.f32.mrf.mxu3 }
 0x12d   : > { %v1665_v49 = vadd.f32 %v1664_v57, %v1535_v2  ;;  %v1395_v35 = vpop.permute.xlu1 %1394 }
 0x12e   : > { %v1459_v41 = vsel %vm829_vm4, %v1427_v37, %v1395_v35 }
 0x12f   : > { %v2485_v43 = vadd.f32 %v2408_v19, %v1665_v49  ;;  %3015 = vmatmul.msk.bf16.gmra.mxu0 %vm1484_vm5, %v1459_v41 }
 0x130   : > { %v2410_v53 = vpop.f32.mrf.mxu2 }
 0x131   : > { %v2517_v13 = vpack.c.bf16 %v2485_v43, %v2485_v43  ;;  %v2583_v60 = vsel %vm796_vm3, %v2485_v43, 0.0  ;;  %v2651_v62 = vmul.f32 %v2485_v43, %v2485_v43  ;;  %v1666_v1 = vpop.f32.mrf.mxu1  ;;  %v2152_v12 = vpop.permute.xlu2 %2151 }
 0x132   : > { %v2584_v30 = vadd.f32 %v2583_v60, %v2582_v27  ;;  %v2144_v14 = vpop.permute.xlu0 %2143  ;;  %v2312_v60 = vsel %vm796_vm3, %v4110_v10, %v2152_v12 }
 0x133   : > { %2550 = vst.msk [vmem:[%s4391_s10 + $0x8] sm:$0xf] %vm2547_vm6, %v2517_v13  ;;  %v2684_v32 = vsel %vm796_vm3, %v2651_v62, 0.0  ;;  %v2304_v45 = vsel %vm796_vm3, %v3998_v7, %v2144_v14 }
 0x134   : > { %v2685_v61 = vadd.f32 %v2684_v32, %v2683_v51  ;;  %v1537_v20 = vpop.f32.mrf.mxu0  ;;  %v2336_v24 = vsel %vm829_vm4, %v2304_v45, %v2272_v15 }
 0x135   : > { %v1667_v59 = vadd.f32 %v1666_v1, %v1537_v20  ;;  %3122 = vmatmul.msk.bf16.gmra.mxu2 %vm1484_vm5, %v2336_v24  ;;  %v795_v16 = vpop.permute.xlu1 %794 }
 0x136   : > { %v861_v63 = vsel %vm829_vm4, %v828_v29, %v795_v16 }
 0x137   : > { %v2486_v54 = vadd.f32 %v2410_v53, %v1667_v59  ;;  %3043 = vmatmul.msk.bf16.gmra.mxu3 %vm1484_vm5, %v861_v63  ;;  %v3364_v53 = vld [vmem:[%s3507_s19 + $0x78] sm:$0xff]  }
 0x138   : > { %v2413_v17 = vpop.f32.mrf.mxu2 }
 0x139   : > { %v2518_v7 = vpack.c.bf16 %v2486_v54, %v2486_v54  ;;  %v2585_v50 = vsel %vm796_vm3, %v2486_v54, 0.0  ;;  %v2652_v56 = vmul.f32 %v2486_v54, %v2486_v54  ;;  %v654_v28 = vpop.permute.xlu2 %653 }
 0x13a   : > { %v2586_v3 = vadd.f32 %v2585_v50, %v2584_v30  ;;  %v652_v22 = vpop.permute.xlu0 %651  ;;  %v1669_v44 = vpop.f32.mrf.mxu1  ;;  %v816_v12 = vsel %vm796_vm3, %v4123_v34, %v654_v28 }
 0x13b   : > { %2551 = vst.msk [vmem:[%s4391_s10 + $0xc] sm:$0xf] %vm2547_vm6, %v2518_v7  ;;  %v2686_v46 = vsel %vm796_vm3, %v2652_v56, 0.0  ;;  %v814_v11 = vsel %vm796_vm3, %v4358_v25, %v652_v22  ;;  %v4457_v45 = vpop.f32.mrf.mxu3 }
 0x13c   : > { %v2687_v4 = vadd.f32 %v2686_v46, %v2685_v61  ;;  %v847_v31 = vsel %vm829_vm4, %v814_v11, %v781_v6 }
 0x13d   : > { %3036 = vmatmul.msk.bf16.gmra.mxu1 %vm1484_vm5, %v847_v31  ;;  %v1269_v26 = vpop.permute.xlu1 %1268 }
 0x13e   : > { %v1429_v55 = vsel %vm796_vm3, %v4008_v40, %v1269_v26 }
 0x140   : > { %v2415_v41 = vpop.f32.mrf.mxu2 }
 0x141   : > { %v1540_v27 = vpop.f32.mrf.mxu0  ;;  %v1399_v58 = vpop.permute.xlu2 %1398 }
 0x142   : > { %v1670_v8 = vadd.f32 %v1669_v44, %v1540_v27  ;;  %v1397_v52 = vpop.permute.xlu0 %1396  ;;  %v1671_v49 = vpop.f32.mrf.mxu1 }
 0x143   : > { %v1461_v25 = vsel %vm829_vm4, %v1429_v55, %v1397_v52  ;;  %v4472_v46 = vpop.f32.mrf.mxu3 }
 0x144   : > { %v2487_v51 = vadd.f32 %v2413_v17, %v1670_v8  ;;  %3016 = vmatmul.msk.bf16.gmra.mxu0 %vm1484_vm5, %v1461_v25 }
 0x145   : > { %v2146_v57 = vpop.permute.xlu1 %2145 }
 0x146   : > { %v2519_v38 = vpack.c.bf16 %v2487_v51, %v2487_v51  ;;  %v2587_v15 = vsel %vm796_vm3, %v2487_v51, 0.0  ;;  %v2653_v39 = vmul.f32 %v2487_v51, %v2487_v51  ;;  %v2306_v37 = vsel %vm796_vm3, %v4045_v18, %v2146_v57 }
 0x147   : > { %v2588_v19 = vadd.f32 %v2587_v15, %v2586_v3 }
 0x148   : > { %2552 = vst.msk [vmem:[%s4391_s10 + $0x10] sm:$0xf] %vm2547_vm6, %v2519_v38  ;;  %v2688_v40 = vsel %vm796_vm3, %v2653_v39, 0.0 }
 0x149   : > { %v2689_v2 = vadd.f32 %v2688_v40, %v2687_v4  ;;  %v1542_v35 = vpop.f32.mrf.mxu0  ;;  %v2276_v20 = vpop.permute.xlu2 %2275 }
 0x14a   : > { %v1672_v6 = vadd.f32 %v1671_v49, %v1542_v35  ;;  %v2274_v43 = vpop.permute.xlu0 %2273 }
 0x14b   : > { %v2338_v13 = vsel %vm829_vm4, %v2306_v37, %v2274_v43 }
 0x14c   : > { %v2488_v62 = vadd.f32 %v2415_v41, %v1672_v6  ;;  %3123 = vmatmul.msk.bf16.gmra.mxu2 %vm1484_vm5, %v2338_v13 }
 0x14d   : > { %v2280_v32 = vpop.permute.xlu1 %2279 }
 0x14e   : > { %v2520_v30 = vpack.c.bf16 %v2488_v62, %v2488_v62  ;;  %v2589_v14 = vsel %vm796_vm3, %v2488_v62, 0.0  ;;  %v2654_v18 = vmul.f32 %v2488_v62, %v2488_v62  ;;  %v2344_v61 = vsel %vm829_vm4, %v2312_v60, %v2280_v32 }
 0x14f   : > { %v2590_v29 = vadd.f32 %v2589_v14, %v2588_v19  ;;  %3126 = vmatmul.msk.bf16.vlgmr.msra.gmra.mxu3 %vm1484_vm5, %v2344_v61  ;;  %v4484_v57 = vpop.f32.mrf.mxu3 }
 0x150   : > { %2553 = vst.msk [vmem:[%s4391_s10 + $0x14] sm:$0xf] %vm2547_vm6, %v2520_v30  ;;  %v2690_v1 = vsel %vm796_vm3, %v2654_v18, 0.0 }
 0x151   : > { %v2691_v10 = vadd.f32 %v2690_v1, %v2689_v2  ;;  %v1273_v17 = vpop.permute.xlu2 %1272 }
 0x152   : > { %v1271_v24 = vpop.permute.xlu0 %1270  ;;  %v1545_v16 = vpop.f32.mrf.mxu0  ;;  %v1433_v30 = vsel %vm796_vm3, %v4206_v9, %v1273_v17 }
 0x153   : > { %v1431_v59 = vsel %vm796_vm3, %v3364_v53, %v1271_v24  ;;  %v2418_v54 = vpop.f32.mrf.mxu2 }
 0x154   : > { %v1674_v63 = vpop.f32.mrf.mxu1  ;;  %v1463_v7 = vsel %vm829_vm4, %v1431_v59, %v1399_v58 }
 0x155   : > { %v1675_v50 = vadd.f32 %v1674_v63, %v1545_v16  ;;  %3017 = vmatmul.msk.bf16.gmra.mxu0 %vm1484_vm5, %v1463_v7  ;;  %v783_v56 = vpop.permute.xlu1 %782 }
 0x156   : > { %v849_v22 = vsel %vm829_vm4, %v816_v12, %v783_v56 }
 0x157   : > { %v2489_v3 = vadd.f32 %v2418_v54, %v1675_v50  ;;  %3037 = vmatmul.msk.bf16.gmra.mxu1 %vm1484_vm5, %v849_v22  ;;  %v4493_v60 = vpop.f32.mrf.mxu3 }
 0x159   : > { %v2521_v11 = vpack.c.bf16 %v2489_v3, %v2489_v3  ;;  %v2591_v4 = vsel %vm796_vm3, %v2489_v3, 0.0  ;;  %v2655_v34 = vmul.f32 %v2489_v3, %v2489_v3  ;;  %v2150_v6 = vpop.permute.xlu2 %2149 }
 0x15a   : > { %v2592_v31 = vadd.f32 %v2591_v4, %v2590_v29  ;;  %v2148_v26 = vpop.permute.xlu0 %2147  ;;  %v1547_v55 = vpop.f32.mrf.mxu0  ;;  %v2310_v54 = vsel %vm796_vm3, %v4240_v5, %v2150_v6 }
 0x15b   : > { %2554 = vst.msk [vmem:[%s4391_s10 + $0x18] sm:$0xf] %vm2547_vm6, %v2521_v11  ;;  %v2692_v28 = vsel %vm796_vm3, %v2655_v34, 0.0  ;;  %v2308_v44 = vsel %vm796_vm3, %v4276_v21, %v2148_v26  ;;  %v2420_v51 = vpop.f32.mrf.mxu2 }
 0x15c   : > { %v2693_v27 = vadd.f32 %v2692_v28, %v2691_v10  ;;  %v1676_v8 = vpop.f32.mrf.mxu1  ;;  %v2340_v52 = vsel %vm829_vm4, %v2308_v44, %v2276_v20 }
 0x15d   : > { %v1677_v25 = vadd.f32 %v1676_v8, %v1547_v55  ;;  %3124 = vmatmul.msk.bf16.gmra.mxu2 %vm1484_vm5, %v2340_v52  ;;  %v2154_v38 = vpop.permute.xlu1 %2153 }
 0x15e   : > { %v2314_v39 = vsel %vm796_vm3, %v4139_v0, %v2154_v38 }
 0x15f   : > { %v2490_v15 = vadd.f32 %v2420_v51, %v1677_v25 }
 0x160   : > { %v4510_v3 = vpop.f32.mrf.mxu3 }
 0x161   : > { %v2522_v19 = vpack.c.bf16 %v2490_v15, %v2490_v15  ;;  %v2593_v21 = vsel %vm796_vm3, %v2490_v15, 0.0  ;;  %v2656_v58 = vmul.f32 %v2490_v15, %v2490_v15  ;;  %v2284_v10 = vpop.permute.xlu2 %2283 }
 0x162   : > { %v2594_v40 = vadd.f32 %v2593_v21, %v2592_v31  ;;  %v2282_v37 = vpop.permute.xlu0 %2281 }
 0x163   : > { %2555 = vst.msk [vmem:[%s4391_s10 + $0x1c] sm:$0xf] %vm2547_vm6, %v2522_v19  ;;  %v2694_v2 = vsel %vm796_vm3, %v2656_v58, 0.0  ;;  %v2346_v49 = vsel %vm829_vm4, %v2314_v39, %v2282_v37 }
 0x164   : > { %v2695_v35 = vadd.f32 %v2694_v2, %v2693_v27  ;;  %3127 = vmatmul.msk.bf16.gmra.mxu3 %vm1484_vm5, %v2346_v49 }
 0x165   : > { %v656_v43 = vpop.permute.xlu1 %655 }
 0x166   : > { %v818_v0 = vsel %vm796_vm3, %v3364_v53, %v656_v43 }
 0x167   : > { %v2423_v14 = vpop.f32.mrf.mxu2 }
 0x168   : > { %v4523_v38 = vpop.f32.mrf.mxu3 }
 0x169   : > { %v1679_v41 = vpop.f32.mrf.mxu1  ;;  %v787_v28 = vpop.permute.xlu2 %786 }
 0x16a   : > { %v785_v13 = vpop.permute.xlu0 %784 }
 0x16b   : > { %v851_v62 = vsel %vm829_vm4, %v818_v0, %v785_v13 }
 0x16c   : > { %v1550_v18 = vpop.f32.mrf.mxu0  ;;  %3038 = vmatmul.msk.bf16.gmra.mxu1 %vm1484_vm5, %v851_v62 }
 0x16d   : > { %v1680_v32 = vadd.f32 %v1679_v41, %v1550_v18  ;;  %v1401_v29 = vpop.permute.xlu1 %1400 }
 0x16e   : > { %v1465_v1 = vsel %vm829_vm4, %v1433_v30, %v1401_v29 }
 0x16f   : > { %v2491_v61 = vadd.f32 %v2423_v14, %v1680_v32  ;;  %3018 = vmatmul.msk.bf16.gmra.mxu0 %vm1484_vm5, %v1465_v1  ;;  %v2425_v11 = vpop.f32.mrf.mxu2 }
 0x171   : > { %v2523_v20 = vpack.c.bf16 %v2491_v61, %v2491_v61  ;;  %v2595_v24 = vsel %vm796_vm3, %v2491_v61, 0.0  ;;  %v2657_v53 = vmul.f32 %v2491_v61, %v2491_v61  ;;  %v1681_v7 = vpop.f32.mrf.mxu1  ;;  %v2286_v37 = vpop.permute.xlu2 %2285 }
 0x172   : > { %v2596_v59 = vadd.f32 %v2595_v24, %v2594_v40  ;;  %v2156_v16 = vpop.permute.xlu0 %2155 }
 0x173   : > { %2556 = vst.msk [vmem:[%s4391_s10 + $0x20] sm:$0xf] %vm2547_vm6, %v2523_v20  ;;  %v2696_v9 = vsel %vm796_vm3, %v2657_v53, 0.0  ;;  %v2316_v12 = vsel %vm796_vm3, %v4260_v36, %v2156_v16 }
 0x174   : > { %v2697_v63 = vadd.f32 %v2696_v9, %v2695_v35  ;;  %v1552_v50 = vpop.f32.mrf.mxu0  ;;  %v2348_v56 = vsel %vm829_vm4, %v2316_v12, %v2284_v10 }
 0x175   : > { %v1682_v22 = vadd.f32 %v1681_v7, %v1552_v50  ;;  %3128 = vmatmul.msk.bf16.gmra.mxu3 %vm1484_vm5, %v2348_v56  ;;  %v2278_v4 = vpop.permute.xlu1 %2277 }
 0x176   : > { %v2342_v31 = vsel %vm829_vm4, %v2310_v54, %v2278_v4 }
 0x177   : > { %v2492_v34 = vadd.f32 %v2425_v11, %v1682_v22  ;;  %3125 = vmatmul.msk.bf16.gmra.mxu2 %vm1484_vm5, %v2342_v31 }
 0x178   : > { %v2428_v39 = vpop.f32.mrf.mxu2 }
 0x179   : > { %v2524_v36 = vpack.c.bf16 %v2492_v34, %v2492_v34  ;;  %v2597_v5 = vsel %vm796_vm3, %v2492_v34, 0.0  ;;  %v2658_v26 = vmul.f32 %v2492_v34, %v2492_v34 }
 0x17a   : > { %v2598_v44 = vadd.f32 %v2597_v5, %v2596_v59  ;;  %v658_v55 = vpop.permute.xlu0 %657  ;;  %v1684_v51 = vpop.f32.mrf.mxu1 }
 0x17b   : > { %2557 = vst.msk [vmem:[%s4391_s10 + $0x24] sm:$0xf] %vm2547_vm6, %v2524_v36  ;;  %v2698_v17 = vsel %vm796_vm3, %v2658_v26, 0.0  ;;  %v820_v27 = vsel %vm796_vm3, %v4247_v33, %v658_v55  ;;  %v4532_v0 = vpop.f32.mrf.mxu3 }
 0x17c   : > { %v2699_v8 = vadd.f32 %v2698_v17, %v2697_v63  ;;  %v853_v52 = vsel %vm829_vm4, %v820_v27, %v787_v28 }
 0x17d   : > { %3039 = vmatmul.msk.bf16.gmra.mxu1 %vm1484_vm5, %v853_v52  ;;  %v1275_v25 = vpop.permute.xlu1 %1274 }
 0x17e   : > { %v1435_v15 = vsel %vm796_vm3, %v4304_v48, %v1275_v25 }
 0x180   : > { %v2430_v32 = vpop.f32.mrf.mxu2 }
 0x181   : > { %v1555_v19 = vpop.f32.mrf.mxu0 }
 0x182   : > { %v1685_v21 = vadd.f32 %v1684_v51, %v1555_v19  ;;  %v1403_v58 = vpop.permute.xlu0 %1402  ;;  %v1686_v30 = vpop.f32.mrf.mxu1 }
 0x183   : > { %v1467_v40 = vsel %vm829_vm4, %v1435_v15, %v1403_v58  ;;  %v4543_v59 = vpop.f32.mrf.mxu3 }
 0x184   : > { %v2493_v33 = vadd.f32 %v2428_v39, %v1685_v21  ;;  %3019 = vmatmul.msk.bf16.gmra.mxu0 %vm1484_vm5, %v1467_v40 }
 0x185   : > { %v2158_v6 = vpop.permute.xlu1 %2157 }
 0x186   : > { %v2525_v2 = vpack.c.bf16 %v2493_v33, %v2493_v33  ;;  %v2599_v49 = vsel %vm796_vm3, %v2493_v33, 0.0  ;;  %v2659_v35 = vmul.f32 %v2493_v33, %v2493_v33  ;;  %v2318_v48 = vsel %vm796_vm3, %v4308_v42, %v2158_v6 }
 0x187   : > { %v2600_v43 = vadd.f32 %v2599_v49, %v2598_v44  ;;  %v2350_v13 = vsel %vm829_vm4, %v2318_v48, %v2286_v37 }
 0x188   : > { %2558 = vst.msk [vmem:[%s4391_s10 + $0x28] sm:$0xf] %vm2547_vm6, %v2525_v2  ;;  %v2700_v41 = vsel %vm796_vm3, %v2659_v35, 0.0  ;;  %3129 = vmatmul.msk.bf16.gmra.mxu3 %vm1484_vm5, %v2350_v13 }
 0x189   : > { %v2701_v62 = vadd.f32 %v2700_v41, %v2699_v8  ;;  %v1557_v14 = vpop.f32.mrf.mxu0 }
 0x18a   : > { %v1687_v18 = vadd.f32 %v1686_v30, %v1557_v14 }
 0x18c   : > { %v2494_v29 = vadd.f32 %v2430_v32, %v1687_v18 }
 0x18e   : > { %v2526_v61 = vpack.c.bf16 %v2494_v29, %v2494_v29  ;;  %v2601_v42 = vsel %vm796_vm3, %v2494_v29, 0.0  ;;  %v2660_v1 = vmul.f32 %v2494_v29, %v2494_v29 }
 0x18f   : > { %v2602_v10 = vadd.f32 %v2601_v42, %v2600_v43  ;;  %v4546_v56 = vpop.f32.mrf.mxu3 }
 0x190   : > { %2559 = vst.msk [vmem:[%s4391_s10 + $0x2c] sm:$0xf] %vm2547_vm6, %v2526_v61  ;;  %v2702_v20 = vsel %vm796_vm3, %v2660_v1, 0.0 }
 0x191   : > { %v2703_v24 = vadd.f32 %v2702_v20, %v2701_v62 }
 0x192   : > { %v1560_v53 = vpop.f32.mrf.mxu0  ;;  %v2433_v16 = vpop.f32.mrf.mxu2 }
 0x194   : > { %v1689_v9 = vpop.f32.mrf.mxu1 }
 0x195   : > { %v1690_v12 = vadd.f32 %v1689_v9, %v1560_v53 }
 0x197   : > { %v2495_v54 = vadd.f32 %v2433_v16, %v1690_v12  ;;  %v4555_v8 = vpop.f32.mrf.mxu3 }
 0x199   : > { %v2527_v63 = vpack.c.bf16 %v2495_v54, %v2495_v54  ;;  %v2603_v7 = vsel %vm796_vm3, %v2495_v54, 0.0  ;;  %v2661_v50 = vmul.f32 %v2495_v54, %v2495_v54 }
 0x19a   : > { %v2604_v22 = vadd.f32 %v2603_v7, %v2602_v10  ;;  %v1562_v11 = vpop.f32.mrf.mxu0  ;;  %v2435_v5 = vpop.f32.mrf.mxu2 }
 0x19b   : > { %2560 = vst.msk [vmem:[%s4391_s10 + $0x30] sm:$0xf] %vm2547_vm6, %v2527_v63  ;;  %v2704_v4 = vsel %vm796_vm3, %v2661_v50, 0.0 }
 0x19c   : > { %v2705_v34 = vadd.f32 %v2704_v4, %v2703_v24  ;;  %v1691_v31 = vpop.f32.mrf.mxu1 }
 0x19d   : > { %v1692_v36 = vadd.f32 %v1691_v31, %v1562_v11 }
 0x19f   : > { %v2496_v26 = vadd.f32 %v2435_v5, %v1692_v36 }
 0x1a0   : > { %v4557_v19 = vpop.f32.mrf.mxu3 }
 0x1a1   : > { %v2528_v28 = vpack.c.bf16 %v2496_v26, %v2496_v26  ;;  %v2605_v44 = vsel %vm796_vm3, %v2496_v26, 0.0  ;;  %v2662_v55 = vmul.f32 %v2496_v26, %v2496_v26 }
 0x1a2   : > { %v2606_v17 = vadd.f32 %v2605_v44, %v2604_v22  ;;  %v1720_v22 = vadd.f32 %v4532_v0, %v4437_v23  ;;  %v1722_v44 = vadd.f32 %v4543_v59, %v4445_v47  ;;  %v1725_v47 = vadd.f32 %v4546_v56, %v4457_v45 }
 0x1a3   : > { %2561 = vst.msk [vmem:[%s4391_s10 + $0x34] sm:$0xf] %vm2547_vm6, %v2528_v28  ;;  %v2706_v27 = vsel %vm796_vm3, %v2662_v55, 0.0 }
 0x1a4   : > { %v2707_v52 = vadd.f32 %v2706_v27, %v2705_v34 }
 0x1a7   : > { %v2438_v51 = vpop.f32.mrf.mxu2 }
 0x1a8   : > { %v4563_v13 = vpop.f32.mrf.mxu3 }
 0x1a9   : > { %v1694_v25 = vpop.f32.mrf.mxu1 }
 0x1ac   : > { %v1565_v15 = vpop.f32.mrf.mxu0 }
 0x1ad   : > { %v1695_v39 = vadd.f32 %v1694_v25, %v1565_v15 }
 0x1af   : > { %v2497_v21 = vadd.f32 %v2438_v51, %v1695_v39  ;;  %v2440_v43 = vpop.f32.mrf.mxu2 }
 0x1b1   : > { %v2529_v58 = vpack.c.bf16 %v2497_v21, %v2497_v21  ;;  %v2607_v40 = vsel %vm796_vm3, %v2497_v21, 0.0  ;;  %v2663_v33 = vmul.f32 %v2497_v21, %v2497_v21  ;;  %v1696_v35 = vpop.f32.mrf.mxu1 }
 0x1b2   : > { %v2608_v37 = vadd.f32 %v2607_v40, %v2606_v17 }
 0x1b3   : > { %2562 = vst.msk [vmem:[%s4391_s10 + $0x38] sm:$0xf] %vm2547_vm6, %v2529_v58  ;;  %v2708_v2 = vsel %vm796_vm3, %v2663_v33, 0.0 }
 0x1b4   : > { %v2709_v49 = vadd.f32 %v2708_v2, %v2707_v52  ;;  %v1567_v6 = vpop.f32.mrf.mxu0  ;;  %v1727_v2 = vadd.f32 %v4555_v8, %v4472_v46  ;;  %v1730_v46 = vadd.f32 %v4557_v19, %v4484_v57  ;;  %v1732_v19 = vadd.f32 %v4563_v13, %v4493_v60 }
 0x1b5   : > { %v1697_v48 = vadd.f32 %v1696_v35, %v1567_v6 }
 0x1b7   : > { %v2498_v41 = vadd.f32 %v2440_v43, %v1697_v48 }
 0x1b8   : > { %v2443_v42 = vpop.f32.mrf.mxu2 }
 0x1b9   : > { %v2530_v62 = vpack.c.bf16 %v2498_v41, %v2498_v41  ;;  %v2609_v30 = vsel %vm796_vm3, %v2498_v41, 0.0  ;;  %v2664_v14 = vmul.f32 %v2498_v41, %v2498_v41 }
 0x1ba   : > { %v4566_v18 = vadd.f32 %v2609_v30, %v2608_v37  ;;  %v1699_v61 = vpop.f32.mrf.mxu1  ;;  %v4573_v1 = vpop.f32.mrf.mxu3 }
 0x1bb   : > { %2563 = vst.msk [vmem:[%s4391_s10 + $0x3c] sm:$0xf] %vm2547_vm6, %v2530_v62  ;;  %v2710_v32 = vsel %vm796_vm3, %v2664_v14, 0.0 }
 0x1bc   : > { %v4571_v29 = vadd.f32 %v2710_v32, %v2709_v49 }
 0x1c0   : > { %v2445_v54 = vpop.f32.mrf.mxu2 }
 0x1c1   : > { %v1570_v10 = vpop.f32.mrf.mxu0 }
 0x1c2   : > { %v1700_v20 = vadd.f32 %v1699_v61, %v1570_v10  ;;  %v1701_v16 = vpop.f32.mrf.mxu1  ;;  %v4581_v63 = vpop.f32.mrf.mxu3 }
 0x1c4   : > { %v4575_v24 = vadd.f32 %v2443_v42, %v1700_v20 }
 0x1c6   : > { %v2531_v53 = vpack.c.bf16 %v4575_v24, %v4575_v24  ;;  %v2665_v10 = vmul.f32 %v4575_v24, %v4575_v24  ;;  %v2611_v20 = vsel %vm796_vm3, %v4575_v24, 0.0 }
 0x1c8   : > { %2564 = vst.msk [vmem:[%s4391_s10 + $0x40] sm:$0xf] %vm2547_vm6, %v2531_v53 }
 0x1c9   : > { %v1572_v9 = vpop.f32.mrf.mxu0 }
 0x1ca   : > { %v1702_v12 = vadd.f32 %v1701_v16, %v1572_v9  ;;  %v2712_v16 = vsel %vm796_vm3, %v2665_v10, 0.0 }
 0x1cb   : > { %v2713_v13 = vadd.f32 %v2712_v16, %v4571_v29 }
 0x1cc   : > { %v2500_v7 = vadd.f32 %v2445_v54, %v1702_v12 }
 0x1ce   : > { %v2532_v50 = vpack.c.bf16 %v2500_v7, %v2500_v7  ;;  %v2666_v57 = vmul.f32 %v2500_v7, %v2500_v7  ;;  %v2613_v9 = vsel %vm796_vm3, %v2500_v7, 0.0 }
 0x1cf   : > { %v2448_v31 = vpop.f32.mrf.mxu2 }
 0x1d0   : > { %2565 = vst.msk [vmem:[%s4391_s10 + $0x44] sm:$0xf] %vm2547_vm6, %v2532_v50  ;;  %v2612_v50 = vadd.f32 %v2611_v20, %v4566_v18  ;;  %v2714_v24 = vsel %vm796_vm3, %v2666_v57, 0.0 }
 0x1d2   : > { %v1575_v11 = vpop.f32.mrf.mxu0  ;;  %v2463_v4 = vpop.f32.mrf.mxu3 }
 0x1d3   : > { %v4587_v34 = vadd.f32 %v2463_v4, %v1720_v22 }
 0x1d4   : > { %v1704_v36 = vpop.f32.mrf.mxu1 }
 0x1d5   : > { %v2539_v5 = vpack.c.bf16 %v4587_v34, %v4587_v34  ;;  %v1705_v26 = vadd.f32 %v1704_v36, %v1575_v11  ;;  %v2627_v57 = vsel %vm796_vm3, %v4587_v34, 0.0 }
 0x1d7   : > { %2572 = vst.msk [vmem:[%s4391_s10 + $0x60] sm:$0xf] %vm2547_vm6, %v2539_v5  ;;  %v2501_v28 = vadd.f32 %v2448_v31, %v1705_v26  ;;  %v2450_v51 = vpop.f32.mrf.mxu2  ;;  %v2614_v5 = vadd.f32 %v2613_v9, %v2612_v50 }
 0x1d9   : > { %v2533_v55 = vpack.c.bf16 %v2501_v28, %v2501_v28  ;;  %v2667_v12 = vmul.f32 %v2501_v28, %v2501_v28  ;;  %v2615_v31 = vsel %vm796_vm3, %v2501_v28, 0.0 }
 0x1da   : > { %v2465_v23 = vpop.f32.mrf.mxu3  ;;  %v1577_v0 = vpop.f32.mrf.mxu0 }
 0x1db   : > { %2566 = vst.msk [vmem:[%s4391_s10 + $0x48] sm:$0xf] %vm2547_vm6, %v2533_v55  ;;  %v4597_v17 = vadd.f32 %v2465_v23, %v1722_v44  ;;  %v2716_v18 = vsel %vm796_vm3, %v2667_v12, 0.0  ;;  %v2715_v23 = vadd.f32 %v2714_v24, %v2713_v13 }
 0x1dc   : > { %v1706_v27 = vpop.f32.mrf.mxu1 }
 0x1dd   : > { %v2540_v52 = vpack.c.bf16 %v4597_v17, %v4597_v17  ;;  %v1707_v25 = vadd.f32 %v1706_v27, %v1577_v0  ;;  %v2616_v0 = vadd.f32 %v2615_v31, %v2614_v5 }
 0x1df   : > { %2573 = vst.msk [vmem:[%s4391_s10 + $0x64] sm:$0xf] %vm2547_vm6, %v2540_v52  ;;  %v2502_v15 = vadd.f32 %v2450_v51, %v1707_v25  ;;  %v2717_v25 = vadd.f32 %v2716_v18, %v2715_v23 }
 0x1e0   : > { %v2453_v33 = vpop.f32.mrf.mxu2 }
 0x1e1   : > { %v2534_v39 = vpack.c.bf16 %v2502_v15, %v2502_v15  ;;  %v2668_v36 = vmul.f32 %v2502_v15, %v2502_v15  ;;  %v2617_v26 = vsel %vm796_vm3, %v2502_v15, 0.0 }
 0x1e2   : > { %v2618_v51 = vadd.f32 %v2617_v26, %v2616_v0 }
 0x1e3   : > { %2567 = vst.msk [vmem:[%s4391_s10 + $0x4c] sm:$0xf] %vm2547_vm6, %v2534_v39  ;;  %v2718_v28 = vsel %vm796_vm3, %v2668_v36, 0.0 }
 0x1e7   : > { %v2468_v59 = vpop.f32.mrf.mxu3 }
 0x1e8   : > { %v4607_v21 = vadd.f32 %v2468_v59, %v1725_v47  ;;  %v2455_v8 = vpop.f32.mrf.mxu2  ;;  %v2719_v59 = vadd.f32 %v2718_v28, %v2717_v25 }
 0x1e9   : > { %v1709_v40 = vpop.f32.mrf.mxu1 }
 0x1ea   : > { %v2541_v58 = vpack.c.bf16 %v4607_v21, %v4607_v21  ;;  %v2675_v50 = vmul.f32 %v4607_v21, %v4607_v21  ;;  %v2631_v31 = vsel %vm796_vm3, %v4607_v21, 0.0 }
 0x1ec   : > { %2574 = vst.msk [vmem:[%s4391_s10 + $0x68] sm:$0xf] %vm2547_vm6, %v2541_v58  ;;  %v1580_v37 = vpop.f32.mrf.mxu0 }
 0x1ed   : > { %v1710_v49 = vadd.f32 %v1709_v40, %v1580_v37 }
 0x1ef   : > { %v2470_v35 = vpop.f32.mrf.mxu3  ;;  %v2503_v6 = vadd.f32 %v2453_v33, %v1710_v49 }
 0x1f0   : > { %v4615_v43 = vadd.f32 %v2470_v35, %v1727_v2  ;;  %v1735_v35 = vadd.f32 %v4573_v1, %v4510_v3 }
 0x1f1   : > { %v2535_v45 = vpack.c.bf16 %v2503_v6, %v2503_v6  ;;  %v1711_v48 = vpop.f32.mrf.mxu1  ;;  %v2669_v44 = vmul.f32 %v2503_v6, %v2503_v6  ;;  %v2619_v27 = vsel %vm796_vm3, %v2503_v6, 0.0 }
 0x1f2   : > { %v2542_v56 = vpack.c.bf16 %v4615_v43, %v4615_v43  ;;  %v2620_v58 = vadd.f32 %v2619_v27, %v2618_v51  ;;  %v2676_v36 = vmul.f32 %v4615_v43, %v4615_v43 }
 0x1f3   : > { %2568 = vst.msk [vmem:[%s4391_s10 + $0x50] sm:$0xf] %vm2547_vm6, %v2535_v45  ;;  %v2720_v39 = vsel %vm796_vm3, %v2669_v44, 0.0 }
 0x1f4   : > { %2575 = vst.msk [vmem:[%s4391_s10 + $0x6c] sm:$0xf] %vm2547_vm6, %v2542_v56  ;;  %v1582_v41 = vpop.f32.mrf.mxu0  ;;  %v2721_v6 = vadd.f32 %v2720_v39, %v2719_v59  ;;  %v2734_v21 = vsel %vm796_vm3, %v2676_v36, 0.0 }
 0x1f5   : > { %v1712_v62 = vadd.f32 %v1711_v48, %v1582_v41 }
 0x1f7   : > { %v2504_v30 = vadd.f32 %v2455_v8, %v1712_v62 }
 0x1f8   : > { %v2473_v14 = vpop.f32.mrf.mxu3 }
 0x1f9   : > { %v4625_v32 = vadd.f32 %v2473_v14, %v1730_v46  ;;  %v2536_v61 = vpack.c.bf16 %v2504_v30, %v2504_v30  ;;  %v2670_v29 = vmul.f32 %v2504_v30, %v2504_v30  ;;  %v2621_v47 = vsel %vm796_vm3, %v2504_v30, 0.0 }
 0x1fa   : > { %v1714_v53 = vpop.f32.mrf.mxu1  ;;  %v2458_v22 = vpop.f32.mrf.mxu2  ;;  %v2622_v45 = vadd.f32 %v2621_v47, %v2620_v58  ;;  %v2673_v14 = vmul.f32 %v4587_v34, %v4587_v34  ;;  %v1737_v34 = vadd.f32 %v4581_v63, %v4523_v38  ;;  %v2633_v38 = vsel %vm796_vm3, %v4615_v43, 0.0 }
 0x1fb   : > { %v2543_v42 = vpack.c.bf16 %v4625_v32, %v4625_v32  ;;  %2569 = vst.msk [vmem:[%s4391_s10 + $0x54] sm:$0xf] %vm2547_vm6, %v2536_v61  ;;  %v2722_v37 = vsel %vm796_vm3, %v2670_v29, 0.0  ;;  %v2677_v63 = vmul.f32 %v4625_v32, %v4625_v32 }
 0x1fc   : > { %v2723_v46 = vadd.f32 %v2722_v37, %v2721_v6  ;;  %v2728_v12 = vsel %vm796_vm3, %v2673_v14, 0.0 }
 0x1fd   : > { %2576 = vst.msk [vmem:[%s4391_s10 + $0x70] sm:$0xf] %vm2547_vm6, %v2543_v42  ;;  %v2736_v43 = vsel %vm796_vm3, %v2677_v63, 0.0 }
 0x200   : > { %v2475_v54 = vpop.f32.mrf.mxu3 }
 0x201   : > { %v4642_v11 = vadd.f32 %v2475_v54, %v1732_v19  ;;  %v1585_v4 = vpop.f32.mrf.mxu0  ;;  %v2674_v19 = vmul.f32 %v4597_v17, %v4597_v17  ;;  %v2629_v54 = vsel %vm796_vm3, %v4597_v17, 0.0 }
 0x202   : > { %v1715_v60 = vadd.f32 %v1714_v53, %v1585_v4  ;;  %v1716_v40 = vpop.f32.mrf.mxu1  ;;  %v2460_v56 = vpop.f32.mrf.mxu2 }
 0x203   : > { %v2544_v7 = vpack.c.bf16 %v4642_v11, %v4642_v11  ;;  %v2730_v24 = vsel %vm796_vm3, %v2674_v19, 0.0  ;;  %v2678_v23 = vmul.f32 %v4642_v11, %v4642_v11  ;;  %v2637_v27 = vsel %vm796_vm3, %v4642_v11, 0.0 }
 0x204   : > { %v2505_v55 = vadd.f32 %v2458_v22, %v1715_v60 }
 0x205   : > { %2577 = vst.msk [vmem:[%s4391_s10 + $0x74] sm:$0xf] %vm2547_vm6, %v2544_v7  ;;  %v2732_v7 = vsel %vm796_vm3, %v2675_v50, 0.0  ;;  %v2738_v51 = vsel %vm796_vm3, %v2678_v23, 0.0 }
 0x206   : > { %v2537_v52 = vpack.c.bf16 %v2505_v55, %v2505_v55  ;;  %v2671_v15 = vmul.f32 %v2505_v55, %v2505_v55  ;;  %v2623_v2 = vsel %vm796_vm3, %v2505_v55, 0.0  ;;  %v2635_v55 = vsel %vm796_vm3, %v4625_v32, 0.0 }
 0x207   : > { %v2624_v8 = vadd.f32 %v2623_v2, %v2622_v45 }
 0x208   : > { %2570 = vst.msk [vmem:[%s4391_s10 + $0x58] sm:$0xf] %vm2547_vm6, %v2537_v52  ;;  %v2724_v48 = vsel %vm796_vm3, %v2671_v15, 0.0 }
 0x209   : > { %v1587_v33 = vpop.f32.mrf.mxu0  ;;  %v2725_v3 = vadd.f32 %v2724_v48, %v2723_v46 }
 0x20a   : > { %v1717_v49 = vadd.f32 %v1716_v40, %v1587_v33 }
 0x20b   : > { %v2478_v62 = vpop.f32.mrf.mxu3 }
 0x20c   : > { %v2506_v41 = vadd.f32 %v2460_v56, %v1717_v49  ;;  %v2513_v30 = vadd.f32 %v2478_v62, %v1735_v35 }
 0x20e   : > { %v2538_v61 = vpack.c.bf16 %v2506_v41, %v2506_v41  ;;  %v2625_v42 = vsel %vm796_vm3, %v2506_v41, 0.0  ;;  %v2672_v10 = vmul.f32 %v2506_v41, %v2506_v41  ;;  %v2545_v20 = vpack.c.bf16 %v2513_v30, %v2513_v30 }
 0x20f   : > { %v2626_v1 = vadd.f32 %v2625_v42, %v2624_v8  ;;  %v2679_v29 = vmul.f32 %v2513_v30, %v2513_v30  ;;  %v2639_v32 = vsel %vm796_vm3, %v2513_v30, 0.0 }
 0x210   : > { %2571 = vst.msk [vmem:[%s4391_s10 + $0x5c] sm:$0xf] %vm2547_vm6, %v2538_v61  ;;  %v2726_v53 = vsel %vm796_vm3, %v2672_v10, 0.0 }
 0x211   : > { %v2628_v16 = vadd.f32 %v2627_v57, %v2626_v1  ;;  %v2727_v9 = vadd.f32 %v2726_v53, %v2725_v3  ;;  %2578 = vst.msk [vmem:[%s4391_s10 + $0x78] sm:$0xf] %vm2547_vm6, %v2545_v20  ;;  %v2740_v59 = vsel %vm796_vm3, %v2679_v29, 0.0 }
 0x213   : > { %v2630_v22 = vadd.f32 %v2629_v54, %v2628_v16  ;;  %v2729_v4 = vadd.f32 %v2728_v12, %v2727_v9  ;;  %v2480_v60 = vpop.f32.mrf.mxu3 }
 0x214   : > { %v2514_v5 = vadd.f32 %v2480_v60, %v1737_v34 }
 0x215   : > { %v2731_v13 = vadd.f32 %v2730_v24, %v2729_v4  ;;  %v2632_v17 = vadd.f32 %v2631_v31, %v2630_v22 }
 0x216   : > { %v2546_v44 = vpack.c.bf16 %v2514_v5, %v2514_v5  ;;  %v2680_v39 = vmul.f32 %v2514_v5, %v2514_v5  ;;  %v2641_v58 = vsel %vm796_vm3, %v2514_v5, 0.0 }
 0x217   : > { %v2634_v18 = vadd.f32 %v2633_v38, %v2632_v17  ;;  %v2733_v26 = vadd.f32 %v2732_v7, %v2731_v13 }
 0x218   : > { %2579 = vst.msk [vmem:[%s4391_s10 + $0x7c] sm:$0xf] %vm2547_vm6, %v2546_v44  ;;  %v2742_v37 = vsel %vm796_vm3, %v2680_v39, 0.0 }
 0x219   : > { %v2636_v0 = vadd.f32 %v2635_v55, %v2634_v18  ;;  %v2735_v28 = vadd.f32 %v2734_v21, %v2733_v26 }
 0x21b   : > { %v2638_v52 = vadd.f32 %v2637_v27, %v2636_v0  ;;  %v2737_v25 = vadd.f32 %v2736_v43, %v2735_v28 }
 0x21d   : > { %v2640_v47 = vadd.f32 %v2639_v32, %v2638_v52  ;;  %v2739_v15 = vadd.f32 %v2738_v51, %v2737_v25 }
 0x21f   : > { %v2741_v40 = vadd.f32 %v2740_v59, %v2739_v15  ;;  %v2642_v33 = vadd.f32 %v2641_v58, %v2640_v47 }
 0x221   : > { %v2643_v11 = vrot.slane %v2642_v33, 4  ;;  %v2743_v2 = vadd.f32 %v2742_v37, %v2741_v40 }
 0x223   : > { %v2644_v49 = vadd.f32 %v2643_v11, %v2642_v33  ;;  %v2744_v35 = vrot.slane %v2743_v2, 4 }
 0x225   : > { %v2645_v6 = vrot.slane %v2644_v49, 2  ;;  %v2745_v45 = vadd.f32 %v2744_v35, %v2743_v2 }
 0x227   : > { %v2646_v56 = vadd.f32 %v2645_v6, %v2644_v49  ;;  %v2746_v48 = vrot.slane %v2745_v45, 2 }
 0x229   : > { %v2647_v41 = vrot.slane %v2646_v56, 1  ;;  %v2747_v62 = vadd.f32 %v2746_v48, %v2745_v45 }
 0x22b   : > { %v2648_v46 = vadd.f32 %v2647_v41, %v2646_v56  ;;  %v2748_v8 = vrot.slane %v2747_v62, 1 }
 0x22d   : > { %v2749_v30 = vadd.f32 %v2748_v8, %v2747_v62  ;;  %2755 = vst.msk [vmem:[%s244_s18] sm:$0x1] %vm2754_vm7, %v2648_v46 }
 0x22f   : > { %2756 = vst.msk [vmem:[%s244_s18 + $0x1] sm:$0x1] %vm2754_vm7, %v2749_v30 }
 0x230 PF: > { %s14_s14 = sadd.s32 1, %s3459_s14   ;;  %s4725_s12 = smov %s3455_s13 }
 0x231   : > { %p11_p5 = scmp.ge.s32.totalorder %s14_s14, 4   ;;  %s4726_s13 = smov %s4728_s15 }
 0x233   :  { %13 = sbr.rel (!%p11_p5) target bundleno = 2 (0x2), region = 86 }

// kernel: residual_forward.4
= control target key start
LH: loop header
LB: loop body
LE: loop exit
PB: predicated region body
PF: predicated region fallthrough
CT: control target
= control target key end

     0   :  { %s4373_s18 = smov 0   ;;  %s4375_s19 = smov 0   ;;  %s6162_s0 = inlined_call_operand.vmem [shape: bf16[2,18,18,4], index: 0, kind: input, shape index: {}]   ;;  %s6163_s1 = inlined_call_operand.vmem [shape: f32[1,4], index: 1, kind: input, shape index: {}]   ;;  %s6164_s2 = inlined_call_operand.vmem [shape: f32[1,4], index: 2, kind: input, shape index: {}]   ;;  %s6165_s3 = inlined_call_operand.vmem [shape: bf16[3,12,4], index: 3, kind: input, shape index: {}]   ;;  %s6166_s4 = inlined_call_operand.vmem [shape: bf16[2,256,4], index: 4, kind: output, shape index: {0}]   ;;  %s6167_s5 = inlined_call_operand.vmem [shape: f32[2,2,4], index: 5, kind: output, shape index: {1}]  }
   0x1   :  { %s4377_s20 = smov 0  }
   0x2 LB: > { %s35_s21 = sadd.s32 1, %s4335_s19  ;;  %p3955_p0 = scmp.ge.s32.totalorder %s4339_s20, 1  ;;  %s4339_s20 = sphi %s4377_s20, %s16_s20   ;;  %s4335_s19 = sphi %s4375_s19, %s6169_s19   ;;  %s4331_s18 = sphi %s4373_s18, %s6168_s18  }
   0x3   : > { %p37_p1 = scmp.ge.s32.totalorder %s35_s21, 2  ;;  %p224_p2 = scmp.lt.s32.totalorder %s4339_s20, 3 }
   0x5   : > { %s6171_s21 = smov (%p37_p1, %s35_s21), 0  ;;  %p225_p3 = pnand %p3955_p0, %p224_p2 }
   0x6   : > { %p270_p4 = scmp.lt.s32.totalorder (!%p225_p3), %s4331_s18, 1  ;;  %s4341_s30 = smov (!%p225_p3), 8  }
   0x7   : > { %228 = sbr.rel (%p225_p3) target bundleno = 718 (0x2ce), region = 36  ;;  %s4342_s6 = smov (!%p225_p3), 4  }
   0xc   : > { %s6173_s18 = smov (!%p270_p4, %s4331_s18), 1  ;;  %v4402_v0 = vld [vmem:[%s6163_s1] ss:$0 sm:$0xff]  ;;  %vm1097_vm0 = vcmask 1046528   ;;  %vm824_vm1 = vsmask.f32 7424 }
   0xd   : > { %s4280_s22 = smul.u32 216, %s6173_s18  ;;  %v4407_v1 = vld [vmem:[%s6164_s2] ss:$0 sm:$0xff]  ;;  %vm2219_vm2 = vcmask 1045504   ;;  %vm1178_vm3 = vcmask 31744   ;;  %vm1211_vm4 = vcmask 64512  }
   0xe   : > { %vm2186_vm5 = vcmask 97280   ;;  %s4154_s13 = sshll.u32 %s6173_s18, 7  ;;  %vm3569_vm6 = vcmask 27648   ;;  %vm3776_vm7 = vcmask 24576  }
   0xf   : > { %s4397_s25 = scalar_lea.vmem %s6162_s0, %s4280_s22  ;;  %s5807_s16 = scalar_lea.vmem %s6166_s4, %s4154_s13 }
  0x10   : > { %v4269_v2 = vld [vmem:[%s4397_s25 + $0x18] sm:$0xff]   ;;  %v4098_v3 = vld [vmem:[%s4397_s25 + $0x20] sm:$0x1]  ;;  %v504_v10 = vld [vmem:[%s4397_s25 + $0x8] sm:$0x1] }
  0x11   : > { %v4114_v4 = vld [vmem:[%s4397_s25 + $0x18] sm:$0xe]  ;;  %v4225_v5 = vunpack.c.h.bf16 %v4269_v2  ;;  %v2653_v6 = vunpack.c.l.bf16 %v4098_v3  ;;  %v4224_v8 = vunpack.c.l.bf16 %v4269_v2  ;;  %v4159_v9 = vld [vmem:[%s4397_s25] sm:$0xff]   ;;  %v520_v14 = vunpack.c.l.bf16 %v504_v10  ;;  %v4099_v52 = vld [vmem:[%s4397_s25 + $0x2c] sm:$0x1] }
  0x12   : > { %v2749_v7 = vunpack.c.l.bf16 %v4114_v4  ;;  %v4068_v11 = vld [vmem:[%s4397_s25 + $0x24] sm:$0xff]   ;;  %v4160_v12 = vunpack.c.l.bf16 %v4159_v9  ;;  %v4161_v13 = vunpack.c.h.bf16 %v4159_v9  ;;  %v2654_v3 = vunpack.c.l.bf16 %v4099_v52 }
  0x13   : > { %v2479_v15 = vunpack.c.l.bf16 %v4068_v11  ;;  %v2510_v16 = vmul.f32 %v4402_v0, %v4225_v5  ;;  %v2669_v17 = vmul.f32 %v4402_v0, %v2653_v6  ;;  %v2509_v19 = vmul.f32 %v4402_v0, %v4224_v8  ;;  %v4115_v57 = vld [vmem:[%s4397_s25 + $0x24] sm:$0xe]  ;;  %v3960_v8 = vld [vmem:[%s4397_s25 + $0xc] sm:$0xff]  }
  0x14   : > { %v2765_v18 = vmul.f32 %v4402_v0, %v2749_v7  ;;  %v373_v20 = vmul.f32 %v4402_v0, %v4160_v12  ;;  %v374_v21 = vmul.f32 %v4402_v0, %v4161_v13  ;;  %v536_v22 = vmul.f32 %v4402_v0, %v520_v14  ;;  %v3992_v13 = vld [vmem:[%s4397_s25 + $0x14] sm:$0x1] }
  0x15   : > { %v2480_v23 = vunpack.c.h.bf16 %v4068_v11  ;;  %v2542_v24 = vadd.f32 %v4407_v1, %v2510_v16  ;;  %v2685_v25 = vadd.f32 %v4407_v1, %v2669_v17  ;;  %v2541_v27 = vadd.f32 %v4407_v1, %v2509_v19 }
  0x16   : > { %v2781_v26 = vadd.f32 %v4407_v1, %v2765_v18  ;;  %v408_v28 = vadd.f32 %v4407_v1, %v373_v20  ;;  %v409_v29 = vadd.f32 %v4407_v1, %v374_v21  ;;  %v552_v30 = vadd.f32 %v4407_v1, %v536_v22 }
  0x17   : > { %v2511_v31 = vmul.f32 %v4402_v0, %v2479_v15  ;;  %v2574_v32 = vmax.f32 %v2542_v24, 0.0  ;;  %v2701_v33 = vmax.f32 %v2685_v25, 0.0  ;;  %v2573_v35 = vmax.f32 %v2541_v27, 0.0 }
  0x18   : > { %v2797_v34 = vmax.f32 %v2781_v26, 0.0  ;;  %v440_v36 = vmax.f32 %v408_v28, 0.0  ;;  %v441_v37 = vmax.f32 %v409_v29, 0.0  ;;  %v568_v38 = vmax.f32 %v552_v30, 0.0 }
  0x19   : > { %v2512_v39 = vmul.f32 %v4402_v0, %v2480_v23  ;;  %v2606_v40 = vpack.c.bf16 %v2574_v32, %v2574_v32  ;;  %v2717_v41 = vpack.c.bf16 %v2701_v33, %v2701_v33  ;;  %v2605_v43 = vpack.c.bf16 %v2573_v35, %v2573_v35 }
  0x1a   : > { %v2813_v42 = vpack.c.bf16 %v2797_v34, %v2797_v34  ;;  %v472_v44 = vpack.c.bf16 %v440_v36, %v440_v36  ;;  %v4431_v45 = vpack.c.bf16 %v441_v37, %v441_v37  ;;  %v584_v46 = vpack.c.bf16 %v568_v38, %v568_v38 }
  0x1b   : > { %v2543_v47 = vadd.f32 %v4407_v1, %v2511_v31  ;;  %v4434_v48 = vunpack.c.l.b16 %v2606_v40  ;;  %v2925_v49 = vunpack.c.l.b16 %v2717_v41  ;;  %v2861_v51 = vunpack.c.l.b16 %v2605_v43 }
  0x1c   : > { %v3197_v50 = vunpack.c.l.b16 %v2813_v42  ;;  %v728_v53 = vunpack.c.l.b16 %v472_v44  ;;  %v729_v54 = vunpack.c.l.b16 %v4431_v45  ;;  %v792_v55 = vunpack.c.l.b16 %v584_v46  ;;  %v3984_v42 = vld [vmem:[%s4397_s25 + $0x9c] sm:$0xff]  }
  0x1d   : > { %v2544_v56 = vadd.f32 %v4407_v1, %v2512_v39  ;;  %v2941_v58 = vpack.c.b16 %v2925_v49, %v2925_v49  ;;  %v4442_v60 = vpack.c.b16 %v4434_v48, %v2861_v51  ;;  %v2575_v61 = vmax.f32 %v2543_v47, 0.0 }
  0x1e   : > { %v3213_v59 = vpack.c.b16 %v4434_v48, %v3197_v50  ;;  %v4446_v62 = vpack.c.b16 %v729_v54, %v728_v53  ;;  %v4448_v63 = vpack.c.b16 %v792_v55, %v792_v55  ;;  %v2750_v7 = vunpack.c.l.bf16 %v4115_v57 }
  0x1f   : > { %v2576_v2 = vmax.f32 %v2544_v56, 0.0  ;;  %v3230_v5 = vrot.slane %v2941_v58, 1  ;;  %v2607_v6 = vpack.c.bf16 %v2575_v61, %v2575_v61  ;;  %v2670_v15 = vmul.f32 %v4402_v0, %v2654_v3 }
  0x20   : > { %v3229_v4 = vrot.slane %v3213_v59, 1  ;;  %v826_v9 = vshrl.u32 %v4446_v62, 16  ;;  %v828_v10 = vshll.u32 %v4446_v62, 16  ;;  %v833_v11 = vshll.u32 %v4448_v63, 16 }
  0x21   : > { %v2608_v12 = vpack.c.bf16 %v2576_v2, %v2576_v2  ;;  %v2766_v16 = vmul.f32 %v4402_v0, %v2750_v7  ;;  %v2863_v17 = vunpack.c.l.b16 %v2607_v6  ;;  %v1282_v21 = vunpack.c.l.bf16 %v3960_v8  ;;  %v4004_v7 = vld [vmem:[%s4397_s25 + $0xa4] sm:$0x1] }
  0x22   : > { %v3231_v14 = vsel %vm1097_vm0, %v3229_v4, %v3230_v5  ;;  %v830_v18 = vrot.slane %v828_v10, 1  ;;  %v835_v19 = vrot.slane %v833_v11, 1  ;;  %v2686_v22 = vadd.f32 %v4407_v1, %v2670_v15 }
  0x23   : > { %3277 = vrot.lane.b32.xlu0 %v3231_v14, %s4341_s30  ;;  %v2864_v20 = vunpack.c.l.b16 %v2608_v12  ;;  %v2782_v23 = vadd.f32 %v4407_v1, %v2766_v16  ;;  %v1283_v24 = vunpack.c.h.bf16 %v3960_v8  ;;  %v1458_v25 = vunpack.c.l.bf16 %v3992_v13  ;;  %v600_v12 = vld [vmem:[%s4397_s25] sm:$0xe] }
  0x24   : > { %v831_v26 = vor.u32 %v830_v18, %v826_v9  ;;  %v1314_v28 = vmul.f32 %v4402_v0, %v1282_v21  ;;  %v2958_v29 = vshrl.u32 %v4442_v60, 16  ;;  %v2702_v30 = vmax.f32 %v2686_v22, 0.0 }
  0x25   : > { %v4461_v27 = vpack.c.b16 %v2864_v20, %v2863_v17  ;;  %v2798_v31 = vmax.f32 %v2782_v23, 0.0  ;;  %v1315_v32 = vmul.f32 %v4402_v0, %v1283_v24  ;;  %v1474_v33 = vmul.f32 %v4402_v0, %v1458_v25 }
  0x26   : > { %v836_v34 = vsel %vm824_vm1, %v831_v26, %v835_v19  ;;  %v1346_v35 = vadd.f32 %v4407_v1, %v1314_v28  ;;  %v2960_v36 = vshll.u32 %v4442_v60, 16  ;;  %v2965_v37 = vshll.u32 %v2941_v58, 16 }
  0x27   : > { %1017 = vrot.lane.b32.xlu1 %v836_v34, %s4342_s6  ;;  %v2718_v38 = vpack.c.bf16 %v2702_v30, %v2702_v30  ;;  %v2814_v39 = vpack.c.bf16 %v2798_v31, %v2798_v31  ;;  %v1347_v40 = vadd.f32 %v4407_v1, %v1315_v32  ;;  %v1490_v41 = vadd.f32 %v4407_v1, %v1474_v33  ;;  %v308_v30 = vld [vmem:[%s4397_s25 + $0xc] sm:$0xff]  }
  0x28   : > { %v1378_v43 = vmax.f32 %v1346_v35, 0.0  ;;  %v2962_v44 = vrot.slane %v2960_v36, 1  ;;  %v2967_v46 = vrot.slane %v2965_v37, 1  ;;  %v2970_v47 = vshrl.u32 %v4461_v27, 16  ;;  %v505_v35 = vld [vmem:[%s4397_s25 + $0x14] sm:$0x1] }
  0x29   : > { %v2926_v49 = vunpack.c.l.b16 %v2718_v38  ;;  %v3198_v50 = vunpack.c.l.b16 %v2814_v39  ;;  %v1379_v51 = vmax.f32 %v1347_v40, 0.0  ;;  %v1506_v52 = vmax.f32 %v1490_v41, 0.0 }
  0x2a   : > { %v1410_v53 = vpack.c.bf16 %v1378_v43, %v1378_v43  ;;  %v4475_v55 = vor.u32 %v2962_v44, %v2958_v29  ;;  %v2972_v56 = vshll.u32 %v4461_v27, 16  ;;  %v1306_v57 = vunpack.c.l.bf16 %v3984_v42 }
  0x2b   : > { %v2942_v58 = vpack.c.b16 %v2926_v49, %v2926_v49  ;;  %v3214_v59 = vpack.c.b16 %v2864_v20, %v3198_v50  ;;  %v4478_v61 = vpack.c.bf16 %v1379_v51, %v1379_v51  ;;  %v1522_v2 = vpack.c.bf16 %v1506_v52, %v1506_v52  ;;  %v601_v50 = vld [vmem:[%s4397_s25 + $0xc] sm:$0xe] }
  0x2c   : > { %v1666_v3 = vunpack.c.l.b16 %v1410_v53  ;;  %v2968_v4 = vsel %vm824_vm1, %v4475_v55, %v2967_v46  ;;  %v2974_v5 = vrot.slane %v2972_v56, 1  ;;  %v1307_v6 = vunpack.c.h.bf16 %v3984_v42 }
  0x2d   : > { %v3232_v8 = vrot.slane %v3214_v59, 1  ;;  %v3233_v9 = vrot.slane %v2942_v58, 1  ;;  %v1667_v10 = vunpack.c.l.b16 %v4478_v61  ;;  %v1730_v11 = vunpack.c.l.b16 %v1522_v2 }
  0x2e   : > { %v2975_v13 = vor.u32 %v2974_v5, %v2970_v47  ;;  %v2977_v14 = vshll.u32 %v2942_v58, 16  ;;  %v1338_v15 = vmul.f32 %v4402_v0, %v1306_v57  ;;  %v1339_v16 = vmul.f32 %v4402_v0, %v1307_v6  ;;  %v4008_v57 = vld [vmem:[%s4397_s25 + $0xc] sm:$0xe] }
  0x2f   : > { %v3234_v17 = vsel %vm1097_vm0, %v3232_v8, %v3233_v9  ;;  %v4490_v18 = vpack.c.b16 %v1667_v10, %v1666_v3  ;;  %v4492_v19 = vpack.c.b16 %v1730_v11, %v1730_v11  ;;  %v1470_v20 = vunpack.c.l.bf16 %v4004_v7 }
  0x30   : > { %3279 = vrot.lane.b32.xlu0 %v3234_v17, %s4341_s30  ;;  %v2979_v21 = vrot.slane %v2977_v14, 1  ;;  %v1370_v22 = vadd.f32 %v4407_v1, %v1338_v15  ;;  %v1371_v23 = vadd.f32 %v4407_v1, %v1339_v16  ;;  %v616_v24 = vunpack.c.l.bf16 %v600_v12 }
  0x31   : > { %v1763_v25 = vshrl.u32 %v4490_v18, 16  ;;  %v1765_v26 = vshll.u32 %v4490_v18, 16  ;;  %v1770_v28 = vshll.u32 %v4492_v19, 16  ;;  %v1486_v29 = vmul.f32 %v4402_v0, %v1470_v20 }
  0x32   : > { %v4503_v31 = vsel %vm824_vm1, %v2975_v13, %v2979_v21  ;;  %v1402_v32 = vmax.f32 %v1370_v22, 0.0  ;;  %v1403_v33 = vmax.f32 %v1371_v23, 0.0  ;;  %v632_v34 = vmul.f32 %v4402_v0, %v616_v24 }
  0x33   : > { %v1767_v36 = vrot.slane %v1765_v26, 1  ;;  %v1772_v37 = vrot.slane %v1770_v28, 1  ;;  %v1502_v38 = vadd.f32 %v4407_v1, %v1486_v29  ;;  %v1099_v39 = vrot.slane %v4448_v63, 1 }
  0x34   : > { %v1434_v40 = vpack.c.bf16 %v1402_v32, %v1402_v32  ;;  %v4509_v41 = vpack.c.bf16 %v1403_v33, %v1403_v33  ;;  %v648_v42 = vadd.f32 %v4407_v1, %v632_v34  ;;  %v340_v43 = vunpack.c.l.bf16 %v308_v30  ;;  %v3993_v32 = vld [vmem:[%s4397_s25 + $0x20] sm:$0x1] }
  0x35   : > { %v1768_v44 = vor.u32 %v1767_v36, %v1763_v25  ;;  %v1518_v46 = vmax.f32 %v1502_v38, 0.0  ;;  %v341_v47 = vunpack.c.h.bf16 %v308_v30  ;;  %v521_v49 = vunpack.c.l.bf16 %v505_v35 }
  0x36   : > { %v1690_v51 = vunpack.c.l.b16 %v1434_v40  ;;  %v1691_v52 = vunpack.c.l.b16 %v4509_v41  ;;  %v664_v53 = vmax.f32 %v648_v42, 0.0  ;;  %v375_v56 = vmul.f32 %v4402_v0, %v340_v43  ;;  %v4009_v40 = vld [vmem:[%s4397_s25 + $0x18] sm:$0xe]  ;;  %v4270_v42 = vld [vmem:[%s4397_s25 + $0x30] sm:$0xff]  }
  0x37   : > { %v1773_v63 = vsel %vm824_vm1, %v1768_v44, %v1772_v37  ;;  %v1534_v58 = vpack.c.bf16 %v1518_v46, %v1518_v46  ;;  %v376_v59 = vmul.f32 %v4402_v0, %v341_v47  ;;  %v537_v2 = vmul.f32 %v4402_v0, %v521_v49 }
  0x38   : > { %1954 = vrot.lane.b32.xlu1 %v1773_v63, %s4342_s6  ;;  %3149 = vrot.lane.b32.xlu0 %v2968_v4, %s4342_s6  ;;  %v4523_v3 = vpack.c.b16 %v1691_v52, %v1690_v51  ;;  %v680_v5 = vpack.c.bf16 %v664_v53, %v664_v53  ;;  %v410_v6 = vadd.f32 %v4407_v1, %v375_v56  ;;  %v617_v7 = vunpack.c.l.bf16 %v601_v50 }
  0x39   : > { %v1742_v8 = vunpack.c.l.b16 %v1534_v58  ;;  %v411_v9 = vadd.f32 %v4407_v1, %v376_v59  ;;  %v553_v11 = vadd.f32 %v4407_v1, %v537_v2  ;;  %v1554_v12 = vunpack.c.l.bf16 %v4008_v57 }
  0x3a   : > { %v1907_v13 = vshrl.u32 %v4523_v3, 16  ;;  %v1909_v14 = vshll.u32 %v4523_v3, 16  ;;  %v1065_v4 = vunpack.c.l.b16 %v680_v5  ;;  %v442_v15 = vmax.f32 %v410_v6, 0.0 }
  0x3b   : > { %v4530_v16 = vpack.c.b16 %v1742_v8, %v1742_v8  ;;  %v443_v17 = vmax.f32 %v411_v9, 0.0  ;;  %v569_v20 = vmax.f32 %v553_v11, 0.0  ;;  %v633_v21 = vmul.f32 %v4402_v0, %v617_v7  ;;  %v4100_v8 = vld [vmem:[%s4397_s25 + $0x38] sm:$0x1] }
  0x3c   : > { %v1911_v22 = vrot.slane %v1909_v14, 1  ;;  %v1081_v23 = vpack.c.b16 %v729_v54, %v1065_v4  ;;  %v474_v24 = vpack.c.bf16 %v442_v15, %v442_v15  ;;  %v1570_v25 = vmul.f32 %v4402_v0, %v1554_v12 }
  0x3d   : > { %v1914_v26 = vshll.u32 %v4530_v16, 16  ;;  %v475_v28 = vpack.c.bf16 %v443_v17, %v443_v17  ;;  %v585_v29 = vpack.c.bf16 %v569_v20, %v569_v20  ;;  %v649_v30 = vadd.f32 %v4407_v1, %v633_v21 }
  0x3e   : > { %v1912_v33 = vor.u32 %v1911_v22, %v1907_v13  ;;  %v1098_v34 = vrot.slane %v1081_v23, 1  ;;  %v730_v35 = vunpack.c.l.b16 %v474_v24  ;;  %v1586_v36 = vadd.f32 %v4407_v1, %v1570_v25 }
  0x3f   : > { %v1916_v37 = vrot.slane %v1914_v26, 1  ;;  %v731_v45 = vunpack.c.l.b16 %v475_v28  ;;  %v793_v54 = vunpack.c.l.b16 %v585_v29  ;;  %v665_v38 = vmax.f32 %v649_v30, 0.0 }
  0x40   : > { %3151 = vrot.lane.b32.xlu1 %v4503_v31, %s4342_s6  ;;  %v1100_v43 = vsel %vm1097_vm0, %v1098_v34, %v1099_v39  ;;  %v1602_v44 = vmax.f32 %v1586_v36, 0.0  ;;  %v2035_v46 = vrot.slane %v4492_v19, 1  ;;  %v1459_v47 = vunpack.c.l.bf16 %v3993_v32 }
  0x41   : > { %v1917_v49 = vsel %vm824_vm1, %v1912_v33, %v1916_v37  ;;  %1146 = vrot.lane.b32.xlu2 %v1100_v43, %s4341_s30  ;;  %v4548_v50 = vpack.c.b16 %v731_v45, %v730_v35  ;;  %v809_v51 = vpack.c.b16 %v793_v54, %v793_v54  ;;  %v681_v53 = vpack.c.bf16 %v665_v38, %v665_v38  ;;  %v4267_v37 = vld [vmem:[%s4397_s25 + $0xa8] sm:$0xff]  }
  0x42   : > { %1978 = vrot.lane.b32.xlu0 %v1917_v49, %s4342_s6  ;;  %v1618_v56 = vpack.c.bf16 %v1602_v44, %v1602_v44  ;;  %v1475_v31 = vmul.f32 %v4402_v0, %v1459_v47  ;;  %v1555_v57 = vunpack.c.l.bf16 %v4009_v40  ;;  %v4228_v39 = vunpack.c.l.bf16 %v4270_v42 }
  0x43   : > { %v838_v63 = vshrl.u32 %v4548_v50, 16  ;;  %v840_v19 = vshll.u32 %v4548_v50, 16  ;;  %v845_v58 = vshll.u32 %v809_v51, 16  ;;  %v1066_v59 = vunpack.c.l.b16 %v681_v53 }
  0x44   : > { %v1102_v2 = vrot.slane %v809_v51, 1  ;;  %v2002_v5 = vunpack.c.l.b16 %v1618_v56  ;;  %v1491_v6 = vadd.f32 %v4407_v1, %v1475_v31  ;;  %v1571_v7 = vmul.f32 %v4402_v0, %v1555_v57  ;;  %v4005_v56 = vld [vmem:[%s4397_s25 + $0xb0] sm:$0x1]  ;;  %v4021_v31 = vld [vmem:[%s4397_s25 + $0xa8] sm:$0xe] }
  0x45   : > { %v842_v9 = vrot.slane %v840_v19, 1  ;;  %v847_v11 = vrot.slane %v845_v58, 1  ;;  %v1082_v12 = vpack.c.b16 %v731_v45, %v1066_v59  ;;  %v4229_v13 = vunpack.c.h.bf16 %v4270_v42 }
  0x46   : > { %v2018_v14 = vpack.c.b16 %v1667_v10, %v2002_v5  ;;  %v1507_v4 = vmax.f32 %v1491_v6, 0.0  ;;  %v1587_v15 = vadd.f32 %v4407_v1, %v1571_v7  ;;  %v4561_v17 = vmul.f32 %v4402_v0, %v4228_v39  ;;  %v4020_v10 = vld [vmem:[%s4397_s25 + $0x9c] sm:$0xe] }
  0x47   : > { %v843_v20 = vor.u32 %v842_v9, %v838_v63  ;;  %v1101_v21 = vrot.slane %v1082_v12, 1  ;;  %v4564_v22 = vmul.f32 %v4402_v0, %v4229_v13  ;;  %v2655_v23 = vunpack.c.l.bf16 %v4100_v8 }
  0x48   : > { %v2034_v24 = vrot.slane %v2018_v14, 1  ;;  %v1523_v25 = vpack.c.bf16 %v1507_v4, %v1507_v4  ;;  %v1603_v26 = vmax.f32 %v1587_v15, 0.0  ;;  %v2545_v61 = vadd.f32 %v4407_v1, %v4561_v17 }
  0x49   : > { %v848_v28 = vsel %vm824_vm1, %v843_v20, %v847_v11  ;;  %v1103_v29 = vsel %vm1097_vm0, %v1101_v21, %v1102_v2  ;;  %v2546_v30 = vadd.f32 %v4407_v1, %v4564_v22  ;;  %v2671_v32 = vmul.f32 %v4402_v0, %v2655_v23 }
  0x4a   : > { %1019 = vrot.lane.b32.xlu1 %v848_v28, %s4342_s6  ;;  %1148 = vrot.lane.b32.xlu0 %v1103_v29, %s4341_s30  ;;  %v2036_v33 = vsel %vm1097_vm0, %v2034_v24, %v2035_v46  ;;  %v1619_v34 = vpack.c.bf16 %v1603_v26, %v1603_v26  ;;  %v1731_v35 = vunpack.c.l.b16 %v1523_v25  ;;  %v2577_v36 = vmax.f32 %v2545_v61, 0.0 }
  0x4b   : > { %2082 = vrot.lane.b32.xlu2 %v2036_v33, %s4341_s30  ;;  %v2578_v45 = vmax.f32 %v2546_v30, 0.0  ;;  %v2687_v54 = vadd.f32 %v4407_v1, %v2671_v32  ;;  %v1566_v38 = vunpack.c.l.bf16 %v4020_v10  ;;  %v2071_v40 = vrot.slane %v4530_v16, 1 }
  0x4c   : > { %v4581_v42 = vpack.c.b16 %v1731_v35, %v1731_v35  ;;  %v2003_v43 = vunpack.c.l.b16 %v1619_v34  ;;  %v2609_v44 = vpack.c.bf16 %v2577_v36, %v2577_v36  ;;  %v4216_v47 = vunpack.c.l.bf16 %v4267_v37 }
  0x4d   : > { %v2610_v46 = vpack.c.bf16 %v2578_v45, %v2578_v45  ;;  %v2703_v49 = vmax.f32 %v2687_v54, 0.0  ;;  %v1582_v51 = vmul.f32 %v4402_v0, %v1566_v38  ;;  %v4217_v53 = vunpack.c.h.bf16 %v4267_v37  ;;  %v506_v45 = vld [vmem:[%s4397_s25 + $0x20] sm:$0x1] }
  0x4e   : > { %v2019_v57 = vpack.c.b16 %v4434_v48, %v2003_v43  ;;  %v2038_v39 = vrot.slane %v4581_v42, 1  ;;  %v2865_v63 = vunpack.c.l.b16 %v2609_v44  ;;  %v1340_v19 = vmul.f32 %v4402_v0, %v4216_v47 }
  0x4f   : > { %v2719_v58 = vpack.c.bf16 %v2703_v49, %v2703_v49  ;;  %v4589_v59 = vunpack.c.l.b16 %v2610_v46  ;;  %v1598_v2 = vadd.f32 %v4407_v1, %v1582_v51  ;;  %v1341_v5 = vmul.f32 %v4402_v0, %v4217_v53 }
  0x50   : > { %v2037_v6 = vrot.slane %v2019_v57, 1  ;;  %v1372_v7 = vadd.f32 %v4407_v1, %v1340_v19  ;;  %v1471_v8 = vunpack.c.l.bf16 %v4005_v56  ;;  %v1567_v9 = vunpack.c.l.bf16 %v4021_v31  ;;  %v3964_v56 = vld [vmem:[%s4397_s25 + $0x24] sm:$0xff]   ;;  %v3994_v19 = vld [vmem:[%s4397_s25 + $0x2c] sm:$0x1] }
  0x51   : > { %v4595_v11 = vpack.c.b16 %v4589_v59, %v2865_v63  ;;  %v2927_v12 = vunpack.c.l.b16 %v2719_v58  ;;  %v1614_v13 = vmax.f32 %v1598_v2, 0.0  ;;  %v1373_v14 = vadd.f32 %v4407_v1, %v1341_v5 }
  0x52   : > { %v2039_v4 = vsel %vm1097_vm0, %v2037_v6, %v2038_v39  ;;  %v1404_v15 = vmax.f32 %v1372_v7, 0.0  ;;  %v1487_v20 = vmul.f32 %v4402_v0, %v1471_v8  ;;  %v1583_v21 = vmul.f32 %v4402_v0, %v1567_v9  ;;  %v4010_v9 = vld [vmem:[%s4397_s25 + $0x24] sm:$0xe] }
  0x53   : > { %2084 = vrot.lane.b32.xlu1 %v2039_v4, %s4341_s30  ;;  %v4602_v23 = vpack.c.b16 %v2927_v12, %v2927_v12  ;;  %v2982_v24 = vshrl.u32 %v4595_v11, 16  ;;  %v2984_v25 = vshll.u32 %v4595_v11, 16  ;;  %v1630_v26 = vpack.c.bf16 %v1614_v13, %v1614_v13 }
  0x54   : > { %v1405_v61 = vmax.f32 %v1373_v14, 0.0  ;;  %v1436_v10 = vpack.c.bf16 %v1404_v15, %v1404_v15  ;;  %v1503_v28 = vadd.f32 %v4407_v1, %v1487_v20  ;;  %v1599_v29 = vadd.f32 %v4407_v1, %v1583_v21 }
  0x55   : > { %v2986_v30 = vrot.slane %v2984_v25, 1  ;;  %v2989_v32 = vshll.u32 %v4602_v23, 16  ;;  %v2014_v33 = vunpack.c.l.b16 %v1630_v26  ;;  %v522_v53 = vunpack.c.l.bf16 %v506_v45  ;;  %v3988_v45 = vld [vmem:[%s4397_s25 + $0xb4] sm:$0xff]  }
  0x56   : > { %v1437_v34 = vpack.c.bf16 %v1405_v61, %v1405_v61  ;;  %v1519_v35 = vmax.f32 %v1503_v28, 0.0  ;;  %v1615_v36 = vmax.f32 %v1599_v29, 0.0  ;;  %v1692_v37 = vunpack.c.l.b16 %v1436_v10 }
  0x57   : > { %v4610_v54 = vor.u32 %v2986_v30, %v2982_v24  ;;  %v2991_v38 = vrot.slane %v2989_v32, 1  ;;  %v2030_v43 = vpack.c.b16 %v1691_v52, %v2014_v33  ;;  %v538_v52 = vmul.f32 %v4402_v0, %v522_v53 }
  0x58   : > { %v1535_v44 = vpack.c.bf16 %v1519_v35, %v1519_v35  ;;  %v1631_v47 = vpack.c.bf16 %v1615_v36, %v1615_v36  ;;  %v1693_v46 = vunpack.c.l.b16 %v1437_v34  ;;  %v1782_v63 = vshll.u32 %v4581_v42, 16 }
  0x59   : > { %v2992_v49 = vsel %vm824_vm1, %v4610_v54, %v2991_v38  ;;  %v2070_v51 = vrot.slane %v2030_v43, 1  ;;  %v1286_v5 = vunpack.c.l.bf16 %v3964_v56  ;;  %v554_v6 = vadd.f32 %v4407_v1, %v538_v52 }
  0x5a   : > { %3153 = vrot.lane.b32.xlu0 %v2992_v49, %s4342_s6  ;;  %v4618_v31 = vpack.c.b16 %v1693_v46, %v1692_v37  ;;  %v1743_v57 = vunpack.c.l.b16 %v1535_v44  ;;  %v2015_v39 = vunpack.c.l.b16 %v1631_v47  ;;  %v1784_v7 = vrot.slane %v1782_v63, 1  ;;  %v4006_v47 = vld [vmem:[%s4397_s25 + $0xbc] sm:$0x1] }
  0x5b   : > { %v2072_v41 = vsel %vm1097_vm0, %v2070_v51, %v2071_v40  ;;  %v1287_v8 = vunpack.c.h.bf16 %v3964_v56  ;;  %v1318_v16 = vmul.f32 %v4402_v0, %v1286_v5  ;;  %v1460_v40 = vunpack.c.l.bf16 %v3994_v19 }
  0x5c   : > { %2106 = vrot.lane.b32.xlu2 %v2072_v41, %s4341_s30  ;;  %v1759_v58 = vpack.c.b16 %v1743_v57, %v1743_v57  ;;  %v2031_v2 = vpack.c.b16 %v1693_v46, %v2015_v39  ;;  %v570_v14 = vmax.f32 %v554_v6, 0.0  ;;  %v1785_v42 = vsel %vm824_vm1, %v4475_v55, %v1784_v7 }
  0x5d   : > { %v1319_v4 = vmul.f32 %v4402_v0, %v1287_v8  ;;  %v1350_v20 = vadd.f32 %v4407_v1, %v1318_v16  ;;  %v1476_v21 = vmul.f32 %v4402_v0, %v1460_v40  ;;  %v1556_v24 = vunpack.c.l.bf16 %v4010_v9  ;;  %v4022_v16 = vld [vmem:[%s4397_s25 + $0xb4] sm:$0xe] }
  0x5e   : > { %v2073_v12 = vrot.slane %v2031_v2, 1  ;;  %v2074_v13 = vrot.slane %v1759_v58, 1  ;;  %v586_v25 = vpack.c.bf16 %v570_v14, %v570_v14  ;;  %v1919_v29 = vshrl.u32 %v4618_v31, 16 }
  0x5f   : > { %v1351_v26 = vadd.f32 %v4407_v1, %v1319_v4  ;;  %v1382_v61 = vmax.f32 %v1350_v20, 0.0  ;;  %v1492_v10 = vadd.f32 %v4407_v1, %v1476_v21  ;;  %v1572_v28 = vmul.f32 %v4402_v0, %v1556_v24 }
  0x60   : > { %v2075_v15 = vsel %vm1097_vm0, %v2073_v12, %v2074_v13  ;;  %v794_v30 = vunpack.c.l.b16 %v586_v25  ;;  %v1921_v33 = vshll.u32 %v4618_v31, 16  ;;  %v1926_v37 = vshll.u32 %v1759_v58, 16 }
  0x61   : > { %2108 = vrot.lane.b32.xlu1 %v2075_v15, %s4341_s30  ;;  %v1383_v32 = vmax.f32 %v1351_v26, 0.0  ;;  %v1414_v34 = vpack.c.bf16 %v1382_v61, %v1382_v61  ;;  %v1508_v35 = vmax.f32 %v1492_v10, 0.0  ;;  %v1588_v36 = vadd.f32 %v4407_v1, %v1572_v28  ;;  %v4116_v15 = vld [vmem:[%s4397_s25 + $0x30] sm:$0xe] }
  0x62   : > { %v4645_v38 = vpack.c.b16 %v794_v30, %v794_v30  ;;  %v1923_v44 = vrot.slane %v1921_v33, 1  ;;  %v1928_v53 = vrot.slane %v1926_v37, 1  ;;  %v1310_v41 = vunpack.c.l.bf16 %v3988_v45  ;;  %v4072_v37 = vld [vmem:[%s4397_s25 + $0x3c] sm:$0xff]  }
  0x63   : > { %v1415_v43 = vpack.c.bf16 %v1383_v32, %v1383_v32  ;;  %v1524_v46 = vpack.c.bf16 %v1508_v35, %v1508_v35  ;;  %v1670_v49 = vunpack.c.l.b16 %v1414_v34  ;;  %v1604_v51 = vmax.f32 %v1588_v36, 0.0 }
  0x64   : > { %1956 = vrot.lane.b32.xlu2 %v1785_v42, %s4342_s6  ;;  %v857_v56 = vshll.u32 %v4645_v38, 16  ;;  %v1924_v39 = vor.u32 %v1923_v44, %v1919_v29  ;;  %v1311_v19 = vunpack.c.h.bf16 %v3988_v45  ;;  %v1472_v58 = vunpack.c.l.bf16 %v4006_v47 }
  0x65   : > { %v1671_v57 = vunpack.c.l.b16 %v1415_v43  ;;  %v1732_v52 = vunpack.c.l.b16 %v1524_v46  ;;  %v1620_v63 = vpack.c.bf16 %v1604_v51, %v1604_v51  ;;  %v1342_v7 = vmul.f32 %v4402_v0, %v1310_v41  ;;  %v4101_v46 = vld [vmem:[%s4397_s25 + $0x44] sm:$0x1] }
  0x66   : > { %v859_v2 = vrot.slane %v857_v56, 1  ;;  %v1929_v6 = vsel %vm824_vm1, %v1924_v39, %v1928_v53  ;;  %v1343_v12 = vmul.f32 %v4402_v0, %v1311_v19  ;;  %v1488_v13 = vmul.f32 %v4402_v0, %v1472_v58 }
  0x67   : > { %v4649_v5 = vpack.c.b16 %v1671_v57, %v1670_v49  ;;  %v1748_v8 = vpack.c.b16 %v1732_v52, %v1732_v52  ;;  %v2004_v9 = vunpack.c.l.b16 %v1620_v63  ;;  %v1374_v4 = vadd.f32 %v4407_v1, %v1342_v7  ;;  %v4117_v49 = vld [vmem:[%s4397_s25 + $0x3c] sm:$0xe] }
  0x68   : > { %v860_v40 = vsel %vm824_vm1, %v4475_v55, %v859_v2  ;;  %v1375_v25 = vadd.f32 %v4407_v1, %v1343_v12  ;;  %v1504_v55 = vadd.f32 %v4407_v1, %v1488_v13  ;;  %v1568_v10 = vunpack.c.l.bf16 %v4022_v16 }
  0x69   : > { %v1787_v14 = vshrl.u32 %v4649_v5, 16  ;;  %v1789_v42 = vshll.u32 %v4649_v5, 16  ;;  %1021 = vrot.lane.b32.xlu0 %v860_v40, %s4342_s6  ;;  %v1794_v20 = vshll.u32 %v1748_v8, 16  ;;  %v2020_v21 = vpack.c.b16 %v1671_v57, %v2004_v9 }
  0x6a   : > { %v2041_v24 = vrot.slane %v1748_v8, 1  ;;  %v1406_v61 = vmax.f32 %v1374_v4, 0.0  ;;  %v1407_v30 = vmax.f32 %v1375_v25, 0.0  ;;  %v2751_v32 = vunpack.c.l.bf16 %v4116_v15 }
  0x6b   : > { %v1791_v26 = vrot.slane %v1789_v42, 1  ;;  %v1796_v28 = vrot.slane %v1794_v20, 1  ;;  %v2040_v29 = vrot.slane %v2020_v21, 1  ;;  %v1520_v35 = vmax.f32 %v1504_v55, 0.0 }
  0x6c   : > { %1980 = vrot.lane.b32.xlu2 %v1929_v6, %s4342_s6  ;;  %v1438_v34 = vpack.c.bf16 %v1406_v61, %v1406_v61  ;;  %v1584_v36 = vmul.f32 %v4402_v0, %v1568_v10  ;;  %v1439_v43 = vpack.c.bf16 %v1407_v30, %v1407_v30  ;;  %v2767_v44 = vmul.f32 %v4402_v0, %v2751_v32 }
  0x6d   : > { %v1792_v33 = vor.u32 %v1791_v26, %v1787_v14  ;;  %v2042_v45 = vsel %vm1097_vm0, %v2040_v29, %v2041_v24  ;;  %v3236_v47 = vrot.slane %v4602_v23, 1  ;;  %v1536_v53 = vpack.c.bf16 %v1520_v35, %v1520_v35  ;;  %v3995_v29 = vld [vmem:[%s4397_s25 + $0x38] sm:$0x1]  ;;  %v4714_v23 = vld [vmem:[%s6163_s1] ss:$0 sm:$0xff] }
  0x6e   : > { %v1694_v56 = vunpack.c.l.b16 %v1438_v34  ;;  %v1600_v57 = vadd.f32 %v4407_v1, %v1584_v36  ;;  %v1695_v39 = vunpack.c.l.b16 %v1439_v43  ;;  %v2783_v41 = vadd.f32 %v4407_v1, %v2767_v44 }
  0x6f   : > { %v1797_v51 = vsel %vm824_vm1, %v1792_v33, %v1796_v28  ;;  %v2483_v52 = vunpack.c.l.bf16 %v4072_v37  ;;  %v2484_v63 = vunpack.c.h.bf16 %v4072_v37  ;;  %v1744_v19 = vunpack.c.l.b16 %v1536_v53 }
  0x70   : > { %1958 = vrot.lane.b32.xlu1 %v1797_v51, %s4342_s6  ;;  %v1616_v58 = vmax.f32 %v1600_v57, 0.0  ;;  %v2656_v2 = vunpack.c.l.bf16 %v4101_v46  ;;  %v2752_v6 = vunpack.c.l.bf16 %v4117_v49  ;;  %v4678_v7 = vpack.c.b16 %v1695_v39, %v1694_v56  ;;  %v602_v51 = vld [vmem:[%s4397_s25 + $0x18] sm:$0xe] }
  0x71   : > { %2086 = vrot.lane.b32.xlu0 %v2042_v45, %s4341_s30  ;;  %v2799_v8 = vmax.f32 %v2783_v41, 0.0  ;;  %v2515_v9 = vmul.f32 %v4402_v0, %v2483_v52  ;;  %v2516_v12 = vmul.f32 %v4402_v0, %v2484_v63  ;;  %v1760_v13 = vpack.c.b16 %v1744_v19, %v1744_v19 }
  0x72   : > { %v1632_v16 = vpack.c.bf16 %v1616_v58, %v1616_v58  ;;  %v2672_v40 = vmul.f32 %v4402_v0, %v2656_v2  ;;  %v2768_v14 = vmul.f32 %v4402_v0, %v2752_v6  ;;  %v1931_v42 = vshrl.u32 %v4678_v7, 16  ;;  %v312_v58 = vld [vmem:[%s4397_s25 + $0x24] sm:$0xff]   ;;  %v507_v2 = vld [vmem:[%s4397_s25 + $0x2c] sm:$0x1] }
  0x73   : > { %v1933_v4 = vshll.u32 %v4678_v7, 16  ;;  %v2815_v15 = vpack.c.bf16 %v2799_v8, %v2799_v8  ;;  %v2547_v20 = vadd.f32 %v4407_v1, %v2515_v9  ;;  %v1938_v21 = vshll.u32 %v1760_v13, 16 }
  0x74   : > { %v2016_v24 = vunpack.c.l.b16 %v1632_v16  ;;  %v2077_v25 = vrot.slane %v1760_v13, 1  ;;  %v2548_v26 = vadd.f32 %v4407_v1, %v2516_v12  ;;  %v2688_v28 = vadd.f32 %v4407_v1, %v2672_v40  ;;  %v603_v13 = vld [vmem:[%s4397_s25 + $0x24] sm:$0xe] }
  0x75   : > { %v1935_v61 = vrot.slane %v1933_v4, 1  ;;  %v3199_v55 = vunpack.c.l.b16 %v2815_v15  ;;  %v2579_v10 = vmax.f32 %v2547_v20, 0.0  ;;  %v1940_v30 = vrot.slane %v1938_v21, 1 }
  0x76   : > { %v2032_v32 = vpack.c.b16 %v1695_v39, %v2016_v24  ;;  %v2580_v33 = vmax.f32 %v2548_v26, 0.0  ;;  %v2784_v34 = vadd.f32 %v4407_v1, %v2768_v14  ;;  %v2704_v45 = vmax.f32 %v2688_v28, 0.0  ;;  %v4268_v26 = vld [vmem:[%s4397_s25 + $0xc0] sm:$0xff]  }
  0x77   : > { %v1936_v35 = vor.u32 %v1935_v61, %v1931_v42  ;;  %v3215_v36 = vpack.c.b16 %v4589_v59, %v3199_v55  ;;  %v2611_v37 = vpack.c.bf16 %v2579_v10, %v2579_v10  ;;  %v1461_v49 = vunpack.c.l.bf16 %v3995_v29  ;;  %v4723_v61 = vld [vmem:[%s6164_s2] ss:$0 sm:$0xff] }
  0x78   : > { %v2076_v43 = vrot.slane %v2032_v32, 1  ;;  %v2612_v44 = vpack.c.bf16 %v2580_v33, %v2580_v33  ;;  %v2800_v46 = vmax.f32 %v2784_v34, 0.0  ;;  %v2720_v57 = vpack.c.bf16 %v2704_v45, %v2704_v45 }
  0x79   : > { %v1941_v53 = vsel %vm824_vm1, %v1936_v35, %v1940_v30  ;;  %v3235_v56 = vrot.slane %v3215_v36, 1  ;;  %v2867_v39 = vunpack.c.l.b16 %v2611_v37  ;;  %v1477_v19 = vmul.f32 %v4402_v0, %v1461_v49 }
  0x7a   : > { %1982 = vrot.lane.b32.xlu1 %v1941_v53, %s4342_s6  ;;  %v2078_v41 = vsel %vm1097_vm0, %v2076_v43, %v2077_v25  ;;  %v2816_v52 = vpack.c.bf16 %v2800_v46, %v2800_v46  ;;  %v2868_v63 = vunpack.c.l.b16 %v2612_v44  ;;  %v2928_v8 = vunpack.c.l.b16 %v2720_v57 }
  0x7b   : > { %2110 = vrot.lane.b32.xlu0 %v2078_v41, %s4341_s30  ;;  %v3237_v6 = vsel %vm1097_vm0, %v3235_v56, %v3236_v47  ;;  %v618_v9 = vunpack.c.l.bf16 %v602_v51  ;;  %v1105_v12 = vrot.slane %v4645_v38, 1  ;;  %v1493_v0 = vadd.f32 %v4407_v1, %v1477_v19 }
  0x7c   : > { %3281 = vrot.lane.b32.xlu2 %v3237_v6, %s4341_s30  ;;  %v4706_v16 = vpack.c.b16 %v2868_v63, %v2867_v39  ;;  %v3200_v40 = vunpack.c.l.b16 %v2816_v52  ;;  %v344_v14 = vunpack.c.l.bf16 %v312_v58  ;;  %v4709_v42 = vpack.c.b16 %v2928_v8, %v2928_v8  ;;  %v4007_v6 = vld [vmem:[%s4397_s25 + $0xc8] sm:$0x1] }
  0x7d   : > { %v634_v47 = vmul.f32 %v4714_v23, %v618_v9  ;;  %v345_v4 = vunpack.c.h.bf16 %v312_v58  ;;  %v523_v15 = vunpack.c.l.bf16 %v507_v2  ;;  %v1509_v21 = vmax.f32 %v1493_v0, 0.0 }
  0x7e   : > { %v3216_v20 = vpack.c.b16 %v2868_v63, %v3200_v40  ;;  %v379_v24 = vmul.f32 %v4714_v23, %v344_v14  ;;  %v619_v25 = vunpack.c.l.bf16 %v603_v13  ;;  %v3239_v1 = vrot.slane %v4709_v42, 1 }
  0x7f   : > { %v650_v55 = vadd.f32 %v4723_v61, %v634_v47  ;;  %v380_v10 = vmul.f32 %v4714_v23, %v345_v4  ;;  %v539_v28 = vmul.f32 %v4714_v23, %v523_v15  ;;  %v1525_v30 = vpack.c.bf16 %v1509_v21, %v1509_v21 }
  0x80   : > { %v3238_v29 = vrot.slane %v3216_v20, 1  ;;  %v414_v32 = vadd.f32 %v4723_v61, %v379_v24  ;;  %v635_v33 = vmul.f32 %v4714_v23, %v619_v25  ;;  %v4220_v37 = vunpack.c.l.bf16 %v4268_v26 }
  0x81   : > { %v666_v34 = vmax.f32 %v650_v55, 0.0  ;;  %v415_v35 = vadd.f32 %v4723_v61, %v380_v10  ;;  %v555_v36 = vadd.f32 %v4723_v61, %v539_v28  ;;  %v1733_v43 = vunpack.c.l.b16 %v1525_v30  ;;  %v4271_v30 = vld [vmem:[%s4397_s25 + $0x48] sm:$0xff]  }
  0x82   : > { %v3240_v45 = vsel %vm1097_vm0, %v3238_v29, %v3239_v1  ;;  %v446_v44 = vmax.f32 %v414_v32, 0.0  ;;  %v651_v46 = vadd.f32 %v4723_v61, %v635_v33  ;;  %v4221_v56 = vunpack.c.h.bf16 %v4268_v26 }
  0x83   : > { %3283 = vrot.lane.b32.xlu1 %v3240_v45, %s4341_s30  ;;  %v682_v49 = vpack.c.bf16 %v666_v34, %v666_v34  ;;  %v447_v51 = vmax.f32 %v415_v35, 0.0  ;;  %v571_v53 = vmax.f32 %v555_v36, 0.0  ;;  %v4735_v57 = vpack.c.b16 %v1733_v43, %v1733_v43  ;;  %v4102_v36 = vld [vmem:[%s4397_s25 + $0x50] sm:$0x1] }
  0x84   : > { %v478_v39 = vpack.c.bf16 %v446_v44, %v446_v44  ;;  %v667_v41 = vmax.f32 %v651_v46, 0.0  ;;  %v1344_v52 = vmul.f32 %v4714_v23, %v4220_v37  ;;  %v1345_v2 = vmul.f32 %v4714_v23, %v4221_v56 }
  0x85   : > { %v1067_v63 = vunpack.c.l.b16 %v682_v49  ;;  %v479_v19 = vpack.c.bf16 %v447_v51, %v447_v51  ;;  %v587_v58 = vpack.c.bf16 %v571_v53, %v571_v53  ;;  %v1806_v8 = vshll.u32 %v4735_v57, 16  ;;  %v4118_v49 = vld [vmem:[%s4397_s25 + $0x48] sm:$0xe] }
  0x86   : > { %v683_v9 = vpack.c.bf16 %v667_v41, %v667_v41  ;;  %v734_v13 = vunpack.c.l.b16 %v478_v39  ;;  %v1376_v40 = vadd.f32 %v4723_v61, %v1344_v52  ;;  %v1377_v4 = vadd.f32 %v4723_v61, %v1345_v2 }
  0x87   : > { %v1083_v0 = vpack.c.b16 %v4434_v48, %v1067_v63  ;;  %v735_v14 = vunpack.c.l.b16 %v479_v19  ;;  %v795_v47 = vunpack.c.l.b16 %v587_v58  ;;  %v1808_v15 = vrot.slane %v1806_v8, 1 }
  0x88   : > { %v1068_v20 = vunpack.c.l.b16 %v683_v9  ;;  %v1408_v21 = vmax.f32 %v1376_v40, 0.0  ;;  %v1473_v24 = vunpack.c.l.bf16 %v4007_v6  ;;  %v1409_v55 = vmax.f32 %v1377_v4, 0.0 }
  0x89   : > { %v1104_v25 = vrot.slane %v1083_v0, 1  ;;  %v4744_v26 = vpack.c.b16 %v735_v14, %v734_v13  ;;  %v4746_v1 = vpack.c.b16 %v795_v47, %v795_v47  ;;  %v1809_v10 = vsel %vm824_vm1, %v4610_v54, %v1808_v15 }
  0x8a   : > { %v1084_v48 = vpack.c.b16 %v735_v14, %v1068_v20  ;;  %v1440_v28 = vpack.c.bf16 %v1408_v21, %v1408_v21  ;;  %v1489_v29 = vmul.f32 %v4714_v23, %v1473_v24  ;;  %1960 = vrot.lane.b32.xlu0 %v1809_v10, %s4342_s6  ;;  %v4757_v34 = vpack.c.bf16 %v1409_v55, %v1409_v55 }
  0x8b   : > { %v1106_v32 = vsel %vm1097_vm0, %v1104_v25, %v1105_v12  ;;  %v1108_v33 = vrot.slane %v4746_v1, 1  ;;  %v2994_v35 = vshrl.u32 %v4706_v16, 16  ;;  %v2996_v43 = vshll.u32 %v4706_v16, 16 }
  0x8c   : > { %1150 = vrot.lane.b32.xlu2 %v1106_v32, %s4341_s30  ;;  %v1107_v54 = vrot.slane %v1084_v48, 1  ;;  %v1505_v37 = vadd.f32 %v4723_v61, %v1489_v29  ;;  %v1696_v45 = vunpack.c.l.b16 %v1440_v28  ;;  %v1697_v44 = vunpack.c.l.b16 %v4757_v34 }
  0x8d   : > { %v3001_v38 = vshll.u32 %v4709_v42, 16  ;;  %v4232_v12 = vunpack.c.l.bf16 %v4271_v30  ;;  %v4233_v46 = vunpack.c.h.bf16 %v4271_v30  ;;  %v2998_v56 = vrot.slane %v2996_v43, 1 }
  0x8e   : > { %v1109_v51 = vsel %vm1097_vm0, %v1107_v54, %v1108_v33  ;;  %v1521_v53 = vmax.f32 %v1505_v37, 0.0  ;;  %v2657_v39 = vunpack.c.l.bf16 %v4102_v36  ;;  %v4771_v41 = vpack.c.b16 %v1697_v44, %v1696_v45  ;;  %v508_v37 = vld [vmem:[%s4397_s25 + $0x38] sm:$0x1] }
  0x8f   : > { %1152 = vrot.lane.b32.xlu1 %v1109_v51, %s4341_s30  ;;  %v3003_v52 = vrot.slane %v3001_v38, 1  ;;  %v2517_v63 = vmul.f32 %v4714_v23, %v4232_v12  ;;  %v2518_v19 = vmul.f32 %v4714_v23, %v4233_v46  ;;  %v2999_v58 = vor.u32 %v2998_v56, %v2994_v35 }
  0x90   : > { %v1537_v42 = vpack.c.bf16 %v1521_v53, %v1521_v53  ;;  %v2673_v2 = vmul.f32 %v4714_v23, %v2657_v39  ;;  %v2753_v6 = vunpack.c.l.bf16 %v4118_v49  ;;  %v1943_v8 = vshrl.u32 %v4771_v41, 16 }
  0x91   : > { %v1945_v9 = vshll.u32 %v4771_v41, 16  ;;  %v2549_v13 = vadd.f32 %v4723_v61, %v2517_v63  ;;  %v2550_v40 = vadd.f32 %v4723_v61, %v2518_v19  ;;  %v3004_v14 = vsel %vm824_vm1, %v2999_v58, %v3003_v52 }
  0x92   : > { %v1745_v0 = vunpack.c.l.b16 %v1537_v42  ;;  %v2689_v47 = vadd.f32 %v4723_v61, %v2673_v2  ;;  %v2769_v4 = vmul.f32 %v4714_v23, %v2753_v6  ;;  %v862_v24 = vshrl.u32 %v4744_v26, 16 }
  0x93   : > { %v1947_v15 = vrot.slane %v1945_v9, 1  ;;  %v2581_v20 = vmax.f32 %v2549_v13, 0.0  ;;  %v2582_v21 = vmax.f32 %v2550_v40, 0.0  ;;  %v864_v48 = vshll.u32 %v4744_v26, 16  ;;  %v4011_v13 = vld [vmem:[%s4397_s25 + $0x30] sm:$0xe] }
  0x94   : > { %v4784_v25 = vpack.c.b16 %v1745_v0, %v1745_v0  ;;  %3155 = vrot.lane.b32.xlu2 %v3004_v14, %s4342_s6  ;;  %v2705_v55 = vmax.f32 %v2689_v47, 0.0  ;;  %v2785_v10 = vadd.f32 %v4723_v61, %v2769_v4  ;;  %v869_v32 = vshll.u32 %v4746_v1, 16 }
  0x95   : > { %v1948_v28 = vor.u32 %v1947_v15, %v1943_v8  ;;  %v2613_v29 = vpack.c.bf16 %v2581_v20, %v2581_v20  ;;  %v2614_v30 = vpack.c.bf16 %v2582_v21, %v2582_v21  ;;  %v866_v54 = vrot.slane %v864_v48, 1  ;;  %v3968_v48 = vld [vmem:[%s4397_s25 + $0x3c] sm:$0xff]  }
  0x96   : > { %v1950_v33 = vshll.u32 %v4784_v25, 16  ;;  %v2721_v35 = vpack.c.bf16 %v2705_v55, %v2705_v55  ;;  %v2801_v36 = vmax.f32 %v2785_v10, 0.0  ;;  %v871_v38 = vrot.slane %v869_v32, 1 }
  0x97   : > { %v2869_v45 = vunpack.c.l.b16 %v2613_v29  ;;  %v4792_v43 = vunpack.c.l.b16 %v2614_v30  ;;  %v416_v12 = vadd.f32 %v4723_v61, %v4561_v17  ;;  %v867_v53 = vor.u32 %v866_v54, %v862_v24  ;;  %v604_v17 = vld [vmem:[%s4397_s25 + $0x30] sm:$0xe] }
  0x98   : > { %v1952_v46 = vrot.slane %v1950_v33, 1  ;;  %v2929_v49 = vunpack.c.l.b16 %v2721_v35  ;;  %v2817_v51 = vpack.c.bf16 %v2801_v36, %v2801_v36  ;;  %v417_v56 = vadd.f32 %v4723_v61, %v4564_v22  ;;  %v3996_v33 = vld [vmem:[%s4397_s25 + $0x44] sm:$0x1] }
  0x99   : > { %v4797_v1 = vpack.c.b16 %v4792_v43, %v2869_v45  ;;  %v448_v39 = vmax.f32 %v416_v12, 0.0  ;;  %v524_v52 = vunpack.c.l.bf16 %v508_v37  ;;  %v872_v58 = vsel %vm824_vm1, %v867_v53, %v871_v38 }
  0x9a   : > { %v1953_v63 = vsel %vm824_vm1, %v1948_v28, %v1952_v46  ;;  %v2945_v19 = vpack.c.b16 %v2929_v49, %v2929_v49  ;;  %v3201_v42 = vunpack.c.l.b16 %v2817_v51  ;;  %v449_v8 = vmax.f32 %v417_v56, 0.0 }
  0x9b   : > { %1984 = vrot.lane.b32.xlu0 %v1953_v63, %s4342_s6  ;;  %v3006_v2 = vshrl.u32 %v4797_v1, 16  ;;  %v3008_v6 = vshll.u32 %v4797_v1, 16  ;;  %v480_v9 = vpack.c.bf16 %v448_v39, %v448_v39  ;;  %v540_v14 = vmul.f32 %v4714_v23, %v524_v52  ;;  %v4012_v39 = vld [vmem:[%s4397_s25 + $0x3c] sm:$0xe] }
  0x9c   : > { %v3013_v22 = vshll.u32 %v2945_v19, 16  ;;  %v3217_v40 = vpack.c.b16 %v4792_v43, %v3201_v42  ;;  %v3242_v0 = vrot.slane %v2945_v19, 1  ;;  %1023 = vrot.lane.b32.xlu2 %v872_v58, %s4342_s6  ;;  %v481_v4 = vpack.c.bf16 %v449_v8, %v449_v8 }
  0x9d   : > { %v3010_v47 = vrot.slane %v3008_v6, 1  ;;  %v736_v15 = vunpack.c.l.b16 %v480_v9  ;;  %v620_v20 = vunpack.c.l.bf16 %v604_v17  ;;  %v556_v55 = vadd.f32 %v4723_v61, %v540_v14 }
  0x9e   : > { %v3015_v21 = vrot.slane %v3013_v22, 1  ;;  %v3241_v24 = vrot.slane %v3217_v40, 1  ;;  %v1557_v10 = vunpack.c.l.bf16 %v4011_v13  ;;  %v737_v29 = vunpack.c.l.b16 %v481_v4 }
  0x9f   : > { %v4813_v28 = vor.u32 %v3010_v47, %v3006_v2  ;;  %v636_v30 = vmul.f32 %v4714_v23, %v620_v20  ;;  %v2044_v32 = vrot.slane %v4735_v57, 1  ;;  %v572_v36 = vmax.f32 %v556_v55, 0.0 }
  0xa0   : > { %v3243_v35 = vsel %vm1097_vm0, %v3241_v24, %v3242_v0  ;;  %v1573_v54 = vmul.f32 %v4714_v23, %v1557_v10  ;;  %v1290_v37 = vunpack.c.l.bf16 %v3968_v48  ;;  %v4822_v38 = vpack.c.b16 %v737_v29, %v736_v15  ;;  %v4076_v24 = vld [vmem:[%s4397_s25 + $0x54] sm:$0xff]  }
  0xa1   : > { %v3016_v45 = vsel %vm824_vm1, %v4813_v28, %v3015_v21  ;;  %v652_v12 = vadd.f32 %v4723_v61, %v636_v30  ;;  %v1291_v46 = vunpack.c.h.bf16 %v3968_v48  ;;  %v588_v49 = vpack.c.bf16 %v572_v36, %v572_v36 }
  0xa2   : > { %3157 = vrot.lane.b32.xlu1 %v3016_v45, %s4342_s6  ;;  %v1589_v51 = vadd.f32 %v4723_v61, %v1573_v54  ;;  %v1322_v53 = vmul.f32 %v4714_v23, %v1290_v37  ;;  %v1462_v56 = vunpack.c.l.bf16 %v3996_v33  ;;  %v874_v52 = vshrl.u32 %v4822_v38, 16 }
  0xa3   : > { %3285 = vrot.lane.b32.xlu0 %v3243_v35, %s4341_s30  ;;  %v876_v63 = vshll.u32 %v4822_v38, 16  ;;  %v668_v19 = vmax.f32 %v652_v12, 0.0  ;;  %v1323_v42 = vmul.f32 %v4714_v23, %v1291_v46  ;;  %v796_v58 = vunpack.c.l.b16 %v588_v49 }
  0xa4   : > { %v1605_v17 = vmax.f32 %v1589_v51, 0.0  ;;  %v1354_v2 = vadd.f32 %v4723_v61, %v1322_v53  ;;  %v1478_v6 = vmul.f32 %v4714_v23, %v1462_v56  ;;  %v1558_v22 = vunpack.c.l.bf16 %v4012_v39  ;;  %v4103_v39 = vld [vmem:[%s4397_s25 + $0x5c] sm:$0x1] }
  0xa5   : > { %v878_v8 = vrot.slane %v876_v63, 1  ;;  %v684_v9 = vpack.c.bf16 %v668_v19, %v668_v19  ;;  %v1355_v13 = vadd.f32 %v4723_v61, %v1323_v42  ;;  %v812_v40 = vpack.c.b16 %v796_v58, %v796_v58  ;;  %v4023_v42 = vld [vmem:[%s4397_s25 + $0xc0] sm:$0xe] }
  0xa6   : > { %v1621_v0 = vpack.c.bf16 %v1605_v17, %v1605_v17  ;;  %v1386_v14 = vmax.f32 %v1354_v2, 0.0  ;;  %v1494_v47 = vadd.f32 %v4723_v61, %v1478_v6  ;;  %v1574_v21 = vmul.f32 %v4714_v23, %v1558_v22  ;;  %v4259_v22 = vld [vmem:[%s4397_s25 + $0x90] sm:$0xff]  }
  0xa7   : > { %v879_v4 = vor.u32 %v878_v8, %v874_v52  ;;  %v1069_v15 = vunpack.c.l.b16 %v684_v9  ;;  %v1387_v20 = vmax.f32 %v1355_v13, 0.0  ;;  %v881_v55 = vshll.u32 %v812_v40, 16 }
  0xa8   : > { %v1111_v10 = vrot.slane %v812_v40, 1  ;;  %v2005_v48 = vunpack.c.l.b16 %v1621_v0  ;;  %v1418_v30 = vpack.c.bf16 %v1386_v14, %v1386_v14  ;;  %v1510_v36 = vmax.f32 %v1494_v47, 0.0 }
  0xa9   : > { %v1085_v33 = vpack.c.b16 %v737_v29, %v1069_v15  ;;  %v1419_v35 = vpack.c.bf16 %v1387_v20, %v1387_v20  ;;  %v1590_v54 = vadd.f32 %v4723_v61, %v1574_v21  ;;  %v883_v37 = vrot.slane %v881_v55, 1  ;;  %v516_v20 = vld [vmem:[%s4397_s25 + $0x98] sm:$0x1] }
  0xaa   : > { %v2021_v45 = vpack.c.b16 %v4589_v59, %v2005_v48  ;;  %v1674_v12 = vunpack.c.l.b16 %v1418_v30  ;;  %v2487_v46 = vunpack.c.l.bf16 %v4076_v24  ;;  %v1526_v51 = vpack.c.bf16 %v1510_v36, %v1510_v36 }
  0xab   : > { %v1110_v49 = vrot.slane %v1085_v33, 1  ;;  %v1606_v53 = vmax.f32 %v1590_v54, 0.0  ;;  %v1675_v56 = vunpack.c.l.b16 %v1419_v35  ;;  %v884_v52 = vsel %vm824_vm1, %v879_v4, %v883_v37 }
  0xac   : > { %v2043_v63 = vrot.slane %v2021_v45, 1  ;;  %v2488_v29 = vunpack.c.h.bf16 %v4076_v24  ;;  %v2519_v19 = vmul.f32 %v4714_v23, %v2487_v46  ;;  %1025 = vrot.lane.b32.xlu1 %v884_v52, %s4342_s6  ;;  %v1734_v2 = vunpack.c.l.b16 %v1526_v51 }
  0xad   : > { %v1112_v58 = vsel %vm1097_vm0, %v1110_v49, %v1111_v10  ;;  %v1622_v59 = vpack.c.bf16 %v1606_v53, %v1606_v53  ;;  %v4847_v17 = vpack.c.b16 %v1675_v56, %v1674_v12  ;;  %v2658_v13 = vunpack.c.l.bf16 %v4103_v39  ;;  %v612_v12 = vld [vmem:[%s4397_s25 + $0x90] sm:$0xe] }
  0xae   : > { %1154 = vrot.lane.b32.xlu0 %v1112_v58, %s4341_s30  ;;  %v2045_v6 = vsel %vm1097_vm0, %v2043_v63, %v2044_v32  ;;  %v2520_v8 = vmul.f32 %v4714_v23, %v2488_v29  ;;  %v2551_v9 = vadd.f32 %v4723_v61, %v2519_v19  ;;  %v4857_v40 = vpack.c.b16 %v1734_v2, %v1734_v2 }
  0xaf   : > { %2088 = vrot.lane.b32.xlu2 %v2045_v6, %s4341_s30  ;;  %v2006_v0 = vunpack.c.l.b16 %v1622_v59  ;;  %v1569_v14 = vunpack.c.l.bf16 %v4023_v42  ;;  %v2080_v47 = vrot.slane %v4784_v25, 1  ;;  %v2674_v57 = vmul.f32 %v4714_v23, %v2658_v13 }
  0xb0   : > { %v2552_v4 = vadd.f32 %v4723_v61, %v2520_v8  ;;  %v2583_v15 = vmax.f32 %v2551_v9, 0.0  ;;  %v4184_v32 = vunpack.c.l.bf16 %v4259_v22  ;;  %v2047_v24 = vrot.slane %v4857_v40, 1 }
  0xb1   : > { %v2022_v21 = vpack.c.b16 %v1675_v56, %v2006_v0  ;;  %v1585_v55 = vmul.f32 %v4714_v23, %v1569_v14  ;;  %v4185_v10 = vunpack.c.h.bf16 %v4259_v22  ;;  %v2690_v33 = vadd.f32 %v4723_v61, %v2674_v57  ;;  %v316_v56 = vld [vmem:[%s4397_s25 + $0x3c] sm:$0xff]  }
  0xb2   : > { %v2584_v48 = vmax.f32 %v2552_v4, 0.0  ;;  %v2615_v30 = vpack.c.bf16 %v2583_v15, %v2583_v15  ;;  %v397_v35 = vmul.f32 %v4714_v23, %v4184_v32  ;;  %v532_v45 = vunpack.c.l.bf16 %v516_v20 }
  0xb3   : > { %v2046_v36 = vrot.slane %v2022_v21, 1  ;;  %v1601_v54 = vadd.f32 %v4723_v61, %v1585_v55  ;;  %v398_v37 = vmul.f32 %v4714_v23, %v4185_v10  ;;  %v2706_v49 = vmax.f32 %v2690_v33, 0.0 }
  0xb4   : > { %v4870_v46 = vpack.c.bf16 %v2584_v48, %v2584_v48  ;;  %v2871_v51 = vunpack.c.l.b16 %v2615_v30  ;;  %v432_v53 = vadd.f32 %v4723_v61, %v397_v35  ;;  %v548_v29 = vmul.f32 %v4714_v23, %v532_v45  ;;  %v509_v45 = vld [vmem:[%s4397_s25 + $0x44] sm:$0x1] }
  0xb5   : > { %v2048_v39 = vsel %vm1097_vm0, %v2046_v36, %v2047_v24  ;;  %v1617_v52 = vmax.f32 %v1601_v54, 0.0  ;;  %v433_v63 = vadd.f32 %v4723_v61, %v398_v37  ;;  %v2722_v19 = vpack.c.bf16 %v2706_v49, %v2706_v49 }
  0xb6   : > { %2090 = vrot.lane.b32.xlu1 %v2048_v39, %s4341_s30  ;;  %v2872_v42 = vunpack.c.l.b16 %v4870_v46  ;;  %v464_v58 = vmax.f32 %v432_v53, 0.0  ;;  %v628_v59 = vunpack.c.l.bf16 %v612_v12  ;;  %v564_v8 = vadd.f32 %v4723_v61, %v548_v29 }
  0xb7   : > { %v1633_v2 = vpack.c.bf16 %v1617_v52, %v1617_v52  ;;  %v465_v6 = vmax.f32 %v433_v63, 0.0  ;;  %v348_v9 = vunpack.c.l.bf16 %v316_v56  ;;  %v2930_v22 = vunpack.c.l.b16 %v2722_v19 }
  0xb8   : > { %v4882_v13 = vpack.c.b16 %v2872_v42, %v2871_v51  ;;  %v496_v0 = vpack.c.bf16 %v464_v58, %v464_v58  ;;  %v644_v14 = vmul.f32 %v4714_v23, %v628_v59  ;;  %v580_v57 = vmax.f32 %v564_v8, 0.0  ;;  %v3997_v58 = vld [vmem:[%s4397_s25 + $0x50] sm:$0x1] }
  0xb9   : > { %v2017_v4 = vunpack.c.l.b16 %v1633_v2  ;;  %v497_v15 = vpack.c.bf16 %v465_v6, %v465_v6  ;;  %v349_v32 = vunpack.c.h.bf16 %v316_v56  ;;  %v4885_v20 = vpack.c.b16 %v2930_v22, %v2930_v22 }
  0xba   : > { %v3018_v21 = vshrl.u32 %v4882_v13, 16  ;;  %v3020_v24 = vshll.u32 %v4882_v13, 16  ;;  %v660_v55 = vadd.f32 %v4723_v61, %v644_v14  ;;  %v596_v48 = vpack.c.bf16 %v580_v57, %v580_v57 }
  0xbb   : > { %v2033_v10 = vpack.c.b16 %v1697_v44, %v2017_v4  ;;  %v752_v30 = vunpack.c.l.b16 %v496_v0  ;;  %v753_v33 = vunpack.c.l.b16 %v497_v15  ;;  %v3025_v36 = vshll.u32 %v4885_v20, 16  ;;  %v4913_v0 = vpop.permute.xlu0 %3277 }
  0xbc   : > { %v3022_v35 = vrot.slane %v3020_v24, 1  ;;  %v676_v54 = vmax.f32 %v660_v55, 0.0  ;;  %v383_v37 = vmul.f32 %v4714_v23, %v348_v9  ;;  %v804_v51 = vunpack.c.l.b16 %v596_v48  ;;  %v4013_v48 = vld [vmem:[%s4397_s25 + $0x48] sm:$0xe] }
  0xbd   : > { %v2079_v12 = vrot.slane %v2033_v10, 1  ;;  %v4895_v49 = vpack.c.b16 %v753_v33, %v752_v30  ;;  %v384_v53 = vmul.f32 %v4714_v23, %v349_v32  ;;  %v3027_v34 = vrot.slane %v3025_v36, 1  ;;  %v4048_v32 = vld [vmem:[%s6165_s3] sm:$0xf] }
  0xbe   : > { %v3023_v56 = vor.u32 %v3022_v35, %v3018_v21  ;;  %v692_v44 = vpack.c.bf16 %v676_v54, %v676_v54  ;;  %v418_v39 = vadd.f32 %v4723_v61, %v383_v37  ;;  %v4902_v63 = vpack.c.b16 %v804_v51, %v804_v51  ;;  %v4155_v21 = vld [vmem:[%s6165_s3] sm:$0x30] }
  0xbf   : > { %v2081_v52 = vsel %vm1097_vm0, %v2079_v12, %v2080_v47  ;;  %v419_v29 = vadd.f32 %v4723_v61, %v384_v53  ;;  %v525_v19 = vunpack.c.l.bf16 %v509_v45  ;;  %v1811_v8 = vshrl.u32 %v4847_v17, 16  ;;  %v1018_v12 = vpop.permute.xlu1 %1017 }
  0xc0   : > { %v3028_v59 = vsel %vm824_vm1, %v3023_v56, %v3027_v34  ;;  %2112 = vrot.lane.b32.xlu2 %v2081_v52, %s4341_s30  ;;  %v1077_v2 = vunpack.c.l.b16 %v692_v44  ;;  %v450_v6 = vmax.f32 %v418_v39, 0.0  ;;  %v1135_v25 = vrot.slane %v4902_v63, 1 }
  0xc1   : > { %3159 = vrot.lane.b32.xlu0 %v3028_v59, %s4342_s6  ;;  %v451_v47 = vmax.f32 %v419_v29, 0.0  ;;  %v541_v9 = vmul.f32 %v4714_v23, %v525_v19  ;;  %v1813_v22 = vshll.u32 %v4847_v17, 16  ;;  %v1818_v15 = vshll.u32 %v4857_v40, 16 }
  0xc2   : > { %v1093_v14 = vpack.c.b16 %v753_v33, %v1077_v2  ;;  %v482_v4 = vpack.c.bf16 %v450_v6, %v450_v6  ;;  %v1463_v57 = vunpack.c.l.bf16 %v3997_v58  ;;  %v4049_v45 = vor.u32 %v4155_v21, %v4048_v32 }
  0xc3   : > { %v4922_v24 = vpack.c.bf16 %v451_v47, %v451_v47  ;;  %v557_v55 = vadd.f32 %v4723_v61, %v541_v9  ;;  %v1815_v10 = vrot.slane %v1813_v22, 1  ;;  %v1820_v35 = vrot.slane %v1818_v15, 1  ;;  %v4954_v21 = vpop.permute.xlu0 %3279 }
  0xc4   : > { %v1134_v30 = vrot.slane %v1093_v14, 1  ;;  %v738_v33 = vunpack.c.l.b16 %v482_v4  ;;  %v1479_v40 = vmul.f32 %v4714_v23, %v1463_v57  ;;  %v1559_v56 = vunpack.c.l.bf16 %v4013_v48 }
  0xc5   : > { %v573_v36 = vmax.f32 %v557_v55, 0.0  ;;  %v739_v54 = vunpack.c.l.b16 %v4922_v24  ;;  %v1816_v37 = vor.u32 %v1815_v10, %v1811_v8  ;;  %v4937_v52 = vsel %vm2219_vm2, %v4049_v45, 0  ;;  %v517_v55 = vld [vmem:[%s4397_s25 + $0xa4] sm:$0x1]  ;;  %v4028_v10 = vld [vmem:[%s6165_s3 + $0x8] sm:$0xf] }
  0xc6   : > { %v1136_v51 = vsel %vm1097_vm0, %v1134_v30, %v1135_v25  ;;  %v1495_v53 = vadd.f32 %v4723_v61, %v1479_v40  ;;  %2359 = vmatpush.bf16.msra.mxu1 %v4937_v52  ;;  %v1180_v19 = vsel %vm1178_vm3, %v4446_v62, %v1018_v12  ;;  %v1575_v58 = vmul.f32 %v4714_v23, %v1559_v56  ;;  %v1147_v25 = vpop.permute.xlu2 %1146  ;;  %v332_v62 = vld [vmem:[%s4397_s25 + $0x9c] sm:$0xff]  }
  0xc7   : > { %1170 = vrot.lane.b32.xlu1 %v1136_v51, %s4341_s30  ;;  %v589_v34 = vpack.c.bf16 %v573_v36, %v573_v36  ;;  %v4933_v44 = vpack.c.b16 %v739_v54, %v738_v33  ;;  %v1821_v39 = vsel %vm824_vm1, %v1816_v37, %v1820_v35  ;;  %v970_v59 = vshrl.u32 %v4895_v49, 16 }
  0xc8   : > { %1962 = vrot.lane.b32.xlu2 %v1821_v39, %s4342_s6  ;;  %v1511_v29 = vmax.f32 %v1495_v53, 0.0  ;;  %v972_v47 = vshll.u32 %v4895_v49, 16  ;;  %v1591_v22 = vadd.f32 %v4723_v61, %v1575_v58  ;;  %v977_v14 = vshll.u32 %v4902_v63, 16  ;;  %v4156_v63 = vld [vmem:[%s6165_s3 + $0x8] sm:$0x30] }
  0xc9   : > { %v797_v2 = vunpack.c.l.b16 %v589_v34  ;;  %v886_v6 = vshrl.u32 %v4933_v44, 16  ;;  %v888_v8 = vshll.u32 %v4933_v44, 16  ;;  %v1213_v32 = vsel %vm1211_vm4, %v1180_v19, %v1147_v25  ;;  %v1955_v19 = vpop.permute.xlu1 %1954  ;;  %v4119_v25 = vld [vmem:[%s4397_s25 + $0x54] sm:$0xe] }
  0xca   : > { %v1527_v9 = vpack.c.bf16 %v1511_v29, %v1511_v29  ;;  %v974_v57 = vrot.slane %v972_v47, 1  ;;  %v1607_v30 = vmax.f32 %v1591_v22, 0.0  ;;  %v979_v33 = vrot.slane %v977_v14, 1  ;;  %4050 = vmatmul.msk.bf16.vlgmr.msra.gmra.mxu1 %vm2186_vm5, %v1213_v32 }
  0xcb   : > { %v4951_v4 = vpack.c.b16 %v797_v2, %v797_v2  ;;  %v890_v15 = vrot.slane %v888_v8, 1  ;;  %v364_v37 = vunpack.c.l.bf16 %v332_v62  ;;  %v365_v51 = vunpack.c.h.bf16 %v332_v62  ;;  %v613_v8 = vld [vmem:[%s4397_s25 + $0x9c] sm:$0xe] }
  0xcc   : > { %v1735_v48 = vunpack.c.l.b16 %v1527_v9  ;;  %v975_v36 = vor.u32 %v974_v57, %v970_v59  ;;  %v1623_v12 = vpack.c.bf16 %v1607_v30, %v1607_v30  ;;  %v533_v53 = vunpack.c.l.bf16 %v517_v55 }
  0xcd   : > { %v891_v35 = vor.u32 %v890_v15, %v886_v6  ;;  %v893_v40 = vshll.u32 %v4951_v4, 16  ;;  %v399_v39 = vmul.f32 %v4714_v23, %v364_v37  ;;  %v4029_v29 = vor.u32 %v4156_v63, %v4028_v10  ;;  %v4134_v63 = vld [vmem:[%s6165_s3 + $0x10] sm:$0xf] }
  0xce   : > { %v1751_v45 = vpack.c.b16 %v1735_v48, %v1735_v48  ;;  %v980_v34 = vsel %vm824_vm1, %v975_v36, %v979_v33  ;;  %v2007_v2 = vunpack.c.l.b16 %v1623_v12  ;;  %v400_v59 = vmul.f32 %v4714_v23, %v365_v51  ;;  %v2083_v55 = vpop.permute.xlu2 %2082 }
  0xcf   : > { %v895_v56 = vrot.slane %v893_v40, 1  ;;  %v434_v9 = vadd.f32 %v4723_v61, %v399_v39  ;;  %v549_v22 = vmul.f32 %v4714_v23, %v533_v53  ;;  %v2221_v14 = vsel %vm2219_vm2, %v4029_v29, 0 }
  0xd0   : > { %v1830_v58 = vshll.u32 %v1751_v45, 16  ;;  %v2050_v6 = vrot.slane %v1751_v45, 1  ;;  %1041 = vrot.lane.b32.xlu2 %v980_v34, %s4342_s6  ;;  %v2023_v15 = vpack.c.b16 %v4792_v43, %v2007_v2  ;;  %v435_v57 = vadd.f32 %v4723_v61, %v400_v59  ;;  %2230 = vmatpush.bf16.msra.mxu0 %v2221_v14 }
  0xd1   : > { %v896_v47 = vsel %vm824_vm1, %v891_v35, %v895_v56  ;;  %v2115_v32 = vsel %vm1178_vm3, %v4490_v18, %v1955_v19  ;;  %v466_v10 = vmax.f32 %v434_v9, 0.0  ;;  %v565_v48 = vadd.f32 %v4723_v61, %v549_v22  ;;  %v4157_v35 = vld [vmem:[%s6165_s3 + $0x10] sm:$0x30]  ;;  %4277 = vmatpush.bf16.msra.mxu3 %v2221_v14  ;;  %v3150_v56 = vpop.permute.xlu0 %3149 }
  0xd2   : > { %1027 = vrot.lane.b32.xlu0 %v896_v47, %s4342_s6  ;;  %v1832_v62 = vrot.slane %v1830_v58, 1  ;;  %v629_v30 = vunpack.c.l.bf16 %v613_v8  ;;  %v2754_v33 = vunpack.c.l.bf16 %v4119_v25  ;;  %v2049_v18 = vrot.slane %v2023_v15, 1  ;;  %v4272_v58 = vld [vmem:[%s4397_s25 + $0x60] sm:$0xff]   ;;  %v4104_v25 = vld [vmem:[%s4397_s25 + $0x68] sm:$0x1] }
  0xd3   : > { %v467_v36 = vmax.f32 %v435_v57, 0.0  ;;  %v3245_v37 = vrot.slane %v4885_v20, 1  ;;  %v498_v45 = vpack.c.bf16 %v466_v10, %v466_v10  ;;  %v581_v12 = vmax.f32 %v565_v48, 0.0  ;;  %v4120_v47 = vld [vmem:[%s4397_s25 + $0x60] sm:$0xe] }
  0xd4   : > { %v1833_v40 = vsel %vm824_vm1, %v4813_v28, %v1832_v62  ;;  %v645_v51 = vmul.f32 %v4714_v23, %v629_v30  ;;  %v2770_v53 = vmul.f32 %v4714_v23, %v2754_v33  ;;  %v2051_v34 = vsel %vm1097_vm0, %v2049_v18, %v2050_v6 }
  0xd5   : > { %4278 = vmatpush.bf16.msrb.mxu3 %v4937_v52  ;;  %1964 = vrot.lane.b32.xlu1 %v1833_v40, %s4342_s6  ;;  %v499_v39 = vpack.c.bf16 %v467_v36, %v467_v36  ;;  %v2147_v29 = vsel %vm1211_vm4, %v2115_v32, %v2083_v55  ;;  %v4135_v19 = vor.u32 %v4157_v35, %v4134_v63  ;;  %v754_v52 = vunpack.c.l.b16 %v498_v45 }
  0xd6   : > { %v597_v2 = vpack.c.bf16 %v581_v12, %v581_v12  ;;  %v661_v59 = vadd.f32 %v4723_v61, %v645_v51  ;;  %v2786_v8 = vadd.f32 %v4723_v61, %v2770_v53  ;;  %4030 = vmatmul.msk.bf16.vlgmr.msra.gmra.mxu0 %vm2186_vm5, %v2147_v29  ;;  %v3310_v6 = vsel %vm1178_vm3, %v4442_v60, %v3150_v56 }
  0xd7   : > { %v755_v9 = vunpack.c.l.b16 %v499_v39  ;;  %v5003_v22 = vsel %vm2219_vm2, %v4135_v19, 0  ;;  %v4236_v14 = vunpack.c.l.bf16 %v4272_v58  ;;  %v4237_v32 = vunpack.c.h.bf16 %v4272_v58  ;;  %v5022_v39 = vpop.permute.xlu2 %2106 }
  0xd8   : > { %v805_v62 = vunpack.c.l.b16 %v597_v2  ;;  %v677_v15 = vmax.f32 %v661_v59, 0.0  ;;  %v2802_v57 = vmax.f32 %v2786_v8, 0.0  ;;  %3423 = vmatpush.bf16.msra.mxu2 %v5003_v22  ;;  %v2659_v48 = vunpack.c.l.bf16 %v4104_v25 }
  0xd9   : > { %v5009_v55 = vpack.c.b16 %v755_v9, %v754_v52  ;;  %v5012_v10 = vmul.f32 %v4714_v23, %v4236_v14  ;;  %v2755_v30 = vunpack.c.l.bf16 %v4120_v47  ;;  %v5015_v40 = vmul.f32 %v4714_v23, %v4237_v32 }
  0xda   : > { %2092 = vrot.lane.b32.xlu0 %v2051_v34, %s4341_s30  ;;  %v821_v33 = vpack.c.b16 %v805_v62, %v805_v62  ;;  %v693_v63 = vpack.c.bf16 %v677_v15, %v677_v15  ;;  %v2818_v35 = vpack.c.bf16 %v2802_v57, %v2802_v57  ;;  %v2675_v12 = vmul.f32 %v4714_v23, %v2659_v48  ;;  %v3152_v57 = vpop.permute.xlu1 %3151 }
  0xdb   : > { %v982_v18 = vshrl.u32 %v5009_v55, 16  ;;  %v984_v36 = vshll.u32 %v5009_v55, 16  ;;  %v2553_v45 = vadd.f32 %v4723_v61, %v5012_v10  ;;  %v2554_v19 = vadd.f32 %v4723_v61, %v5015_v40 }
  0xdc   : > { %v989_v51 = vshll.u32 %v821_v33, 16  ;;  %v1078_v53 = vunpack.c.l.b16 %v693_v63  ;;  %v1138_v56 = vrot.slane %v821_v33, 1  ;;  %v3202_v34 = vunpack.c.l.b16 %v2818_v35 }
  0xdd   : > { %v986_v29 = vrot.slane %v984_v36, 1  ;;  %v2585_v58 = vmax.f32 %v2553_v45, 0.0  ;;  %v2691_v2 = vadd.f32 %v4723_v61, %v2675_v12  ;;  %v2771_v25 = vmul.f32 %v4714_v23, %v2755_v30  ;;  %v605_v36 = vld [vmem:[%s4397_s25 + $0x3c] sm:$0xe] }
  0xde   : > { %v991_v52 = vrot.slane %v989_v51, 1  ;;  %v1094_v59 = vpack.c.b16 %v755_v9, %v1078_v53  ;;  %v3218_v8 = vpack.c.b16 %v2872_v42, %v3202_v34  ;;  %v2586_v14 = vmax.f32 %v2554_v19, 0.0  ;;  %v3972_v9 = vld [vmem:[%s4397_s25 + $0x54] sm:$0xff]  }
  0xdf   : > { %v987_v47 = vor.u32 %v986_v29, %v982_v18  ;;  %v2617_v62 = vpack.c.bf16 %v2585_v58, %v2585_v58  ;;  %v2707_v15 = vmax.f32 %v2691_v2, 0.0  ;;  %v2787_v33 = vadd.f32 %v4723_v61, %v2771_v25  ;;  %v3998_v18 = vld [vmem:[%s4397_s25 + $0x5c] sm:$0x1] }
  0xe0   : > { %v1137_v32 = vrot.slane %v1094_v59, 1  ;;  %v3244_v48 = vrot.slane %v3218_v8, 1  ;;  %v3342_v63 = vsel %vm1211_vm4, %v3310_v6, %v4913_v0  ;;  %v2618_v42 = vpack.c.bf16 %v2586_v14, %v2586_v14 }
  0xe1   : > { %v992_v46 = vsel %vm824_vm1, %v987_v47, %v991_v52  ;;  %v2723_v35 = vpack.c.bf16 %v2707_v15, %v2707_v15  ;;  %v2873_v30 = vunpack.c.l.b16 %v2617_v62  ;;  %4136 = vmatmul.msk.bf16.vlgmr.msra.gmra.mxu2 %vm2186_vm5, %v3342_v63  ;;  %v2803_v51 = vmax.f32 %v2787_v33, 0.0  ;;  %v1957_v62 = vpop.permute.xlu2 %1956  ;;  %v510_v15 = vld [vmem:[%s4397_s25 + $0x50] sm:$0x1] }
  0xe2   : > { %1043 = vrot.lane.b32.xlu1 %v992_v46, %s4342_s6  ;;  %v1139_v45 = vsel %vm1097_vm0, %v1137_v32, %v1138_v56  ;;  %v3246_v12 = vsel %vm1097_vm0, %v3244_v48, %v3245_v37  ;;  %v5045_v0 = vsel %vm1178_vm3, %v4461_v27, %v3152_v57  ;;  %v5049_v6 = vunpack.c.l.b16 %v2618_v42  ;;  %v1979_v56 = vpop.permute.xlu0 %1978 }
  0xe3   : > { %1172 = vrot.lane.b32.xlu0 %v1139_v45, %s4341_s30  ;;  %3287 = vrot.lane.b32.xlu2 %v3246_v12, %s4341_s30  ;;  %v2931_v53 = vunpack.c.l.b16 %v2723_v35  ;;  %v1294_v34 = vunpack.c.l.bf16 %v3972_v9  ;;  %v1295_v29 = vunpack.c.h.bf16 %v3972_v9  ;;  %v2819_v19 = vpack.c.bf16 %v2803_v51, %v2803_v51  ;;  %v5079_v12 = vld [vmem:[%s6163_s1] ss:$0 sm:$0xff] }
  0xe4   : > { %v1464_v20 = vunpack.c.l.bf16 %v3998_v18  ;;  %v621_v58 = vunpack.c.l.bf16 %v605_v36  ;;  %v1114_v37 = vrot.slane %v4951_v4, 1  ;;  %v5053_v2 = vpack.c.b16 %v5049_v6, %v2873_v30 }
  0xe5   : > { %v5055_v27 = vpack.c.b16 %v2931_v53, %v2931_v53  ;;  %v1326_v52 = vmul.f32 %v4714_v23, %v1294_v34  ;;  %v1327_v59 = vmul.f32 %v4714_v23, %v1295_v29  ;;  %v3203_v8 = vunpack.c.l.b16 %v2819_v19  ;;  %v606_v53 = vld [vmem:[%s4397_s25 + $0x48] sm:$0xe] }
  0xe6   : > { %v1480_v25 = vmul.f32 %v4714_v23, %v1464_v20  ;;  %v637_v47 = vmul.f32 %v4714_v23, %v621_v58  ;;  %v2139_v14 = vsel %vm1178_vm3, %v4523_v3, %v1979_v56  ;;  %v5069_v33 = vsel %vm1178_vm3, %v4442_v60, %v1957_v62  ;;  %v5089_v20 = vld [vmem:[%s6164_s2] ss:$0 sm:$0xff] }
  0xe7   : > { %v3248_v57 = vrot.slane %v5055_v27, 1  ;;  %v1358_v32 = vadd.f32 %v4723_v61, %v1326_v52  ;;  %v1359_v48 = vadd.f32 %v4723_v61, %v1327_v59  ;;  %v3219_v63 = vpack.c.b16 %v5049_v6, %v3203_v8 }
  0xe8   : > { %v1496_v23 = vadd.f32 %v4723_v61, %v1480_v25  ;;  %v653_v9 = vadd.f32 %v4723_v61, %v637_v47  ;;  %v526_v42 = vunpack.c.l.bf16 %v510_v15  ;;  %v622_v8 = vunpack.c.l.bf16 %v606_v53  ;;  %v1020_v15 = vpop.permute.xlu1 %1019 }
  0xe9   : > { %v1390_v3 = vmax.f32 %v1358_v32, 0.0  ;;  %v1391_v46 = vmax.f32 %v1359_v48, 0.0  ;;  %v3247_v35 = vrot.slane %v3219_v63, 1  ;;  %v2171_v62 = vsel %vm1211_vm4, %v2139_v14, %v5022_v39 }
  0xea   : > { %v1512_v30 = vmax.f32 %v1496_v23, 0.0  ;;  %v669_v18 = vmax.f32 %v653_v9, 0.0  ;;  %v542_v51 = vmul.f32 %v5079_v12, %v526_v42  ;;  %v638_v63 = vmul.f32 %v5079_v12, %v622_v8  ;;  %4042 = vmatmul.msk.bf16.vlgmr.msra.gmra.mxu3 %vm2186_vm5, %v2171_v62  ;;  %v518_v9 = vld [vmem:[%s4397_s25 + $0xb0] sm:$0x1] }
  0xeb   : > { %v1422_v36 = vpack.c.bf16 %v1390_v3, %v1390_v3  ;;  %v5074_v45 = vpack.c.bf16 %v1391_v46, %v1391_v46  ;;  %v3249_v61 = vsel %vm1097_vm0, %v3247_v35, %v3248_v57  ;;  %v4260_v57 = vld [vmem:[%s4397_s25 + $0xa8] sm:$0xff]   ;;  %v5107_v23 = vsel %vm1178_vm3, %v4548_v50, %v1020_v15  ;;  %4279 = vmatpush.bf16.msra.mxu3 %v5003_v22 }
  0xec   : > { %v1528_v34 = vpack.c.bf16 %v1512_v30, %v1512_v30  ;;  %v685_v29 = vpack.c.bf16 %v669_v18, %v669_v18  ;;  %3289 = vrot.lane.b32.xlu1 %v3249_v61, %s4341_s30  ;;  %v558_v58 = vadd.f32 %v5089_v20, %v542_v51  ;;  %v4188_v42 = vunpack.c.l.bf16 %v4260_v57 }
  0xed   : > { %v1678_v56 = vunpack.c.l.b16 %v1422_v36  ;;  %v1679_v19 = vunpack.c.l.b16 %v5074_v45  ;;  %v4189_v18 = vunpack.c.h.bf16 %v4260_v57  ;;  %v534_v50 = vunpack.c.l.bf16 %v518_v9 }
  0xee   : > { %v1736_v52 = vunpack.c.l.b16 %v1528_v34  ;;  %v1070_v59 = vunpack.c.l.b16 %v685_v29  ;;  %v574_v47 = vmax.f32 %v558_v58, 0.0  ;;  %v401_v61 = vmul.f32 %v5079_v12, %v4188_v42  ;;  %v4105_v42 = vld [vmem:[%s4397_s25 + $0x74] sm:$0x1] }
  0xef   : > { %v5094_v25 = vpack.c.b16 %v1679_v19, %v1678_v56  ;;  %v402_v29 = vmul.f32 %v5079_v12, %v4189_v18  ;;  %v550_v56 = vmul.f32 %v5079_v12, %v534_v50  ;;  %v3032_v4 = vshll.u32 %v5053_v2, 16 }
  0xf0   : > { %v5099_v32 = vpack.c.b16 %v1736_v52, %v1736_v52  ;;  %v1086_v48 = vpack.c.b16 %v739_v54, %v1070_v59  ;;  %v590_v14 = vpack.c.bf16 %v574_v47, %v574_v47  ;;  %v654_v54 = vadd.f32 %v5089_v20, %v638_v63 }
  0xf1   : > { %v1835_v3 = vshrl.u32 %v5094_v25, 16  ;;  %v1837_v39 = vshll.u32 %v5094_v25, 16  ;;  %v436_v52 = vadd.f32 %v5089_v20, %v401_v61  ;;  %v3030_v59 = vshrl.u32 %v5053_v2, 16 }
  0xf2   : > { %v1842_v46 = vshll.u32 %v5099_v32, 16  ;;  %v1113_v24 = vrot.slane %v1086_v48, 1  ;;  %v798_v30 = vunpack.c.l.b16 %v590_v14  ;;  %v670_v53 = vmax.f32 %v654_v54, 0.0 }
  0xf3   : > { %v1839_v35 = vrot.slane %v1837_v39, 1  ;;  %v437_v62 = vadd.f32 %v5089_v20, %v402_v29  ;;  %v566_v15 = vadd.f32 %v5089_v20, %v550_v56  ;;  %v468_v48 = vmax.f32 %v436_v52, 0.0  ;;  %v1981_v39 = vpop.permute.xlu2 %1980 }
  0xf4   : > { %v1844_v36 = vrot.slane %v1842_v46, 1  ;;  %v1115_v51 = vsel %vm1097_vm0, %v1113_v24, %v1114_v37  ;;  %v5120_v34 = vpack.c.b16 %v798_v30, %v798_v30  ;;  %v686_v58 = vpack.c.bf16 %v670_v53, %v670_v53  ;;  %v4080_v37 = vld [vmem:[%s4397_s25 + $0x6c] sm:$0xff]  }
  0xf5   : > { %v1840_v22 = vor.u32 %v1839_v35, %v1835_v3  ;;  %1156 = vrot.lane.b32.xlu2 %v1115_v51, %s4341_s30  ;;  %v3034_v63 = vrot.slane %v3032_v4, 1  ;;  %v3037_v9 = vshll.u32 %v5055_v27, 16  ;;  %v1149_v3 = vpop.permute.xlu0 %1148  ;;  %v469_v14 = vmax.f32 %v437_v62, 0.0  ;;  %v4121_v4 = vld [vmem:[%s4397_s25 + $0x6c] sm:$0xe] }
  0xf6   : > { %v1117_v47 = vrot.slane %v5120_v34, 1  ;;  %v1071_v57 = vunpack.c.l.b16 %v686_v58  ;;  %v582_v46 = vmax.f32 %v566_v15, 0.0  ;;  %v5136_v24 = vsel %vm1178_vm3, %v4618_v31, %v1981_v39 }
  0xf7   : > { %v1845_v8 = vsel %vm824_vm1, %v1840_v22, %v1844_v36  ;;  %v2491_v54 = vunpack.c.l.bf16 %v4080_v37  ;;  %v500_v30 = vpack.c.bf16 %v468_v48, %v468_v48  ;;  %v5140_v18 = vor.u32 %v3034_v63, %v3030_v59  ;;  %v2085_v59 = vpop.permute.xlu1 %2084 }
  0xf8   : > { %1966 = vrot.lane.b32.xlu0 %v1845_v8, %s4342_s6  ;;  %v1087_v35 = vpack.c.b16 %v4792_v43, %v1071_v57  ;;  %v3039_v50 = vrot.slane %v3037_v9, 1  ;;  %v501_v36 = vpack.c.bf16 %v469_v14, %v469_v14  ;;  %v598_v51 = vpack.c.bf16 %v582_v46, %v582_v46 }
  0xf9   : > { %v2492_v27 = vunpack.c.h.bf16 %v4080_v37  ;;  %v2523_v53 = vmul.f32 %v5079_v12, %v2491_v54  ;;  %v756_v22 = vunpack.c.l.b16 %v500_v30  ;;  %v2660_v29 = vunpack.c.l.bf16 %v4105_v42 }
  0xfa   : > { %v1116_v61 = vrot.slane %v1087_v35, 1  ;;  %v3040_v31 = vsel %vm824_vm1, %v5140_v18, %v3039_v50  ;;  %v5145_v56 = vunpack.c.l.b16 %v501_v36  ;;  %v806_v58 = vunpack.c.l.b16 %v598_v51  ;;  %v320_v51 = vld [vmem:[%s4397_s25 + $0x54] sm:$0xff]  }
  0xfb   : > { %v2524_v43 = vmul.f32 %v5079_v12, %v2492_v27  ;;  %v2555_v52 = vadd.f32 %v5089_v20, %v2523_v53  ;;  %v2676_v8 = vmul.f32 %v5079_v12, %v2660_v29  ;;  %v1215_v62 = vsel %vm1211_vm4, %v5107_v23, %v1149_v3 }
  0xfc   : > { %v1118_v37 = vsel %vm1097_vm0, %v1116_v61, %v1117_v47  ;;  %v3344_v15 = vsel %vm1211_vm4, %v5045_v0, %v4954_v21  ;;  %v5160_v57 = vpack.c.b16 %v5145_v56, %v756_v22  ;;  %v5162_v48 = vpack.c.b16 %v806_v58, %v806_v58  ;;  %4051 = vmatmul.msk.bf16.gmra.mxu1 %vm2186_vm5, %v1215_v62  ;;  %v511_v22 = vld [vmem:[%s4397_s25 + $0x5c] sm:$0x1] }
  0xfd   : > { %3161 = vrot.lane.b32.xlu2 %v3040_v31, %s4342_s6  ;;  %1158 = vrot.lane.b32.xlu1 %v1118_v37, %s4341_s30  ;;  %v2556_v63 = vadd.f32 %v5089_v20, %v2524_v43  ;;  %v2587_v9 = vmax.f32 %v2555_v52, 0.0  ;;  %v2692_v47 = vadd.f32 %v5089_v20, %v2676_v8  ;;  %v2756_v23 = vunpack.c.l.bf16 %v4121_v4  ;;  %v3154_v35 = vpop.permute.xlu0 %3153  ;;  %v5185_v52 = vpop.permute.xlu2 %3281 }
  0xfe   : > { %4137 = vmatmul.msk.bf16.gmra.mxu2 %vm2186_vm5, %v3344_v15  ;;  %v2149_v21 = vsel %vm1211_vm4, %v5069_v33, %v2085_v59  ;;  %v994_v0 = vshrl.u32 %v5160_v57, 16  ;;  %v996_v3 = vshll.u32 %v5160_v57, 16  ;;  %v1001_v39 = vshll.u32 %v5162_v48, 16 }
  0xff   : > { %v2588_v14 = vmax.f32 %v2556_v63, 0.0  ;;  %4031 = vmatmul.msk.bf16.gmra.mxu0 %vm2186_vm5, %v2149_v21  ;;  %v2619_v46 = vpack.c.bf16 %v2587_v9, %v2587_v9  ;;  %v2708_v54 = vmax.f32 %v2692_v47, 0.0  ;;  %v2772_v42 = vmul.f32 %v5079_v12, %v2756_v23  ;;  %v607_v21 = vld [vmem:[%s4397_s25 + $0x54] sm:$0xe] }
 0x100   : > { %v998_v30 = vrot.slane %v996_v3, 1  ;;  %v1003_v50 = vrot.slane %v1001_v39, 1  ;;  %v905_v33 = vshll.u32 %v5120_v34, 16  ;;  %v5183_v43 = vsel %vm1178_vm3, %v4595_v11, %v3154_v35 }
 0x101   : > { %v2620_v36 = vpack.c.bf16 %v2588_v14, %v2588_v14  ;;  %v2724_v27 = vpack.c.bf16 %v2708_v54, %v2708_v54  ;;  %v2875_v53 = vunpack.c.l.b16 %v2619_v46  ;;  %v2788_v61 = vadd.f32 %v5089_v20, %v2772_v42  ;;  %v2109_v46 = vpop.permute.xlu1 %2108 }
 0x102   : > { %v5179_v31 = vor.u32 %v998_v30, %v994_v0  ;;  %v907_v58 = vrot.slane %v905_v33, 1  ;;  %v352_v34 = vunpack.c.l.bf16 %v320_v51  ;;  %v353_v62 = vunpack.c.h.bf16 %v320_v51  ;;  %v4014_v51 = vld [vmem:[%s4397_s25 + $0x54] sm:$0xe] }
 0x103   : > { %v2876_v29 = vunpack.c.l.b16 %v2620_v36  ;;  %v2932_v59 = vunpack.c.l.b16 %v2724_v27  ;;  %v2804_v4 = vmax.f32 %v2788_v61, 0.0  ;;  %v527_v15 = vunpack.c.l.bf16 %v511_v22 }
 0x104   : > { %v1004_v37 = vsel %vm824_vm1, %v5179_v31, %v1003_v50  ;;  %v908_v47 = vsel %vm824_vm1, %v4813_v28, %v907_v58  ;;  %v387_v23 = vmul.f32 %v5079_v12, %v352_v34  ;;  %v388_v39 = vmul.f32 %v5079_v12, %v353_v62 }
 0x105   : > { %v5189_v8 = vpack.c.b16 %v2876_v29, %v2875_v53  ;;  %1045 = vrot.lane.b32.xlu0 %v1004_v37, %s4342_s6  ;;  %v2948_v63 = vpack.c.b16 %v2932_v59, %v2932_v59  ;;  %v2820_v9 = vpack.c.bf16 %v2804_v4, %v2804_v4  ;;  %1029 = vrot.lane.b32.xlu2 %v908_v47, %s4342_s6  ;;  %v623_v33 = vunpack.c.l.bf16 %v607_v21  ;;  %v1022_v37 = vpop.permute.xlu0 %1021  ;;  %v3999_v47 = vld [vmem:[%s4397_s25 + $0x68] sm:$0x1] }
 0x106   : > { %v543_v14 = vmul.f32 %v5079_v12, %v527_v15  ;;  %v422_v28 = vadd.f32 %v5089_v20, %v387_v23  ;;  %v423_v50 = vadd.f32 %v5089_v20, %v388_v39  ;;  %v2173_v22 = vsel %vm1211_vm4, %v5136_v24, %v2109_v46 }
 0x107   : > { %v3042_v0 = vshrl.u32 %v5189_v8, 16  ;;  %v3044_v3 = vshll.u32 %v5189_v8, 16  ;;  %v3049_v54 = vshll.u32 %v2948_v63, 16  ;;  %v3204_v42 = vunpack.c.l.b16 %v2820_v9  ;;  %4043 = vmatmul.msk.bf16.gmra.mxu3 %vm2186_vm5, %v2173_v22 }
 0x108   : > { %v3251_v35 = vrot.slane %v2948_v63, 1  ;;  %v559_v36 = vadd.f32 %v5089_v20, %v543_v14  ;;  %v454_v61 = vmax.f32 %v422_v28, 0.0  ;;  %v455_v59 = vmax.f32 %v423_v50, 0.0 }
 0x109   : > { %v3046_v30 = vrot.slane %v3044_v3, 1  ;;  %v3051_v27 = vrot.slane %v3049_v54, 1  ;;  %v3220_v53 = vpack.c.b16 %v2876_v29, %v3204_v42  ;;  %v639_v34 = vmul.f32 %v5079_v12, %v623_v33  ;;  %v4015_v3 = vld [vmem:[%s4397_s25 + $0x60] sm:$0xe] }
 0x10a   : > { %v575_v4 = vmax.f32 %v559_v36, 0.0  ;;  %v486_v15 = vpack.c.bf16 %v454_v61, %v454_v61  ;;  %v1560_v63 = vunpack.c.l.bf16 %v4014_v51  ;;  %v2053_v9 = vrot.slane %v5099_v32, 1  ;;  %v4273_v36 = vld [vmem:[%s4397_s25 + $0x78] sm:$0xff]  }
 0x10b   : > { %v3047_v58 = vor.u32 %v3046_v30, %v3042_v0  ;;  %v3250_v62 = vrot.slane %v3220_v53, 1  ;;  %v487_v23 = vpack.c.bf16 %v455_v59, %v455_v59  ;;  %v655_v21 = vadd.f32 %v5089_v20, %v639_v34  ;;  %v1151_v0 = vpop.permute.xlu2 %1150  ;;  %v519_v32 = vld [vmem:[%s4397_s25 + $0xbc] sm:$0x1] }
 0x10c   : > { %v591_v24 = vpack.c.bf16 %v575_v4, %v575_v4  ;;  %v742_v14 = vunpack.c.l.b16 %v486_v15  ;;  %v1576_v46 = vmul.f32 %v5079_v12, %v1560_v63  ;;  %v1184_v54 = vsel %vm1178_vm3, %v4442_v60, %v1022_v37 }
 0x10d   : > { %v3052_v29 = vsel %vm824_vm1, %v3047_v58, %v3051_v27  ;;  %v3252_v39 = vsel %vm1097_vm0, %v3250_v62, %v3251_v35  ;;  %v743_v42 = vunpack.c.l.b16 %v487_v23  ;;  %v671_v30 = vmax.f32 %v655_v21, 0.0  ;;  %v1959_v58 = vpop.permute.xlu1 %1958 }
 0x10e   : > { %3163 = vrot.lane.b32.xlu1 %v3052_v29, %s4342_s6  ;;  %3291 = vrot.lane.b32.xlu0 %v3252_v39, %s4341_s30  ;;  %v799_v28 = vunpack.c.l.b16 %v591_v24  ;;  %v1465_v50 = vunpack.c.l.bf16 %v3999_v47  ;;  %v1592_v33 = vadd.f32 %v5089_v20, %v1576_v46  ;;  %v1561_v51 = vunpack.c.l.bf16 %v4015_v3  ;;  %v4106_v24 = vld [vmem:[%s4397_s25 + $0x80] sm:$0x1] }
 0x10f   : > { %v1217_v27 = vsel %vm1211_vm4, %v1184_v54, %v1151_v0  ;;  %v3346_v35 = vsel %vm1211_vm4, %v5183_v43, %v5185_v52  ;;  %v5226_v53 = vpack.c.b16 %v743_v42, %v742_v14  ;;  %v687_v60 = vpack.c.bf16 %v671_v30, %v671_v30 }
 0x110   : > { %v815_v61 = vpack.c.b16 %v799_v28, %v799_v28  ;;  %v1481_v22 = vmul.f32 %v5079_v12, %v1465_v50  ;;  %4052 = vmatmul.msk.bf16.gmra.mxu1 %vm2186_vm5, %v1217_v27  ;;  %v1608_v59 = vmax.f32 %v1592_v33, 0.0  ;;  %v1577_v4 = vmul.f32 %v5079_v12, %v1561_v51  ;;  %4138 = vmatmul.msk.bf16.gmra.mxu2 %vm2186_vm5, %v3346_v35 }
 0x111   : > { %v5234_v34 = vsel %vm1178_vm3, %v4649_v5, %v1959_v58  ;;  %v4240_v43 = vunpack.c.l.bf16 %v4273_v36  ;;  %v910_v52 = vshrl.u32 %v5226_v53, 16  ;;  %v912_v37 = vshll.u32 %v5226_v53, 16 }
 0x112   : > { %v917_v62 = vshll.u32 %v815_v61, 16  ;;  %v1072_v15 = vunpack.c.l.b16 %v687_v60  ;;  %v1120_v63 = vrot.slane %v815_v61, 1  ;;  %v1624_v47 = vpack.c.bf16 %v1608_v59, %v1608_v59 }
 0x113   : > { %v1497_v29 = vadd.f32 %v5089_v20, %v1481_v22  ;;  %v1593_v23 = vadd.f32 %v5089_v20, %v1577_v4  ;;  %v914_v21 = vrot.slane %v912_v37, 1  ;;  %v4241_v5 = vunpack.c.h.bf16 %v4273_v36  ;;  %v614_v36 = vld [vmem:[%s4397_s25 + $0xa8] sm:$0xe] }
 0x114   : > { %v919_v0 = vrot.slane %v917_v62, 1  ;;  %v1088_v3 = vpack.c.b16 %v743_v42, %v1072_v15  ;;  %v2008_v39 = vunpack.c.l.b16 %v1624_v47  ;;  %v5242_v54 = vmul.f32 %v5079_v12, %v4240_v43 }
 0x115   : > { %v1513_v14 = vmax.f32 %v1497_v29, 0.0  ;;  %v1609_v46 = vmax.f32 %v1593_v23, 0.0  ;;  %v915_v28 = vor.u32 %v914_v21, %v910_v52  ;;  %v5245_v50 = vmul.f32 %v5079_v12, %v4241_v5  ;;  %v3156_v23 = vpop.permute.xlu2 %3155 }
 0x116   : > { %v1119_v30 = vrot.slane %v1088_v3, 1  ;;  %v2661_v33 = vunpack.c.l.bf16 %v4106_v24  ;;  %v2024_v51 = vpack.c.b16 %v1679_v19, %v2008_v39  ;;  %v2557_v42 = vadd.f32 %v5089_v20, %v5242_v54  ;;  %v336_v24 = vld [vmem:[%s4397_s25 + $0xb4] sm:$0xff]  }
 0x117   : > { %v1529_v27 = vpack.c.bf16 %v1513_v14, %v1513_v14  ;;  %v1625_v35 = vpack.c.bf16 %v1609_v46, %v1609_v46  ;;  %v920_v61 = vsel %vm824_vm1, %v915_v28, %v919_v0  ;;  %v2558_v22 = vadd.f32 %v5089_v20, %v5245_v50  ;;  %v615_v39 = vld [vmem:[%s4397_s25 + $0xb4] sm:$0xe] }
 0x118   : > { %v1121_v60 = vsel %vm1097_vm0, %v1119_v30, %v1120_v63  ;;  %v2677_v58 = vmul.f32 %v5079_v12, %v2661_v33  ;;  %1031 = vrot.lane.b32.xlu1 %v920_v61, %s4342_s6  ;;  %v2052_v45 = vrot.slane %v2024_v51, 1  ;;  %v2589_v4 = vmax.f32 %v2557_v42, 0.0  ;;  %v2087_v51 = vpop.permute.xlu0 %2086 }
 0x119   : > { %1160 = vrot.lane.b32.xlu0 %v1121_v60, %s4341_s30  ;;  %v1737_v19 = vunpack.c.l.b16 %v1529_v27  ;;  %v2009_v59 = vunpack.c.l.b16 %v1625_v35  ;;  %v2590_v43 = vmax.f32 %v2558_v22, 0.0  ;;  %v630_v37 = vunpack.c.l.bf16 %v614_v36 }
 0x11a   : > { %v2693_v52 = vadd.f32 %v5089_v20, %v2677_v58  ;;  %v1141_v62 = vrot.slane %v5162_v48, 1  ;;  %v2054_v15 = vsel %vm1097_vm0, %v2052_v45, %v2053_v9  ;;  %v2621_v29 = vpack.c.bf16 %v2589_v4, %v2589_v4 }
 0x11b   : > { %v5264_v63 = vpack.c.b16 %v1737_v19, %v1737_v19  ;;  %v2025_v47 = vpack.c.b16 %v5049_v6, %v2009_v59  ;;  %2094 = vrot.lane.b32.xlu2 %v2054_v15, %s4341_s30  ;;  %v2622_v21 = vpack.c.bf16 %v2590_v43, %v2590_v43  ;;  %v646_v3 = vmul.f32 %v5079_v12, %v630_v37 }
 0x11c   : > { %v2709_v0 = vmax.f32 %v2693_v52, 0.0  ;;  %v5272_v5 = vsel %vm1178_vm3, %v4706_v16, %v3156_v23  ;;  %v2877_v46 = vunpack.c.l.b16 %v2621_v29  ;;  %v368_v6 = vunpack.c.l.bf16 %v336_v24 }
 0x11d   : > { %v2055_v9 = vrot.slane %v2025_v47, 1  ;;  %v2056_v14 = vrot.slane %v5264_v63, 1  ;;  %v5277_v30 = vunpack.c.l.b16 %v2622_v21  ;;  %v662_v33 = vadd.f32 %v5089_v20, %v646_v3  ;;  %v1983_v21 = vpop.permute.xlu1 %1982 }
 0x11e   : > { %v2725_v28 = vpack.c.bf16 %v2709_v0, %v2709_v0  ;;  %v369_v27 = vunpack.c.h.bf16 %v336_v24  ;;  %v403_v42 = vmul.f32 %v5079_v12, %v368_v6  ;;  %v535_v16 = vunpack.c.l.bf16 %v519_v32 }
 0x11f   : > { %v2057_v35 = vsel %vm1097_vm0, %v2055_v9, %v2056_v14  ;;  %v631_v36 = vunpack.c.l.bf16 %v615_v39  ;;  %v5283_v61 = vpack.c.b16 %v5277_v30, %v2877_v46  ;;  %v678_v22 = vmax.f32 %v662_v33, 0.0 }
 0x120   : > { %v2933_v60 = vunpack.c.l.b16 %v2725_v28  ;;  %v404_v58 = vmul.f32 %v5079_v12, %v369_v27  ;;  %2096 = vrot.lane.b32.xlu1 %v2057_v35, %s4341_s30  ;;  %v438_v45 = vadd.f32 %v5089_v20, %v403_v42  ;;  %v551_v19 = vmul.f32 %v5079_v12, %v535_v16  ;;  %v512_v27 = vld [vmem:[%s4397_s25 + $0x68] sm:$0x1] }
 0x121   : > { %v647_v59 = vmul.f32 %v5079_v12, %v631_v36  ;;  %v2151_v4 = vsel %vm1211_vm4, %v5234_v34, %v2087_v51  ;;  %v3054_v52 = vshrl.u32 %v5283_v61, 16  ;;  %v3056_v37 = vshll.u32 %v5283_v61, 16 }
 0x122   : > { %v5292_v43 = vpack.c.b16 %v2933_v60, %v2933_v60  ;;  %v694_v15 = vpack.c.bf16 %v678_v22, %v678_v22  ;;  %4032 = vmatmul.msk.bf16.gmra.mxu0 %vm2186_vm5, %v2151_v4  ;;  %v439_v47 = vadd.f32 %v5089_v20, %v404_v58  ;;  %v470_v29 = vmax.f32 %v438_v45, 0.0 }
 0x123   : > { %v567_v23 = vadd.f32 %v5089_v20, %v551_v19  ;;  %v663_v24 = vadd.f32 %v5089_v20, %v647_v59  ;;  %v3058_v0 = vrot.slane %v3056_v37, 1  ;;  %v2143_v32 = vsel %vm1178_vm3, %v4678_v7, %v1983_v21  ;;  %v2111_v21 = vpop.permute.xlu0 %2110 }
 0x124   : > { %v3061_v34 = vshll.u32 %v5292_v43, 16  ;;  %v1079_v3 = vunpack.c.l.b16 %v694_v15  ;;  %v471_v39 = vmax.f32 %v439_v47, 0.0  ;;  %v502_v9 = vpack.c.bf16 %v470_v29, %v470_v29  ;;  %v3976_v47 = vld [vmem:[%s4397_s25 + $0x6c] sm:$0xff]  }
 0x125   : > { %v583_v14 = vmax.f32 %v567_v23, 0.0  ;;  %v679_v46 = vmax.f32 %v663_v24, 0.0  ;;  %v5303_v6 = vor.u32 %v3058_v0, %v3054_v52  ;;  %v424_v51 = vadd.f32 %v5089_v20, %v5012_v10  ;;  %v1024_v0 = vpop.permute.xlu2 %1023 }
 0x126   : > { %v3063_v28 = vrot.slane %v3061_v34, 1  ;;  %v1095_v33 = vpack.c.b16 %v5145_v56, %v1079_v3  ;;  %v503_v35 = vpack.c.bf16 %v471_v39, %v471_v39  ;;  %v758_v36 = vunpack.c.l.b16 %v502_v9  ;;  %v4000_v34 = vld [vmem:[%s4397_s25 + $0x74] sm:$0x1] }
 0x127   : > { %v599_v42 = vpack.c.bf16 %v583_v14, %v583_v14  ;;  %v695_v16 = vpack.c.bf16 %v679_v46, %v679_v46  ;;  %v425_v22 = vadd.f32 %v5089_v20, %v5015_v40  ;;  %v456_v58 = vmax.f32 %v424_v51, 0.0 }
 0x128   : > { %v3064_v7 = vsel %vm824_vm1, %v5303_v6, %v3063_v28  ;;  %v1140_v60 = vrot.slane %v1095_v33, 1  ;;  %v759_v45 = vunpack.c.l.b16 %v503_v35  ;;  %v528_v59 = vunpack.c.l.bf16 %v512_v27  ;;  %v4016_v28 = vld [vmem:[%s4397_s25 + $0x6c] sm:$0xe] }
 0x129   : > { %3165 = vrot.lane.b32.xlu0 %v3064_v7, %s4342_s6  ;;  %v807_v19 = vunpack.c.l.b16 %v599_v42  ;;  %v1080_v10 = vunpack.c.l.b16 %v695_v16  ;;  %v457_v52 = vmax.f32 %v425_v22, 0.0  ;;  %v488_v37 = vpack.c.bf16 %v456_v58, %v456_v58  ;;  %v3284_v42 = vpop.permute.xlu1 %3283 }
 0x12a   : > { %v1142_v4 = vsel %vm1097_vm0, %v1140_v60, %v1141_v62  ;;  %v1854_v15 = vshll.u32 %v5264_v63, 16  ;;  %v5320_v40 = vpack.c.b16 %v759_v45, %v758_v36  ;;  %v544_v24 = vmul.f32 %v5079_v12, %v528_v59 }
 0x12b   : > { %1174 = vrot.lane.b32.xlu2 %v1142_v4, %s4341_s30  ;;  %v823_v29 = vpack.c.b16 %v807_v19, %v807_v19  ;;  %v1096_v23 = vpack.c.b16 %v759_v45, %v1080_v10  ;;  %v5324_v48 = vpack.c.bf16 %v457_v52, %v457_v52  ;;  %v744_v62 = vunpack.c.l.b16 %v488_v37 }
 0x12c   : > { %v1856_v3 = vrot.slane %v1854_v15, 1  ;;  %v5328_v63 = vsel %vm1178_vm3, %v4744_v26, %v1024_v0  ;;  %v560_v14 = vadd.f32 %v5089_v20, %v544_v24  ;;  %v1298_v46 = vunpack.c.l.bf16 %v3976_v47 }
 0x12d   : > { %v1143_v39 = vrot.slane %v1096_v23, 1  ;;  %v1144_v9 = vrot.slane %v823_v29, 1  ;;  %v745_v33 = vunpack.c.l.b16 %v5324_v48  ;;  %v1299_v27 = vunpack.c.h.bf16 %v3976_v47 }
 0x12e   : > { %v1857_v51 = vsel %vm824_vm1, %v5140_v18, %v1856_v3  ;;  %v1466_v35 = vunpack.c.l.bf16 %v4000_v34  ;;  %v576_v36 = vmax.f32 %v560_v14, 0.0  ;;  %v1330_v26 = vmul.f32 %v5079_v12, %v1298_v46  ;;  %v1961_v14 = vpop.permute.xlu0 %1960  ;;  %v4084_v46 = vld [vmem:[%s4397_s25 + $0x84] sm:$0xff]  }
 0x12f   : > { %v1145_v16 = vsel %vm1097_vm0, %v1143_v39, %v1144_v9  ;;  %v2175_v7 = vsel %vm1211_vm4, %v2143_v32, %v2111_v21  ;;  %v5341_v60 = vpack.c.b16 %v745_v33, %v744_v62  ;;  %v1331_v22 = vmul.f32 %v5079_v12, %v1299_v27 }
 0x130   : > { %1176 = vrot.lane.b32.xlu1 %v1145_v16, %s4341_s30  ;;  %v1482_v18 = vmul.f32 %v5079_v12, %v1466_v35  ;;  %4044 = vmatmul.msk.bf16.gmra.mxu3 %vm2186_vm5, %v2175_v7  ;;  %v1562_v58 = vunpack.c.l.bf16 %v4016_v28  ;;  %v592_v45 = vpack.c.bf16 %v576_v36, %v576_v36  ;;  %v1362_v19 = vadd.f32 %v5089_v20, %v1330_v26  ;;  %v4107_v7 = vld [vmem:[%s4397_s25 + $0x8c] sm:$0x1] }
 0x131   : > { %v3348_v10 = vsel %vm1211_vm4, %v5272_v5, %v3284_v42  ;;  %v1006_v32 = vshrl.u32 %v5320_v40, 16  ;;  %v922_v59 = vshrl.u32 %v5341_v60, 16  ;;  %v924_v4 = vshll.u32 %v5341_v60, 16 }
 0x132   : > { %v1363_v52 = vadd.f32 %v5089_v20, %v1331_v22  ;;  %v1498_v37 = vadd.f32 %v5089_v20, %v1482_v18  ;;  %4139 = vmatmul.msk.bf16.gmra.mxu2 %vm2186_vm5, %v3348_v10  ;;  %v800_v15 = vunpack.c.l.b16 %v592_v45  ;;  %v1394_v47 = vmax.f32 %v1362_v19, 0.0 }
 0x133   : > { %1968 = vrot.lane.b32.xlu2 %v1857_v51, %s4342_s6  ;;  %v1578_v23 = vmul.f32 %v5079_v12, %v1562_v58  ;;  %v1008_v5 = vshll.u32 %v5320_v40, 16  ;;  %v926_v24 = vrot.slane %v924_v4, 1  ;;  %v1013_v34 = vshll.u32 %v823_v29, 16  ;;  %v2089_v58 = vpop.permute.xlu2 %2088 }
 0x134   : > { %v1395_v21 = vmax.f32 %v1363_v52, 0.0  ;;  %v1514_v0 = vmax.f32 %v1498_v37, 0.0  ;;  %v5358_v62 = vpack.c.b16 %v800_v15, %v800_v15  ;;  %v1426_v3 = vpack.c.bf16 %v1394_v47, %v1394_v47 }
 0x135   : > { %v1594_v39 = vadd.f32 %v5089_v20, %v1578_v23  ;;  %v1010_v9 = vrot.slane %v1008_v5, 1  ;;  %v927_v28 = vor.u32 %v926_v24, %v922_v59  ;;  %v1015_v35 = vrot.slane %v1013_v34, 1  ;;  %v1153_v24 = vpop.permute.xlu1 %1152 }
 0x136   : > { %v1427_v51 = vpack.c.bf16 %v1395_v21, %v1395_v21  ;;  %v1530_v27 = vpack.c.bf16 %v1514_v0, %v1514_v0  ;;  %v929_v42 = vshll.u32 %v5358_v62, 16  ;;  %v1682_v16 = vunpack.c.l.b16 %v1426_v3  ;;  %v4123_v21 = vld [vmem:[%s4397_s25 + $0x84] sm:$0xe] }
 0x137   : > { %v1610_v36 = vmax.f32 %v1594_v39, 0.0  ;;  %v1011_v26 = vor.u32 %v1010_v9, %v1006_v32  ;;  %v2121_v18 = vsel %vm1178_vm3, %v4595_v11, %v1961_v14  ;;  %v2495_v45 = vunpack.c.l.bf16 %v4084_v46 }
 0x138   : > { %v1683_v22 = vunpack.c.l.b16 %v1427_v51  ;;  %v1738_v29 = vunpack.c.l.b16 %v1530_v27  ;;  %v931_v19 = vrot.slane %v929_v42, 1  ;;  %v2496_v4 = vunpack.c.h.bf16 %v4084_v46  ;;  %v4122_v51 = vld [vmem:[%s4397_s25 + $0x78] sm:$0xe] }
 0x139   : > { %v1626_v10 = vpack.c.bf16 %v1610_v36, %v1610_v36  ;;  %v1016_v59 = vsel %vm824_vm1, %v1011_v26, %v1015_v35  ;;  %v2527_v15 = vmul.f32 %v5079_v12, %v2495_v45  ;;  %v2662_v32 = vunpack.c.l.bf16 %v4107_v7 }
 0x13a   : > { %v5367_v52 = vpack.c.b16 %v1683_v22, %v1682_v16  ;;  %v1754_v37 = vpack.c.b16 %v1738_v29, %v1738_v29  ;;  %v932_v47 = vsel %vm824_vm1, %v927_v28, %v931_v19  ;;  %v2528_v11 = vmul.f32 %v5079_v12, %v2496_v4 }
 0x13b   : > { %v2010_v23 = vunpack.c.l.b16 %v1626_v10  ;;  %1047 = vrot.lane.b32.xlu2 %v1016_v59, %s4342_s6  ;;  %v2153_v5 = vsel %vm1211_vm4, %v2121_v18, %v2089_v58  ;;  %1033 = vrot.lane.b32.xlu0 %v932_v47, %s4342_s6  ;;  %v2559_v14 = vadd.f32 %v5089_v20, %v2527_v15  ;;  %v2678_v28 = vmul.f32 %v5079_v12, %v2662_v32 }
 0x13c   : > { %v1859_v0 = vshrl.u32 %v5367_v52, 16  ;;  %v1861_v34 = vshll.u32 %v5367_v52, 16  ;;  %v1866_v3 = vshll.u32 %v1754_v37, 16  ;;  %v2059_v39 = vrot.slane %v1754_v37, 1  ;;  %4033 = vmatmul.msk.bf16.gmra.mxu0 %vm2186_vm5, %v2153_v5  ;;  %v4110_v37 = vld [vmem:[%s4397_s25 + $0xb0] sm:$0x1] }
 0x13d   : > { %v2026_v9 = vpack.c.b16 %v1683_v22, %v2010_v23  ;;  %v2560_v46 = vadd.f32 %v5089_v20, %v2528_v11  ;;  %v2758_v42 = vunpack.c.l.bf16 %v4123_v21  ;;  %v1219_v16 = vsel %vm1211_vm4, %v5328_v63, %v1153_v24  ;;  %v1985_v22 = vpop.permute.xlu0 %1984  ;;  %v4126_v11 = vld [vmem:[%s4397_s25 + $0xa8] sm:$0xe] }
 0x13e   : > { %v1863_v27 = vrot.slane %v1861_v34, 1  ;;  %v1868_v35 = vrot.slane %v1866_v3, 1  ;;  %v2591_v26 = vmax.f32 %v2559_v14, 0.0  ;;  %v2694_v29 = vadd.f32 %v5089_v20, %v2678_v28  ;;  %4053 = vmatmul.msk.bf16.gmra.mxu1 %vm2186_vm5, %v1219_v16  ;;  %v2113_v3 = vpop.permute.xlu2 %2112 }
 0x13f   : > { %v2058_v36 = vrot.slane %v2026_v9, 1  ;;  %v2592_v7 = vmax.f32 %v2560_v46, 0.0  ;;  %v2774_v58 = vmul.f32 %v5079_v12, %v2758_v42  ;;  %v2757_v45 = vunpack.c.l.bf16 %v4122_v51 }
 0x140   : > { %v1864_v18 = vor.u32 %v1863_v27, %v1859_v0  ;;  %v3254_v19 = vrot.slane %v5292_v43, 1  ;;  %v2623_v59 = vpack.c.bf16 %v2591_v26, %v2591_v26  ;;  %v2710_v63 = vmax.f32 %v2694_v29, 0.0 }
 0x141   : > { %v2060_v10 = vsel %vm1097_vm0, %v2058_v36, %v2059_v39  ;;  %v2624_v4 = vpack.c.bf16 %v2592_v7, %v2592_v7  ;;  %v2790_v32 = vadd.f32 %v5089_v20, %v2774_v58  ;;  %v2773_v47 = vmul.f32 %v5079_v12, %v2757_v45 }
 0x142   : > { %v1869_v15 = vsel %vm824_vm1, %v1864_v18, %v1868_v35  ;;  %v2145_v23 = vsel %vm1178_vm3, %v4771_v41, %v1985_v22  ;;  %v2726_v5 = vpack.c.bf16 %v2710_v63, %v2710_v63  ;;  %v2879_v24 = vunpack.c.l.b16 %v2623_v59 }
 0x143   : > { %1970 = vrot.lane.b32.xlu1 %v1869_v15, %s4342_s6  ;;  %v2880_v21 = vunpack.c.l.b16 %v2624_v4  ;;  %2098 = vrot.lane.b32.xlu0 %v2060_v10, %s4341_s30  ;;  %v2806_v0 = vmax.f32 %v2790_v32, 0.0  ;;  %v2789_v34 = vadd.f32 %v5089_v20, %v2773_v47  ;;  %v2665_v39 = vunpack.c.l.bf16 %v4110_v37  ;;  %v3158_v37 = vpop.permute.xlu1 %3157  ;;  %v4001_v15 = vld [vmem:[%s4397_s25 + $0x80] sm:$0x1] }
 0x144   : > { %v2934_v14 = vunpack.c.l.b16 %v2726_v5  ;;  %v2761_v46 = vunpack.c.l.bf16 %v4126_v11  ;;  %v2177_v5 = vsel %vm1211_vm4, %v2145_v23, %v2113_v3  ;;  %v513_v23 = vld [vmem:[%s4397_s25 + $0x74] sm:$0x1] }
 0x145   : > { %v5400_v9 = vpack.c.b16 %v2880_v21, %v2879_v24  ;;  %v2822_v28 = vpack.c.bf16 %v2806_v0, %v2806_v0  ;;  %v2805_v51 = vmax.f32 %v2789_v34, 0.0  ;;  %v2681_v41 = vmul.f32 %v5079_v12, %v2665_v39  ;;  %v608_v24 = vld [vmem:[%s4397_s25 + $0x60] sm:$0xe]  ;;  %4045 = vmatmul.msk.bf16.gmra.mxu3 %vm2186_vm5, %v2177_v5 }
 0x146   : > { %v2950_v27 = vpack.c.b16 %v2934_v14, %v2934_v14  ;;  %v2777_v18 = vmul.f32 %v5079_v12, %v2761_v46  ;;  %v3318_v34 = vsel %vm1178_vm3, %v4797_v1, %v3158_v37  ;;  %v529_v43 = vunpack.c.l.bf16 %v513_v23 }
 0x147   : > { %v3066_v35 = vshrl.u32 %v5400_v9, 16  ;;  %v3068_v42 = vshll.u32 %v5400_v9, 16  ;;  %v3206_v16 = vunpack.c.l.b16 %v2822_v28  ;;  %v2821_v36 = vpack.c.bf16 %v2805_v51, %v2805_v51  ;;  %v1963_v51 = vpop.permute.xlu2 %1962 }
 0x148   : > { %v2697_v26 = vadd.f32 %v5089_v20, %v2681_v41  ;;  %v3073_v29 = vshll.u32 %v2950_v27, 16  ;;  %v3257_v22 = vrot.slane %v2950_v27, 1  ;;  %v2793_v63 = vadd.f32 %v5089_v20, %v2777_v18  ;;  %v324_v41 = vld [vmem:[%s4397_s25 + $0x6c] sm:$0xff]   ;;  %v5437_v18 = vld [vmem:[%s6163_s1] ss:$0 sm:$0xff] }
 0x149   : > { %v3070_v7 = vrot.slane %v3068_v42, 1  ;;  %v3222_v58 = vpack.c.b16 %v2880_v21, %v3206_v16  ;;  %v3205_v45 = vunpack.c.l.b16 %v2821_v36  ;;  %v1467_v28 = vunpack.c.l.bf16 %v4001_v15  ;;  %v609_v16 = vld [vmem:[%s4397_s25 + $0x6c] sm:$0xe] }
 0x14a   : > { %v2713_v10 = vmax.f32 %v2697_v26, 0.0  ;;  %v3075_v4 = vrot.slane %v3073_v29, 1  ;;  %v2809_v21 = vmax.f32 %v2793_v63, 0.0  ;;  %v624_v27 = vunpack.c.l.bf16 %v608_v24 }
 0x14b   : > { %v3071_v59 = vor.u32 %v3070_v7, %v3066_v35  ;;  %v3256_v32 = vrot.slane %v3222_v58, 1  ;;  %v3221_v47 = vpack.c.b16 %v5277_v30, %v3205_v45  ;;  %v1123_v35 = vrot.slane %v5358_v62, 1  ;;  %v3286_v58 = vpop.permute.xlu0 %3285 }
 0x14c   : > { %v2729_v11 = vpack.c.bf16 %v2713_v10, %v2713_v10  ;;  %v2825_v3 = vpack.c.bf16 %v2809_v21, %v2809_v21  ;;  %v5424_v42 = vsel %vm1178_vm3, %v4847_v17, %v1963_v51  ;;  %v1483_v7 = vmul.f32 %v5079_v12, %v1467_v28 }
 0x14d   : > { %v3076_v0 = vsel %vm824_vm1, %v3071_v59, %v3075_v4  ;;  %v3258_v39 = vsel %vm1097_vm0, %v3256_v32, %v3257_v22  ;;  %v3253_v14 = vrot.slane %v3221_v47, 1  ;;  %v356_v29 = vunpack.c.l.bf16 %v324_v41  ;;  %v5450_v47 = vld [vmem:[%s6164_s2] ss:$0 sm:$0xff] }
 0x14e   : > { %3167 = vrot.lane.b32.xlu1 %v3076_v0, %s4342_s6  ;;  %v2937_v46 = vunpack.c.l.b16 %v2729_v11  ;;  %3295 = vrot.lane.b32.xlu0 %v3258_v39, %s4341_s30  ;;  %v3209_v22 = vunpack.c.l.b16 %v2825_v3  ;;  %v640_v17 = vmul.f32 %v5437_v18, %v624_v27  ;;  %v357_v45 = vunpack.c.h.bf16 %v324_v41  ;;  %v1026_v39 = vpop.permute.xlu1 %1025 }
 0x14f   : > { %v3255_v36 = vsel %vm1097_vm0, %v3253_v14, %v3254_v19  ;;  %v1499_v10 = vadd.f32 %v5089_v20, %v1483_v7  ;;  %v391_v12 = vmul.f32 %v5437_v18, %v356_v29  ;;  %v625_v59 = vunpack.c.l.bf16 %v609_v16  ;;  %v4274_v14 = vld [vmem:[%s4397_s25 + $0x90] sm:$0xff]  }
 0x150   : > { %v5430_v26 = vpack.c.b16 %v2937_v46, %v2937_v46  ;;  %3293 = vrot.lane.b32.xlu2 %v3255_v36, %s4341_s30  ;;  %v3225_v4 = vpack.c.b16 %v5145_v56, %v3209_v22  ;;  %v656_v63 = vadd.f32 %v5089_v20, %v640_v17  ;;  %v392_v37 = vmul.f32 %v5437_v18, %v357_v45 }
 0x151   : > { %v545_v15 = vmul.f32 %v5437_v18, %v529_v43  ;;  %v1515_v32 = vmax.f32 %v1499_v10, 0.0  ;;  %v426_v11 = vadd.f32 %v5450_v47, %v391_v12  ;;  %v641_v5 = vmul.f32 %v5437_v18, %v625_v59  ;;  %v4108_v43 = vld [vmem:[%s4397_s25 + $0x98] sm:$0x1] }
 0x152   : > { %v3266_v19 = vrot.slane %v5430_v26, 1  ;;  %v3350_v24 = vsel %vm1211_vm4, %v3318_v34, %v3286_v58  ;;  %v3265_v0 = vrot.slane %v3225_v4, 1  ;;  %v672_v56 = vmax.f32 %v656_v63, 0.0 }
 0x153   : > { %v427_v20 = vadd.f32 %v5450_v47, %v392_v37  ;;  %v561_v21 = vadd.f32 %v5450_v47, %v545_v15  ;;  %4140 = vmatmul.msk.bf16.gmra.mxu2 %vm2186_vm5, %v3350_v24  ;;  %v1531_v46 = vpack.c.bf16 %v1515_v32, %v1515_v32  ;;  %v458_v28 = vmax.f32 %v426_v11, 0.0 }
 0x154   : > { %v657_v51 = vadd.f32 %v5450_v47, %v641_v5  ;;  %v5462_v41 = vsel %vm1178_vm3, %v4822_v38, %v1026_v39  ;;  %v3267_v34 = vsel %vm1097_vm0, %v3265_v0, %v3266_v19  ;;  %v688_v23 = vpack.c.bf16 %v672_v56, %v672_v56 }
 0x155   : > { %v459_v3 = vmax.f32 %v427_v20, 0.0  ;;  %v577_v27 = vmax.f32 %v561_v21, 0.0  ;;  %v1739_v16 = vunpack.c.l.b16 %v1531_v46  ;;  %v490_v36 = vpack.c.bf16 %v458_v28, %v458_v28 }
 0x156   : > { %3301 = vrot.lane.b32.xlu1 %v3267_v34, %s4341_s30  ;;  %v673_v7 = vmax.f32 %v657_v51, 0.0  ;;  %v4244_v29 = vunpack.c.l.bf16 %v4274_v14  ;;  %v1073_v22 = vunpack.c.l.b16 %v688_v23  ;;  %v4245_v45 = vunpack.c.h.bf16 %v4274_v14  ;;  %v1155_v51 = vpop.permute.xlu0 %1154  ;;  %v4092_v34 = vld [vmem:[%s4397_s25 + $0xb4] sm:$0xff]  }
 0x157   : > { %v491_v17 = vpack.c.bf16 %v459_v3, %v459_v3  ;;  %v593_v58 = vpack.c.bf16 %v577_v27, %v577_v27  ;;  %v5467_v10 = vpack.c.b16 %v1739_v16, %v1739_v16  ;;  %v746_v12 = vunpack.c.l.b16 %v490_v36  ;;  %v1042_v36 = vpop.permute.xlu2 %1041 }
 0x158   : > { %v689_v38 = vpack.c.bf16 %v673_v7, %v673_v7  ;;  %v2529_v19 = vmul.f32 %v5437_v18, %v4244_v29  ;;  %v1089_v59 = vpack.c.b16 %v745_v33, %v1073_v22  ;;  %v2530_v37 = vmul.f32 %v5437_v18, %v4245_v45  ;;  %v4111_v29 = vld [vmem:[%s4397_s25 + $0xbc] sm:$0x1]  ;;  %v4127_v45 = vld [vmem:[%s4397_s25 + $0xb4] sm:$0xe] }
 0x159   : > { %v747_v4 = vunpack.c.l.b16 %v491_v17  ;;  %v801_v63 = vunpack.c.l.b16 %v593_v58  ;;  %v1878_v15 = vshll.u32 %v5467_v10, 16  ;;  %v2663_v5 = vunpack.c.l.bf16 %v4108_v43 }
 0x15a   : > { %v1074_v32 = vunpack.c.l.b16 %v689_v38  ;;  %v2561_v11 = vadd.f32 %v5450_v47, %v2529_v19  ;;  %v1122_v24 = vrot.slane %v1089_v59, 1  ;;  %v2562_v20 = vadd.f32 %v5450_v47, %v2530_v37  ;;  %v2091_v19 = vpop.permute.xlu1 %2090 }
 0x15b   : > { %v5475_v0 = vpack.c.b16 %v747_v4, %v746_v12  ;;  %v5477_v56 = vpack.c.b16 %v801_v63, %v801_v63  ;;  %v1880_v48 = vrot.slane %v1878_v15, 1  ;;  %v2679_v39 = vmul.f32 %v5437_v18, %v2663_v5 }
 0x15c   : > { %v1090_v33 = vpack.c.b16 %v747_v4, %v1074_v32  ;;  %v2593_v21 = vmax.f32 %v2561_v11, 0.0  ;;  %v1124_v14 = vsel %vm1097_vm0, %v1122_v24, %v1123_v35  ;;  %v2594_v28 = vmax.f32 %v2562_v20, 0.0 }
 0x15d   : > { %v1126_v46 = vrot.slane %v5477_v56, 1  ;;  %v1881_v23 = vsel %vm824_vm1, %v5303_v6, %v1880_v48  ;;  %1162 = vrot.lane.b32.xlu2 %v1124_v14, %s4341_s30  ;;  %v2695_v16 = vadd.f32 %v5450_v47, %v2679_v39  ;;  %v3109_v35 = vshll.u32 %v5430_v26, 16 }
 0x15e   : > { %v1125_v3 = vrot.slane %v1090_v33, 1  ;;  %v2625_v27 = vpack.c.bf16 %v2593_v21, %v2593_v21  ;;  %1972 = vrot.lane.b32.xlu0 %v1881_v23, %s4342_s6  ;;  %v2626_v62 = vpack.c.bf16 %v2594_v28, %v2594_v28  ;;  %v5494_v7 = vsel %vm1178_vm3, %v4895_v49, %v1042_v36 }
 0x15f   : > { %v2711_v6 = vmax.f32 %v2695_v16, 0.0  ;;  %v2503_v58 = vunpack.c.l.bf16 %v4092_v34  ;;  %v3111_v38 = vrot.slane %v3109_v35, 1  ;;  %v2504_v12 = vunpack.c.h.bf16 %v4092_v34  ;;  %v3160_v34 = vpop.permute.xlu0 %3159 }
 0x160   : > { %v1127_v22 = vsel %vm1097_vm0, %v1125_v3, %v1126_v46  ;;  %v2881_v17 = vunpack.c.l.b16 %v2625_v27  ;;  %v5500_v43 = vunpack.c.l.b16 %v2626_v62  ;;  %v2666_v4 = vunpack.c.l.bf16 %v4111_v29 }
 0x161   : > { %1164 = vrot.lane.b32.xlu1 %v1127_v22, %s4341_s30  ;;  %v2727_v59 = vpack.c.bf16 %v2711_v6, %v2711_v6  ;;  %v2535_v26 = vmul.f32 %v5437_v18, %v2503_v58  ;;  %v1221_v49 = vsel %vm1211_vm4, %v5462_v41, %v1155_v51  ;;  %v2536_v37 = vmul.f32 %v5437_v18, %v2504_v12 }
 0x162   : > { %v5506_v63 = vpack.c.b16 %v5500_v43, %v2881_v17  ;;  %4054 = vmatmul.msk.bf16.gmra.mxu1 %vm2186_vm5, %v1221_v49  ;;  %v2762_v15 = vunpack.c.l.bf16 %v4127_v45  ;;  %v2682_v5 = vmul.f32 %v5437_v18, %v2666_v4  ;;  %v2155_v24 = vsel %vm1211_vm4, %v5424_v42, %v2091_v19  ;;  %v3288_v45 = vpop.permute.xlu2 %3287 }
 0x163   : > { %v2935_v32 = vunpack.c.l.b16 %v2727_v59  ;;  %v2567_v11 = vadd.f32 %v5450_v47, %v2535_v26  ;;  %v3112_v48 = vsel %vm824_vm1, %v5179_v31, %v3111_v38  ;;  %v2568_v33 = vadd.f32 %v5450_v47, %v2536_v37  ;;  %4034 = vmatmul.msk.bf16.gmra.mxu0 %vm2186_vm5, %v2155_v24  ;;  %v514_v38 = vld [vmem:[%s4397_s25 + $0x80] sm:$0x1] }
 0x164   : > { %v3078_v20 = vshrl.u32 %v5506_v63, 16  ;;  %v3080_v41 = vshll.u32 %v5506_v63, 16  ;;  %v2698_v14 = vadd.f32 %v5450_v47, %v2682_v5  ;;  %v2778_v42 = vmul.f32 %v5437_v18, %v2762_v15 }
 0x165   : > { %v5520_v21 = vpack.c.b16 %v2935_v32, %v2935_v32  ;;  %3173 = vrot.lane.b32.xlu2 %v3112_v48, %s4342_s6  ;;  %v2599_v39 = vmax.f32 %v2567_v11, 0.0  ;;  %v2600_v28 = vmax.f32 %v2568_v33, 0.0  ;;  %v934_v51 = vshrl.u32 %v5475_v0, 16 }
 0x166   : > { %v3082_v46 = vrot.slane %v3080_v41, 1  ;;  %v936_v31 = vshll.u32 %v5475_v0, 16  ;;  %v2714_v27 = vmax.f32 %v2698_v14, 0.0  ;;  %v2794_v16 = vadd.f32 %v5450_v47, %v2778_v42 }
 0x167   : > { %v3085_v23 = vshll.u32 %v5520_v21, 16  ;;  %v2631_v3 = vpack.c.bf16 %v2599_v39, %v2599_v39  ;;  %v2632_v62 = vpack.c.bf16 %v2600_v28, %v2600_v28  ;;  %v941_v29 = vshll.u32 %v5477_v56, 16 }
 0x168   : > { %v5529_v36 = vor.u32 %v3082_v46, %v3078_v20  ;;  %v938_v35 = vrot.slane %v936_v31, 1  ;;  %v2730_v6 = vpack.c.bf16 %v2714_v27, %v2714_v27  ;;  %v2810_v58 = vmax.f32 %v2794_v16, 0.0  ;;  %v4017_v31 = vld [vmem:[%s4397_s25 + $0x78] sm:$0xe]  ;;  %v1028_v16 = vpop.permute.xlu0 %1027 }
 0x169   : > { %v3087_v22 = vrot.slane %v3085_v23, 1  ;;  %v2887_v17 = vunpack.c.l.b16 %v2631_v3  ;;  %v2888_v12 = vunpack.c.l.b16 %v2632_v62  ;;  %v943_v59 = vrot.slane %v941_v29, 1 }
 0x16a   : > { %v939_v19 = vor.u32 %v938_v35, %v934_v51  ;;  %v3320_v26 = vsel %vm1178_vm3, %v4882_v13, %v3160_v34  ;;  %v2938_v49 = vunpack.c.l.b16 %v2730_v6  ;;  %v2826_v37 = vpack.c.bf16 %v2810_v58, %v2810_v58 }
 0x16b   : > { %v3088_v4 = vsel %vm824_vm1, %v5529_v36, %v3087_v22  ;;  %v428_v56 = vadd.f32 %v5450_v47, %v5242_v54  ;;  %v5540_v15 = vpack.c.b16 %v2888_v12, %v2887_v17  ;;  %v429_v11 = vadd.f32 %v5450_v47, %v5245_v50  ;;  %v1171_v54 = vpop.permute.xlu1 %1170  ;;  %v610_v50 = vld [vmem:[%s4397_s25 + $0x78] sm:$0xe] }
 0x16c   : > { %3169 = vrot.lane.b32.xlu0 %v3088_v4, %s4342_s6  ;;  %v944_v32 = vsel %vm824_vm1, %v939_v19, %v943_v59  ;;  %v530_v5 = vunpack.c.l.bf16 %v514_v38  ;;  %v2954_v13 = vpack.c.b16 %v2938_v49, %v2938_v49  ;;  %v3210_v24 = vunpack.c.l.b16 %v2826_v37  ;;  %v3980_v38 = vld [vmem:[%s4397_s25 + $0x84] sm:$0xff]  }
 0x16d   : > { %1035 = vrot.lane.b32.xlu2 %v944_v32, %s4342_s6  ;;  %v460_v20 = vmax.f32 %v428_v56, 0.0  ;;  %v3352_v41 = vsel %vm1211_vm4, %v3320_v26, %v3288_v45  ;;  %v3114_v48 = vshrl.u32 %v5540_v15, 16  ;;  %v3116_v33 = vshll.u32 %v5540_v15, 16  ;;  %v1157_v26 = vpop.permute.xlu2 %1156 }
 0x16e   : > { %v461_v39 = vmax.f32 %v429_v11, 0.0  ;;  %v546_v14 = vmul.f32 %v5437_v18, %v530_v5  ;;  %4141 = vmatmul.msk.bf16.gmra.mxu2 %vm2186_vm5, %v3352_v41  ;;  %v3121_v42 = vshll.u32 %v2954_v13, 16  ;;  %v3226_v46 = vpack.c.b16 %v2888_v12, %v3210_v24  ;;  %v4002_v12 = vld [vmem:[%s4397_s25 + $0x8c] sm:$0x1]  ;;  %v4018_v24 = vld [vmem:[%s4397_s25 + $0x84] sm:$0xe] }
 0x16f   : > { %v3269_v28 = vrot.slane %v2954_v13, 1  ;;  %v492_v51 = vpack.c.bf16 %v460_v20, %v460_v20  ;;  %v3118_v34 = vrot.slane %v3116_v33, 1  ;;  %v1237_v27 = vsel %vm1211_vm4, %v5494_v7, %v1171_v54 }
 0x170   : > { %v493_v23 = vpack.c.bf16 %v461_v39, %v461_v39  ;;  %v562_v3 = vadd.f32 %v5450_v47, %v546_v14  ;;  %v3123_v62 = vrot.slane %v3121_v42, 1  ;;  %v3268_v35 = vrot.slane %v3226_v46, 1  ;;  %4062 = vmatmul.msk.bf16.vlgmr.msrb.gmra.mxu3 %vm2186_vm5, %v1237_v27 }
 0x171   : > { %v748_v29 = vunpack.c.l.b16 %v492_v51  ;;  %v626_v22 = vunpack.c.l.bf16 %v610_v50  ;;  %v3119_v6 = vor.u32 %v3118_v34, %v3114_v48  ;;  %v1563_v45 = vunpack.c.l.bf16 %v4017_v31 }
 0x172   : > { %v578_v17 = vmax.f32 %v562_v3, 0.0  ;;  %v749_v58 = vunpack.c.l.b16 %v493_v23  ;;  %v3270_v19 = vsel %vm1097_vm0, %v3268_v35, %v3269_v28  ;;  %v1190_v7 = vsel %vm1178_vm3, %v4933_v44, %v1028_v16 }
 0x173   : > { %v642_v59 = vmul.f32 %v5437_v18, %v626_v22  ;;  %v3124_v4 = vsel %vm824_vm1, %v3119_v6, %v3123_v62  ;;  %v1579_v56 = vmul.f32 %v5437_v18, %v1563_v45  ;;  %v1302_v11 = vunpack.c.l.bf16 %v3980_v38  ;;  %v1965_v3 = vpop.permute.xlu1 %1964 }
 0x174   : > { %3303 = vrot.lane.b32.xlu0 %v3270_v19, %s4341_s30  ;;  %v594_v49 = vpack.c.bf16 %v578_v17, %v578_v17  ;;  %v5565_v37 = vpack.c.b16 %v749_v58, %v748_v29  ;;  %3175 = vrot.lane.b32.xlu1 %v3124_v4, %s4342_s6  ;;  %v1303_v5 = vunpack.c.h.bf16 %v3980_v38  ;;  %v1468_v13 = vunpack.c.l.bf16 %v4002_v12 }
 0x175   : > { %v658_v32 = vadd.f32 %v5450_v47, %v642_v59  ;;  %v1595_v54 = vadd.f32 %v5450_v47, %v1579_v56  ;;  %v1334_v33 = vmul.f32 %v5437_v18, %v1302_v11  ;;  %v1564_v28 = vunpack.c.l.bf16 %v4018_v24  ;;  %v5584_v11 = vpop.permute.xlu0 %2092 }
 0x176   : > { %v802_v20 = vunpack.c.l.b16 %v594_v49  ;;  %v946_v44 = vshrl.u32 %v5565_v37, 16  ;;  %v948_v41 = vshll.u32 %v5565_v37, 16  ;;  %v1335_v39 = vmul.f32 %v5437_v18, %v1303_v5  ;;  %v5586_v5 = vpop.permute.xlu2 %3161 }
 0x177   : > { %v674_v48 = vmax.f32 %v658_v32, 0.0  ;;  %v1484_v14 = vmul.f32 %v5437_v18, %v1468_v13  ;;  %v1611_v46 = vmax.f32 %v1595_v54, 0.0  ;;  %v1366_v31 = vadd.f32 %v5450_v47, %v1334_v33  ;;  %v4276_v32 = vld [vmem:[%s4397_s25 + $0xc0] sm:$0xff]  }
 0x178   : > { %v818_v50 = vpack.c.b16 %v802_v20, %v802_v20  ;;  %v950_v42 = vrot.slane %v948_v41, 1  ;;  %v1367_v34 = vadd.f32 %v5450_v47, %v1335_v39  ;;  %v1580_v12 = vmul.f32 %v5437_v18, %v1564_v28 }
 0x179   : > { %v690_v51 = vpack.c.bf16 %v674_v48, %v674_v48  ;;  %v1500_v23 = vadd.f32 %v5450_v47, %v1484_v14  ;;  %v1627_v35 = vpack.c.bf16 %v1611_v46, %v1611_v46  ;;  %v1398_v22 = vmax.f32 %v1366_v31, 0.0 }
 0x17a   : > { %v951_v27 = vor.u32 %v950_v42, %v946_v44  ;;  %v953_v16 = vshll.u32 %v818_v50, 16  ;;  %v1129_v62 = vrot.slane %v818_v50, 1  ;;  %v1399_v6 = vmax.f32 %v1367_v34, 0.0 }
 0x17b   : > { %v1075_v29 = vunpack.c.l.b16 %v690_v51  ;;  %v1516_v17 = vmax.f32 %v1500_v23, 0.0  ;;  %v2011_v38 = vunpack.c.l.b16 %v1627_v35  ;;  %v1223_v19 = vsel %vm1211_vm4, %v1190_v7, %v1157_v26  ;;  %v4088_v23 = vld [vmem:[%s4397_s25 + $0x9c] sm:$0xff]   ;;  %v4109_v35 = vld [vmem:[%s4397_s25 + $0xa4] sm:$0x1] }
 0x17c   : > { %v955_v45 = vrot.slane %v953_v16, 1  ;;  %v1430_v4 = vpack.c.bf16 %v1398_v22, %v1398_v22  ;;  %v1431_v49 = vpack.c.bf16 %v1399_v6, %v1399_v6  ;;  %4055 = vmatmul.msk.bf16.gmra.mxu1 %vm2186_vm5, %v1223_v19  ;;  %v2062_v20 = vrot.slane %v5467_v10, 1 }
 0x17d   : > { %v1091_v59 = vpack.c.b16 %v749_v58, %v1075_v29  ;;  %v1532_v56 = vpack.c.bf16 %v1516_v17, %v1516_v17  ;;  %v2027_v24 = vpack.c.b16 %v5277_v30, %v2011_v38  ;;  %v1596_v7 = vadd.f32 %v5450_v47, %v1580_v12  ;;  %v4112_v58 = vld [vmem:[%s4397_s25 + $0xc8] sm:$0x1]  ;;  %v4124_v30 = vld [vmem:[%s4397_s25 + $0x90] sm:$0xe]  ;;  %v5613_v29 = vpop.permute.xlu1 %1043 }
 0x17e   : > { %v956_v13 = vsel %vm824_vm1, %v951_v27, %v955_v45  ;;  %v1686_v44 = vunpack.c.l.b16 %v1430_v4  ;;  %v5596_v54 = vsel %vm1178_vm3, %v4797_v1, %v1965_v3  ;;  %v4252_v39 = vunpack.c.l.bf16 %v4276_v32 }
 0x17f   : > { %1037 = vrot.lane.b32.xlu1 %v956_v13, %s4342_s6  ;;  %v1128_v26 = vrot.slane %v1091_v59, 1  ;;  %v1740_v41 = vunpack.c.l.b16 %v1532_v56  ;;  %v2061_v48 = vrot.slane %v2027_v24, 1  ;;  %v1612_v33 = vmax.f32 %v1596_v7, 0.0 }
 0x180   : > { %v4253_v14 = vunpack.c.h.bf16 %v4276_v32  ;;  %v1687_v50 = vunpack.c.l.b16 %v1431_v49  ;;  %v2667_v46 = vunpack.c.l.bf16 %v4112_v58  ;;  %v2537_v31 = vmul.f32 %v5437_v18, %v4252_v39  ;;  %v5623_v58 = vpop.permute.xlu0 %1172 }
 0x181   : > { %v1130_v10 = vsel %vm1097_vm0, %v1128_v26, %v1129_v62  ;;  %v5600_v42 = vpack.c.b16 %v1740_v41, %v1740_v41  ;;  %v2063_v28 = vsel %vm1097_vm0, %v2061_v48, %v2062_v20  ;;  %v1628_v51 = vpack.c.bf16 %v1612_v33, %v1612_v33  ;;  %v5625_v26 = vpop.permute.xlu2 %1029 }
 0x182   : > { %1166 = vrot.lane.b32.xlu0 %v1130_v10, %s4341_s30  ;;  %v2538_v34 = vmul.f32 %v5437_v18, %v4253_v14  ;;  %2100 = vrot.lane.b32.xlu2 %v2063_v28, %s4341_s30  ;;  %v5608_v3 = vpack.c.b16 %v1687_v50, %v1686_v44  ;;  %v2683_v16 = vmul.f32 %v5437_v18, %v2667_v46  ;;  %v2759_v62 = vunpack.c.l.bf16 %v4124_v30 }
 0x183   : > { %v2065_v27 = vrot.slane %v5600_v42, 1  ;;  %v2012_v22 = vunpack.c.l.b16 %v1628_v51  ;;  %v2569_v6 = vadd.f32 %v5450_v47, %v2537_v31  ;;  %v3260_v45 = vrot.slane %v5520_v21, 1 }
 0x184   : > { %v2570_v17 = vadd.f32 %v5450_v47, %v2538_v34  ;;  %v2699_v38 = vadd.f32 %v5450_v47, %v2683_v16  ;;  %v2775_v12 = vmul.f32 %v5437_v18, %v2759_v62  ;;  %v2499_v19 = vunpack.c.l.bf16 %v4088_v23 }
 0x185   : > { %v2500_v59 = vunpack.c.h.bf16 %v4088_v23  ;;  %v2028_v4 = vpack.c.b16 %v1687_v50, %v2012_v22  ;;  %v2601_v49 = vmax.f32 %v2569_v6, 0.0  ;;  %v2664_v32 = vunpack.c.l.bf16 %v4109_v35  ;;  %v4125_v50 = vld [vmem:[%s4397_s25 + $0x9c] sm:$0xe] }
 0x186   : > { %v2602_v56 = vmax.f32 %v2570_v17, 0.0  ;;  %v2715_v13 = vmax.f32 %v2699_v38, 0.0  ;;  %v2791_v24 = vadd.f32 %v5450_v47, %v2775_v12  ;;  %v2531_v20 = vmul.f32 %v5437_v18, %v2499_v19 }
 0x187   : > { %v2532_v7 = vmul.f32 %v5437_v18, %v2500_v59  ;;  %v2064_v44 = vrot.slane %v2028_v4, 1  ;;  %v2633_v41 = vpack.c.bf16 %v2601_v49, %v2601_v49  ;;  %v2680_v33 = vmul.f32 %v5437_v18, %v2664_v32  ;;  %v5647_v59 = vpop.permute.xlu1 %3289 }
 0x188   : > { %v5627_v48 = vpack.c.bf16 %v2602_v56, %v2602_v56  ;;  %v2731_v39 = vpack.c.bf16 %v2715_v13, %v2715_v13  ;;  %v2807_v14 = vmax.f32 %v2791_v24, 0.0  ;;  %v2563_v30 = vadd.f32 %v5450_v47, %v2531_v20  ;;  %v328_v13 = vld [vmem:[%s4397_s25 + $0x84] sm:$0xff]  }
 0x189   : > { %v2564_v10 = vadd.f32 %v5450_v47, %v2532_v7  ;;  %v2066_v46 = vsel %vm1097_vm0, %v2064_v44, %v2065_v27  ;;  %v2889_v28 = vunpack.c.l.b16 %v2633_v41  ;;  %v2696_v31 = vadd.f32 %v5450_v47, %v2680_v33  ;;  %v5658_v7 = vpop.permute.xlu0 %1966  ;;  %v5660_v44 = vpop.permute.xlu2 %2094 }
 0x18a   : > { %v2890_v51 = vunpack.c.l.b16 %v5627_v48  ;;  %2102 = vrot.lane.b32.xlu1 %v2066_v46, %s4341_s30  ;;  %v2939_v34 = vunpack.c.l.b16 %v2731_v39  ;;  %v2823_v23 = vpack.c.bf16 %v2807_v14, %v2807_v14  ;;  %v2595_v16 = vmax.f32 %v2563_v30, 0.0  ;;  %v515_v30 = vld [vmem:[%s4397_s25 + $0x8c] sm:$0x1] }
 0x18b   : > { %v2596_v62 = vmax.f32 %v2564_v10, 0.0  ;;  %v2712_v22 = vmax.f32 %v2696_v31, 0.0  ;;  %v2760_v6 = vunpack.c.l.bf16 %v4125_v50  ;;  %v2157_v27 = vsel %vm1211_vm4, %v5596_v54, %v5584_v11 }
 0x18c   : > { %v5639_v35 = vpack.c.b16 %v2890_v51, %v2889_v28  ;;  %v5644_v17 = vpack.c.b16 %v2939_v34, %v2939_v34  ;;  %v3207_v38 = vunpack.c.l.b16 %v2823_v23  ;;  %v2627_v12 = vpack.c.bf16 %v2595_v16, %v2595_v16  ;;  %4035 = vmatmul.msk.bf16.gmra.mxu0 %vm2186_vm5, %v2157_v27 }
 0x18d   : > { %v2628_v19 = vpack.c.bf16 %v2596_v62, %v2596_v62  ;;  %v2728_v56 = vpack.c.bf16 %v2712_v22, %v2712_v22  ;;  %v2776_v32 = vmul.f32 %v5437_v18, %v2760_v6  ;;  %v3322_v24 = vsel %vm1178_vm3, %v5053_v2, %v5586_v5  ;;  %v5667_v5 = vpop.f32.mrf.mxu1 }
 0x18e   : > { %v3126_v4 = vshrl.u32 %v5639_v35, 16  ;;  %v3128_v49 = vshll.u32 %v5639_v35, 16  ;;  %v3133_v11 = vshll.u32 %v5644_v17, 16  ;;  %v3223_v54 = vpack.c.b16 %v5500_v43, %v3207_v38  ;;  %v4003_v38 = vld [vmem:[%s4397_s25 + $0x98] sm:$0x1] }
 0x18f   : > { %v2883_v20 = vunpack.c.l.b16 %v2627_v12  ;;  %v2792_v33 = vadd.f32 %v5450_v47, %v2776_v32  ;;  %v2884_v39 = vunpack.c.l.b16 %v2628_v19  ;;  %v2936_v14 = vunpack.c.l.b16 %v2728_v56 }
 0x190   : > { %v3130_v41 = vrot.slane %v3128_v49, 1  ;;  %v3135_v10 = vrot.slane %v3133_v11, 1  ;;  %v3259_v50 = vrot.slane %v3223_v54, 1  ;;  %v1206_v46 = vsel %vm1178_vm3, %v5009_v55, %v5613_v29  ;;  %v4019_v54 = vld [vmem:[%s4397_s25 + $0x90] sm:$0xe] }
 0x191   : > { %v360_v28 = vunpack.c.l.bf16 %v328_v13  ;;  %v2808_v34 = vmax.f32 %v2792_v33, 0.0  ;;  %v5669_v23 = vpack.c.b16 %v2936_v14, %v2936_v14  ;;  %v361_v16 = vunpack.c.h.bf16 %v328_v13 }
 0x192   : > { %v3131_v31 = vor.u32 %v3130_v41, %v3126_v4  ;;  %v3261_v62 = vsel %vm1097_vm0, %v3259_v50, %v3260_v45  ;;  %v5674_v22 = vpack.c.b16 %v2884_v39, %v2883_v20  ;;  %v531_v27 = vunpack.c.l.bf16 %v515_v30  ;;  %v5691_v30 = vpop.permute.xlu1 %1158 }
 0x193   : > { %v395_v6 = vmul.f32 %v5437_v18, %v360_v28  ;;  %3297 = vrot.lane.b32.xlu2 %v3261_v62, %s4341_s30  ;;  %v2824_v29 = vpack.c.bf16 %v2808_v34, %v2808_v34  ;;  %v396_v12 = vmul.f32 %v5437_v18, %v361_v16  ;;  %v1883_v19 = vshrl.u32 %v5608_v3, 16 }
 0x194   : > { %v3136_v55 = vsel %vm824_vm1, %v3131_v31, %v3135_v10  ;;  %v547_v45 = vmul.f32 %v5437_v18, %v531_v27  ;;  %v1885_v4 = vshll.u32 %v5608_v3, 16  ;;  %v1890_v49 = vshll.u32 %v5600_v42, 16  ;;  %v5696_v31 = vpop.f32.mrf.mxu0  ;;  %v5699_v27 = vpop.permute.xlu0 %1045 }
 0x195   : > { %3177 = vrot.lane.b32.xlu0 %v3136_v55, %s4342_s6  ;;  %v430_v21 = vadd.f32 %v5450_v47, %v395_v6  ;;  %v3208_v56 = vunpack.c.l.b16 %v2824_v29  ;;  %v3263_v32 = vrot.slane %v5669_v23, 1  ;;  %v431_v13 = vadd.f32 %v5450_v47, %v396_v12 }
 0x196   : > { %v1469_v11 = vunpack.c.l.bf16 %v4003_v38  ;;  %v563_v41 = vadd.f32 %v5450_v47, %v547_v45  ;;  %v1887_v33 = vrot.slane %v1885_v4, 1  ;;  %v1892_v14 = vrot.slane %v1890_v49, 1  ;;  %v5701_v38 = vpop.permute.xlu2 %1174  ;;  %v4096_v4 = vld [vmem:[%s4397_s25 + $0xcc] sm:$0xff]   ;;  %v5714_v49 = vpop.f32.mrf.mxu1 }
 0x197   : > { %v462_v20 = vmax.f32 %v430_v21, 0.0  ;;  %v3224_v10 = vpack.c.b16 %v2884_v39, %v3208_v56  ;;  %v463_v50 = vmax.f32 %v431_v13, 0.0  ;;  %v1239_v42 = vsel %vm1211_vm4, %v1206_v46, %v5623_v58  ;;  %v5708_v46 = vpop.f32.mrf.mxu2 }
 0x198   : > { %v1485_v28 = vmul.f32 %v5437_v18, %v1469_v11  ;;  %v579_v16 = vmax.f32 %v563_v41, 0.0  ;;  %v1888_v62 = vor.u32 %v1887_v33, %v1883_v19  ;;  %4063 = vmatmul.msk.bf16.gmra.mxu3 %vm2186_vm5, %v1239_v42  ;;  %v1565_v6 = vunpack.c.l.bf16 %v4019_v54 }
 0x199   : > { %v494_v34 = vpack.c.bf16 %v462_v20, %v462_v20  ;;  %v3262_v39 = vrot.slane %v3224_v10, 1  ;;  %v5703_v55 = vpack.c.bf16 %v463_v50, %v463_v50  ;;  %v3354_v58 = vsel %vm1211_vm4, %v3322_v24, %v5647_v59 }
 0x19a   : > { %v1501_v29 = vadd.f32 %v5450_v47, %v1485_v28  ;;  %v595_v12 = vpack.c.bf16 %v579_v16, %v579_v16  ;;  %v1893_v19 = vsel %vm824_vm1, %v1888_v62, %v1892_v14  ;;  %v1581_v45 = vmul.f32 %v5437_v18, %v1565_v6  ;;  %4142 = vmatmul.msk.bf16.gmra.mxu2 %vm2186_vm5, %v3354_v58  ;;  %v4113_v16 = vld [vmem:[%s4397_s25 + $0xd4] sm:$0x1]  ;;  %v5734_v62 = vpop.permute.xlu1 %3163 }
 0x19b   : > { %v750_v21 = vunpack.c.l.b16 %v494_v34  ;;  %v3264_v56 = vsel %vm1097_vm0, %v3262_v39, %v3263_v32  ;;  %v751_v13 = vunpack.c.l.b16 %v5703_v55  ;;  %1974 = vrot.lane.b32.xlu2 %v1893_v19, %s4342_s6  ;;  %v3090_v24 = vshrl.u32 %v5674_v22, 16 }
 0x19c   : > { %v1517_v59 = vmax.f32 %v1501_v29, 0.0  ;;  %3299 = vrot.lane.b32.xlu1 %v3264_v56, %s4341_s30  ;;  %v803_v11 = vunpack.c.l.b16 %v595_v12  ;;  %v1597_v54 = vadd.f32 %v5450_v47, %v1581_v45  ;;  %v3092_v20 = vshll.u32 %v5674_v22, 16 }
 0x19d   : > { %v3097_v41 = vshll.u32 %v5669_v23, 16  ;;  %v5726_v32 = vpack.c.b16 %v751_v13, %v750_v21  ;;  %v2127_v14 = vsel %vm1178_vm3, %v5094_v25, %v5658_v7  ;;  %v2507_v10 = vunpack.c.l.bf16 %v4096_v4  ;;  %v5740_v7 = vpop.permute.xlu0 %3291 }
 0x19e   : > { %v1533_v33 = vpack.c.bf16 %v1517_v59, %v1517_v59  ;;  %v5731_v50 = vpack.c.b16 %v803_v11, %v803_v11  ;;  %v1613_v28 = vmax.f32 %v1597_v54, 0.0  ;;  %v3094_v42 = vrot.slane %v3092_v20, 1  ;;  %v5742_v19 = vpop.permute.xlu2 %1968  ;;  %v2234_v54 = vpop.f32.mrf.mxu0 }
 0x19f   : > { %v3099_v34 = vrot.slane %v3097_v41, 1  ;;  %v958_v23 = vshrl.u32 %v5726_v32, 16  ;;  %v960_v6 = vshll.u32 %v5726_v32, 16  ;;  %v2508_v29 = vunpack.c.h.bf16 %v4096_v4  ;;  %v5745_v20 = vpop.f32.mrf.mxu2 }
 0x1a0   : > { %v1741_v39 = vunpack.c.l.b16 %v1533_v33  ;;  %v965_v58 = vshll.u32 %v5731_v50, 16  ;;  %v1629_v12 = vpack.c.bf16 %v1613_v28, %v1613_v28  ;;  %v3095_v21 = vor.u32 %v3094_v42, %v3090_v24 }
 0x1a1   : > { %v2539_v25 = vmul.f32 %v5437_v18, %v2507_v10  ;;  %v962_v45 = vrot.slane %v960_v6, 1  ;;  %v2540_v59 = vmul.f32 %v5437_v18, %v2508_v29  ;;  %v2668_v11 = vunpack.c.l.bf16 %v4113_v16  ;;  %v5749_v10 = vpop.f32.mrf.mxu1 }
 0x1a2   : > { %v1757_v56 = vpack.c.b16 %v1741_v39, %v1741_v39  ;;  %v967_v4 = vrot.slane %v965_v58, 1  ;;  %v2013_v41 = vunpack.c.l.b16 %v1629_v12  ;;  %v3100_v33 = vsel %vm824_vm1, %v3095_v21, %v3099_v34  ;;  %v4128_v12 = vld [vmem:[%s4397_s25 + $0xc0] sm:$0xe] }
 0x1a3   : > { %v2571_v24 = vadd.f32 %v5450_v47, %v2539_v25  ;;  %v963_v28 = vor.u32 %v962_v45, %v958_v23  ;;  %v1192_v42 = vsel %vm1178_vm3, %v4797_v1, %v5625_v26  ;;  %3171 = vrot.lane.b32.xlu2 %v3100_v33, %s4342_s6  ;;  %v2572_v16 = vadd.f32 %v5450_v47, %v2540_v59 }
 0x1a4   : > { %v1902_v6 = vshll.u32 %v1757_v56, 16  ;;  %v2029_v39 = vpack.c.b16 %v5500_v43, %v2013_v41  ;;  %v2684_v58 = vmul.f32 %v5437_v18, %v2668_v11  ;;  %v2159_v34 = vsel %vm1211_vm4, %v2127_v14, %v5660_v44  ;;  %v1032_v44 = vpop.permute.xlu1 %1031 }
 0x1a5   : > { %v2603_v29 = vmax.f32 %v2571_v24, 0.0  ;;  %v968_v23 = vsel %vm824_vm1, %v963_v28, %v967_v4  ;;  %v2068_v25 = vrot.slane %v1757_v56, 1  ;;  %v2604_v45 = vmax.f32 %v2572_v16, 0.0  ;;  %4036 = vmatmul.msk.bf16.gmra.mxu0 %vm2186_vm5, %v2159_v34  ;;  %v611_v24 = vld [vmem:[%s4397_s25 + $0x84] sm:$0xe]  ;;  %v5780_v28 = vpop.permute.xlu0 %1160 }
 0x1a6   : > { %v1904_v21 = vrot.slane %v1902_v6, 1  ;;  %1039 = vrot.lane.b32.xlu0 %v968_v23, %s4342_s6  ;;  %v2067_v1 = vrot.slane %v2029_v39, 1  ;;  %v2700_v26 = vadd.f32 %v5450_v47, %v2684_v58  ;;  %v1225_v59 = vsel %vm1211_vm4, %v1192_v42, %v5691_v30  ;;  %v5787_v39 = vpop.permute.xlu2 %1047 }
 0x1a7   : > { %v2635_v43 = vpack.c.bf16 %v2603_v29, %v2603_v29  ;;  %v5769_v11 = vpack.c.bf16 %v2604_v45, %v2604_v45  ;;  %4056 = vmatmul.msk.bf16.gmra.mxu1 %vm2186_vm5, %v1225_v59  ;;  %v2763_v56 = vunpack.c.l.bf16 %v4128_v12  ;;  %v2362_v33 = vadd.f32 %v5667_v5, %v5696_v31  ;;  %v2237_v5 = vpop.f32.mrf.mxu0  ;;  %v5795_v34 = vpop.f32.mrf.mxu2 }
 0x1a8   : > { %v1905_v14 = vsel %vm824_vm1, %v5529_v36, %v1904_v21  ;;  %v2716_v4 = vmax.f32 %v2700_v26, 0.0  ;;  %v1208_v30 = vsel %vm1178_vm3, %v5160_v57, %v5699_v27  ;;  %v3272_v6 = vrot.slane %v5644_v17, 1 }
 0x1a9   : > { %1976 = vrot.lane.b32.xlu1 %v1905_v14, %s4342_s6  ;;  %v2891_v41 = vunpack.c.l.b16 %v2635_v43  ;;  %v2892_v36 = vunpack.c.l.b16 %v5769_v11  ;;  %v2779_v42 = vmul.f32 %v5437_v18, %v2763_v56  ;;  %v1241_v16 = vsel %vm1211_vm4, %v1208_v30, %v5701_v38  ;;  %v5797_v12 = vpop.f32.mrf.mxu1 }
 0x1aa   : > { %v2069_v31 = vsel %vm1097_vm0, %v2067_v1, %v2068_v25  ;;  %v2732_v29 = vpack.c.bf16 %v2716_v4, %v2716_v4  ;;  %4064 = vmatmul.msk.bf16.gmra.mxu3 %vm2186_vm5, %v1241_v16  ;;  %v3324_v27 = vsel %vm1178_vm3, %v5189_v8, %v5734_v62  ;;  %v3505_v58 = vadd.f32 %v5708_v46, %v2362_v33 }
 0x1ab   : > { %v5801_v38 = vpack.c.b16 %v2892_v36, %v2891_v41  ;;  %v2795_v23 = vadd.f32 %v5450_v47, %v2779_v42  ;;  %v627_v8 = vunpack.c.l.bf16 %v611_v24  ;;  %v2364_v62 = vadd.f32 %v5714_v49, %v2234_v54  ;;  %v4129_v54 = vld [vmem:[%s4397_s25 + $0xcc] sm:$0xe] }
 0x1ac   : > { %v2940_v46 = vunpack.c.l.b16 %v2732_v29  ;;  %v3537_v21 = vpack.c.bf16 %v3505_v58, %v3505_v58  ;;  %v3671_v25 = vmul.f32 %v3505_v58, %v3505_v58  ;;  %v3602_v14 = vsel %vm1178_vm3, %v3505_v58, 0.0  ;;  %v2097_v4 = vpop.permute.xlu1 %2096 }
 0x1ad   : > { %v3138_v45 = vshrl.u32 %v5801_v38, 16  ;;  %v3140_v1 = vshll.u32 %v5801_v38, 16  ;;  %v2811_v43 = vmax.f32 %v2795_v23, 0.0  ;;  %v643_v26 = vmul.f32 %v5437_v18, %v627_v8 }
 0x1ae   : > { %2104 = vrot.lane.b32.xlu0 %v2069_v31, %s4341_s30  ;;  %v5814_v59 = vpack.c.b16 %v2940_v46, %v2940_v46  ;;  %3570 = vst.msk [vmem:[%s5807_s16] sm:$0xf] %vm3569_vm6, %v3537_v21  ;;  %v1132_v56 = vrot.slane %v5731_v50, 1  ;;  %v3356_v49 = vsel %vm1211_vm4, %v3324_v27, %v5740_v7  ;;  %v3703_v30 = vsel %vm1178_vm3, %v3671_v25, 0.0  ;;  %v3166_v31 = vpop.permute.xlu0 %3165 }
 0x1af   : > { %v3142_v41 = vrot.slane %v3140_v1, 1  ;;  %v2827_v33 = vpack.c.bf16 %v2811_v43, %v2811_v43  ;;  %v659_v18 = vadd.f32 %v5450_v47, %v643_v26  ;;  %4143 = vmatmul.msk.bf16.gmra.mxu2 %vm2186_vm5, %v3356_v49  ;;  %v2129_v42 = vsel %vm1178_vm3, %v5053_v2, %v5742_v19  ;;  %v2239_v47 = vpop.f32.mrf.mxu0  ;;  %v3432_v1 = vpop.f32.mrf.mxu2 }
 0x1b0   : > { %v3145_v24 = vshll.u32 %v5814_v59, 16  ;;  %v1194_v16 = vsel %vm1178_vm3, %v5226_v53, %v1032_v44  ;;  %v3506_v7 = vadd.f32 %v5745_v20, %v2364_v62  ;;  %v2764_v23 = vunpack.c.l.bf16 %v4129_v54  ;;  %v4315_v20 = vld [vmem:[%s6163_s1] ss:$0 sm:$0xff] }
 0x1b1   : > { %v3143_v29 = vor.u32 %v3142_v41, %v3138_v45  ;;  %v3211_v27 = vunpack.c.l.b16 %v2827_v33  ;;  %v675_v58 = vmax.f32 %v659_v18, 0.0  ;;  %v2371_v62 = vpop.f32.mrf.mxu1  ;;  %v1227_v26 = vsel %vm1211_vm4, %v1194_v16, %v5780_v28  ;;  %v4316_v41 = vld [vmem:[%s6164_s2] ss:$0 sm:$0xff] }
 0x1b2   : > { %v3147_v8 = vrot.slane %v3145_v24, 1  ;;  %v3538_v46 = vpack.c.bf16 %v3506_v7, %v3506_v7  ;;  %v3603_v21 = vsel %vm1178_vm3, %v3506_v7, 0.0  ;;  %v3672_v25 = vmul.f32 %v3506_v7, %v3506_v7 }
 0x1b3   : > { %v3227_v2 = vpack.c.b16 %v2890_v51, %v3211_v27  ;;  %v691_v19 = vpack.c.bf16 %v675_v58, %v675_v58  ;;  %v3604_v53 = vadd.f32 %v3603_v21, %v3602_v14  ;;  %v2780_v44 = vmul.f32 %v4315_v20, %v2764_v23  ;;  %v3294_v51 = vpop.permute.xlu2 %3293 }
 0x1b4   : > { %v3148_v45 = vsel %vm824_vm1, %v3143_v29, %v3147_v8  ;;  %3571 = vst.msk [vmem:[%s5807_s16 + $0x4] sm:$0xf] %vm3569_vm6, %v3538_v46  ;;  %v3704_v43 = vsel %vm1178_vm3, %v3672_v25, 0.0  ;;  %v2367_v48 = vadd.f32 %v5749_v10, %v2237_v5  ;;  %v1210_v18 = vsel %vm1178_vm3, %v5320_v40, %v5787_v39  ;;  %v1177_v5 = vpop.permute.xlu1 %1176 }
 0x1b5   : > { %3179 = vrot.lane.b32.xlu1 %v3148_v45, %s4342_s6  ;;  %v3271_v14 = vrot.slane %v3227_v2, 1  ;;  %v1076_v49 = vunpack.c.l.b16 %v691_v19  ;;  %v3705_v54 = vadd.f32 %v3704_v43, %v3703_v30  ;;  %v2796_v33 = vadd.f32 %v4316_v41, %v2780_v44  ;;  %v5877_v19 = vpop.f32.mrf.mxu3 }
 0x1b6   : > { %v2161_v24 = vsel %vm1211_vm4, %v2129_v42, %v2097_v4  ;;  %v3507_v28 = vadd.f32 %v5795_v34, %v2367_v48  ;;  %v2369_v10 = vadd.f32 %v5797_v12, %v2239_v47  ;;  %v3326_v40 = vsel %vm1178_vm3, %v5283_v61, %v3166_v31  ;;  %v1034_v12 = vpop.permute.xlu0 %1033 }
 0x1b7   : > { %v3273_v30 = vsel %vm1097_vm0, %v3271_v14, %v3272_v6  ;;  %v1092_v16 = vpack.c.b16 %v751_v13, %v1076_v49  ;;  %4057 = vmatmul.msk.bf16.gmra.mxu1 %vm2186_vm5, %v1227_v26  ;;  %v2812_v7 = vmax.f32 %v2796_v33, 0.0  ;;  %4037 = vmatmul.msk.bf16.gmra.mxu0 %vm2186_vm5, %v2161_v24  ;;  %v1243_v6 = vsel %vm1211_vm4, %v1210_v18, %v1177_v5  ;;  %v2242_v29 = vpop.f32.mrf.mxu0  ;;  %v3435_v31 = vpop.f32.mrf.mxu2 }
 0x1b8   : > { %3305 = vrot.lane.b32.xlu2 %v3273_v30, %s4341_s30  ;;  %v3539_v39 = vpack.c.bf16 %v3507_v28, %v3507_v28  ;;  %v3605_v34 = vsel %vm1178_vm3, %v3507_v28, 0.0  ;;  %v3673_v17 = vmul.f32 %v3507_v28, %v3507_v28  ;;  %v3508_v42 = vadd.f32 %v3432_v1, %v2369_v10 }
 0x1b9   : > { %v1131_v55 = vrot.slane %v1092_v16, 1  ;;  %v2828_v13 = vpack.c.bf16 %v2812_v7, %v2812_v7  ;;  %v3606_v4 = vadd.f32 %v3605_v34, %v3604_v53  ;;  %v2372_v58 = vadd.f32 %v2371_v62, %v2242_v29  ;;  %v2373_v44 = vpop.f32.mrf.mxu1 }
 0x1ba   : > { %3572 = vst.msk [vmem:[%s5807_s16 + $0x8] sm:$0xf] %vm3569_vm6, %v3539_v39  ;;  %v3706_v27 = vsel %vm1178_vm3, %v3673_v17, 0.0  ;;  %4065 = vmatmul.msk.bf16.gmra.mxu3 %vm2186_vm5, %v1243_v6  ;;  %v3540_v8 = vpack.c.bf16 %v3508_v42, %v3508_v42  ;;  %v3358_v46 = vsel %vm1211_vm4, %v3326_v40, %v3294_v51  ;;  %v3607_v21 = vsel %vm1178_vm3, %v3508_v42, 0.0 }
 0x1bb   : > { %v3212_v23 = vunpack.c.l.b16 %v2828_v13  ;;  %v3707_v47 = vadd.f32 %v3706_v27, %v3705_v54  ;;  %v3674_v25 = vmul.f32 %v3508_v42, %v3508_v42  ;;  %v3509_v2 = vadd.f32 %v3435_v31, %v2372_v58  ;;  %v1163_v45 = vpop.permute.xlu2 %1162 }
 0x1bc   : > { %v1133_v1 = vsel %vm1097_vm0, %v1131_v55, %v1132_v56  ;;  %3573 = vst.msk [vmem:[%s5807_s16 + $0xc] sm:$0xf] %vm3569_vm6, %v3540_v8  ;;  %v3608_v20 = vadd.f32 %v3607_v21, %v3606_v4  ;;  %v1971_v43 = vpop.permute.xlu1 %1970  ;;  %v3275_v11 = vrot.slane %v5814_v59, 1  ;;  %v1196_v54 = vsel %vm1178_vm3, %v5341_v60, %v1034_v12 }
 0x1bd   : > { %v3228_v53 = vpack.c.b16 %v2892_v36, %v3212_v23  ;;  %v3708_v62 = vsel %vm1178_vm3, %v3674_v25, 0.0  ;;  %v3541_v26 = vpack.c.bf16 %v3509_v2, %v3509_v2  ;;  %v3609_v48 = vsel %vm1178_vm3, %v3509_v2, 0.0  ;;  %v5902_v34 = vpop.f32.mrf.mxu3 }
 0x1be   : > { %v3675_v50 = vmul.f32 %v3509_v2, %v3509_v2  ;;  %v3709_v56 = vadd.f32 %v3708_v62, %v3707_v47  ;;  %v3610_v51 = vadd.f32 %v3609_v48, %v3608_v20  ;;  %v2099_v14 = vpop.permute.xlu0 %2098  ;;  %v2131_v41 = vsel %vm1178_vm3, %v5367_v52, %v1971_v43 }
 0x1bf   : > { %4144 = vmatmul.msk.bf16.gmra.mxu2 %vm2186_vm5, %v3358_v46  ;;  %3574 = vst.msk [vmem:[%s5807_s16 + $0x10] sm:$0xf] %vm3569_vm6, %v3541_v26  ;;  %v3274_v49 = vrot.slane %v3228_v53, 1  ;;  %v2244_v18 = vpop.f32.mrf.mxu0  ;;  %v3437_v24 = vpop.f32.mrf.mxu2  ;;  %v1229_v10 = vsel %vm1211_vm4, %v1196_v54, %v1163_v45  ;;  %v2163_v59 = vsel %vm1211_vm4, %v2131_v41, %v2099_v14 }
 0x1c0   : > { %1168 = vrot.lane.b32.xlu2 %v1133_v1, %s4341_s30  ;;  %v3710_v36 = vsel %vm1178_vm3, %v3675_v50, 0.0  ;;  %v2374_v28 = vadd.f32 %v2373_v44, %v2244_v18 }
 0x1c1   : > { %v3711_v33 = vadd.f32 %v3710_v36, %v3709_v56  ;;  %v3276_v30 = vsel %vm1097_vm0, %v3274_v49, %v3275_v11  ;;  %v2376_v16 = vpop.f32.mrf.mxu1 }
 0x1c2   : > { %v3510_v5 = vadd.f32 %v3437_v24, %v2374_v28 }
 0x1c3   : > { %v3174_v17 = vpop.permute.xlu2 %3173 }
 0x1c4   : > { %v3168_v7 = vpop.permute.xlu1 %3167  ;;  %v3542_v40 = vpack.c.bf16 %v3510_v5, %v3510_v5  ;;  %v3611_v60 = vsel %vm1178_vm3, %v3510_v5, 0.0  ;;  %v3676_v39 = vmul.f32 %v3510_v5, %v3510_v5  ;;  %v3334_v58 = vsel %vm1178_vm3, %v5160_v57, %v3174_v17 }
 0x1c5   : > { %v3612_v52 = vadd.f32 %v3611_v60, %v3610_v51  ;;  %v3328_v12 = vsel %vm1178_vm3, %v5400_v9, %v3168_v7  ;;  %v5919_v1 = vpop.f32.mrf.mxu3 }
 0x1c6   : > { %3575 = vst.msk [vmem:[%s5807_s16 + $0x14] sm:$0xf] %vm3569_vm6, %v3542_v40  ;;  %v3712_v6 = vsel %vm1178_vm3, %v3676_v39, 0.0  ;;  %v3296_v13 = vpop.permute.xlu0 %3295 }
 0x1c7   : > { %4058 = vmatmul.msk.bf16.gmra.mxu1 %vm2186_vm5, %v1229_v10  ;;  %4038 = vmatmul.msk.bf16.gmra.mxu0 %vm2186_vm5, %v2163_v59  ;;  %v3713_v55 = vadd.f32 %v3712_v6, %v3711_v33  ;;  %v2247_v4 = vpop.f32.mrf.mxu0  ;;  %v3440_v42 = vpop.f32.mrf.mxu2  ;;  %v3360_v27 = vsel %vm1211_vm4, %v3328_v12, %v3296_v13 }
 0x1c8   : > { %3307 = vrot.lane.b32.xlu2 %v3276_v30, %s4341_s30  ;;  %v2377_v29 = vadd.f32 %v2376_v16, %v2247_v4  ;;  %s3959_s30 = sshll.u32 %s6173_s18, 1 }
 0x1c9   : > { %v2378_v25 = vpop.f32.mrf.mxu1  ;;  %s298_s26 = scalar_lea.vmem %s6167_s5, %s3959_s30 }
 0x1ca   : > { %v3511_v31 = vadd.f32 %v3440_v42, %v2377_v29 }
 0x1cb   : > { %v1036_v20 = vpop.permute.xlu2 %1035 }
 0x1cc   : > { %v3302_v23 = vpop.permute.xlu1 %3301  ;;  %v3543_v47 = vpack.c.bf16 %v3511_v31, %v3511_v31  ;;  %v3613_v8 = vsel %vm1178_vm3, %v3511_v31, 0.0  ;;  %v3677_v46 = vmul.f32 %v3511_v31, %v3511_v31  ;;  %v1198_v26 = vsel %vm1178_vm3, %v5475_v0, %v1036_v20 }
 0x1cd   : > { %v3366_v9 = vsel %vm1211_vm4, %v3334_v58, %v3302_v23  ;;  %v3614_v21 = vadd.f32 %v3613_v8, %v3612_v52  ;;  %v5931_v41 = vpop.f32.mrf.mxu3 }
 0x1ce   : > { %4148 = vmatmul.msk.bf16.vlgmr.msra.gmra.mxu3 %vm2186_vm5, %v3366_v9  ;;  %3576 = vst.msk [vmem:[%s5807_s16 + $0x18] sm:$0xf] %vm3569_vm6, %v3543_v47  ;;  %v3714_v2 = vsel %vm1178_vm3, %v3677_v46, 0.0 }
 0x1cf   : > { %4145 = vmatmul.msk.bf16.gmra.mxu2 %vm2186_vm5, %v3360_v27  ;;  %v3715_v57 = vadd.f32 %v3714_v2, %v3713_v55  ;;  %v2249_v53 = vpop.f32.mrf.mxu0  ;;  %v3442_v45 = vpop.f32.mrf.mxu2 }
 0x1d0   : > { %v2379_v44 = vadd.f32 %v2378_v25, %v2249_v53  ;;  %v1973_v62 = vpop.permute.xlu0 %1972 }
 0x1d1   : > { %v2133_v54 = vsel %vm1178_vm3, %v5283_v61, %v1973_v62 }
 0x1d2   : > { %v3512_v43 = vadd.f32 %v3442_v45, %v2379_v44 }
 0x1d4   : > { %v1165_v48 = vpop.permute.xlu1 %1164  ;;  %v3544_v50 = vpack.c.bf16 %v3512_v43, %v3512_v43  ;;  %v3615_v56 = vsel %vm1178_vm3, %v3512_v43, 0.0  ;;  %v3678_v51 = vmul.f32 %v3512_v43, %v3512_v43 }
 0x1d5   : > { %v1231_v11 = vsel %vm1211_vm4, %v1198_v26, %v1165_v48  ;;  %v3616_v36 = vadd.f32 %v3615_v56, %v3614_v21  ;;  %v5935_v5 = vpop.f32.mrf.mxu3 }
 0x1d6   : > { %3577 = vst.msk [vmem:[%s5807_s16 + $0x1c] sm:$0xf] %vm3569_vm6, %v3544_v50  ;;  %v3716_v14 = vsel %vm1178_vm3, %v3678_v51, 0.0 }
 0x1d7   : > { %4059 = vmatmul.msk.bf16.gmra.mxu1 %vm2186_vm5, %v1231_v11  ;;  %v3717_v49 = vadd.f32 %v3716_v14, %v3715_v57  ;;  %v3445_v59 = vpop.f32.mrf.mxu2 }
 0x1dc   : > { %v2101_v0 = vpop.permute.xlu2 %2100 }
 0x1dd   : > { %v2165_v33 = vsel %vm1211_vm4, %v2133_v54, %v2101_v0  ;;  %v5947_v13 = vpop.f32.mrf.mxu3 }
 0x1de   : > { %v3170_v18 = vpop.permute.xlu0 %3169  ;;  %4039 = vmatmul.msk.bf16.gmra.mxu0 %vm2186_vm5, %v2165_v33 }
 0x1df   : > { %v2381_v24 = vpop.f32.mrf.mxu1  ;;  %v3330_v55 = vsel %vm1178_vm3, %v5506_v63, %v3170_v18  ;;  %v3447_v8 = vpop.f32.mrf.mxu2 }
 0x1e0   : > { %v2252_v28 = vpop.f32.mrf.mxu0 }
 0x1e1   : > { %v2382_v10 = vadd.f32 %v2381_v24, %v2252_v28 }
 0x1e3   : > { %v3513_v30 = vadd.f32 %v3445_v59, %v2382_v10 }
 0x1e5   : > { %v3545_v7 = vpack.c.bf16 %v3513_v30, %v3513_v30  ;;  %v3617_v61 = vsel %vm1178_vm3, %v3513_v30, 0.0  ;;  %v3679_v40 = vmul.f32 %v3513_v30, %v3513_v30  ;;  %v5955_v9 = vpop.f32.mrf.mxu3 }
 0x1e6   : > { %v3304_v16 = vpop.permute.xlu0 %3303  ;;  %v3176_v60 = vpop.permute.xlu1 %3175  ;;  %v3618_v39 = vadd.f32 %v3617_v61, %v3616_v36 }
 0x1e7   : > { %v3336_v52 = vsel %vm1178_vm3, %v5540_v15, %v3176_v60  ;;  %3578 = vst.msk [vmem:[%s5807_s16 + $0x20] sm:$0xf] %vm3569_vm6, %v3545_v7  ;;  %v3718_v17 = vsel %vm1178_vm3, %v3679_v40, 0.0  ;;  %v2383_v27 = vpop.f32.mrf.mxu1 }
 0x1e8   : > { %v3368_v6 = vsel %vm1211_vm4, %v3336_v52, %v3304_v16  ;;  %v3719_v12 = vadd.f32 %v3718_v17, %v3717_v49  ;;  %v2254_v31 = vpop.f32.mrf.mxu0 }
 0x1e9   : > { %4149 = vmatmul.msk.bf16.gmra.mxu3 %vm2186_vm5, %v3368_v6  ;;  %v2384_v23 = vadd.f32 %v2383_v27, %v2254_v31 }
 0x1eb   : > { %v3514_v46 = vadd.f32 %v3447_v8, %v2384_v23 }
 0x1ed   : > { %v3298_v4 = vpop.permute.xlu2 %3297  ;;  %v3546_v21 = vpack.c.bf16 %v3514_v46, %v3514_v46  ;;  %v3619_v25 = vsel %vm1178_vm3, %v3514_v46, 0.0  ;;  %v3680_v2 = vmul.f32 %v3514_v46, %v3514_v46  ;;  %v5965_v43 = vpop.f32.mrf.mxu3 }
 0x1ee   : > { %v3362_v42 = vsel %vm1211_vm4, %v3330_v55, %v3298_v4  ;;  %v3620_v57 = vadd.f32 %v3619_v25, %v3618_v39 }
 0x1ef   : > { %4146 = vmatmul.msk.bf16.gmra.mxu2 %vm2186_vm5, %v3362_v42  ;;  %3579 = vst.msk [vmem:[%s5807_s16 + $0x24] sm:$0xf] %vm3569_vm6, %v3546_v21 }
 0x1f1   : > { %v1038_v15 = vpop.permute.xlu1 %1037  ;;  %v3450_v50 = vpop.f32.mrf.mxu2 }
 0x1f2   : > { %v1200_v29 = vsel %vm1178_vm3, %v5565_v37, %v1038_v15  ;;  %v3720_v37 = vsel %vm1178_vm3, %v3680_v2, 0.0 }
 0x1f3   : > { %v3721_v53 = vadd.f32 %v3720_v37, %v3719_v12 }
 0x1f4   : > { %v1167_v58 = vpop.permute.xlu0 %1166 }
 0x1f5   : > { %v1233_v47 = vsel %vm1211_vm4, %v1200_v29, %v1167_v58  ;;  %v1975_v20 = vpop.permute.xlu2 %1974  ;;  %v5967_v56 = vpop.f32.mrf.mxu3 }
 0x1f6   : > { %4060 = vmatmul.msk.bf16.gmra.mxu1 %vm2186_vm5, %v1233_v47  ;;  %v2135_v44 = vsel %vm1178_vm3, %v5608_v3, %v1975_v20 }
 0x1f9   : > { %v2386_v26 = vpop.f32.mrf.mxu1  ;;  %v3452_v40 = vpop.f32.mrf.mxu2 }
 0x1fc   : > { %v2103_v62 = vpop.permute.xlu1 %2102 }
 0x1fd   : > { %v2167_v45 = vsel %vm1211_vm4, %v2135_v44, %v2103_v62  ;;  %v3172_v48 = vpop.permute.xlu2 %3171  ;;  %v5980_v60 = vpop.f32.mrf.mxu3 }
 0x1fe   : > { %4040 = vmatmul.msk.bf16.gmra.mxu0 %vm2186_vm5, %v2167_v45  ;;  %v3332_v3 = vsel %vm1178_vm3, %v5674_v22, %v3172_v48 }
 0x201   : > { %v2388_v22 = vpop.f32.mrf.mxu1 }
 0x207   : > { %v3178_v14 = vpop.permute.xlu0 %3177 }
 0x208   : > { %v3338_v28 = vsel %vm1178_vm3, %v5639_v35, %v3178_v14 }
 0x209   : > { %v2257_v51 = vpop.f32.mrf.mxu0 }
 0x20a   : > { %v2387_v11 = vadd.f32 %v2386_v26, %v2257_v51 }
 0x20c   : > { %v3515_v36 = vadd.f32 %v3450_v50, %v2387_v11 }
 0x20e   : > { %v3300_v49 = vpop.permute.xlu1 %3299  ;;  %v3547_v54 = vpack.c.bf16 %v3515_v36, %v3515_v36  ;;  %v3621_v0 = vsel %vm1178_vm3, %v3515_v36, 0.0  ;;  %v3681_v33 = vmul.f32 %v3515_v36, %v3515_v36 }
 0x20f   : > { %v3364_v18 = vsel %vm1211_vm4, %v3332_v3, %v3300_v49  ;;  %v3622_v24 = vadd.f32 %v3621_v0, %v3620_v57 }
 0x210   : > { %4147 = vmatmul.msk.bf16.gmra.mxu2 %vm2186_vm5, %v3364_v18  ;;  %3580 = vst.msk [vmem:[%s5807_s16 + $0x28] sm:$0xf] %vm3569_vm6, %v3547_v54  ;;  %v3722_v10 = vsel %vm1178_vm3, %v3681_v33, 0.0 }
 0x211   : > { %v3723_v59 = vadd.f32 %v3722_v10, %v3721_v53  ;;  %v2259_v30 = vpop.f32.mrf.mxu0 }
 0x212   : > { %v3306_v16 = vpop.permute.xlu2 %3305  ;;  %v2389_v7 = vadd.f32 %v2388_v22, %v2259_v30 }
 0x213   : > { %v3370_v61 = vsel %vm1211_vm4, %v3338_v28, %v3306_v16 }
 0x214   : > { %4150 = vmatmul.msk.bf16.gmra.mxu3 %vm2186_vm5, %v3370_v61  ;;  %v3516_v35 = vadd.f32 %v3452_v40, %v2389_v7 }
 0x216   : > { %v3548_v39 = vpack.c.bf16 %v3516_v35, %v3516_v35  ;;  %v3623_v52 = vsel %vm1178_vm3, %v3516_v35, 0.0  ;;  %v3682_v17 = vmul.f32 %v3516_v35, %v3516_v35 }
 0x217   : > { %v3624_v6 = vadd.f32 %v3623_v52, %v3622_v24 }
 0x218   : > { %v1040_v12 = vpop.permute.xlu0 %1039  ;;  %3581 = vst.msk [vmem:[%s5807_s16 + $0x2c] sm:$0xf] %vm3569_vm6, %v3548_v39  ;;  %v3724_v55 = vsel %vm1178_vm3, %v3682_v17, 0.0 }
 0x219   : > { %v1202_v4 = vsel %vm1178_vm3, %v5726_v32, %v1040_v12  ;;  %v3725_v42 = vadd.f32 %v3724_v55, %v3723_v59 }
 0x21a   : > { %v1169_v15 = vpop.permute.xlu2 %1168 }
 0x21b   : > { %v1235_v29 = vsel %vm1211_vm4, %v1202_v4, %v1169_v15  ;;  %v5990_v27 = vpop.f32.mrf.mxu3  ;;  %v1977_v31 = vpop.permute.xlu1 %1976 }
 0x21c   : > { %4061 = vmatmul.msk.bf16.gmra.mxu1 %vm2186_vm5, %v1235_v29  ;;  %v2137_v58 = vsel %vm1178_vm3, %v5506_v63, %v1977_v31 }
 0x21d   : > { %v3455_v47 = vpop.f32.mrf.mxu2 }
 0x220   : > { %v2105_v23 = vpop.permute.xlu0 %2104 }
 0x221   : > { %v2169_v8 = vsel %vm1211_vm4, %v2137_v58, %v2105_v23 }
 0x222   : > { %4041 = vmatmul.msk.bf16.gmra.mxu0 %vm2186_vm5, %v2169_v8  ;;  %v2262_v32 = vpop.f32.mrf.mxu0  ;;  %v3308_v2 = vpop.permute.xlu2 %3307 }
 0x223   : > { %v5997_v25 = vpop.f32.mrf.mxu3 }
 0x224   : > { %v2391_v46 = vpop.f32.mrf.mxu1 }
 0x225   : > { %v2392_v21 = vadd.f32 %v2391_v46, %v2262_v32  ;;  %v3457_v26 = vpop.f32.mrf.mxu2 }
 0x227   : > { %v3180_v57 = vpop.permute.xlu1 %3179  ;;  %v3517_v37 = vadd.f32 %v3455_v47, %v2392_v21 }
 0x228   : > { %v3340_v53 = vsel %vm1178_vm3, %v5801_v38, %v3180_v57 }
 0x229   : > { %v3372_v63 = vsel %vm1211_vm4, %v3340_v53, %v3308_v2  ;;  %v3549_v20 = vpack.c.bf16 %v3517_v37, %v3517_v37  ;;  %v3625_v44 = vsel %vm1178_vm3, %v3517_v37, 0.0  ;;  %v3683_v62 = vmul.f32 %v3517_v37, %v3517_v37 }
 0x22a   : > { %4151 = vmatmul.msk.bf16.gmra.mxu3 %vm2186_vm5, %v3372_v63  ;;  %v3626_v45 = vadd.f32 %v3625_v44, %v3624_v6  ;;  %v2264_v51 = vpop.f32.mrf.mxu0 }
 0x22b   : > { %3582 = vst.msk [vmem:[%s5807_s16 + $0x30] sm:$0xf] %vm3569_vm6, %v3549_v20  ;;  %v3726_v48 = vsel %vm1178_vm3, %v3683_v62, 0.0 }
 0x22c   : > { %v3727_v50 = vadd.f32 %v3726_v48, %v3725_v42  ;;  %v2393_v11 = vpop.f32.mrf.mxu1 }
 0x22d   : > { %v2394_v36 = vadd.f32 %v2393_v11, %v2264_v51  ;;  %v6007_v14 = vpop.f32.mrf.mxu3 }
 0x22f   : > { %v3518_v38 = vadd.f32 %v3457_v26, %v2394_v36 }
 0x231   : > { %v3550_v3 = vpack.c.bf16 %v3518_v38, %v3518_v38  ;;  %v3627_v49 = vsel %vm1178_vm3, %v3518_v38, 0.0  ;;  %v3684_v54 = vmul.f32 %v3518_v38, %v3518_v38  ;;  %v2422_v38 = vadd.f32 %v5967_v56, %v5877_v19 }
 0x232   : > { %v3628_v0 = vadd.f32 %v3627_v49, %v3626_v45  ;;  %v3460_v33 = vpop.f32.mrf.mxu2  ;;  %v2424_v19 = vadd.f32 %v5980_v60, %v5902_v34 }
 0x233   : > { %3583 = vst.msk [vmem:[%s5807_s16 + $0x34] sm:$0xf] %vm3569_vm6, %v3550_v3  ;;  %v3728_v18 = vsel %vm1178_vm3, %v3684_v54, 0.0 }
 0x234   : > { %v3729_v24 = vadd.f32 %v3728_v18, %v3727_v50  ;;  %v2396_v28 = vpop.f32.mrf.mxu1  ;;  %v2267_v10 = vpop.f32.mrf.mxu0 }
 0x235   : > { %v2397_v59 = vadd.f32 %v2396_v28, %v2267_v10  ;;  %v6013_v30 = vpop.f32.mrf.mxu3 }
 0x237   : > { %v3519_v22 = vadd.f32 %v3460_v33, %v2397_v59 }
 0x239   : > { %v3551_v16 = vpack.c.bf16 %v3519_v22, %v3519_v22  ;;  %v3629_v7 = vsel %vm1178_vm3, %v3519_v22, 0.0  ;;  %v3685_v61 = vmul.f32 %v3519_v22, %v3519_v22 }
 0x23a   : > { %v3630_v40 = vadd.f32 %v3629_v7, %v3628_v0  ;;  %v3462_v35 = vpop.f32.mrf.mxu2 }
 0x23b   : > { %3584 = vst.msk [vmem:[%s5807_s16 + $0x38] sm:$0xf] %vm3569_vm6, %v3551_v16  ;;  %v3730_v39 = vsel %vm1178_vm3, %v3685_v61, 0.0 }
 0x23c   : > { %v3731_v52 = vadd.f32 %v3730_v39, %v3729_v24  ;;  %v2398_v17 = vpop.f32.mrf.mxu1  ;;  %v2269_v6 = vpop.f32.mrf.mxu0 }
 0x23d   : > { %v2399_v12 = vadd.f32 %v2398_v17, %v2269_v6  ;;  %v6020_v29 = vpop.f32.mrf.mxu3 }
 0x23f   : > { %v3520_v55 = vadd.f32 %v3462_v35, %v2399_v12 }
 0x241   : > { %v3552_v4 = vpack.c.bf16 %v3520_v55, %v3520_v55  ;;  %v3631_v42 = vsel %vm1178_vm3, %v3520_v55, 0.0  ;;  %v3686_v15 = vmul.f32 %v3520_v55, %v3520_v55 }
 0x242   : > { %v3632_v31 = vadd.f32 %v3631_v42, %v3630_v40  ;;  %v3465_v23 = vpop.f32.mrf.mxu2  ;;  %v2427_v42 = vadd.f32 %v5990_v27, %v5919_v1 }
 0x243   : > { %3585 = vst.msk [vmem:[%s5807_s16 + $0x3c] sm:$0xf] %vm3569_vm6, %v3552_v4  ;;  %v3732_v58 = vsel %vm1178_vm3, %v3686_v15, 0.0 }
 0x244   : > { %v3733_v47 = vadd.f32 %v3732_v58, %v3731_v52  ;;  %v2401_v8 = vpop.f32.mrf.mxu1  ;;  %v2272_v32 = vpop.f32.mrf.mxu0 }
 0x245   : > { %v2402_v46 = vadd.f32 %v2401_v8, %v2272_v32  ;;  %v6029_v20 = vpop.f32.mrf.mxu3 }
 0x247   : > { %v3521_v21 = vadd.f32 %v3465_v23, %v2402_v46  ;;  %v2429_v23 = vadd.f32 %v5997_v25, %v5931_v41 }
 0x249   : > { %v3553_v2 = vpack.c.bf16 %v3521_v21, %v3521_v21  ;;  %v3633_v57 = vsel %vm1178_vm3, %v3521_v21, 0.0  ;;  %v3687_v37 = vmul.f32 %v3521_v21, %v3521_v21 }
 0x24a   : > { %v3634_v53 = vadd.f32 %v3633_v57, %v3632_v31  ;;  %v3467_v48 = vpop.f32.mrf.mxu2 }
 0x24b   : > { %3586 = vst.msk [vmem:[%s5807_s16 + $0x40] sm:$0xf] %vm3569_vm6, %v3553_v2  ;;  %v3734_v63 = vsel %vm1178_vm3, %v3687_v37, 0.0 }
 0x24c   : > { %v3735_v44 = vadd.f32 %v3734_v63, %v3733_v47  ;;  %v2403_v62 = vpop.f32.mrf.mxu1  ;;  %v2274_v45 = vpop.f32.mrf.mxu0 }
 0x24d   : > { %v2404_v26 = vadd.f32 %v2403_v62, %v2274_v45  ;;  %v2432_v62 = vadd.f32 %v6007_v14, %v5935_v5 }
 0x24f   : > { %v3522_v50 = vadd.f32 %v3467_v48, %v2404_v26 }
 0x251   : > { %v3554_v51 = vpack.c.bf16 %v3522_v50, %v3522_v50  ;;  %v3635_v11 = vsel %vm1178_vm3, %v3522_v50, 0.0  ;;  %v3688_v36 = vmul.f32 %v3522_v50, %v3522_v50  ;;  %v3485_v54 = vpop.f32.mrf.mxu3 }
 0x252   : > { %v3636_v3 = vadd.f32 %v3635_v11, %v3634_v53  ;;  %v6037_v33 = vadd.f32 %v3485_v54, %v2422_v38  ;;  %v3470_v56 = vpop.f32.mrf.mxu2 }
 0x253   : > { %3587 = vst.msk [vmem:[%s5807_s16 + $0x44] sm:$0xf] %vm3569_vm6, %v3554_v51  ;;  %v3736_v49 = vsel %vm1178_vm3, %v3688_v36, 0.0  ;;  %v2434_v51 = vadd.f32 %v6013_v30, %v5947_v13 }
 0x254   : > { %v3737_v0 = vadd.f32 %v3736_v49, %v3735_v44  ;;  %v3561_v18 = vpack.c.bf16 %v6037_v33, %v6037_v33  ;;  %v2406_v24 = vpop.f32.mrf.mxu1 }
 0x256   : > { %3594 = vst.msk [vmem:[%s5807_s16 + $0x60] sm:$0xf] %vm3569_vm6, %v3561_v18 }
 0x259   : > { %v3487_v10 = vpop.f32.mrf.mxu3 }
 0x25a   : > { %v6045_v22 = vadd.f32 %v3487_v10, %v2424_v19  ;;  %v3472_v12 = vpop.f32.mrf.mxu2 }
 0x25b   : > { %v2277_v28 = vpop.f32.mrf.mxu0 }
 0x25c   : > { %v2407_v59 = vadd.f32 %v2406_v24, %v2277_v28  ;;  %v3562_v7 = vpack.c.bf16 %v6045_v22, %v6045_v22  ;;  %v2408_v34 = vpop.f32.mrf.mxu1 }
 0x25e   : > { %v3523_v16 = vadd.f32 %v3470_v56, %v2407_v59  ;;  %3595 = vst.msk [vmem:[%s5807_s16 + $0x64] sm:$0xf] %vm3569_vm6, %v3562_v7 }
 0x260   : > { %v3555_v61 = vpack.c.bf16 %v3523_v16, %v3523_v16  ;;  %v3637_v40 = vsel %vm1178_vm3, %v3523_v16, 0.0  ;;  %v3689_v35 = vmul.f32 %v3523_v16, %v3523_v16 }
 0x261   : > { %v3638_v39 = vadd.f32 %v3637_v40, %v3636_v3 }
 0x262   : > { %3588 = vst.msk [vmem:[%s5807_s16 + $0x48] sm:$0xf] %vm3569_vm6, %v3555_v61  ;;  %v3738_v60 = vsel %vm1178_vm3, %v3689_v35, 0.0 }
 0x263   : > { %v3739_v52 = vadd.f32 %v3738_v60, %v3737_v0  ;;  %v2279_v17 = vpop.f32.mrf.mxu0 }
 0x264   : > { %v2409_v6 = vadd.f32 %v2408_v34, %v2279_v17 }
 0x266   : > { %v3524_v55 = vadd.f32 %v3472_v12, %v2409_v6 }
 0x268   : > { %v3556_v4 = vpack.c.bf16 %v3524_v55, %v3524_v55  ;;  %v3690_v3 = vmul.f32 %v3524_v55, %v3524_v55  ;;  %v3639_v14 = vsel %vm1178_vm3, %v3524_v55, 0.0 }
 0x269   : > { %v3640_v56 = vadd.f32 %v3639_v14, %v3638_v39 }
 0x26a   : > { %3589 = vst.msk [vmem:[%s5807_s16 + $0x4c] sm:$0xf] %vm3569_vm6, %v3556_v4  ;;  %v3740_v24 = vsel %vm1178_vm3, %v3690_v3, 0.0  ;;  %v2437_v4 = vadd.f32 %v6020_v29, %v5955_v9 }
 0x26b   : > { %v3741_v16 = vadd.f32 %v3740_v24, %v3739_v52 }
 0x26c   : > { %v3490_v15 = vpop.f32.mrf.mxu3 }
 0x26d   : > { %v6059_v31 = vadd.f32 %v3490_v15, %v2427_v42  ;;  %v3695_v15 = vmul.f32 %v6037_v33, %v6037_v33 }
 0x26f   : > { %v3563_v58 = vpack.c.bf16 %v6059_v31, %v6059_v31 }
 0x271   : > { %3596 = vst.msk [vmem:[%s5807_s16 + $0x68] sm:$0xf] %vm3569_vm6, %v3563_v58 }
 0x272   : > { %v3475_v27 = vpop.f32.mrf.mxu2 }
 0x273   : > { %v2411_v1 = vpop.f32.mrf.mxu1 }
 0x274   : > { %v3492_v47 = vpop.f32.mrf.mxu3 }
 0x275   : > { %v6067_v8 = vadd.f32 %v3492_v47, %v2429_v23 }
 0x277   : > { %v3564_v32 = vpack.c.bf16 %v6067_v8, %v6067_v8 }
 0x279   : > { %3597 = vst.msk [vmem:[%s5807_s16 + $0x6c] sm:$0xf] %vm3569_vm6, %v3564_v32 }
 0x27a   : > { %v3477_v53 = vpop.f32.mrf.mxu2 }
 0x27b   : > { %v2282_v46 = vpop.f32.mrf.mxu0  ;;  %v2413_v37 = vpop.f32.mrf.mxu1 }
 0x27c   : > { %v2412_v21 = vadd.f32 %v2411_v1, %v2282_v46  ;;  %v3649_v46 = vsel %vm1178_vm3, %v6037_v33, 0.0 }
 0x27e   : > { %v3525_v2 = vadd.f32 %v3475_v27, %v2412_v21  ;;  %v3696_v21 = vmul.f32 %v6045_v22, %v6045_v22 }
 0x280   : > { %v3557_v57 = vpack.c.bf16 %v3525_v2, %v3525_v2  ;;  %v3691_v54 = vmul.f32 %v3525_v2, %v3525_v2  ;;  %v3641_v19 = vsel %vm1178_vm3, %v3525_v2, 0.0 }
 0x281   : > { %v3642_v7 = vadd.f32 %v3641_v19, %v3640_v56 }
 0x282   : > { %3590 = vst.msk [vmem:[%s5807_s16 + $0x50] sm:$0xf] %vm3569_vm6, %v3557_v57  ;;  %v3742_v28 = vsel %vm1178_vm3, %v3691_v54, 0.0 }
 0x283   : > { %v2284_v41 = vpop.f32.mrf.mxu0  ;;  %v3743_v17 = vadd.f32 %v3742_v28, %v3741_v16 }
 0x284   : > { %v2414_v25 = vadd.f32 %v2413_v37, %v2284_v41  ;;  %v3750_v37 = vsel %vm1178_vm3, %v3695_v15, 0.0  ;;  %v3651_v41 = vsel %vm1178_vm3, %v6045_v22, 0.0  ;;  %v2439_v22 = vadd.f32 %v6029_v20, %v5965_v43 }
 0x286   : > { %v3526_v63 = vadd.f32 %v3477_v53, %v2414_v25  ;;  %v3697_v25 = vmul.f32 %v6059_v31, %v6059_v31 }
 0x288   : > { %v3558_v44 = vpack.c.bf16 %v3526_v63, %v3526_v63  ;;  %v3692_v13 = vmul.f32 %v3526_v63, %v3526_v63  ;;  %v3643_v10 = vsel %vm1178_vm3, %v3526_v63, 0.0 }
 0x289   : > { %v3644_v6 = vadd.f32 %v3643_v10, %v3642_v7 }
 0x28a   : > { %3591 = vst.msk [vmem:[%s5807_s16 + $0x54] sm:$0xf] %vm3569_vm6, %v3558_v44  ;;  %v3744_v35 = vsel %vm1178_vm3, %v3692_v13, 0.0  ;;  %v3752_v44 = vsel %vm1178_vm3, %v3696_v21, 0.0 }
 0x28b   : > { %v3745_v42 = vadd.f32 %v3744_v35, %v3743_v17 }
 0x293   : > { %v3480_v11 = vpop.f32.mrf.mxu2 }
 0x297   : > { %v3495_v45 = vpop.f32.mrf.mxu3 }
 0x298   : > { %v6079_v26 = vadd.f32 %v3495_v45, %v2432_v62  ;;  %v3653_v62 = vsel %vm1178_vm3, %v6059_v31, 0.0  ;;  %v3698_v45 = vmul.f32 %v6067_v8, %v6067_v8 }
 0x299   : > { %v2416_v50 = vpop.f32.mrf.mxu1 }
 0x29a   : > { %v3565_v48 = vpack.c.bf16 %v6079_v26, %v6079_v26  ;;  %v3657_v14 = vsel %vm1178_vm3, %v6079_v26, 0.0 }
 0x29b   : > { %v3482_v39 = vpop.f32.mrf.mxu2 }
 0x29c   : > { %3598 = vst.msk [vmem:[%s5807_s16 + $0x70] sm:$0xf] %vm3569_vm6, %v3565_v48 }
 0x29f   : > { %v3497_v36 = vpop.f32.mrf.mxu3  ;;  %v2287_v38 = vpop.f32.mrf.mxu0 }
 0x2a0   : > { %v6087_v49 = vadd.f32 %v3497_v36, %v2434_v51  ;;  %v2417_v5 = vadd.f32 %v2416_v50, %v2287_v38  ;;  %v3754_v51 = vsel %vm1178_vm3, %v3697_v25, 0.0  ;;  %v3699_v36 = vmul.f32 %v6079_v26, %v6079_v26 }
 0x2a1   : > { %v2418_v61 = vpop.f32.mrf.mxu1 }
 0x2a2   : > { %v3566_v0 = vpack.c.bf16 %v6087_v49, %v6087_v49  ;;  %v3527_v18 = vadd.f32 %v3480_v11, %v2417_v5  ;;  %v3655_v11 = vsel %vm1178_vm3, %v6067_v8, 0.0  ;;  %v3756_v5 = vsel %vm1178_vm3, %v3698_v45, 0.0 }
 0x2a3   : > { %v3700_v43 = vmul.f32 %v6087_v49, %v6087_v49  ;;  %v3758_v8 = vsel %vm1178_vm3, %v3699_v36, 0.0 }
 0x2a4   : > { %3599 = vst.msk [vmem:[%s5807_s16 + $0x74] sm:$0xf] %vm3569_vm6, %v3566_v0  ;;  %v3559_v30 = vpack.c.bf16 %v3527_v18, %v3527_v18  ;;  %v3693_v59 = vmul.f32 %v3527_v18, %v3527_v18  ;;  %v3645_v34 = vsel %vm1178_vm3, %v3527_v18, 0.0  ;;  %v3659_v18 = vsel %vm1178_vm3, %v6087_v49, 0.0 }
 0x2a5   : > { %v3646_v52 = vadd.f32 %v3645_v34, %v3644_v6  ;;  %v3760_v56 = vsel %vm1178_vm3, %v3700_v43, 0.0 }
 0x2a6   : > { %3592 = vst.msk [vmem:[%s5807_s16 + $0x58] sm:$0xf] %vm3569_vm6, %v3559_v30  ;;  %v3746_v12 = vsel %vm1178_vm3, %v3693_v59, 0.0 }
 0x2a7   : > { %v2289_v40 = vpop.f32.mrf.mxu0  ;;  %v3747_v32 = vadd.f32 %v3746_v12, %v3745_v42 }
 0x2a8   : > { %v2419_v60 = vadd.f32 %v2418_v61, %v2289_v40 }
 0x2aa   : > { %v3528_v55 = vadd.f32 %v3482_v39, %v2419_v60 }
 0x2ac   : > { %v3560_v58 = vpack.c.bf16 %v3528_v55, %v3528_v55  ;;  %v3647_v23 = vsel %vm1178_vm3, %v3528_v55, 0.0  ;;  %v3694_v47 = vmul.f32 %v3528_v55, %v3528_v55 }
 0x2ad   : > { %v3648_v1 = vadd.f32 %v3647_v23, %v3646_v52  ;;  %v3500_v27 = vpop.f32.mrf.mxu3 }
 0x2ae   : > { %3593 = vst.msk [vmem:[%s5807_s16 + $0x5c] sm:$0xf] %vm3569_vm6, %v3560_v58  ;;  %v3748_v9 = vsel %vm1178_vm3, %v3694_v47, 0.0  ;;  %v3535_v29 = vadd.f32 %v3500_v27, %v2437_v4 }
 0x2af   : > { %v3650_v2 = vadd.f32 %v3649_v46, %v3648_v1  ;;  %v3749_v57 = vadd.f32 %v3748_v9, %v3747_v32 }
 0x2b0   : > { %v3567_v33 = vpack.c.bf16 %v3535_v29, %v3535_v29  ;;  %v3701_v24 = vmul.f32 %v3535_v29, %v3535_v29  ;;  %v3661_v28 = vsel %vm1178_vm3, %v3535_v29, 0.0 }
 0x2b1   : > { %v3652_v53 = vadd.f32 %v3651_v41, %v3650_v2  ;;  %v3751_v63 = vadd.f32 %v3750_v37, %v3749_v57 }
 0x2b2   : > { %3600 = vst.msk [vmem:[%s5807_s16 + $0x78] sm:$0xf] %vm3569_vm6, %v3567_v33  ;;  %v3762_v16 = vsel %vm1178_vm3, %v3701_v24, 0.0 }
 0x2b3   : > { %v3753_v48 = vadd.f32 %v3752_v44, %v3751_v63  ;;  %v3654_v50 = vadd.f32 %v3653_v62, %v3652_v53 }
 0x2b5   : > { %v3656_v38 = vadd.f32 %v3655_v11, %v3654_v50  ;;  %v3755_v31 = vadd.f32 %v3754_v51, %v3753_v48  ;;  %v3502_v3 = vpop.f32.mrf.mxu3 }
 0x2b6   : > { %v3536_v20 = vadd.f32 %v3502_v3, %v2439_v22 }
 0x2b7   : > { %v3658_v54 = vadd.f32 %v3657_v14, %v3656_v38  ;;  %v3757_v0 = vadd.f32 %v3756_v5, %v3755_v31 }
 0x2b8   : > { %v3568_v19 = vpack.c.bf16 %v3536_v20, %v3536_v20  ;;  %v3702_v26 = vmul.f32 %v3536_v20, %v3536_v20  ;;  %v3663_v7 = vsel %vm1178_vm3, %v3536_v20, 0.0 }
 0x2b9   : > { %v3660_v13 = vadd.f32 %v3659_v18, %v3658_v54  ;;  %v3759_v30 = vadd.f32 %v3758_v8, %v3757_v0 }
 0x2ba   : > { %3601 = vst.msk [vmem:[%s5807_s16 + $0x7c] sm:$0xf] %vm3569_vm6, %v3568_v19  ;;  %v3764_v40 = vsel %vm1178_vm3, %v3702_v26, 0.0 }
 0x2bb   : > { %v3662_v10 = vadd.f32 %v3661_v28, %v3660_v13  ;;  %v3761_v59 = vadd.f32 %v3760_v56, %v3759_v30 }
 0x2bd   : > { %v3763_v61 = vadd.f32 %v3762_v16, %v3761_v59  ;;  %v3664_v49 = vadd.f32 %v3663_v7, %v3662_v10 }
 0x2bf   : > { %v3665_v35 = vrot.slane %v3664_v49, 4  ;;  %v3765_v34 = vadd.f32 %v3764_v40, %v3763_v61 }
 0x2c1   : > { %v3666_v60 = vadd.f32 %v3665_v35, %v3664_v49  ;;  %v3766_v17 = vrot.slane %v3765_v34, 4 }
 0x2c3   : > { %v3667_v6 = vrot.slane %v3666_v60, 2  ;;  %v3767_v39 = vadd.f32 %v3766_v17, %v3765_v34 }
 0x2c5   : > { %v3668_v12 = vadd.f32 %v3667_v6, %v3666_v60  ;;  %v3768_v55 = vrot.slane %v3767_v39, 2 }
 0x2c7   : > { %v3669_v4 = vrot.slane %v3668_v12, 1  ;;  %v3769_v42 = vadd.f32 %v3768_v55, %v3767_v39 }
 0x2c9   : > { %v3670_v52 = vadd.f32 %v3669_v4, %v3668_v12  ;;  %v3770_v15 = vrot.slane %v3769_v42, 1 }
 0x2cb   : > { %v3771_v58 = vadd.f32 %v3770_v15, %v3769_v42  ;;  %3777 = vst.msk [vmem:[%s298_s26] sm:$0x1] %vm3776_vm7, %v3670_v52 }
 0x2cd   : > { %3778 = vst.msk [vmem:[%s298_s26 + $0x1] sm:$0x1] %vm3776_vm7, %v3771_v58 }
 0x2ce PF: > { %s16_s20 = sadd.s32 1, %s4339_s20   ;;  %s6168_s18 = smov %s4335_s19 }
 0x2cf   : > { %p13_p5 = scmp.ge.s32.totalorder %s16_s20, 4   ;;  %s6169_s19 = smov %s6171_s21 }
 0x2d1   :  { %15 = sbr.rel (!%p13_p5) target bundleno = 2 (0x2), region = 94 }

</bundles_post_ra>
